<compile_context>
chip_gen: v6e
topology: v6e:2x2x1
jax: 0.10.0
libtpu: 0.0.40
codegen_flags: <defaults>
</compile_context>

<pallas_src>
import functools
from types import SimpleNamespace

import jax
import jax.numpy as jnp
from jax.experimental import pallas as pl
from jax.experimental.pallas import tpu as pltpu

TM_MAX = 512       # max row tile (M) for the fused matmul kernel
LANE = 128         # output channels padded to a full lane tile
SUB = 16           # bf16 sublane packing -> round M tiles to 16
BN_EPS = 1e-5      # PyTorch BatchNorm2d default


def _round_up(v, m):
    return ((v + m - 1) // m) * m


# --------------------------------------------------------------------------
# Pallas kernels
# --------------------------------------------------------------------------
def _matmul_kernel(x_ref, w_ref, o_ref):
    # Plain matmul (bias-less transition layers): bf16 x bf16 -> f32 acc.
    o_ref[...] = jnp.dot(x_ref[...], w_ref[...],
                         preferred_element_type=jnp.float32).astype(o_ref.dtype)


def _matmul_epilogue_kernel(x_ref, w_ref, e_ref, o_ref, *,
                            apply_bias, apply_relu, apply_bn):
    # e_ref rows: 0 = bias, 1 = BN scale, 2 = BN shift (rest padding).
    z = jnp.dot(x_ref[...], w_ref[...], preferred_element_type=jnp.float32)
    if apply_bias:
        z = z + e_ref[0:1, :]
    if apply_relu:
        z = jnp.maximum(z, 0.0)
    if apply_bn:
        z = z * e_ref[1:2, :] + e_ref[2:3, :]
    o_ref[...] = z.astype(o_ref.dtype)


def fused_matmul(xm, wm, epilogue, *, apply_bias, apply_relu, apply_bn,
                 out_dtype):
    """xm:(M,K) bf16, wm:(K,O_pad) bf16, epilogue:(8,O_pad) f32 or None."""
    M, K = xm.shape
    O_pad = wm.shape[1]

    num_tiles = max(1, pl.cdiv(M, TM_MAX))
    tm = _round_up(pl.cdiv(M, num_tiles), SUB)
    m_pad = tm * num_tiles
    if m_pad != M:
        xm = jnp.pad(xm, ((0, m_pad - M), (0, 0)))

    in_specs = [
        pl.BlockSpec((tm, K), lambda i: (i, 0)),
        pl.BlockSpec((K, O_pad), lambda i: (0, 0)),
    ]
    args = [xm, wm]
    if epilogue is not None:
        in_specs.append(pl.BlockSpec((8, O_pad), lambda i: (0, 0)))
        args.append(epilogue)
        kernel = functools.partial(_matmul_epilogue_kernel,
                                   apply_bias=apply_bias,
                                   apply_relu=apply_relu,
                                   apply_bn=apply_bn)
    else:
        kernel = _matmul_kernel

    out = pl.pallas_call(
        kernel,
        out_shape=jax.ShapeDtypeStruct((m_pad, O_pad), out_dtype),
        grid_spec=pltpu.PrefetchScalarGridSpec(
            num_scalar_prefetch=0,
            grid=(m_pad // tm,),
            in_specs=in_specs,
            out_specs=pl.BlockSpec((tm, O_pad), lambda i: (i, 0)),
        ),
        compiler_params=pltpu.CompilerParams(
            dimension_semantics=("parallel",)),
    )(*args)
    return out


# --------------------------------------------------------------------------
# Glue: im2col + conv wrapper (plain JAX)
# --------------------------------------------------------------------------
# TODO(synk): the kh*kw tap accumulation could be moved into the kernel as an
# extra "arbitrary" grid axis to avoid materializing im2col patches in HBM.
def _extract_patches(x, kh, kw, stride, dilation):
    # x: (N, H, W, C), already padded
    N, H, W, C = x.shape
    oh = (H - dilation * (kh - 1) - 1) // stride + 1
    ow = (W - dilation * (kw - 1) - 1) // stride + 1
    cols = []
    for i in range(kh):
        for j in range(kw):
            sl = x[:,
                   i * dilation: i * dilation + (oh - 1) * stride + 1: stride,
                   j * dilation: j * dilation + (ow - 1) * stride + 1: stride,
                   :]
            cols.append(sl)
    # ordering (kh, kw, cin) along last axis -> matches weight reshape below
    patches = jnp.concatenate(cols, axis=-1)
    return patches, oh, ow


def conv2d(x_nhwc, w_oihw, bias=None, *, stride=1, padding=0, dilation=1,
           relu=False, bn=None, out_dtype=jnp.bfloat16):
    """Conv2d (PyTorch semantics) + optional ReLU + optional eval-mode BN."""
    O, Cin, KH, KW = w_oihw.shape
    if padding > 0:
        x_nhwc = jnp.pad(x_nhwc,
                         ((0, 0), (padding, padding), (padding, padding), (0, 0)))
    patches, oh, ow = _extract_patches(x_nhwc, KH, KW, stride, dilation)
    N = patches.shape[0]
    M = N * oh * ow
    K = KH * KW * Cin

    xm = patches.reshape(M, K).astype(jnp.bfloat16)

    O_pad = _round_up(O, LANE)
    wm = jnp.transpose(w_oihw, (2, 3, 1, 0)).reshape(K, O).astype(jnp.float32)
    if O_pad != O:
        wm = jnp.pad(wm, ((0, 0), (0, O_pad - O)))
    wm = wm.astype(jnp.bfloat16)

    apply_bias = bias is not None
    apply_bn = bn is not None
    if apply_bias or apply_bn or relu:
        epi = jnp.zeros((8, O_pad), jnp.float32)
        if apply_bias:
            epi = epi.at[0, :O].set(bias.astype(jnp.float32))
        if apply_bn:
            gamma, beta, mean, var = bn
            scale = gamma * jax.lax.rsqrt(var + BN_EPS)
            shift = beta - mean * scale
            epi = epi.at[1, :O].set(scale)
            epi = epi.at[2, :O].set(shift)
    else:
        epi = None

    ym = fused_matmul(xm, wm, epi, apply_bias=apply_bias, apply_relu=relu,
                      apply_bn=apply_bn, out_dtype=out_dtype)
    return ym[:M, :O].reshape(N, oh, ow, O)


def compose_1x1(w3, b3, w1, b1):
    """Fold a 1x1 conv (w1,b1) into the preceding 3x3 conv (w3,b3).

    w3: (Mid, In, KH, KW), w1: (Out, Mid, 1, 1) — valid because there is no
    nonlinearity between the two convolutions in the reference module.
    """
    w1m = w1[:, :, 0, 0]                          # (Out, Mid)
    w = jnp.einsum("om,mikl->oikl", w1m, w3)      # (Out, In, KH, KW)
    if b3 is None and b1 is None:
        return w, None
    b = jnp.zeros((w1.shape[0],), jnp.float32)
    if b3 is not None:
        b = b + w1m @ b3
    if b1 is not None:
        b = b + b1
    return w, b


# --------------------------------------------------------------------------
# Deterministic parameter initialization (matches module __init__ shapes)
# --------------------------------------------------------------------------
def init_params(key):
    keys = iter(jax.random.split(key, 64))

    def conv_w(o, i, kh, kw):
        fan_in = i * kh * kw
        return jax.random.normal(next(keys), (o, i, kh, kw),
                                 jnp.float32) * (2.0 / fan_in) ** 0.5

    def conv_b(o):
        return 0.05 * jax.random.normal(next(keys), (o,), jnp.float32)

    def bn(c):
        gamma = 1.0 + 0.1 * jax.random.normal(next(keys), (c,), jnp.float32)
        beta = 0.1 * jax.random.normal(next(keys), (c,), jnp.float32)
        mean = 0.1 * jax.random.normal(next(keys), (c,), jnp.float32)
        var = jax.random.uniform(next(keys), (c,), jnp.float32, 0.5, 1.5)
        return (gamma, beta, mean, var)

    p = {}
    # conv1_0: Conv2d(3, 32, 3, padding=2, dilation=2, bias=True)
    p["w1_0"], p["b1_0"] = conv_w(32, 3, 3, 3), conv_b(32)
    # conv1_1 = depthwise_conv(32, 64): Conv2d(32,32,3,s=1,p=0,bias=True),
    #           Conv2d(32,64,1,bias=True), ReLU, BN(64), Dropout
    p["w1_1a"], p["b1_1a"] = conv_w(32, 32, 3, 3), conv_b(32)
    p["w1_1b"], p["b1_1b"] = conv_w(64, 32, 1, 1), conv_b(64)
    p["bn1"] = bn(64)
    # transition1: Conv2d(64,64,3,s=2,p=1,bias=False), Conv2d(64,32,1,bias=False)
    p["wt1a"] = conv_w(64, 64, 3, 3)
    p["wt1b"] = conv_w(32, 64, 1, 1)
    # conv2_0: Conv2d(32, 48, 3, padding=2, dilation=2, bias=True)
    p["w2_0"], p["b2_0"] = conv_w(48, 32, 3, 3), conv_b(48)
    # conv2_1 = depthwise_conv(48, 64)
    p["w2_1a"], p["b2_1a"] = conv_w(48, 48, 3, 3), conv_b(48)
    p["w2_1b"], p["b2_1b"] = conv_w(64, 48, 1, 1), conv_b(64)
    p["bn2"] = bn(64)
    # transition2
    p["wt2a"] = conv_w(64, 64, 3, 3)
    p["wt2b"] = conv_w(32, 64, 1, 1)
    # conv3 = convblock(32, 32, 48, padding=[1,1])
    p["w3a"] = conv_w(32, 32, 3, 3)
    p["bn3a"] = bn(32)
    p["w3b"] = conv_w(48, 32, 3, 3)
    p["bn3b"] = bn(48)
    # transition3
    p["wt3a"] = conv_w(48, 48, 3, 3)
    p["wt3b"] = conv_w(24, 48, 1, 1)
    # conv4 = single_convblock(24, 32, (1,1)): Conv2d(24,32,1,bias=False), ReLU, BN(32)
    p["w4"] = conv_w(32, 24, 1, 1)
    p["bn4"] = bn(32)
    # last_conv: Conv2d(32, 10, 1, bias=True)
    p["w_last"], p["b_last"] = conv_w(10, 32, 1, 1), conv_b(10)
    # NOTE: self.fc is defined in __init__ but never used in forward -> omitted.
    return p


# --------------------------------------------------------------------------
# SeaFar forward (11 fused Pallas matmul calls)
# --------------------------------------------------------------------------
@functools.partial(jax.jit, static_argnames=("loss_function",))
def seafar_forward(params, x_nchw, loss_function="CrossEntropyLoss"):
    p = params
    x = jnp.transpose(x_nchw, (0, 2, 3, 1)).astype(jnp.bfloat16)  # NCHW -> NHWC

    # conv1_0
    x = conv2d(x, p["w1_0"], p["b1_0"], padding=2, dilation=2)
    # conv1_1 (depthwise_conv): 3x3(bias) ∘ 1x1(bias) folded, then ReLU + BN
    w, b = compose_1x1(p["w1_1a"], p["b1_1a"], p["w1_1b"], p["b1_1b"])
    x = conv2d(x, w, b, relu=True, bn=p["bn1"])
    # transition1: 3x3 s2 p1 ∘ 1x1 folded (no bias, no nonlinearity)
    w, _ = compose_1x1(p["wt1a"], None, p["wt1b"], None)
    x = conv2d(x, w, None, padding=1, stride=2)
    # conv2_0
    x = conv2d(x, p["w2_0"], p["b2_0"], padding=2, dilation=2)
    # conv2_1
    w, b = compose_1x1(p["w2_1a"], p["b2_1a"], p["w2_1b"], p["b2_1b"])
    x = conv2d(x, w, b, relu=True, bn=p["bn2"])
    # transition2
    w, _ = compose_1x1(p["wt2a"], None, p["wt2b"], None)
    x = conv2d(x, w, None, padding=1, stride=2)
    # conv3
    x = conv2d(x, p["w3a"], None, padding=1, relu=True, bn=p["bn3a"])
    x = conv2d(x, p["w3b"], None, padding=1, relu=True, bn=p["bn3b"])
    # transition3
    w, _ = compose_1x1(p["wt3a"], None, p["wt3b"], None)
    x = conv2d(x, w, None, padding=1, stride=2)
    # conv4 (1x1 + ReLU + BN)
    x = conv2d(x, p["w4"], None, relu=True, bn=p["bn4"])
    # gap (AvgPool2d(3)) + last_conv (1x1) fused exactly into one 3x3/stride-3
    # conv with the last_conv weight tiled and scaled by 1/9.  Like AvgPool2d,
    # this silently drops trailing rows/cols (4x4 -> uses top-left 3x3).
    w_eff = jnp.tile(p["w_last"] / 9.0, (1, 1, 3, 3))     # (10, 32, 3, 3)
    x = conv2d(x, w_eff, p["b_last"], stride=3, out_dtype=jnp.float32)

    logits = x.reshape(x.shape[0], -1)                    # view(N, -1)
    if loss_function == "CrossEntropyLoss":
        return logits
    elif loss_function == "NLLoss":
        return jax.nn.log_softmax(logits, axis=-1)
    return logits


if __name__ == "__main__":
    config = SimpleNamespace(channel_norm="BatchNorm2d",
                             dropout_value=0.05,
                             loss_function="CrossEntropyLoss")
    key = jax.random.PRNGKey(0)
    k_params, k_x = jax.random.split(key)
    params = init_params(k_params)
    # CIFAR-sized input; spatial 32 is required so AvgPool2d(3) is valid.
    x = jax.random.normal(k_x, (2, 3, 32, 32), jnp.float32)

    out = seafar_forward(params, x, loss_function=config.loss_function)
    out = jax.block_until_ready(out)
    assert out.shape == (2, 10), out.shape
    print("KERNEL_OK")
</pallas_src>

<mosaic_0001>
module attributes {stable_mosaic.version = 11 : i64} {
  func.func @_matmul_epilogue_kernel(%arg0: i32, %arg1: memref<512x27xbf16, #tpu.memory_space<vmem>>, %arg2: memref<27x128xbf16, #tpu.memory_space<vmem>>, %arg3: memref<8x128xf32, #tpu.memory_space<vmem>>, %arg4: memref<512x128xbf16, #tpu.memory_space<vmem>>) attributes {dimension_semantics = [#tpu.dimension_semantics<parallel>], iteration_bounds = array<i64: 4>, scalar_prefetch = 0 : i64, scratch_operands = 0 : i64, tpu.core_type = #tpu.core_type<tc>, window_params = [{transform_indices = @transform_0, window_bounds = array<i64: 512, 27>}, {pipeline_mode = #tpu.pipeline_mode<synchronous>, transform_indices = @transform_1, window_bounds = array<i64: 27, 128>}, {pipeline_mode = #tpu.pipeline_mode<synchronous>, transform_indices = @transform_2, window_bounds = array<i64: 8, 128>}, {transform_indices = @transform_3, window_bounds = array<i64: 512, 128>}]} {
    %c0 = arith.constant 0 : index
    %c0_0 = arith.constant 0 : index
    %0 = vector.load %arg1[%c0, %c0_0] : memref<512x27xbf16, #tpu.memory_space<vmem>>, vector<512x27xbf16>
    %c0_1 = arith.constant 0 : index
    %c0_2 = arith.constant 0 : index
    %1 = vector.load %arg2[%c0_1, %c0_2] : memref<27x128xbf16, #tpu.memory_space<vmem>>, vector<27x128xbf16>
    %cst = arith.constant dense<0.000000e+00> : vector<512x128xf32>
    %2 = tpu.matmul %0, %1, %cst {dimension_numbers = #tpu.dot_dimension_numbers<[1], [0], [0], [1], [0, 0, 1, 1], [], []>} : vector<512x27xbf16>, vector<27x128xbf16>, vector<512x128xf32> -> vector<512x128xf32>
    %c0_3 = arith.constant 0 : index
    %c0_4 = arith.constant 0 : index
    %3 = vector.load %arg3[%c0_3, %c0_4] : memref<8x128xf32, #tpu.memory_space<vmem>>, vector<1x128xf32>
    %4 = vector.broadcast %3 : vector<1x128xf32> to vector<512x128xf32>
    %5 = arith.addf %2, %4 : vector<512x128xf32>
    %6 = arith.truncf %5 : vector<512x128xf32> to vector<512x128xbf16>
    %c0_5 = arith.constant 0 : index
    %c0_6 = arith.constant 0 : index
    %7 = vector.load %arg4[%c0_5, %c0_6] : memref<512x128xbf16, #tpu.memory_space<vmem>>, vector<512x128xbf16>
    tpu.vector_store %arg4[%c0_5, %c0_6], %6 {strides = array<i32>} : memref<512x128xbf16, #tpu.memory_space<vmem>>, vector<512x128xbf16>,
    return
  }
  func.func @transform_0(%arg0: i32) -> (i32, i32) {
    %c0_i32 = arith.constant 0 : i32
    %c0_i32_0 = arith.constant 0 : i32
    return %arg0, %c0_i32 : i32, i32
  }
  func.func @transform_1(%arg0: i32) -> (i32, i32) {
    %c0_i32 = arith.constant 0 : i32
    %c0_i32_0 = arith.constant 0 : i32
    %c0_i32_1 = arith.constant 0 : i32
    return %c0_i32, %c0_i32_0 : i32, i32
  }
  func.func @transform_2(%arg0: i32) -> (i32, i32) {
    %c0_i32 = arith.constant 0 : i32
    %c0_i32_0 = arith.constant 0 : i32
    %c0_i32_1 = arith.constant 0 : i32
    return %c0_i32, %c0_i32_0 : i32, i32
  }
  func.func @transform_3(%arg0: i32) -> (i32, i32) {
    %c0_i32 = arith.constant 0 : i32
    %c0_i32_0 = arith.constant 0 : i32
    return %arg0, %c0_i32 : i32, i32
  }
}

module attributes {stable_mosaic.version = 11 : i64} {
  func.func @_matmul_epilogue_kernel(%arg0: i32, %arg1: memref<464x288xbf16, #tpu.memory_space<vmem>>, %arg2: memref<288x128xbf16, #tpu.memory_space<vmem>>, %arg3: memref<8x128xf32, #tpu.memory_space<vmem>>, %arg4: memref<464x128xbf16, #tpu.memory_space<vmem>>) attributes {dimension_semantics = [#tpu.dimension_semantics<parallel>], iteration_bounds = array<i64: 4>, scalar_prefetch = 0 : i64, scratch_operands = 0 : i64, tpu.core_type = #tpu.core_type<tc>, window_params = [{transform_indices = @transform_0, window_bounds = array<i64: 464, 288>}, {pipeline_mode = #tpu.pipeline_mode<synchronous>, transform_indices = @transform_1, window_bounds = array<i64: 288, 128>}, {pipeline_mode = #tpu.pipeline_mode<synchronous>, transform_indices = @transform_2, window_bounds = array<i64: 8, 128>}, {transform_indices = @transform_3, window_bounds = array<i64: 464, 128>}]} {
    %c0 = arith.constant 0 : index
    %c0_0 = arith.constant 0 : index
    %0 = vector.load %arg1[%c0, %c0_0] : memref<464x288xbf16, #tpu.memory_space<vmem>>, vector<464x288xbf16>
    %c0_1 = arith.constant 0 : index
    %c0_2 = arith.constant 0 : index
    %1 = vector.load %arg2[%c0_1, %c0_2] : memref<288x128xbf16, #tpu.memory_space<vmem>>, vector<288x128xbf16>
    %cst = arith.constant dense<0.000000e+00> : vector<464x128xf32>
    %2 = tpu.matmul %0, %1, %cst {dimension_numbers = #tpu.dot_dimension_numbers<[1], [0], [0], [1], [0, 0, 1, 1], [], []>} : vector<464x288xbf16>, vector<288x128xbf16>, vector<464x128xf32> -> vector<464x128xf32>
    %c0_3 = arith.constant 0 : index
    %c0_4 = arith.constant 0 : index
    %3 = vector.load %arg3[%c0_3, %c0_4] : memref<8x128xf32, #tpu.memory_space<vmem>>, vector<1x128xf32>
    %4 = vector.broadcast %3 : vector<1x128xf32> to vector<464x128xf32>
    %5 = arith.addf %2, %4 : vector<464x128xf32>
    %cst_5 = arith.constant 0.000000e+00 : f32
    %6 = vector.broadcast %cst_5 : f32 to vector<464x128xf32>
    %7 = arith.maximumf %5, %6 : vector<464x128xf32>
    %c1 = arith.constant 1 : index
    %c0_6 = arith.constant 0 : index
    %8 = vector.load %arg3[%c1, %c0_6] : memref<8x128xf32, #tpu.memory_space<vmem>>, vector<1x128xf32>
    %9 = vector.broadcast %8 : vector<1x128xf32> to vector<464x128xf32>
    %10 = arith.mulf %7, %9 : vector<464x128xf32>
    %c2 = arith.constant 2 : index
    %c0_7 = arith.constant 0 : index
    %11 = vector.load %arg3[%c2, %c0_7] : memref<8x128xf32, #tpu.memory_space<vmem>>, vector<1x128xf32>
    %12 = vector.broadcast %11 : vector<1x128xf32> to vector<464x128xf32>
    %13 = arith.addf %10, %12 : vector<464x128xf32>
    %14 = arith.truncf %13 : vector<464x128xf32> to vector<464x128xbf16>
    %c0_8 = arith.constant 0 : index
    %c0_9 = arith.constant 0 : index
    %15 = vector.load %arg4[%c0_8, %c0_9] : memref<464x128xbf16, #tpu.memory_space<vmem>>, vector<464x128xbf16>
    tpu.vector_store %arg4[%c0_8, %c0_9], %14 {strides = array<i32>} : memref<464x128xbf16, #tpu.memory_space<vmem>>, vector<464x128xbf16>,
    return
  }
  func.func @transform_0(%arg0: i32) -> (i32, i32) {
    %c0_i32 = arith.constant 0 : i32
    %c0_i32_0 = arith.constant 0 : i32
    return %arg0, %c0_i32 : i32, i32
  }
  func.func @transform_1(%arg0: i32) -> (i32, i32) {
    %c0_i32 = arith.constant 0 : i32
    %c0_i32_0 = arith.constant 0 : i32
    %c0_i32_1 = arith.constant 0 : i32
    return %c0_i32, %c0_i32_0 : i32, i32
  }
  func.func @transform_2(%arg0: i32) -> (i32, i32) {
    %c0_i32 = arith.constant 0 : i32
    %c0_i32_0 = arith.constant 0 : i32
    %c0_i32_1 = arith.constant 0 : i32
    return %c0_i32, %c0_i32_0 : i32, i32
  }
  func.func @transform_3(%arg0: i32) -> (i32, i32) {
    %c0_i32 = arith.constant 0 : i32
    %c0_i32_0 = arith.constant 0 : i32
    return %arg0, %c0_i32 : i32, i32
  }
}

module attributes {stable_mosaic.version = 11 : i64} {
  func.func @_matmul_kernel(%arg0: i32, %arg1: memref<464x576xbf16, #tpu.memory_space<vmem>>, %arg2: memref<576x128xbf16, #tpu.memory_space<vmem>>, %arg3: memref<464x128xbf16, #tpu.memory_space<vmem>>) attributes {dimension_semantics = [#tpu.dimension_semantics<parallel>], iteration_bounds = array<i64: 1>, scalar_prefetch = 0 : i64, scratch_operands = 0 : i64, tpu.core_type = #tpu.core_type<tc>, window_params = [{transform_indices = @transform_0, window_bounds = array<i64: 464, 576>}, {pipeline_mode = #tpu.pipeline_mode<synchronous>, transform_indices = @transform_1, window_bounds = array<i64: 576, 128>}, {transform_indices = @transform_2, window_bounds = array<i64: 464, 128>}]} {
    %c0 = arith.constant 0 : index
    %c0_0 = arith.constant 0 : index
    %0 = vector.load %arg1[%c0, %c0_0] : memref<464x576xbf16, #tpu.memory_space<vmem>>, vector<464x576xbf16>
    %c0_1 = arith.constant 0 : index
    %c0_2 = arith.constant 0 : index
    %1 = vector.load %arg2[%c0_1, %c0_2] : memref<576x128xbf16, #tpu.memory_space<vmem>>, vector<576x128xbf16>
    %cst = arith.constant dense<0.000000e+00> : vector<464x128xf32>
    %2 = tpu.matmul %0, %1, %cst {dimension_numbers = #tpu.dot_dimension_numbers<[1], [0], [0], [1], [0, 0, 1, 1], [], []>} : vector<464x576xbf16>, vector<576x128xbf16>, vector<464x128xf32> -> vector<464x128xf32>
    %3 = arith.truncf %2 : vector<464x128xf32> to vector<464x128xbf16>
    %c0_3 = arith.constant 0 : index
    %c0_4 = arith.constant 0 : index
    %4 = vector.load %arg3[%c0_3, %c0_4] : memref<464x128xbf16, #tpu.memory_space<vmem>>, vector<464x128xbf16>
    tpu.vector_store %arg3[%c0_3, %c0_4], %3 {strides = array<i32>} : memref<464x128xbf16, #tpu.memory_space<vmem>>, vector<464x128xbf16>,
    return
  }
  func.func @transform_0(%arg0: i32) -> (i32, i32) {
    %c0_i32 = arith.constant 0 : i32
    %c0_i32_0 = arith.constant 0 : i32
    return %arg0, %c0_i32 : i32, i32
  }
  func.func @transform_1(%arg0: i32) -> (i32, i32) {
    %c0_i32 = arith.constant 0 : i32
    %c0_i32_0 = arith.constant 0 : i32
    %c0_i32_1 = arith.constant 0 : i32
    return %c0_i32, %c0_i32_0 : i32, i32
  }
  func.func @transform_2(%arg0: i32) -> (i32, i32) {
    %c0_i32 = arith.constant 0 : i32
    %c0_i32_0 = arith.constant 0 : i32
    return %arg0, %c0_i32 : i32, i32
  }
}

module attributes {stable_mosaic.version = 11 : i64} {
  func.func @_matmul_epilogue_kernel(%arg0: i32, %arg1: memref<464x288xbf16, #tpu.memory_space<vmem>>, %arg2: memref<288x128xbf16, #tpu.memory_space<vmem>>, %arg3: memref<8x128xf32, #tpu.memory_space<vmem>>, %arg4: memref<464x128xbf16, #tpu.memory_space<vmem>>) attributes {dimension_semantics = [#tpu.dimension_semantics<parallel>], iteration_bounds = array<i64: 1>, scalar_prefetch = 0 : i64, scratch_operands = 0 : i64, tpu.core_type = #tpu.core_type<tc>, window_params = [{transform_indices = @transform_0, window_bounds = array<i64: 464, 288>}, {pipeline_mode = #tpu.pipeline_mode<synchronous>, transform_indices = @transform_1, window_bounds = array<i64: 288, 128>}, {pipeline_mode = #tpu.pipeline_mode<synchronous>, transform_indices = @transform_2, window_bounds = array<i64: 8, 128>}, {transform_indices = @transform_3, window_bounds = array<i64: 464, 128>}]} {
    %c0 = arith.constant 0 : index
    %c0_0 = arith.constant 0 : index
    %0 = vector.load %arg1[%c0, %c0_0] : memref<464x288xbf16, #tpu.memory_space<vmem>>, vector<464x288xbf16>
    %c0_1 = arith.constant 0 : index
    %c0_2 = arith.constant 0 : index
    %1 = vector.load %arg2[%c0_1, %c0_2] : memref<288x128xbf16, #tpu.memory_space<vmem>>, vector<288x128xbf16>
    %cst = arith.constant dense<0.000000e+00> : vector<464x128xf32>
    %2 = tpu.matmul %0, %1, %cst {dimension_numbers = #tpu.dot_dimension_numbers<[1], [0], [0], [1], [0, 0, 1, 1], [], []>} : vector<464x288xbf16>, vector<288x128xbf16>, vector<464x128xf32> -> vector<464x128xf32>
    %c0_3 = arith.constant 0 : index
    %c0_4 = arith.constant 0 : index
    %3 = vector.load %arg3[%c0_3, %c0_4] : memref<8x128xf32, #tpu.memory_space<vmem>>, vector<1x128xf32>
    %4 = vector.broadcast %3 : vector<1x128xf32> to vector<464x128xf32>
    %5 = arith.addf %2, %4 : vector<464x128xf32>
    %6 = arith.truncf %5 : vector<464x128xf32> to vector<464x128xbf16>
    %c0_5 = arith.constant 0 : index
    %c0_6 = arith.constant 0 : index
    %7 = vector.load %arg4[%c0_5, %c0_6] : memref<464x128xbf16, #tpu.memory_space<vmem>>, vector<464x128xbf16>
    tpu.vector_store %arg4[%c0_5, %c0_6], %6 {strides = array<i32>} : memref<464x128xbf16, #tpu.memory_space<vmem>>, vector<464x128xbf16>,
    return
  }
  func.func @transform_0(%arg0: i32) -> (i32, i32) {
    %c0_i32 = arith.constant 0 : i32
    %c0_i32_0 = arith.constant 0 : i32
    return %arg0, %c0_i32 : i32, i32
  }
  func.func @transform_1(%arg0: i32) -> (i32, i32) {
    %c0_i32 = arith.constant 0 : i32
    %c0_i32_0 = arith.constant 0 : i32
    %c0_i32_1 = arith.constant 0 : i32
    return %c0_i32, %c0_i32_0 : i32, i32
  }
  func.func @transform_2(%arg0: i32) -> (i32, i32) {
    %c0_i32 = arith.constant 0 : i32
    %c0_i32_0 = arith.constant 0 : i32
    %c0_i32_1 = arith.constant 0 : i32
    return %c0_i32, %c0_i32_0 : i32, i32
  }
  func.func @transform_3(%arg0: i32) -> (i32, i32) {
    %c0_i32 = arith.constant 0 : i32
    %c0_i32_0 = arith.constant 0 : i32
    return %arg0, %c0_i32 : i32, i32
  }
}

module attributes {stable_mosaic.version = 11 : i64} {
  func.func @_matmul_epilogue_kernel(%arg0: i32, %arg1: memref<352x432xbf16, #tpu.memory_space<vmem>>, %arg2: memref<432x128xbf16, #tpu.memory_space<vmem>>, %arg3: memref<8x128xf32, #tpu.memory_space<vmem>>, %arg4: memref<352x128xbf16, #tpu.memory_space<vmem>>) attributes {dimension_semantics = [#tpu.dimension_semantics<parallel>], iteration_bounds = array<i64: 1>, scalar_prefetch = 0 : i64, scratch_operands = 0 : i64, tpu.core_type = #tpu.core_type<tc>, window_params = [{transform_indices = @transform_0, window_bounds = array<i64: 352, 432>}, {pipeline_mode = #tpu.pipeline_mode<synchronous>, transform_indices = @transform_1, window_bounds = array<i64: 432, 128>}, {pipeline_mode = #tpu.pipeline_mode<synchronous>, transform_indices = @transform_2, window_bounds = array<i64: 8, 128>}, {transform_indices = @transform_3, window_bounds = array<i64: 352, 128>}]} {
    %c0 = arith.constant 0 : index
    %c0_0 = arith.constant 0 : index
    %0 = vector.load %arg1[%c0, %c0_0] : memref<352x432xbf16, #tpu.memory_space<vmem>>, vector<352x432xbf16>
    %c0_1 = arith.constant 0 : index
    %c0_2 = arith.constant 0 : index
    %1 = vector.load %arg2[%c0_1, %c0_2] : memref<432x128xbf16, #tpu.memory_space<vmem>>, vector<432x128xbf16>
    %cst = arith.constant dense<0.000000e+00> : vector<352x128xf32>
    %2 = tpu.matmul %0, %1, %cst {dimension_numbers = #tpu.dot_dimension_numbers<[1], [0], [0], [1], [0, 0, 1, 1], [], []>} : vector<352x432xbf16>, vector<432x128xbf16>, vector<352x128xf32> -> vector<352x128xf32>
    %c0_3 = arith.constant 0 : index
    %c0_4 = arith.constant 0 : index
    %3 = vector.load %arg3[%c0_3, %c0_4] : memref<8x128xf32, #tpu.memory_space<vmem>>, vector<1x128xf32>
    %4 = vector.broadcast %3 : vector<1x128xf32> to vector<352x128xf32>
    %5 = arith.addf %2, %4 : vector<352x128xf32>
    %cst_5 = arith.constant 0.000000e+00 : f32
    %6 = vector.broadcast %cst_5 : f32 to vector<352x128xf32>
    %7 = arith.maximumf %5, %6 : vector<352x128xf32>
    %c1 = arith.constant 1 : index
    %c0_6 = arith.constant 0 : index
    %8 = vector.load %arg3[%c1, %c0_6] : memref<8x128xf32, #tpu.memory_space<vmem>>, vector<1x128xf32>
    %9 = vector.broadcast %8 : vector<1x128xf32> to vector<352x128xf32>
    %10 = arith.mulf %7, %9 : vector<352x128xf32>
    %c2 = arith.constant 2 : index
    %c0_7 = arith.constant 0 : index
    %11 = vector.load %arg3[%c2, %c0_7] : memref<8x128xf32, #tpu.memory_space<vmem>>, vector<1x128xf32>
    %12 = vector.broadcast %11 : vector<1x128xf32> to vector<352x128xf32>
    %13 = arith.addf %10, %12 : vector<352x128xf32>
    %14 = arith.truncf %13 : vector<352x128xf32> to vector<352x128xbf16>
    %c0_8 = arith.constant 0 : index
    %c0_9 = arith.constant 0 : index
    %15 = vector.load %arg4[%c0_8, %c0_9] : memref<352x128xbf16, #tpu.memory_space<vmem>>, vector<352x128xbf16>
    tpu.vector_store %arg4[%c0_8, %c0_9], %14 {strides = array<i32>} : memref<352x128xbf16, #tpu.memory_space<vmem>>, vector<352x128xbf16>,
    return
  }
  func.func @transform_0(%arg0: i32) -> (i32, i32) {
    %c0_i32 = arith.constant 0 : i32
    %c0_i32_0 = arith.constant 0 : i32
    return %arg0, %c0_i32 : i32, i32
  }
  func.func @transform_1(%arg0: i32) -> (i32, i32) {
    %c0_i32 = arith.constant 0 : i32
    %c0_i32_0 = arith.constant 0 : i32
    %c0_i32_1 = arith.constant 0 : i32
    return %c0_i32, %c0_i32_0 : i32, i32
  }
  func.func @transform_2(%arg0: i32) -> (i32, i32) {
    %c0_i32 = arith.constant 0 : i32
    %c0_i32_0 = arith.constant 0 : i32
    %c0_i32_1 = arith.constant 0 : i32
    return %c0_i32, %c0_i32_0 : i32, i32
  }
  func.func @transform_3(%arg0: i32) -> (i32, i32) {
    %c0_i32 = arith.constant 0 : i32
    %c0_i32_0 = arith.constant 0 : i32
    return %arg0, %c0_i32 : i32, i32
  }
}

module attributes {stable_mosaic.version = 11 : i64} {
  func.func @_matmul_kernel(%arg0: i32, %arg1: memref<112x576xbf16, #tpu.memory_space<vmem>>, %arg2: memref<576x128xbf16, #tpu.memory_space<vmem>>, %arg3: memref<112x128xbf16, #tpu.memory_space<vmem>>) attributes {dimension_semantics = [#tpu.dimension_semantics<parallel>], iteration_bounds = array<i64: 1>, scalar_prefetch = 0 : i64, scratch_operands = 0 : i64, tpu.core_type = #tpu.core_type<tc>, window_params = [{transform_indices = @transform_0, window_bounds = array<i64: 112, 576>}, {pipeline_mode = #tpu.pipeline_mode<synchronous>, transform_indices = @transform_1, window_bounds = array<i64: 576, 128>}, {transform_indices = @transform_2, window_bounds = array<i64: 112, 128>}]} {
    %c0 = arith.constant 0 : index
    %c0_0 = arith.constant 0 : index
    %0 = vector.load %arg1[%c0, %c0_0] : memref<112x576xbf16, #tpu.memory_space<vmem>>, vector<112x576xbf16>
    %c0_1 = arith.constant 0 : index
    %c0_2 = arith.constant 0 : index
    %1 = vector.load %arg2[%c0_1, %c0_2] : memref<576x128xbf16, #tpu.memory_space<vmem>>, vector<576x128xbf16>
    %cst = arith.constant dense<0.000000e+00> : vector<112x128xf32>
    %2 = tpu.matmul %0, %1, %cst {dimension_numbers = #tpu.dot_dimension_numbers<[1], [0], [0], [1], [0, 0, 1, 1], [], []>} : vector<112x576xbf16>, vector<576x128xbf16>, vector<112x128xf32> -> vector<112x128xf32>
    %3 = arith.truncf %2 : vector<112x128xf32> to vector<112x128xbf16>
    %c0_3 = arith.constant 0 : index
    %c0_4 = arith.constant 0 : index
    %4 = vector.load %arg3[%c0_3, %c0_4] : memref<112x128xbf16, #tpu.memory_space<vmem>>, vector<112x128xbf16>
    tpu.vector_store %arg3[%c0_3, %c0_4], %3 {strides = array<i32>} : memref<112x128xbf16, #tpu.memory_space<vmem>>, vector<112x128xbf16>,
    return
  }
  func.func @transform_0(%arg0: i32) -> (i32, i32) {
    %c0_i32 = arith.constant 0 : i32
    %c0_i32_0 = arith.constant 0 : i32
    return %arg0, %c0_i32 : i32, i32
  }
  func.func @transform_1(%arg0: i32) -> (i32, i32) {
    %c0_i32 = arith.constant 0 : i32
    %c0_i32_0 = arith.constant 0 : i32
    %c0_i32_1 = arith.constant 0 : i32
    return %c0_i32, %c0_i32_0 : i32, i32
  }
  func.func @transform_2(%arg0: i32) -> (i32, i32) {
    %c0_i32 = arith.constant 0 : i32
    %c0_i32_0 = arith.constant 0 : i32
    return %arg0, %c0_i32 : i32, i32
  }
}

module attributes {stable_mosaic.version = 11 : i64} {
  func.func @_matmul_epilogue_kernel(%arg0: i32, %arg1: memref<112x288xbf16, #tpu.memory_space<vmem>>, %arg2: memref<288x128xbf16, #tpu.memory_space<vmem>>, %arg3: memref<8x128xf32, #tpu.memory_space<vmem>>, %arg4: memref<112x128xbf16, #tpu.memory_space<vmem>>) attributes {dimension_semantics = [#tpu.dimension_semantics<parallel>], iteration_bounds = array<i64: 1>, scalar_prefetch = 0 : i64, scratch_operands = 0 : i64, tpu.core_type = #tpu.core_type<tc>, window_params = [{transform_indices = @transform_0, window_bounds = array<i64: 112, 288>}, {pipeline_mode = #tpu.pipeline_mode<synchronous>, transform_indices = @transform_1, window_bounds = array<i64: 288, 128>}, {pipeline_mode = #tpu.pipeline_mode<synchronous>, transform_indices = @transform_2, window_bounds = array<i64: 8, 128>}, {transform_indices = @transform_3, window_bounds = array<i64: 112, 128>}]} {
    %c0 = arith.constant 0 : index
    %c0_0 = arith.constant 0 : index
    %0 = vector.load %arg1[%c0, %c0_0] : memref<112x288xbf16, #tpu.memory_space<vmem>>, vector<112x288xbf16>
    %c0_1 = arith.constant 0 : index
    %c0_2 = arith.constant 0 : index
    %1 = vector.load %arg2[%c0_1, %c0_2] : memref<288x128xbf16, #tpu.memory_space<vmem>>, vector<288x128xbf16>
    %cst = arith.constant dense<0.000000e+00> : vector<112x128xf32>
    %2 = tpu.matmul %0, %1, %cst {dimension_numbers = #tpu.dot_dimension_numbers<[1], [0], [0], [1], [0, 0, 1, 1], [], []>} : vector<112x288xbf16>, vector<288x128xbf16>, vector<112x128xf32> -> vector<112x128xf32>
    %cst_3 = arith.constant 0.000000e+00 : f32
    %3 = vector.broadcast %cst_3 : f32 to vector<112x128xf32>
    %4 = arith.maximumf %2, %3 : vector<112x128xf32>
    %c1 = arith.constant 1 : index
    %c0_4 = arith.constant 0 : index
    %5 = vector.load %arg3[%c1, %c0_4] : memref<8x128xf32, #tpu.memory_space<vmem>>, vector<1x128xf32>
    %6 = vector.broadcast %5 : vector<1x128xf32> to vector<112x128xf32>
    %7 = arith.mulf %4, %6 : vector<112x128xf32>
    %c2 = arith.constant 2 : index
    %c0_5 = arith.constant 0 : index
    %8 = vector.load %arg3[%c2, %c0_5] : memref<8x128xf32, #tpu.memory_space<vmem>>, vector<1x128xf32>
    %9 = vector.broadcast %8 : vector<1x128xf32> to vector<112x128xf32>
    %10 = arith.addf %7, %9 : vector<112x128xf32>
    %11 = arith.truncf %10 : vector<112x128xf32> to vector<112x128xbf16>
    %c0_6 = arith.constant 0 : index
    %c0_7 = arith.constant 0 : index
    %12 = vector.load %arg4[%c0_6, %c0_7] : memref<112x128xbf16, #tpu.memory_space<vmem>>, vector<112x128xbf16>
    tpu.vector_store %arg4[%c0_6, %c0_7], %11 {strides = array<i32>} : memref<112x128xbf16, #tpu.memory_space<vmem>>, vector<112x128xbf16>,
    return
  }
  func.func @transform_0(%arg0: i32) -> (i32, i32) {
    %c0_i32 = arith.constant 0 : i32
    %c0_i32_0 = arith.constant 0 : i32
    return %arg0, %c0_i32 : i32, i32
  }
  func.func @transform_1(%arg0: i32) -> (i32, i32) {
    %c0_i32 = arith.constant 0 : i32
    %c0_i32_0 = arith.constant 0 : i32
    %c0_i32_1 = arith.constant 0 : i32
    return %c0_i32, %c0_i32_0 : i32, i32
  }
  func.func @transform_2(%arg0: i32) -> (i32, i32) {
    %c0_i32 = arith.constant 0 : i32
    %c0_i32_0 = arith.constant 0 : i32
    %c0_i32_1 = arith.constant 0 : i32
    return %c0_i32, %c0_i32_0 : i32, i32
  }
  func.func @transform_3(%arg0: i32) -> (i32, i32) {
    %c0_i32 = arith.constant 0 : i32
    %c0_i32_0 = arith.constant 0 : i32
    return %arg0, %c0_i32 : i32, i32
  }
}

module attributes {stable_mosaic.version = 11 : i64} {
  func.func @_matmul_epilogue_kernel(%arg0: i32, %arg1: memref<32x24xbf16, #tpu.memory_space<vmem>>, %arg2: memref<24x128xbf16, #tpu.memory_space<vmem>>, %arg3: memref<8x128xf32, #tpu.memory_space<vmem>>, %arg4: memref<32x128xbf16, #tpu.memory_space<vmem>>) attributes {dimension_semantics = [#tpu.dimension_semantics<parallel>], iteration_bounds = array<i64: 1>, scalar_prefetch = 0 : i64, scratch_operands = 0 : i64, tpu.core_type = #tpu.core_type<tc>, window_params = [{transform_indices = @transform_0, window_bounds = array<i64: 32, 24>}, {pipeline_mode = #tpu.pipeline_mode<synchronous>, transform_indices = @transform_1, window_bounds = array<i64: 24, 128>}, {pipeline_mode = #tpu.pipeline_mode<synchronous>, transform_indices = @transform_2, window_bounds = array<i64: 8, 128>}, {transform_indices = @transform_3, window_bounds = array<i64: 32, 128>}]} {
    %c0 = arith.constant 0 : index
    %c0_0 = arith.constant 0 : index
    %0 = vector.load %arg1[%c0, %c0_0] : memref<32x24xbf16, #tpu.memory_space<vmem>>, vector<32x24xbf16>
    %c0_1 = arith.constant 0 : index
    %c0_2 = arith.constant 0 : index
    %1 = vector.load %arg2[%c0_1, %c0_2] : memref<24x128xbf16, #tpu.memory_space<vmem>>, vector<24x128xbf16>
    %cst = arith.constant dense<0.000000e+00> : vector<32x128xf32>
    %2 = tpu.matmul %0, %1, %cst {dimension_numbers = #tpu.dot_dimension_numbers<[1], [0], [0], [1], [0, 0, 1, 1], [], []>} : vector<32x24xbf16>, vector<24x128xbf16>, vector<32x128xf32> -> vector<32x128xf32>
    %cst_3 = arith.constant 0.000000e+00 : f32
    %3 = vector.broadcast %cst_3 : f32 to vector<32x128xf32>
    %4 = arith.maximumf %2, %3 : vector<32x128xf32>
    %c1 = arith.constant 1 : index
    %c0_4 = arith.constant 0 : index
    %5 = vector.load %arg3[%c1, %c0_4] : memref<8x128xf32, #tpu.memory_space<vmem>>, vector<1x128xf32>
    %6 = vector.broadcast %5 : vector<1x128xf32> to vector<32x128xf32>
    %7 = arith.mulf %4, %6 : vector<32x128xf32>
    %c2 = arith.constant 2 : index
    %c0_5 = arith.constant 0 : index
    %8 = vector.load %arg3[%c2, %c0_5] : memref<8x128xf32, #tpu.memory_space<vmem>>, vector<1x128xf32>
    %9 = vector.broadcast %8 : vector<1x128xf32> to vector<32x128xf32>
    %10 = arith.addf %7, %9 : vector<32x128xf32>
    %11 = arith.truncf %10 : vector<32x128xf32> to vector<32x128xbf16>
    %c0_6 = arith.constant 0 : index
    %c0_7 = arith.constant 0 : index
    %12 = vector.load %arg4[%c0_6, %c0_7] : memref<32x128xbf16, #tpu.memory_space<vmem>>, vector<32x128xbf16>
    tpu.vector_store %arg4[%c0_6, %c0_7], %11 {strides = array<i32>} : memref<32x128xbf16, #tpu.memory_space<vmem>>, vector<32x128xbf16>,
    return
  }
  func.func @transform_0(%arg0: i32) -> (i32, i32) {
    %c0_i32 = arith.constant 0 : i32
    %c0_i32_0 = arith.constant 0 : i32
    return %arg0, %c0_i32 : i32, i32
  }
  func.func @transform_1(%arg0: i32) -> (i32, i32) {
    %c0_i32 = arith.constant 0 : i32
    %c0_i32_0 = arith.constant 0 : i32
    %c0_i32_1 = arith.constant 0 : i32
    return %c0_i32, %c0_i32_0 : i32, i32
  }
  func.func @transform_2(%arg0: i32) -> (i32, i32) {
    %c0_i32 = arith.constant 0 : i32
    %c0_i32_0 = arith.constant 0 : i32
    %c0_i32_1 = arith.constant 0 : i32
    return %c0_i32, %c0_i32_0 : i32, i32
  }
  func.func @transform_3(%arg0: i32) -> (i32, i32) {
    %c0_i32 = arith.constant 0 : i32
    %c0_i32_0 = arith.constant 0 : i32
    return %arg0, %c0_i32 : i32, i32
  }
}

module attributes {stable_mosaic.version = 11 : i64} {
  func.func @_matmul_kernel(%arg0: i32, %arg1: memref<32x432xbf16, #tpu.memory_space<vmem>>, %arg2: memref<432x128xbf16, #tpu.memory_space<vmem>>, %arg3: memref<32x128xbf16, #tpu.memory_space<vmem>>) attributes {dimension_semantics = [#tpu.dimension_semantics<parallel>], iteration_bounds = array<i64: 1>, scalar_prefetch = 0 : i64, scratch_operands = 0 : i64, tpu.core_type = #tpu.core_type<tc>, window_params = [{transform_indices = @transform_0, window_bounds = array<i64: 32, 432>}, {pipeline_mode = #tpu.pipeline_mode<synchronous>, transform_indices = @transform_1, window_bounds = array<i64: 432, 128>}, {transform_indices = @transform_2, window_bounds = array<i64: 32, 128>}]} {
    %c0 = arith.constant 0 : index
    %c0_0 = arith.constant 0 : index
    %0 = vector.load %arg1[%c0, %c0_0] : memref<32x432xbf16, #tpu.memory_space<vmem>>, vector<32x432xbf16>
    %c0_1 = arith.constant 0 : index
    %c0_2 = arith.constant 0 : index
    %1 = vector.load %arg2[%c0_1, %c0_2] : memref<432x128xbf16, #tpu.memory_space<vmem>>, vector<432x128xbf16>
    %cst = arith.constant dense<0.000000e+00> : vector<32x128xf32>
    %2 = tpu.matmul %0, %1, %cst {dimension_numbers = #tpu.dot_dimension_numbers<[1], [0], [0], [1], [0, 0, 1, 1], [], []>} : vector<32x432xbf16>, vector<432x128xbf16>, vector<32x128xf32> -> vector<32x128xf32>
    %3 = arith.truncf %2 : vector<32x128xf32> to vector<32x128xbf16>
    %c0_3 = arith.constant 0 : index
    %c0_4 = arith.constant 0 : index
    %4 = vector.load %arg3[%c0_3, %c0_4] : memref<32x128xbf16, #tpu.memory_space<vmem>>, vector<32x128xbf16>
    tpu.vector_store %arg3[%c0_3, %c0_4], %3 {strides = array<i32>} : memref<32x128xbf16, #tpu.memory_space<vmem>>, vector<32x128xbf16>,
    return
  }
  func.func @transform_0(%arg0: i32) -> (i32, i32) {
    %c0_i32 = arith.constant 0 : i32
    %c0_i32_0 = arith.constant 0 : i32
    return %arg0, %c0_i32 : i32, i32
  }
  func.func @transform_1(%arg0: i32) -> (i32, i32) {
    %c0_i32 = arith.constant 0 : i32
    %c0_i32_0 = arith.constant 0 : i32
    %c0_i32_1 = arith.constant 0 : i32
    return %c0_i32, %c0_i32_0 : i32, i32
  }
  func.func @transform_2(%arg0: i32) -> (i32, i32) {
    %c0_i32 = arith.constant 0 : i32
    %c0_i32_0 = arith.constant 0 : i32
    return %arg0, %c0_i32 : i32, i32
  }
}

module attributes {stable_mosaic.version = 11 : i64} {
  func.func @_matmul_epilogue_kernel(%arg0: i32, %arg1: memref<16x288xbf16, #tpu.memory_space<vmem>>, %arg2: memref<288x128xbf16, #tpu.memory_space<vmem>>, %arg3: memref<8x128xf32, #tpu.memory_space<vmem>>, %arg4: memref<16x128xf32, #tpu.memory_space<vmem>>) attributes {dimension_semantics = [#tpu.dimension_semantics<parallel>], iteration_bounds = array<i64: 1>, scalar_prefetch = 0 : i64, scratch_operands = 0 : i64, tpu.core_type = #tpu.core_type<tc>, window_params = [{transform_indices = @transform_0, window_bounds = array<i64: 16, 288>}, {pipeline_mode = #tpu.pipeline_mode<synchronous>, transform_indices = @transform_1, window_bounds = array<i64: 288, 128>}, {pipeline_mode = #tpu.pipeline_mode<synchronous>, transform_indices = @transform_2, window_bounds = array<i64: 8, 128>}, {transform_indices = @transform_3, window_bounds = array<i64: 16, 128>}]} {
    %c0 = arith.constant 0 : index
    %c0_0 = arith.constant 0 : index
    %0 = vector.load %arg1[%c0, %c0_0] : memref<16x288xbf16, #tpu.memory_space<vmem>>, vector<16x288xbf16>
    %c0_1 = arith.constant 0 : index
    %c0_2 = arith.constant 0 : index
    %1 = vector.load %arg2[%c0_1, %c0_2] : memref<288x128xbf16, #tpu.memory_space<vmem>>, vector<288x128xbf16>
    %cst = arith.constant dense<0.000000e+00> : vector<16x128xf32>
    %2 = tpu.matmul %0, %1, %cst {dimension_numbers = #tpu.dot_dimension_numbers<[1], [0], [0], [1], [0, 0, 1, 1], [], []>} : vector<16x288xbf16>, vector<288x128xbf16>, vector<16x128xf32> -> vector<16x128xf32>
    %c0_3 = arith.constant 0 : index
    %c0_4 = arith.constant 0 : index
    %3 = vector.load %arg3[%c0_3, %c0_4] : memref<8x128xf32, #tpu.memory_space<vmem>>, vector<1x128xf32>
    %4 = vector.broadcast %3 : vector<1x128xf32> to vector<16x128xf32>
    %5 = arith.addf %2, %4 : vector<16x128xf32>
    %c0_5 = arith.constant 0 : index
    %c0_6 = arith.constant 0 : index
    %6 = vector.load %arg4[%c0_5, %c0_6] : memref<16x128xf32, #tpu.memory_space<vmem>>, vector<16x128xf32>
    tpu.vector_store %arg4[%c0_5, %c0_6], %5 {strides = array<i32>} : memref<16x128xf32, #tpu.memory_space<vmem>>, vector<16x128xf32>,
    return
  }
  func.func @transform_0(%arg0: i32) -> (i32, i32) {
    %c0_i32 = arith.constant 0 : i32
    %c0_i32_0 = arith.constant 0 : i32
    return %arg0, %c0_i32 : i32, i32
  }
  func.func @transform_1(%arg0: i32) -> (i32, i32) {
    %c0_i32 = arith.constant 0 : i32
    %c0_i32_0 = arith.constant 0 : i32
    %c0_i32_1 = arith.constant 0 : i32
    return %c0_i32, %c0_i32_0 : i32, i32
  }
  func.func @transform_2(%arg0: i32) -> (i32, i32) {
    %c0_i32 = arith.constant 0 : i32
    %c0_i32_0 = arith.constant 0 : i32
    %c0_i32_1 = arith.constant 0 : i32
    return %c0_i32, %c0_i32_0 : i32, i32
  }
  func.func @transform_3(%arg0: i32) -> (i32, i32) {
    %c0_i32 = arith.constant 0 : i32
    %c0_i32_0 = arith.constant 0 : i32
    return %arg0, %c0_i32 : i32, i32
  }
}

</mosaic_0001>

<bundles_post_ra>
// kernel: seafar_forward.11
= control target key start
LH: loop header
LB: loop body
LE: loop exit
PB: predicated region body
PF: predicated region fallthrough
CT: control target
= control target key end

     0   :  { %s1763_s12 = smov 0   ;;  %s1962_s0 = inlined_call_operand.vmem [shape: bf16[2048,27], index: 0, kind: input, shape index: {}]   ;;  %s1963_s1 = inlined_call_operand.vmem [shape: bf16[27,128], index: 1, kind: input, shape index: {}]   ;;  %s1964_s2 = inlined_call_operand.vmem [shape: f32[8,128], index: 2, kind: input, shape index: {}]   ;;  %s1965_s3 = inlined_call_operand.vmem [shape: bf16[2048,128], index: 3, kind: output, shape index: {}]  }
   0x1 LB: > { %s1188_s13 = sadd.s32 4294967295, %s1740_s12   ;;  %p1192_p0 = scmp.ge.s32.totalorder %s1740_s12, 1  ;;  %s1740_s12 = sphi %s1763_s12, %s13_s12  }
   0x2   : > { %p138_p1 = scmp.lt.s32.totalorder %s1740_s12, 5 }
   0x4   : > { %p139_p2 = pnand %p1192_p0, %p138_p1 }
   0x5   : > { %s1193_s16 = sshll.u32 (!%p139_p2), %s1188_s13, 6 }
   0x6   : > { %142 = sbr.rel (%p139_p2) target bundleno = 284 (0x11c), region = 32  ;;  %p163_p3 = scmp.lt.s32.totalorder (!%p139_p2), %s1193_s16, 255 }
   0xb   : > { %v1700_v0 = vld [vmem:[%s1963_s1 + $0x8] sm:$0x3f]   ;;  %vm516_vm0 = vcmask 1044480   ;;  %vm517_vm1 = vcmask 1045504   ;;  %v1742_v1 = vmov 65535   ;;  %v1701_v5 = vld [vmem:[%s1963_s1] sm:$0xff]  }
   0xc   : > { %v518_v2 = vsel %vm516_vm0, 4294967295, %v1742_v1  ;;  %s1967_s16 = smov (!%p163_p3, %s1193_s16), 255  ;;  %vm419_vm2 = vcmask 220160   ;;  %v1854_v40 = vld [vmem:[%s1964_s2] ss:$0 sm:$0xff] }
   0xd   : > { %v519_v3 = vsel %vm517_vm1, %v518_v2, 0  ;;  %s1194_s19 = sshll.u32 %s1967_s16, 2 }
   0xe   : > { %v521_v4 = vand.u32 %v1700_v0, %v519_v3  ;;  %s1785_s22 = scalar_lea.vmem %s1962_s0, %s1194_s19  ;;  %s1867_s27 = scalar_lea.vmem %s1965_s3, %s1194_s19 }
   0xf   : > { %v1702_v6 = vld [vmem:[%s1785_s22] sm:$0xff]   ;;  %v1704_v8 = vld [vmem:[%s1785_s22 + $0x8] sm:$0xff]   ;;  %v1706_v10 = vld [vmem:[%s1785_s22 + $0x10] sm:$0xff]  }
  0x10   : > { %1619 = vmatprep.subr.bf16.mxu0 %v521_v4  ;;  %1687 = vmatprep.subr.bf16.mxu1 %v521_v4  ;;  %v1703_v7 = vld [vmem:[%s1785_s22 + $0x80] sm:$0xff]   ;;  %v1705_v9 = vld [vmem:[%s1785_s22 + $0x88] sm:$0xff]   ;;  %v1707_v11 = vld [vmem:[%s1785_s22 + $0x90] sm:$0xff]  }
  0x11   : > { %1620 = vmatpush3.bf16.msra.mxu0 %v521_v4  ;;  %1689 = vmatpush3.bf16.msra.mxu1 %v521_v4  ;;  %v1708_v12 = vld [vmem:[%s1785_s22 + $0x18] sm:$0xff]   ;;  %v1710_v14 = vld [vmem:[%s1785_s22 + $0x20] sm:$0xff]   ;;  %v1712_v16 = vld [vmem:[%s1785_s22 + $0x28] sm:$0xff]  }
  0x12   : > { %1621 = vmatprep.subr.bf16.mxu0 %v1701_v5  ;;  %1688 = vmatprep.subr.bf16.mxu1 %v1701_v5  ;;  %v1709_v13 = vld [vmem:[%s1785_s22 + $0x98] sm:$0xff]   ;;  %v1711_v15 = vld [vmem:[%s1785_s22 + $0xa0] sm:$0xff]   ;;  %v1713_v17 = vld [vmem:[%s1785_s22 + $0xa8] sm:$0xff]  }
  0x13   : > { %1623 = vmatprep.mubr.msk.bf16.mxu0 %vm419_vm2, %v1702_v6  ;;  %1655 = vmatprep.mubr.msk.bf16.mxu1 %vm419_vm2, %v1703_v7  ;;  %v1714_v18 = vld [vmem:[%s1785_s22 + $0x30] sm:$0xff]   ;;  %v1716_v20 = vld [vmem:[%s1785_s22 + $0x38] sm:$0xff]   ;;  %v1718_v22 = vld [vmem:[%s1785_s22 + $0x40] sm:$0xff]  }
  0x14   : > { %v1715_v19 = vld [vmem:[%s1785_s22 + $0xb0] sm:$0xff]   ;;  %v1717_v21 = vld [vmem:[%s1785_s22 + $0xb8] sm:$0xff]   ;;  %v1719_v23 = vld [vmem:[%s1785_s22 + $0xc0] sm:$0xff]  }
  0x15   : > { %1622 = vmatpush3.bf16.msra.mxu0 %v1701_v5  ;;  %1690 = vmatpush3.bf16.msra.mxu1 %v1701_v5  ;;  %v1720_v24 = vld [vmem:[%s1785_s22 + $0x48] sm:$0xff]   ;;  %v1722_v26 = vld [vmem:[%s1785_s22 + $0x50] sm:$0xff]   ;;  %v1724_v28 = vld [vmem:[%s1785_s22 + $0x58] sm:$0xff]  }
  0x16   : > { %v1721_v25 = vld [vmem:[%s1785_s22 + $0xc8] sm:$0xff]   ;;  %v1723_v27 = vld [vmem:[%s1785_s22 + $0xd0] sm:$0xff]   ;;  %v1725_v29 = vld [vmem:[%s1785_s22 + $0xd8] sm:$0xff]  }
  0x17   : > { %v1726_v30 = vld [vmem:[%s1785_s22 + $0x60] sm:$0xff]   ;;  %v1728_v32 = vld [vmem:[%s1785_s22 + $0x68] sm:$0xff]   ;;  %v1730_v34 = vld [vmem:[%s1785_s22 + $0x70] sm:$0xff]  }
  0x18   : > { %1624 = vmatmul.mubr.msk.bf16.vlgmr.msra.gmra.mxu0 %vm419_vm2, %v1704_v8  ;;  %1656 = vmatmul.mubr.msk.bf16.vlgmr.msra.gmra.mxu1 %vm419_vm2, %v1705_v9  ;;  %v1727_v31 = vld [vmem:[%s1785_s22 + $0xe0] sm:$0xff]   ;;  %v1729_v33 = vld [vmem:[%s1785_s22 + $0xe8] sm:$0xff]   ;;  %v1731_v35 = vld [vmem:[%s1785_s22 + $0xf0] sm:$0xff]  }
  0x19   : > { %1627 = vmatprep.mubr.msk.bf16.mxu0 %vm419_vm2, %v1706_v10  ;;  %1659 = vmatprep.mubr.msk.bf16.mxu1 %vm419_vm2, %v1707_v11  ;;  %v1732_v36 = vld [vmem:[%s1785_s22 + $0x78] sm:$0xff]  }
  0x1a   : > { %v1733_v37 = vld [vmem:[%s1785_s22 + $0xf8] sm:$0xff]  }
  0x20   : > { %1628 = vmatmul.mubr.msk.bf16.gmra.mxu0 %vm419_vm2, %v1708_v12  ;;  %1660 = vmatmul.mubr.msk.bf16.gmra.mxu1 %vm419_vm2, %v1709_v13 }
  0x21   : > { %1631 = vmatprep.mubr.msk.bf16.mxu0 %vm419_vm2, %v1710_v14  ;;  %1663 = vmatprep.mubr.msk.bf16.mxu1 %vm419_vm2, %v1711_v15 }
  0x28   : > { %1632 = vmatmul.mubr.msk.bf16.gmra.mxu0 %vm419_vm2, %v1712_v16  ;;  %1664 = vmatmul.mubr.msk.bf16.gmra.mxu1 %vm419_vm2, %v1713_v17 }
  0x29   : > { %1635 = vmatprep.mubr.msk.bf16.mxu0 %vm419_vm2, %v1714_v18  ;;  %1667 = vmatprep.mubr.msk.bf16.mxu1 %vm419_vm2, %v1715_v19 }
  0x30   : > { %1636 = vmatmul.mubr.msk.bf16.gmra.mxu0 %vm419_vm2, %v1716_v20  ;;  %1668 = vmatmul.mubr.msk.bf16.gmra.mxu1 %vm419_vm2, %v1717_v21 }
  0x31   : > { %1639 = vmatprep.mubr.msk.bf16.mxu0 %vm419_vm2, %v1718_v22  ;;  %1671 = vmatprep.mubr.msk.bf16.mxu1 %vm419_vm2, %v1719_v23 }
  0x38   : > { %1640 = vmatmul.mubr.msk.bf16.gmra.mxu0 %vm419_vm2, %v1720_v24  ;;  %1672 = vmatmul.mubr.msk.bf16.gmra.mxu1 %vm419_vm2, %v1721_v25 }
  0x39   : > { %1643 = vmatprep.mubr.msk.bf16.mxu0 %vm419_vm2, %v1722_v26  ;;  %1675 = vmatprep.mubr.msk.bf16.mxu1 %vm419_vm2, %v1723_v27 }
  0x40   : > { %1644 = vmatmul.mubr.msk.bf16.gmra.mxu0 %vm419_vm2, %v1724_v28  ;;  %1676 = vmatmul.mubr.msk.bf16.gmra.mxu1 %vm419_vm2, %v1725_v29 }
  0x41   : > { %1647 = vmatprep.mubr.msk.bf16.mxu0 %vm419_vm2, %v1726_v30  ;;  %1679 = vmatprep.mubr.msk.bf16.mxu1 %vm419_vm2, %v1727_v31 }
  0x48   : > { %1648 = vmatmul.mubr.msk.bf16.gmra.mxu0 %vm419_vm2, %v1728_v32  ;;  %1680 = vmatmul.mubr.msk.bf16.gmra.mxu1 %vm419_vm2, %v1729_v33 }
  0x49   : > { %1651 = vmatprep.mubr.msk.bf16.mxu0 %vm419_vm2, %v1730_v34  ;;  %1683 = vmatprep.mubr.msk.bf16.mxu1 %vm419_vm2, %v1731_v35 }
  0x50   : > { %1652 = vmatmul.mubr.msk.bf16.gmra.mxu0 %vm419_vm2, %v1732_v36  ;;  %1684 = vmatmul.mubr.msk.bf16.gmra.mxu1 %vm419_vm2, %v1733_v37 }
  0xd8   : > { %v1625_v38 = vpop.f32.mrf.mxu0  ;;  %v1657_v39 = vpop.f32.mrf.mxu1 }
  0xd9   : > { %v566_v45 = vadd.f32 %v1625_v38, %v1854_v40  ;;  %v694_v46 = vadd.f32 %v1657_v39, %v1854_v40 }
  0xda   : > { %v557_v41 = vpop.f32.mrf.mxu0  ;;  %v685_v42 = vpop.f32.mrf.mxu1 }
  0xdb   : > { %v558_v49 = vadd.f32 %v1854_v40, %v557_v41  ;;  %v686_v50 = vadd.f32 %v1854_v40, %v685_v42 }
  0xdc   : > { %v1626_v43 = vpop.f32.mrf.mxu0  ;;  %v1658_v44 = vpop.f32.mrf.mxu1 }
  0xdd   : > { %v569_v47 = vadd.f32 %v1626_v43, %v1854_v40  ;;  %v697_v48 = vadd.f32 %v1658_v44, %v1854_v40 }
  0xde   : > { %v560_v51 = vpop.f32.mrf.mxu0  ;;  %v688_v52 = vpop.f32.mrf.mxu1 }
  0xdf   : > { %v1402_v53 = vpack.c.bf16 %v569_v47, %v566_v45  ;;  %v1482_v54 = vpack.c.bf16 %v697_v48, %v694_v46  ;;  %v561_v55 = vadd.f32 %v1854_v40, %v560_v51  ;;  %v689_v56 = vadd.f32 %v1854_v40, %v688_v52 }
  0xe0   : > { %v1629_v57 = vpop.f32.mrf.mxu0  ;;  %v1661_v58 = vpop.f32.mrf.mxu1 }
  0xe1   : > { %1554 = vst [vmem:[%s1867_s27 + $0x8] sm:$0xff] %v1402_v53   ;;  %1570 = vst [vmem:[%s1867_s27 + $0x88] sm:$0xff] %v1482_v54   ;;  %v1397_v59 = vpack.c.bf16 %v561_v55, %v558_v49  ;;  %v1477_v60 = vpack.c.bf16 %v689_v56, %v686_v50  ;;  %v582_v1 = vadd.f32 %v1629_v57, %v1854_v40 }
  0xe2   : > { %v573_v61 = vpop.f32.mrf.mxu0  ;;  %v701_v62 = vpop.f32.mrf.mxu1  ;;  %v710_v2 = vadd.f32 %v1661_v58, %v1854_v40 }
  0xe3   : > { %1398 = vst [vmem:[%s1867_s27] sm:$0xff] %v1397_v59   ;;  %1569 = vst [vmem:[%s1867_s27 + $0x80] sm:$0xff] %v1477_v60   ;;  %v574_v5 = vadd.f32 %v1854_v40, %v573_v61  ;;  %v702_v6 = vadd.f32 %v1854_v40, %v701_v62 }
  0xe4   : > { %v1630_v63 = vpop.f32.mrf.mxu0  ;;  %v1662_v0 = vpop.f32.mrf.mxu1 }
  0xe5   : > { %v585_v3 = vadd.f32 %v1630_v63, %v1854_v40  ;;  %v713_v4 = vadd.f32 %v1662_v0, %v1854_v40 }
  0xe6   : > { %v576_v7 = vpop.f32.mrf.mxu0  ;;  %v704_v8 = vpop.f32.mrf.mxu1 }
  0xe7   : > { %v1412_v9 = vpack.c.bf16 %v585_v3, %v582_v1  ;;  %v1492_v10 = vpack.c.bf16 %v713_v4, %v710_v2  ;;  %v577_v11 = vadd.f32 %v1854_v40, %v576_v7  ;;  %v705_v12 = vadd.f32 %v1854_v40, %v704_v8 }
  0xe8   : > { %v1633_v13 = vpop.f32.mrf.mxu0  ;;  %v1665_v14 = vpop.f32.mrf.mxu1 }
  0xe9   : > { %1556 = vst [vmem:[%s1867_s27 + $0x18] sm:$0xff] %v1412_v9   ;;  %1572 = vst [vmem:[%s1867_s27 + $0x98] sm:$0xff] %v1492_v10   ;;  %v1407_v15 = vpack.c.bf16 %v577_v11, %v574_v5  ;;  %v1487_v16 = vpack.c.bf16 %v705_v12, %v702_v6  ;;  %v598_v21 = vadd.f32 %v1633_v13, %v1854_v40 }
  0xea   : > { %v589_v17 = vpop.f32.mrf.mxu0  ;;  %v717_v18 = vpop.f32.mrf.mxu1  ;;  %v726_v22 = vadd.f32 %v1665_v14, %v1854_v40 }
  0xeb   : > { %1555 = vst [vmem:[%s1867_s27 + $0x10] sm:$0xff] %v1407_v15   ;;  %1571 = vst [vmem:[%s1867_s27 + $0x90] sm:$0xff] %v1487_v16   ;;  %v590_v25 = vadd.f32 %v1854_v40, %v589_v17  ;;  %v718_v26 = vadd.f32 %v1854_v40, %v717_v18 }
  0xec   : > { %v1634_v19 = vpop.f32.mrf.mxu0  ;;  %v1666_v20 = vpop.f32.mrf.mxu1 }
  0xed   : > { %v601_v23 = vadd.f32 %v1634_v19, %v1854_v40  ;;  %v729_v24 = vadd.f32 %v1666_v20, %v1854_v40 }
  0xee   : > { %v592_v27 = vpop.f32.mrf.mxu0  ;;  %v720_v28 = vpop.f32.mrf.mxu1 }
  0xef   : > { %v1422_v29 = vpack.c.bf16 %v601_v23, %v598_v21  ;;  %v1502_v30 = vpack.c.bf16 %v729_v24, %v726_v22  ;;  %v593_v31 = vadd.f32 %v1854_v40, %v592_v27  ;;  %v721_v32 = vadd.f32 %v1854_v40, %v720_v28 }
  0xf0   : > { %v1637_v33 = vpop.f32.mrf.mxu0  ;;  %v1669_v34 = vpop.f32.mrf.mxu1 }
  0xf1   : > { %1558 = vst [vmem:[%s1867_s27 + $0x28] sm:$0xff] %v1422_v29   ;;  %1574 = vst [vmem:[%s1867_s27 + $0xa8] sm:$0xff] %v1502_v30   ;;  %v1417_v35 = vpack.c.bf16 %v593_v31, %v590_v25  ;;  %v1497_v36 = vpack.c.bf16 %v721_v32, %v718_v26  ;;  %v614_v42 = vadd.f32 %v1637_v33, %v1854_v40 }
  0xf2   : > { %v605_v37 = vpop.f32.mrf.mxu0  ;;  %v733_v38 = vpop.f32.mrf.mxu1  ;;  %v742_v43 = vadd.f32 %v1669_v34, %v1854_v40 }
  0xf3   : > { %1557 = vst [vmem:[%s1867_s27 + $0x20] sm:$0xff] %v1417_v35   ;;  %1573 = vst [vmem:[%s1867_s27 + $0xa0] sm:$0xff] %v1497_v36   ;;  %v606_v46 = vadd.f32 %v1854_v40, %v605_v37  ;;  %v734_v47 = vadd.f32 %v1854_v40, %v733_v38 }
  0xf4   : > { %v1638_v39 = vpop.f32.mrf.mxu0  ;;  %v1670_v41 = vpop.f32.mrf.mxu1 }
  0xf5   : > { %v617_v44 = vadd.f32 %v1638_v39, %v1854_v40  ;;  %v745_v45 = vadd.f32 %v1670_v41, %v1854_v40 }
  0xf6   : > { %v608_v48 = vpop.f32.mrf.mxu0  ;;  %v736_v49 = vpop.f32.mrf.mxu1 }
  0xf7   : > { %v1432_v50 = vpack.c.bf16 %v617_v44, %v614_v42  ;;  %v1512_v51 = vpack.c.bf16 %v745_v45, %v742_v43  ;;  %v609_v52 = vadd.f32 %v1854_v40, %v608_v48  ;;  %v737_v53 = vadd.f32 %v1854_v40, %v736_v49 }
  0xf8   : > { %v1641_v54 = vpop.f32.mrf.mxu0  ;;  %v1673_v55 = vpop.f32.mrf.mxu1 }
  0xf9   : > { %1560 = vst [vmem:[%s1867_s27 + $0x38] sm:$0xff] %v1432_v50   ;;  %1576 = vst [vmem:[%s1867_s27 + $0xb8] sm:$0xff] %v1512_v51   ;;  %v1427_v56 = vpack.c.bf16 %v609_v52, %v606_v46  ;;  %v1507_v57 = vpack.c.bf16 %v737_v53, %v734_v47  ;;  %v630_v62 = vadd.f32 %v1641_v54, %v1854_v40 }
  0xfa   : > { %v621_v58 = vpop.f32.mrf.mxu0  ;;  %v749_v59 = vpop.f32.mrf.mxu1  ;;  %v758_v63 = vadd.f32 %v1673_v55, %v1854_v40 }
  0xfb   : > { %1559 = vst [vmem:[%s1867_s27 + $0x30] sm:$0xff] %v1427_v56   ;;  %1575 = vst [vmem:[%s1867_s27 + $0xb0] sm:$0xff] %v1507_v57   ;;  %v622_v2 = vadd.f32 %v1854_v40, %v621_v58  ;;  %v750_v3 = vadd.f32 %v1854_v40, %v749_v59 }
  0xfc   : > { %v1642_v60 = vpop.f32.mrf.mxu0  ;;  %v1674_v61 = vpop.f32.mrf.mxu1 }
  0xfd   : > { %v633_v0 = vadd.f32 %v1642_v60, %v1854_v40  ;;  %v761_v1 = vadd.f32 %v1674_v61, %v1854_v40 }
  0xfe   : > { %v624_v4 = vpop.f32.mrf.mxu0  ;;  %v752_v5 = vpop.f32.mrf.mxu1 }
  0xff   : > { %v1442_v6 = vpack.c.bf16 %v633_v0, %v630_v62  ;;  %v1522_v7 = vpack.c.bf16 %v761_v1, %v758_v63  ;;  %v625_v8 = vadd.f32 %v1854_v40, %v624_v4  ;;  %v753_v9 = vadd.f32 %v1854_v40, %v752_v5 }
 0x100   : > { %v1645_v10 = vpop.f32.mrf.mxu0  ;;  %v1677_v11 = vpop.f32.mrf.mxu1 }
 0x101   : > { %1562 = vst [vmem:[%s1867_s27 + $0x48] sm:$0xff] %v1442_v6   ;;  %1578 = vst [vmem:[%s1867_s27 + $0xc8] sm:$0xff] %v1522_v7   ;;  %v1437_v12 = vpack.c.bf16 %v625_v8, %v622_v2  ;;  %v1517_v13 = vpack.c.bf16 %v753_v9, %v750_v3  ;;  %v646_v18 = vadd.f32 %v1645_v10, %v1854_v40 }
 0x102   : > { %v637_v14 = vpop.f32.mrf.mxu0  ;;  %v765_v15 = vpop.f32.mrf.mxu1  ;;  %v774_v19 = vadd.f32 %v1677_v11, %v1854_v40 }
 0x103   : > { %1561 = vst [vmem:[%s1867_s27 + $0x40] sm:$0xff] %v1437_v12   ;;  %1577 = vst [vmem:[%s1867_s27 + $0xc0] sm:$0xff] %v1517_v13   ;;  %v638_v22 = vadd.f32 %v1854_v40, %v637_v14  ;;  %v766_v23 = vadd.f32 %v1854_v40, %v765_v15 }
 0x104   : > { %v1646_v16 = vpop.f32.mrf.mxu0  ;;  %v1678_v17 = vpop.f32.mrf.mxu1 }
 0x105   : > { %v649_v20 = vadd.f32 %v1646_v16, %v1854_v40  ;;  %v777_v21 = vadd.f32 %v1678_v17, %v1854_v40 }
 0x106   : > { %v640_v24 = vpop.f32.mrf.mxu0  ;;  %v768_v25 = vpop.f32.mrf.mxu1 }
 0x107   : > { %v1452_v26 = vpack.c.bf16 %v649_v20, %v646_v18  ;;  %v1532_v27 = vpack.c.bf16 %v777_v21, %v774_v19  ;;  %v641_v28 = vadd.f32 %v1854_v40, %v640_v24  ;;  %v769_v29 = vadd.f32 %v1854_v40, %v768_v25 }
 0x108   : > { %v1649_v30 = vpop.f32.mrf.mxu0  ;;  %v1681_v31 = vpop.f32.mrf.mxu1 }
 0x109   : > { %1564 = vst [vmem:[%s1867_s27 + $0x58] sm:$0xff] %v1452_v26   ;;  %1580 = vst [vmem:[%s1867_s27 + $0xd8] sm:$0xff] %v1532_v27   ;;  %v1447_v32 = vpack.c.bf16 %v641_v28, %v638_v22  ;;  %v1527_v33 = vpack.c.bf16 %v769_v29, %v766_v23  ;;  %v662_v38 = vadd.f32 %v1649_v30, %v1854_v40 }
 0x10a   : > { %v653_v34 = vpop.f32.mrf.mxu0  ;;  %v781_v35 = vpop.f32.mrf.mxu1  ;;  %v790_v39 = vadd.f32 %v1681_v31, %v1854_v40 }
 0x10b   : > { %1563 = vst [vmem:[%s1867_s27 + $0x50] sm:$0xff] %v1447_v32   ;;  %1579 = vst [vmem:[%s1867_s27 + $0xd0] sm:$0xff] %v1527_v33   ;;  %v654_v43 = vadd.f32 %v1854_v40, %v653_v34  ;;  %v782_v44 = vadd.f32 %v1854_v40, %v781_v35 }
 0x10c   : > { %v1650_v36 = vpop.f32.mrf.mxu0  ;;  %v1682_v37 = vpop.f32.mrf.mxu1 }
 0x10d   : > { %v665_v41 = vadd.f32 %v1650_v36, %v1854_v40  ;;  %v793_v42 = vadd.f32 %v1682_v37, %v1854_v40 }
 0x10e   : > { %v656_v45 = vpop.f32.mrf.mxu0  ;;  %v784_v46 = vpop.f32.mrf.mxu1 }
 0x10f   : > { %v1462_v47 = vpack.c.bf16 %v665_v41, %v662_v38  ;;  %v1542_v48 = vpack.c.bf16 %v793_v42, %v790_v39  ;;  %v657_v49 = vadd.f32 %v1854_v40, %v656_v45  ;;  %v785_v50 = vadd.f32 %v1854_v40, %v784_v46 }
 0x110   : > { %v1653_v51 = vpop.f32.mrf.mxu0  ;;  %v1685_v52 = vpop.f32.mrf.mxu1 }
 0x111   : > { %1566 = vst [vmem:[%s1867_s27 + $0x68] sm:$0xff] %v1462_v47   ;;  %1582 = vst [vmem:[%s1867_s27 + $0xe8] sm:$0xff] %v1542_v48   ;;  %v1457_v53 = vpack.c.bf16 %v657_v49, %v654_v43  ;;  %v1537_v54 = vpack.c.bf16 %v785_v50, %v782_v44  ;;  %v678_v59 = vadd.f32 %v1653_v51, %v1854_v40 }
 0x112   : > { %v669_v55 = vpop.f32.mrf.mxu0  ;;  %v797_v56 = vpop.f32.mrf.mxu1  ;;  %v806_v60 = vadd.f32 %v1685_v52, %v1854_v40 }
 0x113   : > { %1565 = vst [vmem:[%s1867_s27 + $0x60] sm:$0xff] %v1457_v53   ;;  %1581 = vst [vmem:[%s1867_s27 + $0xe0] sm:$0xff] %v1537_v54   ;;  %v670_v63 = vadd.f32 %v1854_v40, %v669_v55  ;;  %v798_v0 = vadd.f32 %v1854_v40, %v797_v56 }
 0x114   : > { %v1654_v57 = vpop.f32.mrf.mxu0  ;;  %v1686_v58 = vpop.f32.mrf.mxu1 }
 0x115   : > { %v681_v61 = vadd.f32 %v1654_v57, %v1854_v40  ;;  %v809_v62 = vadd.f32 %v1686_v58, %v1854_v40 }
 0x116   : > { %v672_v1 = vpop.f32.mrf.mxu0  ;;  %v800_v2 = vpop.f32.mrf.mxu1 }
 0x117   : > { %v1472_v3 = vpack.c.bf16 %v681_v61, %v678_v59  ;;  %v1552_v4 = vpack.c.bf16 %v809_v62, %v806_v60  ;;  %v673_v5 = vadd.f32 %v1854_v40, %v672_v1  ;;  %v801_v6 = vadd.f32 %v1854_v40, %v800_v2 }
 0x119   : > { %1568 = vst [vmem:[%s1867_s27 + $0x78] sm:$0xff] %v1472_v3   ;;  %1584 = vst [vmem:[%s1867_s27 + $0xf8] sm:$0xff] %v1552_v4   ;;  %v1467_v7 = vpack.c.bf16 %v673_v5, %v670_v63  ;;  %v1547_v8 = vpack.c.bf16 %v801_v6, %v798_v0 }
 0x11b   : > { %1567 = vst [vmem:[%s1867_s27 + $0x70] sm:$0xff] %v1467_v7   ;;  %1583 = vst [vmem:[%s1867_s27 + $0xf0] sm:$0xff] %v1547_v8  }
 0x11c PF: > { %s13_s12 = sadd.s32 1, %s1740_s12  }
 0x11d   : > { %p10_p4 = scmp.ge.s32.totalorder %s13_s12, 6  }
 0x11f   :  { %12 = sbr.rel (!%p10_p4) target bundleno = 1 (0x1), region = 62 }

// kernel: seafar_forward.12
= control target key start
LH: loop header
LB: loop body
LE: loop exit
PB: predicated region body
PF: predicated region fallthrough
CT: control target
= control target key end

     0   :  { %s2792_s12 = smov 0   ;;  %s3440_s0 = inlined_call_operand.vmem [shape: bf16[1856,288], index: 0, kind: input, shape index: {}]   ;;  %s3441_s1 = inlined_call_operand.vmem [shape: bf16[288,128], index: 1, kind: input, shape index: {}]   ;;  %s3442_s2 = inlined_call_operand.vmem [shape: f32[8,128], index: 2, kind: input, shape index: {}]   ;;  %s3443_s3 = inlined_call_operand.vmem [shape: bf16[1856,128], index: 3, kind: output, shape index: {}]  }
   0x1 LB: > { %s2026_s13 = sadd.s32 4294967295, %s2767_s12   ;;  %p2030_p0 = scmp.ge.s32.totalorder %s2767_s12, 1  ;;  %s2767_s12 = sphi %s2792_s12, %s13_s12  }
   0x2   : > { %p139_p1 = scmp.lt.s32.totalorder %s2767_s12, 5 }
   0x4   : > { %p140_p2 = pnand %p2030_p0, %p139_p1 }
   0x5   : > { %s164_s18 = smul.u32 (!%p140_p2), 58, %s2026_s13 }
   0x6   : > { %143 = sbr.rel (%p140_p2) target bundleno = 510 (0x1fe), region = 32 }
   0x7   : > { %p165_p3 = scmp.lt.s32.totalorder (!%p140_p2), %s164_s18, 231 }
   0xb   : > { %v2624_v0 = vld [vmem:[%s3441_s1 + $0x38] sm:$0xff]   ;;  %v2769_v1 = vmov 0   ;;  %v2625_v2 = vld [vmem:[%s3441_s1 + $0x30] sm:$0xff]   ;;  %v2770_v3 = vmov 0.0   ;;  %vm2771_vm0 = vmmov 0   ;;  %v2626_v4 = vld [vmem:[%s3441_s1 + $0x28] sm:$0xff]  }
   0xc   : > { %966 = vmatprep.subr.bf16.mxu0 %v2769_v1  ;;  %2492 = vmatprep.subr.bf16.mxu1 %v2770_v3  ;;  %s3445_s18 = smov (!%p165_p3, %s164_s18), 231  ;;  %v2627_v5 = vld [vmem:[%s3441_s1 + $0x20] sm:$0xff]   ;;  %v2628_v6 = vld [vmem:[%s3441_s1 + $0x18] sm:$0xff]   ;;  %v2638_v7 = vld [vmem:[%s3441_s1 + $0x88] sm:$0xff]   ;;  %vm878_vm1 = vcmask 261120  }
   0xd   : > { %967 = vmatpush1.bf16.msra.mxu0 %v2624_v0  ;;  %2496 = vmatprep.mubr.msk.bf16.mxu1 %vm2771_vm0, %v2770_v3  ;;  %s2612_s23 = smul.u32 12, %s3445_s18  ;;  %v2640_v8 = vld [vmem:[%s3441_s1 + $0x80] sm:$0xff]   ;;  %v2629_v9 = vld [vmem:[%s3441_s1 + $0x10] sm:$0xff]   ;;  %v2630_v12 = vld [vmem:[%s3441_s1 + $0x8] sm:$0xff]   ;;  %s2032_s10 = sshll.u32 %s3445_s18, 2 }
   0xe   : > { %968 = vmatprep.subr.bf16.mxu0 %v2769_v1  ;;  %2493 = vmatpush3.bf16.msra.mxu1 %v2638_v7  ;;  %v2631_v13 = vld [vmem:[%s3441_s1] sm:$0xff]   ;;  %v2632_v15 = vld [vmem:[%s3441_s1 + $0x78] sm:$0xff]   ;;  %v2633_v16 = vld [vmem:[%s3441_s1 + $0x70] sm:$0xff]   ;;  %s3106_s14 = scalar_lea.vmem %s3443_s3, %s2032_s10 }
   0xf   : > { %s2835_s5 = scalar_lea.vmem %s3440_s0, %s2612_s23  ;;  %2494 = vmatprep.subr.bf16.mxu1 %v2770_v3  ;;  %v2634_v18 = vld [vmem:[%s3441_s1 + $0x68] sm:$0xff]   ;;  %v2635_v19 = vld [vmem:[%s3441_s1 + $0x60] sm:$0xff]   ;;  %v2636_v21 = vld [vmem:[%s3441_s1 + $0x58] sm:$0xff]  }
  0x10   : > { %v2641_v10 = vld [vmem:[%s2835_s5 + $0x8] ss:$12 sps:$4 sm:$0xff]   ;;  %v2645_v11 = vld [vmem:[%s2835_s5 + $0x4] ss:$12 sps:$4 sm:$0xff]   ;;  %v2646_v14 = vld [vmem:[%s2835_s5 + $0x20] ss:$12 sps:$4 sm:$0xff]  }
  0x11   : > { %969 = vmatpush1.bf16.msra.mxu0 %v2625_v2  ;;  %998 = vmatprep.mubr.bf16.mxu0 %v2645_v11  ;;  %v2650_v17 = vld [vmem:[%s2835_s5 + $0x38] ss:$12 sps:$4 sm:$0xff]   ;;  %v2654_v20 = vld [vmem:[%s2835_s5 + $0x50] ss:$12 sps:$4 sm:$0xff]   ;;  %v2658_v23 = vld [vmem:[%s2835_s5 + $0x68] ss:$12 sps:$4 sm:$0xff]  }
  0x12   : > { %970 = vmatprep.subr.bf16.mxu0 %v2769_v1  ;;  %2495 = vmatpush3.bf16.msra.mxu1 %v2640_v8  ;;  %v2637_v22 = vld [vmem:[%s3441_s1 + $0x50] sm:$0xff]   ;;  %v2639_v24 = vld [vmem:[%s3441_s1 + $0x48] sm:$0xff]   ;;  %v2642_v25 = vld [vmem:[%s3441_s1 + $0x40] sm:$0xff]  }
  0x13   : > { %v2662_v26 = vld [vmem:[%s2835_s5 + $0x80] ss:$12 sps:$4 sm:$0xff]   ;;  %v2647_v28 = vld [vmem:[%s2835_s5 + $0x1c] ss:$12 sps:$4 sm:$0xff]   ;;  %v2666_v29 = vld [vmem:[%s2835_s5 + $0x98] ss:$12 sps:$4 sm:$0xff]  }
  0x14   : > { %v2643_v27 = vld [vmem:[%s2835_s5] ss:$12 sps:$4 sm:$0xff]   ;;  %v2649_v30 = vld [vmem:[%s2835_s5 + $0x18] ss:$12 sps:$4 sm:$0xff]   ;;  %v2670_v32 = vld [vmem:[%s2835_s5 + $0xb0] ss:$12 sps:$4 sm:$0xff]  }
  0x15   : > { %971 = vmatpush1.bf16.msra.mxu0 %v2626_v4  ;;  %2497 = vmatmul.mubr.msk.bf16.vlgmr.msra.gmra.mxu1 %vm878_vm1, %v2641_v10  ;;  %v2651_v31 = vld [vmem:[%s2835_s5 + $0x34] ss:$12 sps:$4 sm:$0xff]   ;;  %v2653_v33 = vld [vmem:[%s2835_s5 + $0x30] ss:$12 sps:$4 sm:$0xff]   ;;  %v2655_v34 = vld [vmem:[%s2835_s5 + $0x4c] ss:$12 sps:$4 sm:$0xff]  }
  0x16   : > { %972 = vmatprep.subr.bf16.mxu0 %v2769_v1  ;;  %2500 = vmatprep.mubr.msk.bf16.mxu1 %vm2771_vm0, %v2770_v3  ;;  %v2674_v35 = vld [vmem:[%s2835_s5 + $0xc8] ss:$12 sps:$4 sm:$0xff]   ;;  %v2659_v37 = vld [vmem:[%s2835_s5 + $0x64] ss:$12 sps:$4 sm:$0xff]   ;;  %v2678_v38 = vld [vmem:[%s2835_s5 + $0xe0] ss:$12 sps:$4 sm:$0xff]  }
  0x17   : > { %v2657_v36 = vld [vmem:[%s2835_s5 + $0x48] ss:$12 sps:$4 sm:$0xff]   ;;  %v2661_v39 = vld [vmem:[%s2835_s5 + $0x60] ss:$12 sps:$4 sm:$0xff]   ;;  %v2682_v41 = vld [vmem:[%s2835_s5 + $0xf8] ss:$12 sps:$4 sm:$0xff]  }
  0x18   : > { %v2663_v40 = vld [vmem:[%s2835_s5 + $0x7c] ss:$12 sps:$4 sm:$0xff]   ;;  %v2665_v42 = vld [vmem:[%s2835_s5 + $0x78] ss:$12 sps:$4 sm:$0xff]   ;;  %v2667_v43 = vld [vmem:[%s2835_s5 + $0x94] ss:$12 sps:$4 sm:$0xff]  }
  0x19   : > { %973 = vmatpush1.bf16.msra.mxu0 %v2627_v5  ;;  %v2686_v44 = vld [vmem:[%s2835_s5 + $0x110] ss:$12 sps:$4 sm:$0xff]   ;;  %v2671_v46 = vld [vmem:[%s2835_s5 + $0xac] ss:$12 sps:$4 sm:$0xff]   ;;  %v2690_v47 = vld [vmem:[%s2835_s5 + $0x128] ss:$12 sps:$4 sm:$0xff]  }
  0x1a   : > { %974 = vmatprep.subr.bf16.mxu0 %v2769_v1  ;;  %v2669_v45 = vld [vmem:[%s2835_s5 + $0x90] ss:$12 sps:$4 sm:$0xff]   ;;  %v2673_v48 = vld [vmem:[%s2835_s5 + $0xa8] ss:$12 sps:$4 sm:$0xff]   ;;  %v2694_v50 = vld [vmem:[%s2835_s5 + $0x140] ss:$12 sps:$4 sm:$0xff]  }
  0x1b   : > { %v2675_v49 = vld [vmem:[%s2835_s5 + $0xc4] ss:$12 sps:$4 sm:$0xff]   ;;  %v2677_v51 = vld [vmem:[%s2835_s5 + $0xc0] ss:$12 sps:$4 sm:$0xff]   ;;  %v2679_v52 = vld [vmem:[%s2835_s5 + $0xdc] ss:$12 sps:$4 sm:$0xff]  }
  0x1c   : > { %v2698_v53 = vld [vmem:[%s2835_s5 + $0x158] ss:$12 sps:$4 sm:$0xff]   ;;  %v2683_v55 = vld [vmem:[%s2835_s5 + $0xf4] ss:$12 sps:$4 sm:$0xff]   ;;  %v2702_v56 = vld [vmem:[%s2835_s5 + $0x170] ss:$12 sps:$4 sm:$0xff]  }
  0x1d   : > { %975 = vmatpush1.bf16.msra.mxu0 %v2628_v6  ;;  %2501 = vmatmul.mubr.msk.bf16.gmra.mxu1 %vm878_vm1, %v2646_v14  ;;  %v2681_v54 = vld [vmem:[%s2835_s5 + $0xd8] ss:$12 sps:$4 sm:$0xff]   ;;  %v2685_v57 = vld [vmem:[%s2835_s5 + $0xf0] ss:$12 sps:$4 sm:$0xff]   ;;  %v2706_v59 = vld [vmem:[%s2835_s5 + $0x188] ss:$12 sps:$4 sm:$0xff]  }
  0x1e   : > { %976 = vmatprep.subr.bf16.mxu0 %v2769_v1  ;;  %2504 = vmatprep.mubr.msk.bf16.mxu1 %vm2771_vm0, %v2770_v3  ;;  %v2687_v58 = vld [vmem:[%s2835_s5 + $0x10c] ss:$12 sps:$4 sm:$0xff]   ;;  %v2689_v60 = vld [vmem:[%s2835_s5 + $0x108] ss:$12 sps:$4 sm:$0xff]   ;;  %v2691_v61 = vld [vmem:[%s2835_s5 + $0x124] ss:$12 sps:$4 sm:$0xff]  }
  0x1f   : > { %v2710_v62 = vld [vmem:[%s2835_s5 + $0x1a0] ss:$12 sps:$4 sm:$0xff]   ;;  %v2695_v0 = vld [vmem:[%s2835_s5 + $0x13c] ss:$12 sps:$4 sm:$0xff]   ;;  %v2697_v2 = vld [vmem:[%s2835_s5 + $0x138] ss:$12 sps:$4 sm:$0xff]  }
  0x20   : > { %v2693_v63 = vld [vmem:[%s2835_s5 + $0x120] ss:$12 sps:$4 sm:$0xff]   ;;  %v2718_v5 = vld [vmem:[%s2835_s5 + $0x1d0] ss:$12 sps:$4 sm:$0xff]   ;;  %v2722_v8 = vld [vmem:[%s2835_s5 + $0x1e8] ss:$12 sps:$4 sm:$0xff]  }
  0x21   : > { %977 = vmatpush1.bf16.msra.mxu0 %v2629_v9  ;;  %v2699_v4 = vld [vmem:[%s2835_s5 + $0x154] ss:$12 sps:$4 sm:$0xff]   ;;  %v2701_v6 = vld [vmem:[%s2835_s5 + $0x150] ss:$12 sps:$4 sm:$0xff]   ;;  %v2703_v7 = vld [vmem:[%s2835_s5 + $0x16c] ss:$12 sps:$4 sm:$0xff]  }
  0x22   : > { %978 = vmatprep.subr.bf16.mxu0 %v2769_v1  ;;  %v2705_v9 = vld [vmem:[%s2835_s5 + $0x168] ss:$12 sps:$4 sm:$0xff]   ;;  %v2707_v10 = vld [vmem:[%s2835_s5 + $0x184] ss:$12 sps:$4 sm:$0xff]   ;;  %v2726_v11 = vld [vmem:[%s2835_s5 + $0x200] ss:$12 sps:$4 sm:$0xff]  }
  0x23   : > { %v2730_v14 = vld [vmem:[%s2835_s5 + $0x218] ss:$12 sps:$4 sm:$0xff]  }
  0x25   : > { %979 = vmatpush1.bf16.msra.mxu0 %v2630_v12  ;;  %2505 = vmatmul.mubr.msk.bf16.gmra.mxu1 %vm878_vm1, %v2650_v17  ;;  %v2709_v12 = vld [vmem:[%s2835_s5 + $0x180] ss:$12 sps:$4 sm:$0xff]   ;;  %v2734_v17 = vld [vmem:[%s2835_s5 + $0x230] ss:$12 sps:$4 sm:$0xff]  }
  0x26   : > { %980 = vmatprep.subr.bf16.mxu0 %v2769_v1  ;;  %2508 = vmatprep.mubr.msk.bf16.mxu1 %vm2771_vm0, %v2770_v3 }
  0x29   : > { %981 = vmatpush1.bf16.msra.mxu0 %v2631_v13  ;;  %v2711_v13 = vld [vmem:[%s2835_s5 + $0x19c] ss:$12 sps:$4 sm:$0xff]  }
  0x2a   : > { %982 = vmatprep.subr.bf16.mxu0 %v2769_v1 }
  0x2d   : > { %983 = vmatpush2.bf16.msra.mxu0 %v2632_v15  ;;  %2509 = vmatmul.mubr.msk.bf16.gmra.mxu1 %vm878_vm1, %v2654_v20  ;;  %v2713_v15 = vld [vmem:[%s2835_s5 + $0x198] ss:$12 sps:$4 sm:$0xff]   ;;  %v2738_v20 = vld [vmem:[%s2835_s5 + $0x248] ss:$12 sps:$4 sm:$0xff]  }
  0x2e   : > { %984 = vmatprep.subr.bf16.mxu0 %v2769_v1  ;;  %2512 = vmatprep.mubr.msk.bf16.mxu1 %vm2771_vm0, %v2770_v3 }
  0x31   : > { %985 = vmatpush2.bf16.msra.mxu0 %v2633_v16  ;;  %v2715_v16 = vld [vmem:[%s2835_s5 + $0x1b4] ss:$12 sps:$4 sm:$0xff]  }
  0x32   : > { %986 = vmatprep.subr.bf16.mxu0 %v2769_v1 }
  0x35   : > { %987 = vmatpush2.bf16.msra.mxu0 %v2634_v18  ;;  %2513 = vmatmul.mubr.msk.bf16.gmra.mxu1 %vm878_vm1, %v2658_v23  ;;  %v2717_v18 = vld [vmem:[%s2835_s5 + $0x1b0] ss:$12 sps:$4 sm:$0xff]  }
  0x36   : > { %988 = vmatprep.subr.bf16.mxu0 %v2769_v1  ;;  %2516 = vmatprep.mubr.msk.bf16.mxu1 %vm2771_vm0, %v2770_v3 }
  0x39   : > { %989 = vmatpush2.bf16.msra.mxu0 %v2635_v19  ;;  %v2719_v19 = vld [vmem:[%s2835_s5 + $0x1cc] ss:$12 sps:$4 sm:$0xff]  }
  0x3a   : > { %990 = vmatprep.subr.bf16.mxu0 %v2769_v1 }
  0x3d   : > { %991 = vmatpush2.bf16.msra.mxu0 %v2636_v21  ;;  %2517 = vmatmul.mubr.msk.bf16.gmra.mxu1 %vm878_vm1, %v2662_v26  ;;  %v2721_v21 = vld [vmem:[%s2835_s5 + $0x1c8] ss:$12 sps:$4 sm:$0xff]   ;;  %v2742_v26 = vld [vmem:[%s2835_s5 + $0x260] ss:$12 sps:$4 sm:$0xff]  }
  0x3e   : > { %992 = vmatprep.subr.bf16.mxu0 %v2769_v1  ;;  %2520 = vmatprep.mubr.msk.bf16.mxu1 %vm2771_vm0, %v2770_v3 }
  0x41   : > { %993 = vmatpush2.bf16.msra.mxu0 %v2637_v22  ;;  %v2723_v22 = vld [vmem:[%s2835_s5 + $0x1e4] ss:$12 sps:$4 sm:$0xff]  }
  0x42   : > { %994 = vmatprep.subr.bf16.mxu0 %v2769_v1 }
  0x45   : > { %995 = vmatpush2.bf16.msra.mxu0 %v2639_v24  ;;  %2521 = vmatmul.mubr.msk.bf16.gmra.mxu1 %vm878_vm1, %v2666_v29  ;;  %v2727_v29 = vld [vmem:[%s2835_s5 + $0x1fc] ss:$12 sps:$4 sm:$0xff]  }
  0x46   : > { %996 = vmatprep.subr.bf16.mxu0 %v2769_v1  ;;  %2524 = vmatprep.mubr.msk.bf16.mxu1 %vm2771_vm0, %v2770_v3  ;;  %v2714_v1 = vld [vmem:[%s2835_s5 + $0x1b8] ss:$12 sps:$4 sm:$0xff]  }
  0x49   : > { %997 = vmatpush2.bf16.msra.mxu0 %v2642_v25 }
  0x4c   : > { %999 = vmatmul.mubr.bf16.vlgmr.msra.gmra.mxu0 %v2643_v27  ;;  %v2725_v27 = vld [vmem:[%s2835_s5 + $0x1e0] ss:$12 sps:$4 sm:$0xff]  }
  0x4d   : > { %1006 = vmatprep.mubr.bf16.mxu0 %v2647_v28  ;;  %2525 = vmatmul.mubr.msk.bf16.gmra.mxu1 %vm878_vm1, %v2670_v32 }
  0x4e   : > { %2528 = vmatprep.mubr.msk.bf16.mxu1 %vm2771_vm0, %v2770_v3 }
  0x54   : > { %1007 = vmatmul.mubr.bf16.gmra.mxu0 %v2649_v30 }
  0x55   : > { %1014 = vmatprep.mubr.bf16.mxu0 %v2651_v31  ;;  %2529 = vmatmul.mubr.msk.bf16.gmra.mxu1 %vm878_vm1, %v2674_v35 }
  0x56   : > { %2532 = vmatprep.mubr.msk.bf16.mxu1 %vm2771_vm0, %v2770_v3 }
  0x5c   : > { %1015 = vmatmul.mubr.bf16.gmra.mxu0 %v2653_v33  ;;  %v2746_v33 = vld [vmem:[%s2835_s5 + $0x278] ss:$12 sps:$4 sm:$0xff]  }
  0x5d   : > { %1022 = vmatprep.mubr.bf16.mxu0 %v2655_v34  ;;  %2533 = vmatmul.mubr.msk.bf16.gmra.mxu1 %vm878_vm1, %v2678_v38  ;;  %v2729_v34 = vld [vmem:[%s2835_s5 + $0x1f8] ss:$12 sps:$4 sm:$0xff]  }
  0x5e   : > { %2536 = vmatprep.mubr.msk.bf16.mxu1 %vm2771_vm0, %v2770_v3 }
  0x64   : > { %1023 = vmatmul.mubr.bf16.gmra.mxu0 %v2657_v36  ;;  %v2731_v36 = vld [vmem:[%s2835_s5 + $0x214] ss:$12 sps:$4 sm:$0xff]  }
  0x65   : > { %1030 = vmatprep.mubr.bf16.mxu0 %v2659_v37  ;;  %2537 = vmatmul.mubr.msk.bf16.gmra.mxu1 %vm878_vm1, %v2682_v41  ;;  %v2733_v41 = vld [vmem:[%s2835_s5 + $0x210] ss:$12 sps:$4 sm:$0xff]  }
  0x66   : > { %2540 = vmatprep.mubr.msk.bf16.mxu1 %vm2771_vm0, %v2770_v3 }
  0x6c   : > { %1031 = vmatmul.mubr.bf16.gmra.mxu0 %v2661_v39 }
  0x6d   : > { %1038 = vmatprep.mubr.bf16.mxu0 %v2663_v40  ;;  %2541 = vmatmul.mubr.msk.bf16.gmra.mxu1 %vm878_vm1, %v2686_v44  ;;  %v2750_v40 = vld [vmem:[%s2835_s5 + $0x290] ss:$12 sps:$4 sm:$0xff]  }
  0x6e   : > { %2544 = vmatprep.mubr.msk.bf16.mxu1 %vm2771_vm0, %v2770_v3 }
  0x74   : > { %1039 = vmatmul.mubr.bf16.gmra.mxu0 %v2665_v42 }
  0x75   : > { %1046 = vmatprep.mubr.bf16.mxu0 %v2667_v43  ;;  %2545 = vmatmul.mubr.msk.bf16.gmra.mxu1 %vm878_vm1, %v2690_v47  ;;  %v2735_v43 = vld [vmem:[%s2835_s5 + $0x22c] ss:$12 sps:$4 sm:$0xff]   ;;  %v2754_v47 = vld [vmem:[%s2835_s5 + $0x2a8] ss:$12 sps:$4 sm:$0xff]  }
  0x76   : > { %2548 = vmatprep.mubr.msk.bf16.mxu1 %vm2771_vm0, %v2770_v3 }
  0x7c   : > { %1047 = vmatmul.mubr.bf16.gmra.mxu0 %v2669_v45 }
  0x7d   : > { %1054 = vmatprep.mubr.bf16.mxu0 %v2671_v46  ;;  %2549 = vmatmul.mubr.msk.bf16.gmra.mxu1 %vm878_vm1, %v2694_v50  ;;  %v2739_v50 = vld [vmem:[%s2835_s5 + $0x244] ss:$12 sps:$4 sm:$0xff]  }
  0x7e   : > { %2552 = vmatprep.mubr.msk.bf16.mxu1 %vm2771_vm0, %v2770_v3 }
  0x84   : > { %1055 = vmatmul.mubr.bf16.gmra.mxu0 %v2673_v48  ;;  %v2737_v48 = vld [vmem:[%s2835_s5 + $0x228] ss:$12 sps:$4 sm:$0xff]  }
  0x85   : > { %1062 = vmatprep.mubr.bf16.mxu0 %v2675_v49  ;;  %2553 = vmatmul.mubr.msk.bf16.gmra.mxu1 %vm878_vm1, %v2698_v53 }
  0x86   : > { %2556 = vmatprep.mubr.msk.bf16.mxu1 %vm2771_vm0, %v2770_v3 }
  0x8c   : > { %1063 = vmatmul.mubr.bf16.gmra.mxu0 %v2677_v51 }
  0x8d   : > { %1070 = vmatprep.mubr.bf16.mxu0 %v2679_v52  ;;  %2557 = vmatmul.mubr.msk.bf16.gmra.mxu1 %vm878_vm1, %v2702_v56  ;;  %v3068_v56 = vld [vmem:[%s3442_s2] ss:$0 sm:$0xff] }
  0x8e   : > { %2560 = vmatprep.mubr.msk.bf16.mxu1 %vm2771_vm0, %v2770_v3 }
  0x94   : > { %1071 = vmatmul.mubr.bf16.gmra.mxu0 %v2681_v54 }
  0x95   : > { %1078 = vmatprep.mubr.bf16.mxu0 %v2683_v55  ;;  %2561 = vmatmul.mubr.msk.bf16.gmra.mxu1 %vm878_vm1, %v2706_v59  ;;  %v2743_v55 = vld [vmem:[%s2835_s5 + $0x25c] ss:$12 sps:$4 sm:$0xff]  }
  0x96   : > { %2564 = vmatprep.mubr.msk.bf16.mxu1 %vm2771_vm0, %v2770_v3 }
  0x9c   : > { %1079 = vmatmul.mubr.bf16.gmra.mxu0 %v2685_v57 }
  0x9d   : > { %1086 = vmatprep.mubr.bf16.mxu0 %v2687_v58  ;;  %2565 = vmatmul.mubr.msk.bf16.gmra.mxu1 %vm878_vm1, %v2710_v62 }
  0x9e   : > { %2568 = vmatprep.mubr.msk.bf16.mxu1 %vm2771_vm0, %v2770_v3 }
  0xa4   : > { %1087 = vmatmul.mubr.bf16.gmra.mxu0 %v2689_v60 }
  0xa5   : > { %1094 = vmatprep.mubr.bf16.mxu0 %v2691_v61  ;;  %2569 = vmatmul.mubr.msk.bf16.gmra.mxu1 %vm878_vm1, %v2714_v1  ;;  %v2745_v1 = vld [vmem:[%s2835_s5 + $0x258] ss:$12 sps:$4 sm:$0xff]  }
  0xa6   : > { %2572 = vmatprep.mubr.msk.bf16.mxu1 %vm2771_vm0, %v2770_v3 }
  0xac   : > { %1095 = vmatmul.mubr.bf16.gmra.mxu0 %v2693_v63 }
  0xad   : > { %1102 = vmatprep.mubr.bf16.mxu0 %v2695_v0  ;;  %2573 = vmatmul.mubr.msk.bf16.gmra.mxu1 %vm878_vm1, %v2718_v5 }
  0xae   : > { %2576 = vmatprep.mubr.msk.bf16.mxu1 %vm2771_vm0, %v2770_v3 }
  0xb4   : > { %1103 = vmatmul.mubr.bf16.gmra.mxu0 %v2697_v2 }
  0xb5   : > { %1110 = vmatprep.mubr.bf16.mxu0 %v2699_v4  ;;  %2577 = vmatmul.mubr.msk.bf16.gmra.mxu1 %vm878_vm1, %v2722_v8 }
  0xb6   : > { %2580 = vmatprep.mubr.msk.bf16.mxu1 %vm2771_vm0, %v2770_v3 }
  0xbc   : > { %1111 = vmatmul.mubr.bf16.gmra.mxu0 %v2701_v6  ;;  %v2747_v6 = vld [vmem:[%s2835_s5 + $0x274] ss:$12 sps:$4 sm:$0xff]  }
  0xbd   : > { %1118 = vmatprep.mubr.bf16.mxu0 %v2703_v7  ;;  %2581 = vmatmul.mubr.msk.bf16.gmra.mxu1 %vm878_vm1, %v2726_v11  ;;  %v3081_v7 = vld [vmem:[%s3442_s2 + $0x1] ss:$0 sm:$0xff] }
  0xbe   : > { %2584 = vmatprep.mubr.msk.bf16.mxu1 %vm2771_vm0, %v2770_v3 }
  0xc4   : > { %1119 = vmatmul.mubr.bf16.gmra.mxu0 %v2705_v9 }
  0xc5   : > { %1126 = vmatprep.mubr.bf16.mxu0 %v2707_v10  ;;  %2585 = vmatmul.mubr.msk.bf16.gmra.mxu1 %vm878_vm1, %v2730_v14 }
  0xc6   : > { %2588 = vmatprep.mubr.msk.bf16.mxu1 %vm2771_vm0, %v2770_v3 }
  0xcc   : > { %1127 = vmatmul.mubr.bf16.gmra.mxu0 %v2709_v12 }
  0xcd   : > { %1134 = vmatprep.mubr.bf16.mxu0 %v2711_v13  ;;  %2589 = vmatmul.mubr.msk.bf16.gmra.mxu1 %vm878_vm1, %v2734_v17 }
  0xce   : > { %2592 = vmatprep.mubr.msk.bf16.mxu1 %vm2771_vm0, %v2770_v3 }
  0xd4   : > { %1135 = vmatmul.mubr.bf16.gmra.mxu0 %v2713_v15 }
  0xd5   : > { %1142 = vmatprep.mubr.bf16.mxu0 %v2715_v16  ;;  %v1265_v23 = vpop.f32.mrf.mxu1  ;;  %2593 = vmatmul.mubr.msk.bf16.gmra.mxu1 %vm878_vm1, %v2738_v20  ;;  %v3091_v16 = vld [vmem:[%s3442_s2 + $0x2] ss:$0 sm:$0xff] }
  0xd6   : > { %2596 = vmatprep.mubr.msk.bf16.mxu1 %vm2771_vm0, %v2770_v3 }
  0xd7   : > { %v2498_v24 = vpop.f32.mrf.mxu1 }
  0xd9   : > { %v3023_v25 = vpop.f32.mrf.mxu1 }
  0xdb   : > { %v2499_v28 = vpop.f32.mrf.mxu1 }
  0xdc   : > { %1143 = vmatmul.mubr.bf16.gmra.mxu0 %v2717_v18  ;;  %v2751_v28 = vld [vmem:[%s2835_s5 + $0x28c] ss:$12 sps:$4 sm:$0xff]  }
  0xdd   : > { %1150 = vmatprep.mubr.bf16.mxu0 %v2719_v19  ;;  %v3028_v30 = vpop.f32.mrf.mxu1  ;;  %2597 = vmatmul.mubr.msk.bf16.gmra.mxu1 %vm878_vm1, %v2742_v26 }
  0xde   : > { %2600 = vmatprep.mubr.msk.bf16.mxu1 %vm2771_vm0, %v2770_v3 }
  0xdf   : > { %v2502_v31 = vpop.f32.mrf.mxu1 }
  0xe1   : > { %v3033_v32 = vpop.f32.mrf.mxu1 }
  0xe3   : > { %v2503_v35 = vpop.f32.mrf.mxu1 }
  0xe4   : > { %1151 = vmatmul.mubr.bf16.gmra.mxu0 %v2721_v21 }
  0xe5   : > { %1158 = vmatprep.mubr.bf16.mxu0 %v2723_v22  ;;  %v3038_v37 = vpop.f32.mrf.mxu1  ;;  %2601 = vmatmul.mubr.msk.bf16.gmra.mxu1 %vm878_vm1, %v2746_v33  ;;  %v2749_v22 = vld [vmem:[%s2835_s5 + $0x270] ss:$12 sps:$4 sm:$0xff]  }
  0xe6   : > { %2604 = vmatprep.mubr.msk.bf16.mxu1 %vm2771_vm0, %v2770_v3 }
  0xe7   : > { %v2506_v38 = vpop.f32.mrf.mxu1 }
  0xe9   : > { %v3043_v39 = vpop.f32.mrf.mxu1 }
  0xeb   : > { %v2507_v42 = vpop.f32.mrf.mxu1 }
  0xec   : > { %1159 = vmatmul.mubr.bf16.gmra.mxu0 %v2725_v27 }
  0xed   : > { %1166 = vmatprep.mubr.bf16.mxu0 %v2727_v29  ;;  %v3048_v44 = vpop.f32.mrf.mxu1  ;;  %2605 = vmatmul.mubr.msk.bf16.gmra.mxu1 %vm878_vm1, %v2750_v40 }
  0xee   : > { %2608 = vmatprep.mubr.msk.bf16.mxu1 %vm2771_vm0, %v2770_v3  ;;  %v2741_v3 = vld [vmem:[%s2835_s5 + $0x240] ss:$12 sps:$4 sm:$0xff]  }
  0xef   : > { %v2510_v45 = vpop.f32.mrf.mxu1 }
  0xf1   : > { %v3053_v46 = vpop.f32.mrf.mxu1 }
  0xf3   : > { %v2511_v49 = vpop.f32.mrf.mxu1 }
  0xf4   : > { %1167 = vmatmul.mubr.bf16.gmra.mxu0 %v2729_v34 }
  0xf5   : > { %1174 = vmatprep.mubr.bf16.mxu0 %v2731_v36  ;;  %v3058_v51 = vpop.f32.mrf.mxu1  ;;  %2609 = vmatmul.mubr.msk.bf16.gmra.mxu1 %vm878_vm1, %v2754_v47  ;;  %v2753_v47 = vld [vmem:[%s2835_s5 + $0x288] ss:$12 sps:$4 sm:$0xff]  }
  0xf7   : > { %v2514_v52 = vpop.f32.mrf.mxu1 }
  0xf9   : > { %v3061_v53 = vpop.f32.mrf.mxu1 }
  0xfb   : > { %v2515_v54 = vpop.f32.mrf.mxu1 }
  0xfc   : > { %1175 = vmatmul.mubr.bf16.gmra.mxu0 %v2733_v41  ;;  %v2757_v54 = vld [vmem:[%s2835_s5 + $0x2a4] ss:$12 sps:$4 sm:$0xff]  }
  0xfd   : > { %1182 = vmatprep.mubr.bf16.mxu0 %v2735_v43  ;;  %v3070_v57 = vpop.f32.mrf.mxu1 }
  0xff   : > { %v2518_v59 = vpop.f32.mrf.mxu1 }
 0x101   : > { %v3073_v62 = vpop.f32.mrf.mxu1 }
 0x103   : > { %v2519_v2 = vpop.f32.mrf.mxu1 }
 0x104   : > { %1183 = vmatmul.mubr.bf16.gmra.mxu0 %v2737_v48 }
 0x105   : > { %1190 = vmatprep.mubr.bf16.mxu0 %v2739_v50  ;;  %v3083_v9 = vpop.f32.mrf.mxu1 }
 0x107   : > { %v2522_v12 = vpop.f32.mrf.mxu1 }
 0x109   : > { %v3093_v18 = vpop.f32.mrf.mxu1 }
 0x10c   : > { %v1000_v58 = vpop.f32.mrf.mxu0  ;;  %1191 = vmatmul.mubr.bf16.gmra.mxu0 %v2741_v3 }
 0x10d   : > { %v1001_v60 = vadd.f32 %v3068_v56, %v1000_v58  ;;  %1198 = vmatprep.mubr.bf16.mxu0 %v2743_v55 }
 0x10e   : > { %v1002_v61 = vpop.f32.mrf.mxu0 }
 0x10f   : > { %v1266_v63 = vadd.f32 %v1265_v23, %v1001_v60  ;;  %v2523_v23 = vpop.f32.mrf.mxu1 }
 0x110   : > { %v1003_v0 = vpop.f32.mrf.mxu0 }
 0x111   : > { %v1496_v4 = vmax.f32 %v1266_v63, 0.0  ;;  %v1004_v5 = vadd.f32 %v3068_v56, %v1003_v0  ;;  %v3108_v31 = vpop.f32.mrf.mxu1 }
 0x112   : > { %v1005_v8 = vpop.f32.mrf.mxu0 }
 0x113   : > { %v1269_v10 = vadd.f32 %v3023_v25, %v1004_v5  ;;  %v1559_v13 = vmul.f32 %v3081_v7, %v1496_v4  ;;  %v2526_v35 = vpop.f32.mrf.mxu1 }
 0x114   : > { %v1008_v11 = vpop.f32.mrf.mxu0  ;;  %1199 = vmatmul.mubr.bf16.gmra.mxu0 %v2745_v1 }
 0x115   : > { %v1497_v14 = vmax.f32 %v1269_v10, 0.0  ;;  %v1009_v15 = vadd.f32 %v3068_v56, %v1008_v11  ;;  %1206 = vmatprep.mubr.bf16.mxu0 %v2747_v6  ;;  %v1622_v24 = vadd.f32 %v3091_v16, %v1559_v13  ;;  %v3114_v42 = vpop.f32.mrf.mxu1 }
 0x116   : > { %v1010_v17 = vpop.f32.mrf.mxu0 }
 0x117   : > { %v1560_v19 = vmul.f32 %v3081_v7, %v1497_v14  ;;  %v1274_v20 = vadd.f32 %v3028_v30, %v1009_v15  ;;  %v2527_v48 = vpop.f32.mrf.mxu1 }
 0x118   : > { %v1011_v21 = vpop.f32.mrf.mxu0 }
 0x119   : > { %v1623_v25 = vadd.f32 %v3091_v16, %v1560_v19  ;;  %v1498_v26 = vmax.f32 %v1274_v20, 0.0  ;;  %v1012_v27 = vadd.f32 %v3068_v56, %v1011_v21  ;;  %v3123_v58 = vpop.f32.mrf.mxu1 }
 0x11a   : > { %v1013_v29 = vpop.f32.mrf.mxu0 }
 0x11b   : > { %v2291_v30 = vpack.c.bf16 %v1623_v25, %v1622_v24  ;;  %v1277_v33 = vadd.f32 %v3033_v32, %v1012_v27  ;;  %v1561_v36 = vmul.f32 %v3081_v7, %v1498_v26  ;;  %v2530_v61 = vpop.f32.mrf.mxu1 }
 0x11c   : > { %v1016_v34 = vpop.f32.mrf.mxu0  ;;  %1207 = vmatmul.mubr.bf16.gmra.mxu0 %v2749_v22 }
 0x11d   : > { %2292 = vst [vmem:[%s3106_s14] sm:$0xff] %v2291_v30   ;;  %v1499_v38 = vmax.f32 %v1277_v33, 0.0  ;;  %v1017_v40 = vadd.f32 %v3068_v56, %v1016_v34  ;;  %1214 = vmatprep.mubr.bf16.mxu0 %v2751_v28  ;;  %v1624_v49 = vadd.f32 %v3091_v16, %v1561_v36  ;;  %v3129_v4 = vpop.f32.mrf.mxu1 }
 0x11e   : > { %v1018_v41 = vpop.f32.mrf.mxu0 }
 0x11f   : > { %v1562_v43 = vmul.f32 %v3081_v7, %v1499_v38  ;;  %v1282_v45 = vadd.f32 %v3038_v37, %v1017_v40  ;;  %v2531_v10 = vpop.f32.mrf.mxu1 }
 0x120   : > { %v1019_v32 = vpop.f32.mrf.mxu0 }
 0x121   : > { %v1625_v50 = vadd.f32 %v3091_v16, %v1562_v43  ;;  %v1500_v52 = vmax.f32 %v1282_v45, 0.0  ;;  %v1020_v3 = vadd.f32 %v3068_v56, %v1019_v32  ;;  %v3137_v17 = vpop.f32.mrf.mxu1 }
 0x122   : > { %v1021_v55 = vpop.f32.mrf.mxu0 }
 0x123   : > { %v2296_v59 = vpack.c.bf16 %v1625_v50, %v1624_v49  ;;  %v1285_v60 = vadd.f32 %v3043_v39, %v1020_v3  ;;  %v1563_v63 = vmul.f32 %v3081_v7, %v1500_v52  ;;  %v2755_v39 = vld [vmem:[%s2835_s5 + $0x2a0] ss:$12 sps:$4 sm:$0xff]   ;;  %v2534_v22 = vpop.f32.mrf.mxu1 }
 0x124   : > { %v1024_v37 = vpop.f32.mrf.mxu0  ;;  %1215 = vmatmul.mubr.bf16.gmra.mxu0 %v2753_v47 }
 0x125   : > { %2433 = vst [vmem:[%s3106_s14 + $0x8] sm:$0xff] %v2296_v59   ;;  %v1501_v0 = vmax.f32 %v1285_v60, 0.0  ;;  %v1025_v1 = vadd.f32 %v3068_v56, %v1024_v37  ;;  %1222 = vmatprep.mubr.bf16.mxu0 %v2757_v54  ;;  %v1626_v11 = vadd.f32 %v3091_v16, %v1563_v63  ;;  %v3143_v26 = vpop.f32.mrf.mxu1 }
 0x126   : > { %v1026_v2 = vpop.f32.mrf.mxu0 }
 0x127   : > { %v1564_v5 = vmul.f32 %v3081_v7, %v1501_v0  ;;  %v1290_v6 = vadd.f32 %v3048_v44, %v1025_v1  ;;  %v2535_v30 = vpop.f32.mrf.mxu1 }
 0x128   : > { %v1027_v8 = vpop.f32.mrf.mxu0 }
 0x129   : > { %v1627_v12 = vadd.f32 %v3091_v16, %v1564_v5  ;;  %v1502_v13 = vmax.f32 %v1290_v6, 0.0  ;;  %v1028_v14 = vadd.f32 %v3068_v56, %v1027_v8  ;;  %v3150_v38 = vpop.f32.mrf.mxu1 }
 0x12a   : > { %v1029_v15 = vpop.f32.mrf.mxu0 }
 0x12b   : > { %v2301_v19 = vpack.c.bf16 %v1627_v12, %v1626_v11  ;;  %v1293_v20 = vadd.f32 %v3053_v46, %v1028_v14  ;;  %v1565_v44 = vmul.f32 %v3081_v7, %v1502_v13  ;;  %v2538_v45 = vpop.f32.mrf.mxu1 }
 0x12c   : > { %v1032_v21 = vpop.f32.mrf.mxu0  ;;  %1223 = vmatmul.mubr.bf16.gmra.mxu0 %v2755_v39 }
 0x12d   : > { %2434 = vst [vmem:[%s3106_s14 + $0x10] sm:$0xff] %v2301_v19   ;;  %v1503_v23 = vmax.f32 %v1293_v20, 0.0  ;;  %v1033_v24 = vadd.f32 %v3068_v56, %v1032_v21  ;;  %v1628_v46 = vadd.f32 %v3091_v16, %v1565_v44  ;;  %v3156_v49 = vpop.f32.mrf.mxu1 }
 0x12e   : > { %v1034_v25 = vpop.f32.mrf.mxu0 }
 0x12f   : > { %v1566_v27 = vmul.f32 %v3081_v7, %v1503_v23  ;;  %v1298_v28 = vadd.f32 %v3058_v51, %v1033_v24  ;;  %v2539_v54 = vpop.f32.mrf.mxu1 }
 0x130   : > { %v1035_v29 = vpop.f32.mrf.mxu0 }
 0x131   : > { %v1629_v33 = vadd.f32 %v3091_v16, %v1566_v27  ;;  %v1504_v34 = vmax.f32 %v1298_v28, 0.0  ;;  %v1036_v35 = vadd.f32 %v3068_v56, %v1035_v29  ;;  %v3163_v61 = vpop.f32.mrf.mxu1 }
 0x132   : > { %v1037_v36 = vpop.f32.mrf.mxu0 }
 0x133   : > { %v2306_v40 = vpack.c.bf16 %v1629_v33, %v1628_v46  ;;  %v1301_v41 = vadd.f32 %v3061_v53, %v1036_v35  ;;  %v1567_v51 = vmul.f32 %v3081_v7, %v1504_v34  ;;  %v2542_v2 = vpop.f32.mrf.mxu1 }
 0x134   : > { %v1040_v43 = vpop.f32.mrf.mxu0 }
 0x135   : > { %2435 = vst [vmem:[%s3106_s14 + $0x18] sm:$0xff] %v2306_v40   ;;  %v1505_v32 = vmax.f32 %v1301_v41, 0.0  ;;  %v1041_v47 = vadd.f32 %v3068_v56, %v1040_v43  ;;  %v1630_v53 = vadd.f32 %v3091_v16, %v1567_v51  ;;  %v3169_v39 = vpop.f32.mrf.mxu1 }
 0x136   : > { %v1042_v48 = vpop.f32.mrf.mxu0 }
 0x137   : > { %v1568_v50 = vmul.f32 %v3081_v7, %v1505_v32  ;;  %v1306_v52 = vadd.f32 %v3070_v57, %v1041_v47  ;;  %v2543_v13 = vpop.f32.mrf.mxu1 }
 0x138   : > { %v1043_v3 = vpop.f32.mrf.mxu0 }
 0x139   : > { %v1631_v55 = vadd.f32 %v3091_v16, %v1568_v50  ;;  %v1506_v59 = vmax.f32 %v1306_v52, 0.0  ;;  %v1044_v60 = vadd.f32 %v3068_v56, %v1043_v3  ;;  %v3176_v21 = vpop.f32.mrf.mxu1 }
 0x13a   : > { %v1045_v37 = vpop.f32.mrf.mxu0 }
 0x13b   : > { %v2311_v63 = vpack.c.bf16 %v1631_v55, %v1630_v53  ;;  %v1309_v0 = vadd.f32 %v3073_v62, %v1044_v60  ;;  %v1569_v57 = vmul.f32 %v3081_v7, %v1506_v59  ;;  %v2546_v24 = vpop.f32.mrf.mxu1 }
 0x13c   : > { %v1048_v1 = vpop.f32.mrf.mxu0 }
 0x13d   : > { %2436 = vst [vmem:[%s3106_s14 + $0x20] sm:$0xff] %v2311_v63   ;;  %v1507_v5 = vmax.f32 %v1309_v0, 0.0  ;;  %v1049_v6 = vadd.f32 %v3068_v56, %v1048_v1  ;;  %v1632_v62 = vadd.f32 %v3091_v16, %v1569_v57  ;;  %v3182_v29 = vpop.f32.mrf.mxu1 }
 0x13e   : > { %v1050_v8 = vpop.f32.mrf.mxu0 }
 0x13f   : > { %v1570_v10 = vmul.f32 %v3081_v7, %v1507_v5  ;;  %v1314_v11 = vadd.f32 %v3083_v9, %v1049_v6  ;;  %v2547_v34 = vpop.f32.mrf.mxu1 }
 0x140   : > { %v1051_v12 = vpop.f32.mrf.mxu0 }
 0x141   : > { %v1633_v14 = vadd.f32 %v3091_v16, %v1570_v10  ;;  %v1508_v15 = vmax.f32 %v1314_v11, 0.0  ;;  %v1052_v19 = vadd.f32 %v3068_v56, %v1051_v12  ;;  %v3189_v43 = vpop.f32.mrf.mxu1 }
 0x142   : > { %v1053_v20 = vpop.f32.mrf.mxu0 }
 0x143   : > { %v2316_v22 = vpack.c.bf16 %v1633_v14, %v1632_v62  ;;  %v1317_v44 = vadd.f32 %v3093_v18, %v1052_v19  ;;  %v1571_v9 = vmul.f32 %v3081_v7, %v1508_v15  ;;  %v2550_v47 = vpop.f32.mrf.mxu1 }
 0x144   : > { %v1056_v23 = vpop.f32.mrf.mxu0 }
 0x145   : > { %2437 = vst [vmem:[%s3106_s14 + $0x28] sm:$0xff] %v2316_v22   ;;  %v1509_v25 = vmax.f32 %v1317_v44, 0.0  ;;  %v1057_v27 = vadd.f32 %v3068_v56, %v1056_v23  ;;  %v1634_v18 = vadd.f32 %v3091_v16, %v1571_v9  ;;  %v3195_v3 = vpop.f32.mrf.mxu1 }
 0x146   : > { %v1058_v28 = vpop.f32.mrf.mxu0 }
 0x147   : > { %v1572_v30 = vmul.f32 %v3081_v7, %v1509_v25  ;;  %v1322_v46 = vadd.f32 %v3108_v31, %v1057_v27  ;;  %v2551_v59 = vpop.f32.mrf.mxu1 }
 0x148   : > { %v1059_v33 = vpop.f32.mrf.mxu0 }
 0x149   : > { %v1635_v35 = vadd.f32 %v3091_v16, %v1572_v30  ;;  %v1510_v36 = vmax.f32 %v1322_v46, 0.0  ;;  %v1060_v40 = vadd.f32 %v3068_v56, %v1059_v33  ;;  %v3202_v1 = vpop.f32.mrf.mxu1 }
 0x14a   : > { %v1061_v41 = vpop.f32.mrf.mxu0 }
 0x14b   : > { %v2321_v45 = vpack.c.bf16 %v1635_v35, %v1634_v18  ;;  %v1325_v51 = vadd.f32 %v3114_v42, %v1060_v40  ;;  %v1573_v31 = vmul.f32 %v3081_v7, %v1510_v36  ;;  %v2554_v6 = vpop.f32.mrf.mxu1 }
 0x14c   : > { %v1064_v32 = vpop.f32.mrf.mxu0 }
 0x14d   : > { %2438 = vst [vmem:[%s3106_s14 + $0x30] sm:$0xff] %v2321_v45   ;;  %v1511_v48 = vmax.f32 %v1325_v51, 0.0  ;;  %v1065_v50 = vadd.f32 %v3068_v56, %v1064_v32  ;;  %v1636_v42 = vadd.f32 %v3091_v16, %v1573_v31  ;;  %v3208_v12 = vpop.f32.mrf.mxu1 }
 0x14e   : > { %v1066_v52 = vpop.f32.mrf.mxu0 }
 0x14f   : > { %v1574_v54 = vmul.f32 %v3081_v7, %v1511_v48  ;;  %v1330_v53 = vadd.f32 %v3123_v58, %v1065_v50  ;;  %v2555_v15 = vpop.f32.mrf.mxu1 }
 0x150   : > { %v1067_v55 = vpop.f32.mrf.mxu0 }
 0x151   : > { %v1637_v60 = vadd.f32 %v3091_v16, %v1574_v54  ;;  %v1512_v37 = vmax.f32 %v1330_v53, 0.0  ;;  %v1068_v63 = vadd.f32 %v3068_v56, %v1067_v55  ;;  %v3215_v23 = vpop.f32.mrf.mxu1 }
 0x152   : > { %v1069_v0 = vpop.f32.mrf.mxu0 }
 0x153   : > { %v2326_v2 = vpack.c.bf16 %v1637_v60, %v1636_v42  ;;  %v1333_v57 = vadd.f32 %v3129_v4, %v1068_v63  ;;  %v1575_v58 = vmul.f32 %v3081_v7, %v1512_v37  ;;  %v2558_v27 = vpop.f32.mrf.mxu1 }
 0x154   : > { %v1072_v5 = vpop.f32.mrf.mxu0 }
 0x155   : > { %2439 = vst [vmem:[%s3106_s14 + $0x38] sm:$0xff] %v2326_v2   ;;  %v1513_v8 = vmax.f32 %v1333_v57, 0.0  ;;  %v1073_v10 = vadd.f32 %v3068_v56, %v1072_v5  ;;  %v1638_v4 = vadd.f32 %v3091_v16, %v1575_v58  ;;  %v3221_v33 = vpop.f32.mrf.mxu1 }
 0x156   : > { %v1074_v11 = vpop.f32.mrf.mxu0 }
 0x157   : > { %v1576_v13 = vmul.f32 %v3081_v7, %v1513_v8  ;;  %v1338_v62 = vadd.f32 %v3137_v17, %v1073_v10  ;;  %v2559_v36 = vpop.f32.mrf.mxu1 }
 0x158   : > { %v1075_v14 = vpop.f32.mrf.mxu0 }
 0x159   : > { %v1639_v19 = vadd.f32 %v3091_v16, %v1576_v13  ;;  %v1514_v20 = vmax.f32 %v1338_v62, 0.0  ;;  %v1076_v22 = vadd.f32 %v3068_v56, %v1075_v14  ;;  %v3228_v32 = vpop.f32.mrf.mxu1 }
 0x15a   : > { %v1077_v44 = vpop.f32.mrf.mxu0 }
 0x15b   : > { %v2331_v24 = vpack.c.bf16 %v1639_v19, %v1638_v4  ;;  %v1341_v9 = vadd.f32 %v3143_v26, %v1076_v22  ;;  %v1577_v17 = vmul.f32 %v3081_v7, %v1514_v20  ;;  %v2562_v50 = vpop.f32.mrf.mxu1 }
 0x15c   : > { %v1080_v25 = vpop.f32.mrf.mxu0 }
 0x15d   : > { %2440 = vst [vmem:[%s3106_s14 + $0x40] sm:$0xff] %v2331_v24   ;;  %v1515_v28 = vmax.f32 %v1341_v9, 0.0  ;;  %v1081_v30 = vadd.f32 %v3068_v56, %v1080_v25  ;;  %v1640_v26 = vadd.f32 %v3091_v16, %v1577_v17  ;;  %v3234_v55 = vpop.f32.mrf.mxu1 }
 0x15e   : > { %v1082_v46 = vpop.f32.mrf.mxu0 }
 0x15f   : > { %v1578_v34 = vmul.f32 %v3081_v7, %v1515_v28  ;;  %v1346_v18 = vadd.f32 %v3150_v38, %v1081_v30  ;;  %v2563_v37 = vpop.f32.mrf.mxu1 }
 0x160   : > { %v1083_v35 = vpop.f32.mrf.mxu0 }
 0x161   : > { %v1641_v40 = vadd.f32 %v3091_v16, %v1578_v34  ;;  %v1516_v41 = vmax.f32 %v1346_v18, 0.0  ;;  %v1084_v45 = vadd.f32 %v3068_v56, %v1083_v35  ;;  %v3241_v5 = vpop.f32.mrf.mxu1 }
 0x162   : > { %v1085_v51 = vpop.f32.mrf.mxu0 }
 0x163   : > { %v2336_v47 = vpack.c.bf16 %v1641_v40, %v1640_v26  ;;  %v1349_v31 = vadd.f32 %v3156_v49, %v1084_v45  ;;  %v1579_v38 = vmul.f32 %v3081_v7, %v1516_v41  ;;  %v2566_v10 = vpop.f32.mrf.mxu1 }
 0x164   : > { %v1088_v48 = vpop.f32.mrf.mxu0 }
 0x165   : > { %2441 = vst [vmem:[%s3106_s14 + $0x48] sm:$0xff] %v2336_v47   ;;  %v1517_v52 = vmax.f32 %v1349_v31, 0.0  ;;  %v1089_v54 = vadd.f32 %v3068_v56, %v1088_v48  ;;  %v1642_v49 = vadd.f32 %v3091_v16, %v1579_v38  ;;  %v3247_v14 = vpop.f32.mrf.mxu1 }
 0x166   : > { %v1090_v53 = vpop.f32.mrf.mxu0 }
 0x167   : > { %v1580_v59 = vmul.f32 %v3081_v7, %v1517_v52  ;;  %v1354_v42 = vadd.f32 %v3163_v61, %v1089_v54  ;;  %v2567_v20 = vpop.f32.mrf.mxu1 }
 0x168   : > { %v1091_v60 = vpop.f32.mrf.mxu0 }
 0x169   : > { %v1643_v63 = vadd.f32 %v3091_v16, %v1580_v59  ;;  %v1518_v0 = vmax.f32 %v1354_v42, 0.0  ;;  %v1092_v2 = vadd.f32 %v3068_v56, %v1091_v60  ;;  %v3254_v25 = vpop.f32.mrf.mxu1 }
 0x16a   : > { %v1093_v57 = vpop.f32.mrf.mxu0 }
 0x16b   : > { %v2341_v6 = vpack.c.bf16 %v1643_v63, %v1642_v49  ;;  %v1357_v58 = vadd.f32 %v3169_v39, %v1092_v2  ;;  %v1581_v61 = vmul.f32 %v3081_v7, %v1518_v0  ;;  %v2570_v30 = vpop.f32.mrf.mxu1 }
 0x16c   : > { %v1096_v8 = vpop.f32.mrf.mxu0 }
 0x16d   : > { %2442 = vst [vmem:[%s3106_s14 + $0x50] sm:$0xff] %v2341_v6   ;;  %v1519_v11 = vmax.f32 %v1357_v58, 0.0  ;;  %v1097_v13 = vadd.f32 %v3068_v56, %v1096_v8  ;;  %v1644_v39 = vadd.f32 %v3091_v16, %v1581_v61  ;;  %v3260_v35 = vpop.f32.mrf.mxu1 }
 0x16e   : > { %v1098_v62 = vpop.f32.mrf.mxu0 }
 0x16f   : > { %v1582_v15 = vmul.f32 %v3081_v7, %v1519_v11  ;;  %v1362_v4 = vadd.f32 %v3176_v21, %v1097_v13  ;;  %v2571_v41 = vpop.f32.mrf.mxu1 }
 0x170   : > { %v1099_v19 = vpop.f32.mrf.mxu0 }
 0x171   : > { %v1645_v22 = vadd.f32 %v3091_v16, %v1582_v15  ;;  %v1520_v44 = vmax.f32 %v1362_v4, 0.0  ;;  %v1100_v24 = vadd.f32 %v3068_v56, %v1099_v19  ;;  %v3267_v48 = vpop.f32.mrf.mxu1 }
 0x172   : > { %v1101_v9 = vpop.f32.mrf.mxu0 }
 0x173   : > { %v2346_v27 = vpack.c.bf16 %v1645_v22, %v1644_v39  ;;  %v1365_v17 = vadd.f32 %v3182_v29, %v1100_v24  ;;  %v1583_v21 = vmul.f32 %v3081_v7, %v1520_v44  ;;  %v2574_v54 = vpop.f32.mrf.mxu1 }
 0x174   : > { %v1104_v28 = vpop.f32.mrf.mxu0 }
 0x175   : > { %2443 = vst [vmem:[%s3106_s14 + $0x58] sm:$0xff] %v2346_v27   ;;  %v1521_v46 = vmax.f32 %v1365_v17, 0.0  ;;  %v1105_v34 = vadd.f32 %v3068_v56, %v1104_v28  ;;  %v1646_v29 = vadd.f32 %v3091_v16, %v1583_v21  ;;  %v3273_v60 = vpop.f32.mrf.mxu1 }
 0x176   : > { %v1106_v18 = vpop.f32.mrf.mxu0 }
 0x177   : > { %v1584_v36 = vmul.f32 %v3081_v7, %v1521_v46  ;;  %v1370_v26 = vadd.f32 %v3189_v43, %v1105_v34  ;;  %v2575_v0 = vpop.f32.mrf.mxu1 }
 0x178   : > { %v1107_v40 = vpop.f32.mrf.mxu0 }
 0x179   : > { %v1647_v45 = vadd.f32 %v3091_v16, %v1584_v36  ;;  %v1522_v51 = vmax.f32 %v1370_v26, 0.0  ;;  %v1108_v47 = vadd.f32 %v3068_v56, %v1107_v40  ;;  %v3280_v8 = vpop.f32.mrf.mxu1 }
 0x17a   : > { %v1109_v31 = vpop.f32.mrf.mxu0 }
 0x17b   : > { %v2351_v50 = vpack.c.bf16 %v1647_v45, %v1646_v29  ;;  %v1373_v38 = vadd.f32 %v3195_v3, %v1108_v47  ;;  %v1585_v43 = vmul.f32 %v3081_v7, %v1522_v51  ;;  %v2578_v13 = vpop.f32.mrf.mxu1 }
 0x17c   : > { %v1112_v52 = vpop.f32.mrf.mxu0 }
 0x17d   : > { %2444 = vst [vmem:[%s3106_s14 + $0x60] sm:$0xff] %v2351_v50   ;;  %v1523_v53 = vmax.f32 %v1373_v38, 0.0  ;;  %v1113_v59 = vadd.f32 %v3068_v56, %v1112_v52  ;;  %v1648_v3 = vadd.f32 %v3091_v16, %v1585_v43  ;;  %v3286_v19 = vpop.f32.mrf.mxu1 }
 0x17e   : > { %v1114_v42 = vpop.f32.mrf.mxu0 }
 0x17f   : > { %v1586_v37 = vmul.f32 %v3081_v7, %v1523_v53  ;;  %v1378_v49 = vadd.f32 %v3202_v1, %v1113_v59  ;;  %v2579_v44 = vpop.f32.mrf.mxu1 }
 0x180   : > { %v1115_v63 = vpop.f32.mrf.mxu0 }
 0x181   : > { %v1649_v2 = vadd.f32 %v3091_v16, %v1586_v37  ;;  %v1524_v57 = vmax.f32 %v1378_v49, 0.0  ;;  %v1116_v6 = vadd.f32 %v3068_v56, %v1115_v63  ;;  %v3293_v28 = vpop.f32.mrf.mxu1 }
 0x182   : > { %v1117_v58 = vpop.f32.mrf.mxu0 }
 0x183   : > { %v2356_v10 = vpack.c.bf16 %v1649_v2, %v1648_v3  ;;  %v1381_v61 = vadd.f32 %v3208_v12, %v1116_v6  ;;  %v1587_v1 = vmul.f32 %v3081_v7, %v1524_v57  ;;  %v2582_v34 = vpop.f32.mrf.mxu1 }
 0x184   : > { %v1120_v11 = vpop.f32.mrf.mxu0 }
 0x185   : > { %2445 = vst [vmem:[%s3106_s14 + $0x68] sm:$0xff] %v2356_v10   ;;  %v1525_v62 = vmax.f32 %v1381_v61, 0.0  ;;  %v1121_v15 = vadd.f32 %v3068_v56, %v1120_v11  ;;  %v1650_v12 = vadd.f32 %v3091_v16, %v1587_v1  ;;  %v3299_v40 = vpop.f32.mrf.mxu1 }
 0x186   : > { %v1122_v4 = vpop.f32.mrf.mxu0 }
 0x187   : > { %v1588_v20 = vmul.f32 %v3081_v7, %v1525_v62  ;;  %v1386_v39 = vadd.f32 %v3215_v23, %v1121_v15  ;;  %v2583_v51 = vpop.f32.mrf.mxu1 }
 0x188   : > { %v1123_v22 = vpop.f32.mrf.mxu0 }
 0x189   : > { %v1651_v24 = vadd.f32 %v3091_v16, %v1588_v20  ;;  %v1526_v9 = vmax.f32 %v1386_v39, 0.0  ;;  %v1124_v27 = vadd.f32 %v3068_v56, %v1123_v22  ;;  %v3306_v52 = vpop.f32.mrf.mxu1 }
 0x18a   : > { %v1125_v17 = vpop.f32.mrf.mxu0 }
 0x18b   : > { %v2361_v30 = vpack.c.bf16 %v1651_v24, %v1650_v12  ;;  %v1389_v21 = vadd.f32 %v3221_v33, %v1124_v27  ;;  %v1589_v23 = vmul.f32 %v3081_v7, %v1526_v9  ;;  %v2586_v59 = vpop.f32.mrf.mxu1 }
 0x18c   : > { %v1128_v46 = vpop.f32.mrf.mxu0 }
 0x18d   : > { %2446 = vst [vmem:[%s3106_s14 + $0x70] sm:$0xff] %v2361_v30   ;;  %v1527_v18 = vmax.f32 %v1389_v21, 0.0  ;;  %v1129_v36 = vadd.f32 %v3068_v56, %v1128_v46  ;;  %v1652_v33 = vadd.f32 %v3091_v16, %v1589_v23  ;;  %v3312_v63 = vpop.f32.mrf.mxu1 }
 0x18e   : > { %v1130_v26 = vpop.f32.mrf.mxu0 }
 0x18f   : > { %v1590_v41 = vmul.f32 %v3081_v7, %v1527_v18  ;;  %v1394_v29 = vadd.f32 %v3228_v32, %v1129_v36  ;;  %v2587_v57 = vpop.f32.mrf.mxu1 }
 0x190   : > { %v1131_v45 = vpop.f32.mrf.mxu0 }
 0x191   : > { %v1653_v47 = vadd.f32 %v3091_v16, %v1590_v41  ;;  %v1528_v31 = vmax.f32 %v1394_v29, 0.0  ;;  %v1132_v50 = vadd.f32 %v3068_v56, %v1131_v45  ;;  %v3319_v11 = vpop.f32.mrf.mxu1 }
 0x192   : > { %v1133_v38 = vpop.f32.mrf.mxu0 }
 0x193   : > { %v2366_v54 = vpack.c.bf16 %v1653_v47, %v1652_v33  ;;  %v1397_v43 = vadd.f32 %v3234_v55, %v1132_v50  ;;  %v1591_v32 = vmul.f32 %v3081_v7, %v1528_v31  ;;  %v2590_v15 = vpop.f32.mrf.mxu1 }
 0x194   : > { %v1136_v53 = vpop.f32.mrf.mxu0 }
 0x195   : > { %2447 = vst [vmem:[%s3106_s14 + $0x78] sm:$0xff] %v2366_v54   ;;  %v1529_v42 = vmax.f32 %v1397_v43, 0.0  ;;  %v1137_v37 = vadd.f32 %v3068_v56, %v1136_v53  ;;  %v1654_v55 = vadd.f32 %v3091_v16, %v1591_v32  ;;  %v3325_v22 = vpop.f32.mrf.mxu1 }
 0x196   : > { %v1138_v49 = vpop.f32.mrf.mxu0 }
 0x197   : > { %v1592_v0 = vmul.f32 %v3081_v7, %v1529_v42  ;;  %v1402_v3 = vadd.f32 %v3241_v5, %v1137_v37  ;;  %v2591_v9 = vpop.f32.mrf.mxu1 }
 0x198   : > { %v1139_v2 = vpop.f32.mrf.mxu0 }
 0x199   : > { %v1655_v6 = vadd.f32 %v3091_v16, %v1592_v0  ;;  %v1530_v58 = vmax.f32 %v1402_v3, 0.0  ;;  %v1140_v10 = vadd.f32 %v3068_v56, %v1139_v2  ;;  %v3332_v46 = vpop.f32.mrf.mxu1 }
 0x19a   : > { %v1141_v61 = vpop.f32.mrf.mxu0 }
 0x19b   : > { %v2371_v13 = vpack.c.bf16 %v1655_v6, %v1654_v55  ;;  %v1405_v1 = vadd.f32 %v3247_v14, %v1140_v10  ;;  %v1593_v5 = vmul.f32 %v3081_v7, %v1530_v58  ;;  %v2594_v36 = vpop.f32.mrf.mxu1 }
 0x19c   : > { %v1144_v62 = vpop.f32.mrf.mxu0 }
 0x19d   : > { %2448 = vst [vmem:[%s3106_s14 + $0x80] sm:$0xff] %v2371_v13   ;;  %v1531_v4 = vmax.f32 %v1405_v1, 0.0  ;;  %v1145_v20 = vadd.f32 %v3068_v56, %v1144_v62  ;;  %v1656_v14 = vadd.f32 %v3091_v16, %v1593_v5  ;;  %v3338_v45 = vpop.f32.mrf.mxu1 }
 0x19e   : > { %v1146_v39 = vpop.f32.mrf.mxu0 }
 0x19f   : > { %v1594_v44 = vmul.f32 %v3081_v7, %v1531_v4  ;;  %v1410_v12 = vadd.f32 %v3254_v25, %v1145_v20  ;;  %v2595_v31 = vpop.f32.mrf.mxu1 }
 0x1a0   : > { %v1147_v24 = vpop.f32.mrf.mxu0 }
 0x1a1   : > { %v1657_v27 = vadd.f32 %v3091_v16, %v1594_v44  ;;  %v1532_v17 = vmax.f32 %v1410_v12, 0.0  ;;  %v1148_v30 = vadd.f32 %v3068_v56, %v1147_v24  ;;  %v3345_v53 = vpop.f32.mrf.mxu1 }
 0x1a2   : > { %v1149_v21 = vpop.f32.mrf.mxu0 }
 0x1a3   : > { %v2376_v34 = vpack.c.bf16 %v1657_v27, %v1656_v14  ;;  %v1413_v23 = vadd.f32 %v3260_v35, %v1148_v30  ;;  %v1595_v25 = vmul.f32 %v3081_v7, %v1532_v17  ;;  %v2598_v37 = vpop.f32.mrf.mxu1 }
 0x1a4   : > { %v1152_v18 = vpop.f32.mrf.mxu0 }
 0x1a5   : > { %2449 = vst [vmem:[%s3106_s14 + $0x88] sm:$0xff] %v2376_v34   ;;  %v1533_v26 = vmax.f32 %v1413_v23, 0.0  ;;  %v1153_v41 = vadd.f32 %v3068_v56, %v1152_v18  ;;  %v1658_v35 = vadd.f32 %v3091_v16, %v1595_v25  ;;  %v3351_v2 = vpop.f32.mrf.mxu1 }
 0x1a6   : > { %v1154_v29 = vpop.f32.mrf.mxu0 }
 0x1a7   : > { %v1596_v51 = vmul.f32 %v3081_v7, %v1533_v26  ;;  %v1418_v33 = vadd.f32 %v3267_v48, %v1153_v41  ;;  %v2599_v58 = vpop.f32.mrf.mxu1 }
 0x1a8   : > { %v1155_v47 = vpop.f32.mrf.mxu0 }
 0x1a9   : > { %v1659_v50 = vadd.f32 %v3091_v16, %v1596_v51  ;;  %v1534_v38 = vmax.f32 %v1418_v33, 0.0  ;;  %v1156_v54 = vadd.f32 %v3068_v56, %v1155_v47  ;;  %v3358_v62 = vpop.f32.mrf.mxu1 }
 0x1aa   : > { %v1157_v43 = vpop.f32.mrf.mxu0 }
 0x1ab   : > { %v2381_v59 = vpack.c.bf16 %v1659_v50, %v1658_v35  ;;  %v1421_v32 = vadd.f32 %v3273_v60, %v1156_v54  ;;  %v1597_v48 = vmul.f32 %v3081_v7, %v1534_v38  ;;  %v2602_v20 = vpop.f32.mrf.mxu1 }
 0x1ac   : > { %v1160_v42 = vpop.f32.mrf.mxu0 }
 0x1ad   : > { %2450 = vst [vmem:[%s3106_s14 + $0x90] sm:$0xff] %v2381_v59   ;;  %v1535_v49 = vmax.f32 %v1421_v32, 0.0  ;;  %v1161_v0 = vadd.f32 %v3068_v56, %v1160_v42  ;;  %v1660_v60 = vadd.f32 %v3091_v16, %v1597_v48  ;;  %v3364_v24 = vpop.f32.mrf.mxu1 }
 0x1ae   : > { %v1162_v3 = vpop.f32.mrf.mxu0 }
 0x1af   : > { %v1598_v57 = vmul.f32 %v3081_v7, %v1535_v49  ;;  %v1426_v55 = vadd.f32 %v3280_v8, %v1161_v0  ;;  %v2603_v17 = vpop.f32.mrf.mxu1 }
 0x1b0   : > { %v1163_v6 = vpop.f32.mrf.mxu0 }
 0x1b1   : > { %v1661_v10 = vadd.f32 %v3091_v16, %v1598_v57  ;;  %v1536_v61 = vmax.f32 %v1426_v55, 0.0  ;;  %v1164_v13 = vadd.f32 %v3068_v56, %v1163_v6  ;;  %v3371_v18 = vpop.f32.mrf.mxu1 }
 0x1b2   : > { %v1165_v1 = vpop.f32.mrf.mxu0 }
 0x1b3   : > { %v2386_v15 = vpack.c.bf16 %v1661_v10, %v1660_v60  ;;  %v1429_v5 = vadd.f32 %v3286_v19, %v1164_v13  ;;  %v1599_v8 = vmul.f32 %v3081_v7, %v1536_v61  ;;  %v2606_v41 = vpop.f32.mrf.mxu1 }
 0x1b4   : > { %v1168_v4 = vpop.f32.mrf.mxu0 }
 0x1b5   : > { %2451 = vst [vmem:[%s3106_s14 + $0x98] sm:$0xff] %v2386_v15   ;;  %v1537_v39 = vmax.f32 %v1429_v5, 0.0  ;;  %v1169_v44 = vadd.f32 %v3068_v56, %v1168_v4  ;;  %v1662_v19 = vadd.f32 %v3091_v16, %v1599_v8  ;;  %v3377_v47 = vpop.f32.mrf.mxu1 }
 0x1b6   : > { %v1170_v12 = vpop.f32.mrf.mxu0 }
 0x1b7   : > { %v1600_v9 = vmul.f32 %v3081_v7, %v1537_v39  ;;  %v1434_v14 = vadd.f32 %v3293_v28, %v1169_v44  ;;  %v2607_v38 = vpop.f32.mrf.mxu1 }
 0x1b8   : > { %v1171_v27 = vpop.f32.mrf.mxu0 }
 0x1b9   : > { %v1663_v30 = vadd.f32 %v3091_v16, %v1600_v9  ;;  %v1538_v21 = vmax.f32 %v1434_v14, 0.0  ;;  %v1172_v34 = vadd.f32 %v3068_v56, %v1171_v27  ;;  %v3384_v42 = vpop.f32.mrf.mxu1 }
 0x1ba   : > { %v1173_v23 = vpop.f32.mrf.mxu0 }
 0x1bb   : > { %v2391_v36 = vpack.c.bf16 %v1663_v30, %v1662_v19  ;;  %v1437_v25 = vadd.f32 %v3299_v40, %v1172_v34  ;;  %v1601_v28 = vmul.f32 %v3081_v7, %v1538_v21  ;;  %v2610_v0 = vpop.f32.mrf.mxu1 }
 0x1bc   : > { %v1176_v26 = vpop.f32.mrf.mxu0 }
 0x1bd   : > { %2452 = vst [vmem:[%s3106_s14 + $0xa0] sm:$0xff] %v2391_v36   ;;  %v1539_v29 = vmax.f32 %v1437_v25, 0.0  ;;  %v1177_v51 = vadd.f32 %v3068_v56, %v1176_v26  ;;  %v1664_v40 = vadd.f32 %v3091_v16, %v1601_v28  ;;  %v3390_v6 = vpop.f32.mrf.mxu1 }
 0x1be   : > { %v1178_v33 = vpop.f32.mrf.mxu0 }
 0x1bf   : > { %v1602_v31 = vmul.f32 %v3081_v7, %v1539_v29  ;;  %v1442_v35 = vadd.f32 %v3306_v52, %v1177_v51  ;;  %v2611_v61 = vpop.f32.mrf.mxu1 }
 0x1c0   : > { %v1179_v50 = vpop.f32.mrf.mxu0 }
 0x1c1   : > { %v1665_v54 = vadd.f32 %v3091_v16, %v1602_v31  ;;  %v1540_v43 = vmax.f32 %v1442_v35, 0.0  ;;  %v1180_v59 = vadd.f32 %v3068_v56, %v1179_v50 }
 0x1c2   : > { %v1181_v32 = vpop.f32.mrf.mxu0 }
 0x1c3   : > { %v2396_v37 = vpack.c.bf16 %v1665_v54, %v1664_v40  ;;  %v1445_v48 = vadd.f32 %v3312_v63, %v1180_v59  ;;  %v1603_v52 = vmul.f32 %v3081_v7, %v1540_v43 }
 0x1c4   : > { %v1184_v49 = vpop.f32.mrf.mxu0 }
 0x1c5   : > { %2453 = vst [vmem:[%s3106_s14 + $0xa8] sm:$0xff] %v2396_v37   ;;  %v1541_v3 = vmax.f32 %v1445_v48, 0.0  ;;  %v1185_v57 = vadd.f32 %v3068_v56, %v1184_v49  ;;  %v1666_v63 = vadd.f32 %v3091_v16, %v1603_v52 }
 0x1c6   : > { %v1186_v55 = vpop.f32.mrf.mxu0 }
 0x1c7   : > { %v1604_v58 = vmul.f32 %v3081_v7, %v1541_v3  ;;  %v1450_v60 = vadd.f32 %v3319_v11, %v1185_v57 }
 0x1c8   : > { %v1187_v10 = vpop.f32.mrf.mxu0 }
 0x1c9   : > { %v1667_v13 = vadd.f32 %v3091_v16, %v1604_v58  ;;  %v1542_v1 = vmax.f32 %v1450_v60, 0.0  ;;  %v1188_v15 = vadd.f32 %v3068_v56, %v1187_v10 }
 0x1ca   : > { %v1189_v5 = vpop.f32.mrf.mxu0 }
 0x1cb   : > { %v2401_v4 = vpack.c.bf16 %v1667_v13, %v1666_v63  ;;  %v1453_v20 = vadd.f32 %v3325_v22, %v1188_v15  ;;  %v1605_v39 = vmul.f32 %v3081_v7, %v1542_v1 }
 0x1cc   : > { %v1192_v8 = vpop.f32.mrf.mxu0 }
 0x1cd   : > { %2454 = vst [vmem:[%s3106_s14 + $0xb0] sm:$0xff] %v2401_v4   ;;  %v1543_v44 = vmax.f32 %v1453_v20, 0.0  ;;  %v1193_v11 = vadd.f32 %v3068_v56, %v1192_v8  ;;  %v1668_v17 = vadd.f32 %v3091_v16, %v1605_v39 }
 0x1ce   : > { %v1194_v12 = vpop.f32.mrf.mxu0 }
 0x1cf   : > { %v1606_v9 = vmul.f32 %v3081_v7, %v1543_v44  ;;  %v1458_v14 = vadd.f32 %v3332_v46, %v1193_v11  ;;  %v2758_v46 = vld [vmem:[%s3442_s2] ss:$0 sm:$0xff] }
 0x1d0   : > { %v1195_v27 = vpop.f32.mrf.mxu0 }
 0x1d1   : > { %v1669_v19 = vadd.f32 %v3091_v16, %v1606_v9  ;;  %v1544_v30 = vmax.f32 %v1458_v14, 0.0  ;;  %v1196_v22 = vadd.f32 %v3068_v56, %v1195_v27 }
 0x1d2   : > { %v1197_v21 = vpop.f32.mrf.mxu0 }
 0x1d3   : > { %v2406_v34 = vpack.c.bf16 %v1669_v19, %v1668_v17  ;;  %v1461_v23 = vadd.f32 %v3338_v45, %v1196_v22  ;;  %v1607_v25 = vmul.f32 %v3081_v7, %v1544_v30 }
 0x1d4   : > { %v1200_v36 = vpop.f32.mrf.mxu0 }
 0x1d5   : > { %2455 = vst [vmem:[%s3106_s14 + $0xb8] sm:$0xff] %v2406_v34   ;;  %v1545_v26 = vmax.f32 %v1461_v23, 0.0  ;;  %v1201_v41 = vadd.f32 %v2758_v46, %v1200_v36  ;;  %v1670_v33 = vadd.f32 %v3091_v16, %v1607_v25 }
 0x1d6   : > { %v1202_v28 = vpop.f32.mrf.mxu0 }
 0x1d7   : > { %v1608_v29 = vmul.f32 %v3081_v7, %v1545_v26  ;;  %v1466_v56 = vadd.f32 %v3345_v53, %v1201_v41  ;;  %v2759_v53 = vld [vmem:[%s3442_s2 + $0x1] ss:$0 sm:$0xff] }
 0x1d8   : > { %v1203_v51 = vpop.f32.mrf.mxu0 }
 0x1d9   : > { %v1671_v45 = vadd.f32 %v3091_v16, %v1608_v29  ;;  %v1546_v31 = vmax.f32 %v1466_v56, 0.0  ;;  %v1204_v35 = vadd.f32 %v2758_v46, %v1203_v51 }
 0x1da   : > { %v1205_v50 = vpop.f32.mrf.mxu0 }
 0x1db   : > { %v2411_v38 = vpack.c.bf16 %v1671_v45, %v1670_v33  ;;  %v1469_v40 = vadd.f32 %v3351_v2, %v1204_v35  ;;  %v1609_v43 = vmul.f32 %v3081_v7, %v1546_v31 }
 0x1dc   : > { %v1208_v54 = vpop.f32.mrf.mxu0 }
 0x1dd   : > { %2456 = vst [vmem:[%s3106_s14 + $0xc0] sm:$0xff] %v2411_v38   ;;  %v1547_v59 = vmax.f32 %v1469_v40, 0.0  ;;  %v1209_v32 = vadd.f32 %v2758_v46, %v1208_v54  ;;  %v1672_v52 = vadd.f32 %v3091_v16, %v1609_v43 }
 0x1de   : > { %v1210_v37 = vpop.f32.mrf.mxu0 }
 0x1df   : > { %v1610_v48 = vmul.f32 %v2759_v53, %v1547_v59  ;;  %v1474_v49 = vadd.f32 %v3358_v62, %v1209_v32 }
 0x1e0   : > { %v1211_v0 = vpop.f32.mrf.mxu0 }
 0x1e1   : > { %v1673_v2 = vadd.f32 %v3091_v16, %v1610_v48  ;;  %v1548_v3 = vmax.f32 %v1474_v49, 0.0  ;;  %v1212_v57 = vadd.f32 %v2758_v46, %v1211_v0  ;;  %v2760_v16 = vld [vmem:[%s3442_s2 + $0x2] ss:$0 sm:$0xff] }
 0x1e2   : > { %v1213_v55 = vpop.f32.mrf.mxu0 }
 0x1e3   : > { %v2416_v7 = vpack.c.bf16 %v1673_v2, %v1672_v52  ;;  %v1477_v58 = vadd.f32 %v3364_v24, %v1212_v57  ;;  %v1611_v10 = vmul.f32 %v2759_v53, %v1548_v3 }
 0x1e4   : > { %v1216_v60 = vpop.f32.mrf.mxu0 }
 0x1e5   : > { %2457 = vst [vmem:[%s3106_s14 + $0xc8] sm:$0xff] %v2416_v7   ;;  %v1549_v61 = vmax.f32 %v1477_v58, 0.0  ;;  %v1217_v63 = vadd.f32 %v2758_v46, %v1216_v60  ;;  %v1674_v5 = vadd.f32 %v2760_v16, %v1611_v10 }
 0x1e6   : > { %v1218_v13 = vpop.f32.mrf.mxu0 }
 0x1e7   : > { %v1612_v1 = vmul.f32 %v2759_v53, %v1549_v61  ;;  %v1482_v62 = vadd.f32 %v3371_v18, %v1217_v63 }
 0x1e8   : > { %v1219_v15 = vpop.f32.mrf.mxu0 }
 0x1e9   : > { %v1675_v4 = vadd.f32 %v2760_v16, %v1612_v1  ;;  %v1550_v20 = vmax.f32 %v1482_v62, 0.0  ;;  %v1220_v8 = vadd.f32 %v2758_v46, %v1219_v15 }
 0x1ea   : > { %v1221_v24 = vpop.f32.mrf.mxu0 }
 0x1eb   : > { %v2421_v39 = vpack.c.bf16 %v1675_v4, %v1674_v5  ;;  %v1485_v44 = vadd.f32 %v3377_v47, %v1220_v8  ;;  %v1613_v12 = vmul.f32 %v2759_v53, %v1550_v20 }
 0x1ec   : > { %v1224_v11 = vpop.f32.mrf.mxu0 }
 0x1ed   : > { %2458 = vst [vmem:[%s3106_s14 + $0xd0] sm:$0xff] %v2421_v39   ;;  %v1551_v9 = vmax.f32 %v1485_v44, 0.0  ;;  %v1225_v14 = vadd.f32 %v2758_v46, %v1224_v11  ;;  %v1676_v30 = vadd.f32 %v2760_v16, %v1613_v12 }
 0x1ee   : > { %v1226_v18 = vpop.f32.mrf.mxu0 }
 0x1ef   : > { %v1614_v27 = vmul.f32 %v2759_v53, %v1551_v9  ;;  %v1490_v17 = vadd.f32 %v3384_v42, %v1225_v14 }
 0x1f0   : > { %v1227_v19 = vpop.f32.mrf.mxu0 }
 0x1f1   : > { %v1677_v22 = vadd.f32 %v2760_v16, %v1614_v27  ;;  %v1552_v21 = vmax.f32 %v1490_v17, 0.0  ;;  %v1228_v34 = vadd.f32 %v2758_v46, %v1227_v19 }
 0x1f2   : > { %v1229_v23 = vpop.f32.mrf.mxu0 }
 0x1f3   : > { %v2426_v36 = vpack.c.bf16 %v1677_v22, %v1676_v30  ;;  %v1493_v47 = vadd.f32 %v3390_v6, %v1228_v34  ;;  %v1615_v25 = vmul.f32 %v2759_v53, %v1552_v21 }
 0x1f5   : > { %2459 = vst [vmem:[%s3106_s14 + $0xd8] sm:$0xff] %v2426_v36   ;;  %v1553_v26 = vmax.f32 %v1493_v47, 0.0  ;;  %v1678_v28 = vadd.f32 %v2760_v16, %v1615_v25 }
 0x1f7   : > { %v1616_v41 = vmul.f32 %v2759_v53, %v1553_v26 }
 0x1f9   : > { %v1679_v29 = vadd.f32 %v2760_v16, %v1616_v41 }
 0x1fb   : > { %v2431_v56 = vpack.c.bf16 %v1679_v29, %v1678_v28 }
 0x1fd   : > { %2460 = vst [vmem:[%s3106_s14 + $0xe0] sm:$0xff] %v2431_v56  }
 0x1fe PF: > { %s13_s12 = sadd.s32 1, %s2767_s12  }
 0x1ff   : > { %p10_p4 = scmp.ge.s32.totalorder %s13_s12, 6  }
 0x201   :  { %12 = sbr.rel (!%p10_p4) target bundleno = 1 (0x1), region = 62 }

// kernel: seafar_forward.13
= control target key start
LH: loop header
LB: loop body
LE: loop exit
PB: predicated region body
PF: predicated region fallthrough
CT: control target
= control target key end

     0   :  { %v3306_v0 = vmov 0   ;;  %v4270_v24 = vmov 0.0   ;;  %vm3308_vm0 = vmmov 0   ;;  %vm1199_vm1 = vcmask 523264   ;;  %s4267_s1 = inlined_call_operand.vmem [shape: bf16[576,128], index: 1, kind: input, shape index: {}]   ;;  %s4268_s0 = inlined_call_operand.vmem [shape: bf16[464,576], index: 0, kind: input, shape index: {}]   ;;  %s4269_s2 = inlined_call_operand.vmem [shape: bf16[464,128], index: 2, kind: output, shape index: {}]  }
   0x1   :  { %1287 = vmatprep.subr.bf16.mxu0 %v3306_v0  ;;  %3032 = vmatprep.subr.bf16.mxu1 %v3306_v0  ;;  %v3067_v1 = vld [vmem:[%s4267_s1 + $0x38] sm:$0xff]   ;;  %v3068_v2 = vld [vmem:[%s4267_s1 + $0x30] sm:$0xff]   ;;  %v3069_v3 = vld [vmem:[%s4267_s1 + $0x28] sm:$0xff]  }
   0x2   :  { %1288 = vmatpush1.bf16.msra.mxu0 %v3067_v1  ;;  %3048 = vmatpush1.bf16.msra.mxu1 %v3067_v1  ;;  %v3070_v4 = vld [vmem:[%s4267_s1 + $0x20] sm:$0xff]   ;;  %v3071_v5 = vld [vmem:[%s4267_s1 + $0x18] sm:$0xff]   ;;  %v3072_v7 = vld [vmem:[%s4267_s1 + $0x10] sm:$0xff]  }
   0x3   :  { %1289 = vmatprep.subr.bf16.mxu0 %v3306_v0  ;;  %3033 = vmatprep.subr.bf16.mxu1 %v3306_v0  ;;  %v3085_v6 = vld [vmem:[%s4268_s0 + $0x4] ss:$20 sps:$4 sm:$0xff]   ;;  %v3088_v8 = vld [vmem:[%s4268_s0 + $0x25c] ss:$20 sps:$4 sm:$0xff]   ;;  %v3073_v9 = vld [vmem:[%s4267_s1 + $0x8] sm:$0xff]  }
   0x4   :  { %1319 = vmatprep.mubr.bf16.mxu0 %v3085_v6  ;;  %1439 = vmatprep.mubr.bf16.mxu1 %v3088_v8  ;;  %v3074_v10 = vld [vmem:[%s4267_s1] sm:$0xff]   ;;  %v3075_v11 = vld [vmem:[%s4267_s1 + $0x78] sm:$0xff]   ;;  %v3076_v12 = vld [vmem:[%s4267_s1 + $0x70] sm:$0xff]  }
   0x5   :  { %v3077_v13 = vld [vmem:[%s4267_s1 + $0x68] sm:$0xff]   ;;  %v3078_v14 = vld [vmem:[%s4267_s1 + $0x60] sm:$0xff]   ;;  %v3079_v15 = vld [vmem:[%s4267_s1 + $0x58] sm:$0xff]  }
   0x6   :  { %1290 = vmatpush1.bf16.msra.mxu0 %v3068_v2  ;;  %3049 = vmatpush1.bf16.msra.mxu1 %v3068_v2  ;;  %v3080_v16 = vld [vmem:[%s4267_s1 + $0x50] sm:$0xff]   ;;  %v3081_v17 = vld [vmem:[%s4267_s1 + $0x48] sm:$0xff]   ;;  %v3082_v18 = vld [vmem:[%s4267_s1 + $0x40] sm:$0xff]  }
   0x7   :  { %1291 = vmatprep.subr.bf16.mxu0 %v3306_v0  ;;  %3034 = vmatprep.subr.bf16.mxu1 %v3306_v0  ;;  %v3083_v19 = vld [vmem:[%s4268_s0] ss:$20 sps:$4 sm:$0xff]   ;;  %v3086_v20 = vld [vmem:[%s4268_s0 + $0x258] ss:$20 sps:$4 sm:$0xff]   ;;  %v3095_v27 = vld [vmem:[%s4268_s0 + $0x28] ss:$20 sps:$4 sm:$0xff]  }
   0x8   :  { %v3089_v21 = vld [vmem:[%s4267_s1 + $0x118] sm:$0xff]   ;;  %v3090_v22 = vld [vmem:[%s4268_s0 + $0x2c] ss:$20 sps:$4 sm:$0xff]   ;;  %v3116_v26 = vld [vmem:[%s4267_s1 + $0x110] sm:$0xff]  }
   0x9   :  { %v3092_v23 = vld [vmem:[%s4268_s0 + $0x284] ss:$20 sps:$4 sm:$0xff]   ;;  %v3097_v28 = vld [vmem:[%s4267_s1 + $0xb0] sm:$0xff]   ;;  %v3100_v31 = vld [vmem:[%s4268_s0 + $0x2ac] ss:$20 sps:$4 sm:$0xff]  }
   0xa   :  { %1292 = vmatpush1.bf16.msra.mxu0 %v3069_v3  ;;  %3050 = vmatpush1.bf16.msra.mxu1 %v3069_v3  ;;  %v3094_v25 = vld [vmem:[%s4267_s1 + $0xb8] sm:$0xff]   ;;  %v3096_v29 = vld [vmem:[%s4268_s0 + $0x280] ss:$20 sps:$4 sm:$0xff]   ;;  %v3104_v32 = vld [vmem:[%s4267_s1 + $0xa8] sm:$0xff]  }
   0xb   :  { %1293 = vmatprep.subr.bf16.mxu0 %v3306_v0  ;;  %3035 = vmatprep.subr.bf16.mxu1 %v3306_v0  ;;  %v3098_v30 = vld [vmem:[%s4268_s0 + $0x54] ss:$20 sps:$4 sm:$0xff]   ;;  %v3102_v34 = vld [vmem:[%s4268_s0 + $0x50] ss:$20 sps:$4 sm:$0xff]   ;;  %v3119_v40 = vld [vmem:[%s4267_s1 + $0x98] sm:$0xff]  }
   0xc   :  { %v3141_v33 = vld [vmem:[%s4267_s1 + $0x108] sm:$0xff]   ;;  %v3111_v35 = vld [vmem:[%s4267_s1 + $0xa0] sm:$0xff]   ;;  %v3105_v38 = vld [vmem:[%s4268_s0 + $0x7c] ss:$20 sps:$4 sm:$0xff]  }
   0xd   :  { %v3171_v36 = vld [vmem:[%s4267_s1 + $0x100] sm:$0xff]   ;;  %v3103_v37 = vld [vmem:[%s4268_s0 + $0x2a8] ss:$20 sps:$4 sm:$0xff]   ;;  %v3126_v41 = vld [vmem:[%s4267_s1 + $0x90] sm:$0xff]  }
   0xe   :  { %1294 = vmatpush1.bf16.msra.mxu0 %v3070_v4  ;;  %3051 = vmatpush1.bf16.msra.mxu1 %v3070_v4  ;;  %v3107_v39 = vld [vmem:[%s4268_s0 + $0x2d4] ss:$20 sps:$4 sm:$0xff]   ;;  %v3109_v42 = vld [vmem:[%s4268_s0 + $0x78] ss:$20 sps:$4 sm:$0xff]   ;;  %v3110_v43 = vld [vmem:[%s4268_s0 + $0x2d0] ss:$20 sps:$4 sm:$0xff]  }
   0xf   :  { %1295 = vmatprep.subr.bf16.mxu0 %v3306_v0  ;;  %3036 = vmatprep.subr.bf16.mxu1 %v3306_v0  ;;  %v3112_v44 = vld [vmem:[%s4268_s0 + $0xa4] ss:$20 sps:$4 sm:$0xff]   ;;  %v3114_v45 = vld [vmem:[%s4268_s0 + $0x2fc] ss:$20 sps:$4 sm:$0xff]   ;;  %v3133_v46 = vld [vmem:[%s4267_s1 + $0x88] sm:$0xff]  }
  0x10   :  { %v3140_v47 = vld [vmem:[%s4267_s1 + $0x80] sm:$0xff]   ;;  %v3118_v49 = vld [vmem:[%s4268_s0 + $0x2f8] ss:$20 sps:$4 sm:$0xff]   ;;  %v3149_v53 = vld [vmem:[%s4267_s1 + $0xf0] sm:$0xff]  }
  0x11   :  { %v3117_v48 = vld [vmem:[%s4268_s0 + $0xa0] ss:$20 sps:$4 sm:$0xff]   ;;  %v3122_v51 = vld [vmem:[%s4268_s0 + $0x324] ss:$20 sps:$4 sm:$0xff]   ;;  %v3124_v54 = vld [vmem:[%s4268_s0 + $0xc8] ss:$20 sps:$4 sm:$0xff]  }
  0x12   :  { %1296 = vmatpush1.bf16.msra.mxu0 %v3071_v5  ;;  %3052 = vmatpush1.bf16.msra.mxu1 %v3071_v5  ;;  %v3120_v50 = vld [vmem:[%s4268_s0 + $0xcc] ss:$20 sps:$4 sm:$0xff]   ;;  %v3146_v52 = vld [vmem:[%s4267_s1 + $0xf8] sm:$0xff]   ;;  %v3127_v56 = vld [vmem:[%s4268_s0 + $0xf4] ss:$20 sps:$4 sm:$0xff]  }
  0x13   :  { %1297 = vmatprep.subr.bf16.mxu0 %v3306_v0  ;;  %3037 = vmatprep.subr.bf16.mxu1 %v3306_v0  ;;  %v3125_v55 = vld [vmem:[%s4268_s0 + $0x320] ss:$20 sps:$4 sm:$0xff]   ;;  %v3156_v58 = vld [vmem:[%s4267_s1 + $0xe8] sm:$0xff]   ;;  %v3131_v60 = vld [vmem:[%s4268_s0 + $0xf0] ss:$20 sps:$4 sm:$0xff]  }
  0x14   :  { %v3129_v57 = vld [vmem:[%s4268_s0 + $0x34c] ss:$20 sps:$4 sm:$0xff]   ;;  %v3132_v61 = vld [vmem:[%s4268_s0 + $0x348] ss:$20 sps:$4 sm:$0xff]   ;;  %v3178_v2 = vld [vmem:[%s4267_s1 + $0xd0] sm:$0xff]  }
  0x15   :  { %v3163_v59 = vld [vmem:[%s4267_s1 + $0xe0] sm:$0xff]   ;;  %v3134_v62 = vld [vmem:[%s4268_s0 + $0x11c] ss:$20 sps:$4 sm:$0xff]   ;;  %v3136_v63 = vld [vmem:[%s4268_s0 + $0x374] ss:$20 sps:$4 sm:$0xff]  }
  0x16   :  { %1298 = vmatpush1.bf16.msra.mxu0 %v3072_v7  ;;  %3053 = vmatpush1.bf16.msra.mxu1 %v3072_v7  ;;  %v3170_v1 = vld [vmem:[%s4267_s1 + $0xd8] sm:$0xff]   ;;  %v3139_v4 = vld [vmem:[%s4268_s0 + $0x370] ss:$20 sps:$4 sm:$0xff]   ;;  %v3185_v7 = vld [vmem:[%s4267_s1 + $0xc8] sm:$0xff]  }
  0x17   :  { %1299 = vmatprep.subr.bf16.mxu0 %v3306_v0  ;;  %3038 = vmatprep.subr.bf16.mxu1 %v3306_v0  ;;  %v3138_v3 = vld [vmem:[%s4268_s0 + $0x118] ss:$20 sps:$4 sm:$0xff]   ;;  %v3144_v6 = vld [vmem:[%s4268_s0 + $0x39c] ss:$20 sps:$4 sm:$0xff]   ;;  %v3186_v8 = vld [vmem:[%s4267_s1 + $0xc0] sm:$0xff]  }
  0x18   :  { %v3142_v5 = vld [vmem:[%s4268_s0 + $0x144] ss:$20 sps:$4 sm:$0xff]  }
  0x1a   :  { %1300 = vmatpush1.bf16.msra.mxu0 %v3073_v9  ;;  %3054 = vmatpush1.bf16.msra.mxu1 %v3073_v9  ;;  %v3147_v9 = vld [vmem:[%s4268_s0 + $0x140] ss:$20 sps:$4 sm:$0xff]  }
  0x1b   :  { %1301 = vmatprep.subr.bf16.mxu0 %v3306_v0  ;;  %3039 = vmatprep.subr.bf16.mxu1 %v3306_v0 }
  0x1e   :  { %1302 = vmatpush1.bf16.msra.mxu0 %v3074_v10  ;;  %3055 = vmatpush1.bf16.msra.mxu1 %v3074_v10  ;;  %v3148_v10 = vld [vmem:[%s4268_s0 + $0x398] ss:$20 sps:$4 sm:$0xff]  }
  0x1f   :  { %1303 = vmatprep.subr.bf16.mxu0 %v3306_v0  ;;  %3040 = vmatprep.subr.bf16.mxu1 %v3306_v0 }
  0x22   :  { %1304 = vmatpush2.bf16.msra.mxu0 %v3075_v11  ;;  %3056 = vmatpush2.bf16.msra.mxu1 %v3075_v11  ;;  %v3150_v11 = vld [vmem:[%s4268_s0 + $0x16c] ss:$20 sps:$4 sm:$0xff]  }
  0x23   :  { %1305 = vmatprep.subr.bf16.mxu0 %v3306_v0  ;;  %3041 = vmatprep.subr.bf16.mxu1 %v3306_v0 }
  0x26   :  { %1306 = vmatpush2.bf16.msra.mxu0 %v3076_v12  ;;  %3057 = vmatpush2.bf16.msra.mxu1 %v3076_v12  ;;  %v3152_v12 = vld [vmem:[%s4268_s0 + $0x3c4] ss:$20 sps:$4 sm:$0xff]  }
  0x27   :  { %1307 = vmatprep.subr.bf16.mxu0 %v3306_v0  ;;  %3042 = vmatprep.subr.bf16.mxu1 %v3306_v0 }
  0x2a   :  { %1308 = vmatpush2.bf16.msra.mxu0 %v3077_v13  ;;  %3058 = vmatpush2.bf16.msra.mxu1 %v3077_v13  ;;  %v3155_v13 = vld [vmem:[%s4268_s0 + $0x3c0] ss:$20 sps:$4 sm:$0xff]  }
  0x2b   :  { %1309 = vmatprep.subr.bf16.mxu0 %v3306_v0  ;;  %3043 = vmatprep.subr.bf16.mxu1 %v3306_v0 }
  0x2e   :  { %1310 = vmatpush2.bf16.msra.mxu0 %v3078_v14  ;;  %3059 = vmatpush2.bf16.msra.mxu1 %v3078_v14  ;;  %v3157_v14 = vld [vmem:[%s4268_s0 + $0x194] ss:$20 sps:$4 sm:$0xff]  }
  0x2f   :  { %1311 = vmatprep.subr.bf16.mxu0 %v3306_v0  ;;  %3044 = vmatprep.subr.bf16.mxu1 %v3306_v0 }
  0x32   :  { %1312 = vmatpush2.bf16.msra.mxu0 %v3079_v15  ;;  %3060 = vmatpush2.bf16.msra.mxu1 %v3079_v15  ;;  %v3159_v15 = vld [vmem:[%s4268_s0 + $0x3ec] ss:$20 sps:$4 sm:$0xff]  }
  0x33   :  { %1313 = vmatprep.subr.bf16.mxu0 %v3306_v0  ;;  %3045 = vmatprep.subr.bf16.mxu1 %v3306_v0 }
  0x36   :  { %1314 = vmatpush2.bf16.msra.mxu0 %v3080_v16  ;;  %3061 = vmatpush2.bf16.msra.mxu1 %v3080_v16  ;;  %v3161_v16 = vld [vmem:[%s4268_s0 + $0x190] ss:$20 sps:$4 sm:$0xff]  }
  0x37   :  { %1315 = vmatprep.subr.bf16.mxu0 %v3306_v0  ;;  %3046 = vmatprep.subr.bf16.mxu1 %v3306_v0 }
  0x3a   :  { %1316 = vmatpush2.bf16.msra.mxu0 %v3081_v17  ;;  %3062 = vmatpush2.bf16.msra.mxu1 %v3081_v17  ;;  %v3162_v17 = vld [vmem:[%s4268_s0 + $0x3e8] ss:$20 sps:$4 sm:$0xff]  }
  0x3b   :  { %1317 = vmatprep.subr.bf16.mxu0 %v3306_v0  ;;  %3047 = vmatprep.subr.bf16.mxu1 %v3306_v0 }
  0x3e   :  { %1318 = vmatpush2.bf16.msra.mxu0 %v3082_v18  ;;  %3063 = vmatpush2.bf16.msra.mxu1 %v3082_v18  ;;  %v3164_v18 = vld [vmem:[%s4268_s0 + $0x1bc] ss:$20 sps:$4 sm:$0xff]  }
  0x3f   :  { %2908 = vmatprep.subr.bf16.mxu0 %v4270_v24  ;;  %1552 = vmatprep.subr.bf16.mxu1 %v3306_v0 }
  0x41   :  { %1320 = vmatmul.mubr.bf16.vlgmr.msra.gmra.mxu0 %v3083_v19  ;;  %1440 = vmatmul.mubr.bf16.vlgmr.msra.gmra.mxu1 %v3086_v20  ;;  %v3166_v19 = vld [vmem:[%s4268_s0 + $0x414] ss:$20 sps:$4 sm:$0xff]   ;;  %v3168_v20 = vld [vmem:[%s4268_s0 + $0x1b8] ss:$20 sps:$4 sm:$0xff]  }
  0x42   :  { %2909 = vmatpush3.bf16.msra.mxu0 %v3089_v21  ;;  %1327 = vmatprep.mubr.bf16.mxu0 %v3090_v22  ;;  %v3169_v21 = vld [vmem:[%s4268_s0 + $0x410] ss:$20 sps:$4 sm:$0xff]  }
  0x43   :  { %1447 = vmatprep.mubr.bf16.mxu1 %v3092_v23  ;;  %1553 = vmatpush1.bf16.msra.mxu1 %v3094_v25  ;;  %v3172_v22 = vld [vmem:[%s4268_s0 + $0x1e4] ss:$20 sps:$4 sm:$0xff]   ;;  %v3174_v23 = vld [vmem:[%s4268_s0 + $0x43c] ss:$20 sps:$4 sm:$0xff]   ;;  %v3176_v25 = vld [vmem:[%s4268_s0 + $0x1e0] ss:$20 sps:$4 sm:$0xff]  }
  0x44   :  { %1554 = vmatprep.subr.bf16.mxu1 %v3306_v0  ;;  %2910 = vmatprep.subr.bf16.mxu0 %v4270_v24 }
  0x46   :  { %2911 = vmatpush3.bf16.msra.mxu0 %v3116_v26  ;;  %v3177_v26 = vld [vmem:[%s4268_s0 + $0x438] ss:$20 sps:$4 sm:$0xff]  }
  0x47   :  { %1555 = vmatpush1.bf16.msra.mxu1 %v3097_v28  ;;  %2912 = vmatprep.subr.bf16.mxu0 %v4270_v24  ;;  %v3181_v28 = vld [vmem:[%s4268_s0 + $0x464] ss:$20 sps:$4 sm:$0xff]  }
  0x48   :  { %1556 = vmatprep.subr.bf16.mxu1 %v3306_v0 }
  0x49   :  { %1328 = vmatmul.mubr.bf16.gmra.mxu0 %v3095_v27  ;;  %1448 = vmatmul.mubr.bf16.gmra.mxu1 %v3096_v29  ;;  %v3179_v27 = vld [vmem:[%s4268_s0 + $0x20c] ss:$20 sps:$4 sm:$0xff]   ;;  %v3183_v29 = vld [vmem:[%s4268_s0 + $0x208] ss:$20 sps:$4 sm:$0xff]  }
  0x4a   :  { %1335 = vmatprep.mubr.bf16.mxu0 %v3098_v30  ;;  %1455 = vmatprep.mubr.bf16.mxu1 %v3100_v31  ;;  %v3184_v30 = vld [vmem:[%s4268_s0 + $0x460] ss:$20 sps:$4 sm:$0xff]  }
  0x4b   :  { %1557 = vmatpush1.bf16.msra.mxu1 %v3104_v32  ;;  %2913 = vmatpush3.bf16.msra.mxu0 %v3141_v33  ;;  %v3187_v31 = vld [vmem:[%s4268_s0 + $0x234] ss:$20 sps:$4 sm:$0xff]   ;;  %v3191_v32 = vld [vmem:[%s4268_s0 + $0xc] ss:$20 sps:$4 sm:$0xff]  }
  0x4c   :  { %1558 = vmatprep.subr.bf16.mxu1 %v3306_v0  ;;  %2914 = vmatprep.subr.bf16.mxu0 %v4270_v24  ;;  %v3189_v33 = vld [vmem:[%s4268_s0 + $0x8] ss:$20 sps:$4 sm:$0xff]  }
  0x4f   :  { %1559 = vmatpush1.bf16.msra.mxu1 %v3111_v35  ;;  %2915 = vmatpush3.bf16.msra.mxu0 %v3171_v36  ;;  %v3193_v35 = vld [vmem:[%s4268_s0 + $0x34] ss:$20 sps:$4 sm:$0xff]   ;;  %v3195_v36 = vld [vmem:[%s4268_s0 + $0x30] ss:$20 sps:$4 sm:$0xff]  }
  0x50   :  { %1560 = vmatprep.subr.bf16.mxu1 %v3306_v0 }
  0x51   :  { %1336 = vmatmul.mubr.bf16.gmra.mxu0 %v3102_v34  ;;  %1456 = vmatmul.mubr.bf16.gmra.mxu1 %v3103_v37  ;;  %v3192_v34 = vld [vmem:[%s4268_s0 + $0x230] ss:$20 sps:$4 sm:$0xff]  }
  0x52   :  { %1343 = vmatprep.mubr.bf16.mxu0 %v3105_v38  ;;  %1463 = vmatprep.mubr.bf16.mxu1 %v3107_v39  ;;  %v3196_v37 = vld [vmem:[%s4268_s0 + $0x10] ss:$20 sps:$4 sm:$0xff]   ;;  %v3199_v39 = vld [vmem:[%s4268_s0 + $0x58] ss:$20 sps:$4 sm:$0xff]  }
  0x53   :  { %1561 = vmatpush1.bf16.msra.mxu1 %v3119_v40  ;;  %v3197_v38 = vld [vmem:[%s4268_s0 + $0x5c] ss:$20 sps:$4 sm:$0xff]   ;;  %v3200_v40 = vld [vmem:[%s4268_s0 + $0x38] ss:$20 sps:$4 sm:$0xff]  }
  0x54   :  { %1562 = vmatprep.subr.bf16.mxu1 %v3306_v0 }
  0x57   :  { %1563 = vmatpush1.bf16.msra.mxu1 %v3126_v41  ;;  %v3201_v41 = vld [vmem:[%s4268_s0 + $0x84] ss:$20 sps:$4 sm:$0xff]  }
  0x58   :  { %1564 = vmatprep.subr.bf16.mxu1 %v3306_v0 }
  0x59   :  { %1344 = vmatmul.mubr.bf16.gmra.mxu0 %v3109_v42  ;;  %1464 = vmatmul.mubr.bf16.gmra.mxu1 %v3110_v43  ;;  %v3203_v42 = vld [vmem:[%s4268_s0 + $0x80] ss:$20 sps:$4 sm:$0xff]  }
  0x5a   :  { %1351 = vmatprep.mubr.bf16.mxu0 %v3112_v44  ;;  %1471 = vmatprep.mubr.bf16.mxu1 %v3114_v45  ;;  %v3204_v43 = vld [vmem:[%s4268_s0 + $0x60] ss:$20 sps:$4 sm:$0xff]   ;;  %v3207_v45 = vld [vmem:[%s4268_s0 + $0xa8] ss:$20 sps:$4 sm:$0xff]  }
  0x5b   :  { %1565 = vmatpush1.bf16.msra.mxu1 %v3133_v46  ;;  %v3205_v44 = vld [vmem:[%s4268_s0 + $0xac] ss:$20 sps:$4 sm:$0xff]   ;;  %v3208_v46 = vld [vmem:[%s4268_s0 + $0x88] ss:$20 sps:$4 sm:$0xff]  }
  0x5c   :  { %1566 = vmatprep.subr.bf16.mxu1 %v3306_v0 }
  0x5f   :  { %1567 = vmatpush1.bf16.msra.mxu1 %v3140_v47  ;;  %v3209_v47 = vld [vmem:[%s4268_s0 + $0xd4] ss:$20 sps:$4 sm:$0xff]  }
  0x60   :  { %1568 = vmatprep.subr.bf16.mxu1 %v3306_v0 }
  0x61   :  { %1352 = vmatmul.mubr.bf16.gmra.mxu0 %v3117_v48  ;;  %1472 = vmatmul.mubr.bf16.gmra.mxu1 %v3118_v49  ;;  %v3211_v48 = vld [vmem:[%s4268_s0 + $0xd0] ss:$20 sps:$4 sm:$0xff]  }
  0x62   :  { %1359 = vmatprep.mubr.bf16.mxu0 %v3120_v50  ;;  %1479 = vmatprep.mubr.bf16.mxu1 %v3122_v51  ;;  %v3212_v49 = vld [vmem:[%s4268_s0 + $0xb0] ss:$20 sps:$4 sm:$0xff]   ;;  %v3215_v51 = vld [vmem:[%s4268_s0 + $0xf8] ss:$20 sps:$4 sm:$0xff]  }
  0x63   :  { %1569 = vmatpush2.bf16.msra.mxu1 %v3146_v52  ;;  %v3213_v50 = vld [vmem:[%s4268_s0 + $0xfc] ss:$20 sps:$4 sm:$0xff]   ;;  %v3216_v52 = vld [vmem:[%s4268_s0 + $0xd8] ss:$20 sps:$4 sm:$0xff]  }
  0x64   :  { %1570 = vmatprep.subr.bf16.mxu1 %v3306_v0 }
  0x67   :  { %1571 = vmatpush2.bf16.msra.mxu1 %v3149_v53  ;;  %v3217_v53 = vld [vmem:[%s4268_s0 + $0x124] ss:$20 sps:$4 sm:$0xff]  }
  0x68   :  { %1572 = vmatprep.subr.bf16.mxu1 %v3306_v0 }
  0x69   :  { %1360 = vmatmul.mubr.bf16.gmra.mxu0 %v3124_v54  ;;  %1480 = vmatmul.mubr.bf16.gmra.mxu1 %v3125_v55  ;;  %v3219_v54 = vld [vmem:[%s4268_s0 + $0x120] ss:$20 sps:$4 sm:$0xff]  }
  0x6a   :  { %1367 = vmatprep.mubr.bf16.mxu0 %v3127_v56  ;;  %1487 = vmatprep.mubr.bf16.mxu1 %v3129_v57  ;;  %v3220_v55 = vld [vmem:[%s4268_s0 + $0x100] ss:$20 sps:$4 sm:$0xff]   ;;  %v3223_v57 = vld [vmem:[%s4268_s0 + $0x148] ss:$20 sps:$4 sm:$0xff]  }
  0x6b   :  { %1573 = vmatpush2.bf16.msra.mxu1 %v3156_v58  ;;  %v3221_v56 = vld [vmem:[%s4268_s0 + $0x14c] ss:$20 sps:$4 sm:$0xff]   ;;  %v3224_v58 = vld [vmem:[%s4268_s0 + $0x128] ss:$20 sps:$4 sm:$0xff]  }
  0x6c   :  { %1574 = vmatprep.subr.bf16.mxu1 %v3306_v0 }
  0x6f   :  { %1575 = vmatpush2.bf16.msra.mxu1 %v3163_v59  ;;  %v3225_v59 = vld [vmem:[%s4268_s0 + $0x174] ss:$20 sps:$4 sm:$0xff]  }
  0x70   :  { %1576 = vmatprep.subr.bf16.mxu1 %v3306_v0 }
  0x71   :  { %1368 = vmatmul.mubr.bf16.gmra.mxu0 %v3131_v60  ;;  %1488 = vmatmul.mubr.bf16.gmra.mxu1 %v3132_v61  ;;  %v3227_v60 = vld [vmem:[%s4268_s0 + $0x170] ss:$20 sps:$4 sm:$0xff]  }
  0x72   :  { %1375 = vmatprep.mubr.bf16.mxu0 %v3134_v62  ;;  %1495 = vmatprep.mubr.bf16.mxu1 %v3136_v63  ;;  %v3228_v61 = vld [vmem:[%s4268_s0 + $0x150] ss:$20 sps:$4 sm:$0xff]   ;;  %v3231_v63 = vld [vmem:[%s4268_s0 + $0x198] ss:$20 sps:$4 sm:$0xff]  }
  0x73   :  { %1577 = vmatpush2.bf16.msra.mxu1 %v3170_v1  ;;  %v3229_v62 = vld [vmem:[%s4268_s0 + $0x19c] ss:$20 sps:$4 sm:$0xff]   ;;  %v3232_v1 = vld [vmem:[%s4268_s0 + $0x178] ss:$20 sps:$4 sm:$0xff]  }
  0x74   :  { %1578 = vmatprep.subr.bf16.mxu1 %v3306_v0 }
  0x77   :  { %1579 = vmatpush2.bf16.msra.mxu1 %v3178_v2  ;;  %v3233_v2 = vld [vmem:[%s4268_s0 + $0x1c4] ss:$20 sps:$4 sm:$0xff]  }
  0x78   :  { %1580 = vmatprep.subr.bf16.mxu1 %v3306_v0 }
  0x79   :  { %1376 = vmatmul.mubr.bf16.gmra.mxu0 %v3138_v3  ;;  %1496 = vmatmul.mubr.bf16.gmra.mxu1 %v3139_v4 }
  0x7a   :  { %1383 = vmatprep.mubr.bf16.mxu0 %v3142_v5  ;;  %1503 = vmatprep.mubr.bf16.mxu1 %v3144_v6 }
  0x7b   :  { %1581 = vmatpush2.bf16.msra.mxu1 %v3185_v7 }
  0x7c   :  { %1582 = vmatprep.subr.bf16.mxu1 %v3306_v0  ;;  %v3154_v0 = vld [vmem:[%s4268_s0 + $0x168] ss:$20 sps:$4 sm:$0xff]  }
  0x7f   :  { %1583 = vmatpush2.bf16.msra.mxu1 %v3186_v8 }
  0x81   :  { %1384 = vmatmul.mubr.bf16.gmra.mxu0 %v3147_v9  ;;  %1504 = vmatmul.mubr.bf16.gmra.mxu1 %v3148_v10  ;;  %v3235_v9 = vld [vmem:[%s4268_s0 + $0x1c0] ss:$20 sps:$4 sm:$0xff]  }
  0x82   :  { %1391 = vmatprep.mubr.bf16.mxu0 %v3150_v11  ;;  %1511 = vmatprep.mubr.bf16.mxu1 %v3152_v12  ;;  %v3236_v10 = vld [vmem:[%s4268_s0 + $0x1a0] ss:$20 sps:$4 sm:$0xff]  }
  0x83   :  { %v3237_v11 = vld [vmem:[%s4268_s0 + $0x1ec] ss:$20 sps:$4 sm:$0xff]  }
  0x89   :  { %1392 = vmatmul.mubr.bf16.gmra.mxu0 %v3154_v0  ;;  %1512 = vmatmul.mubr.bf16.gmra.mxu1 %v3155_v13 }
  0x8a   :  { %1399 = vmatprep.mubr.bf16.mxu0 %v3157_v14  ;;  %1519 = vmatprep.mubr.bf16.mxu1 %v3159_v15 }
  0x91   :  { %1400 = vmatmul.mubr.bf16.gmra.mxu0 %v3161_v16  ;;  %1520 = vmatmul.mubr.bf16.gmra.mxu1 %v3162_v17 }
  0x92   :  { %1407 = vmatprep.mubr.bf16.mxu0 %v3164_v18  ;;  %1527 = vmatprep.mubr.bf16.mxu1 %v3166_v19  ;;  %v3239_v19 = vld [vmem:[%s4268_s0 + $0x1e8] ss:$20 sps:$4 sm:$0xff]  }
  0x99   :  { %1408 = vmatmul.mubr.bf16.gmra.mxu0 %v3168_v20  ;;  %1528 = vmatmul.mubr.bf16.gmra.mxu1 %v3169_v21  ;;  %v3240_v20 = vld [vmem:[%s4268_s0 + $0x1c8] ss:$20 sps:$4 sm:$0xff]  }
  0x9a   :  { %1415 = vmatprep.mubr.bf16.mxu0 %v3172_v22  ;;  %1535 = vmatprep.mubr.bf16.mxu1 %v3174_v23  ;;  %v3241_v21 = vld [vmem:[%s4268_s0 + $0x214] ss:$20 sps:$4 sm:$0xff]  }
  0xa1   :  { %1416 = vmatmul.mubr.bf16.gmra.mxu0 %v3176_v25  ;;  %1536 = vmatmul.mubr.bf16.gmra.mxu1 %v3177_v26 }
  0xa2   :  { %1423 = vmatprep.mubr.bf16.mxu0 %v3179_v27  ;;  %1543 = vmatprep.mubr.bf16.mxu1 %v3181_v28 }
  0xa9   :  { %1424 = vmatmul.mubr.bf16.gmra.mxu0 %v3183_v29  ;;  %1544 = vmatmul.mubr.bf16.gmra.mxu1 %v3184_v30 }
  0xaa   :  { %1431 = vmatprep.mubr.bf16.mxu0 %v3187_v31  ;;  %1584 = vmatprep.mubr.bf16.mxu1 %v3191_v32  ;;  %v3243_v31 = vld [vmem:[%s4268_s0 + $0x210] ss:$20 sps:$4 sm:$0xff]  }
  0xab   :  { %v3244_v32 = vld [vmem:[%s4268_s0 + $0x1f0] ss:$20 sps:$4 sm:$0xff]  }
  0xb1   :  { %1432 = vmatmul.mubr.bf16.gmra.mxu0 %v3192_v34  ;;  %1585 = vmatmul.mubr.bf16.vlgmr.msra.gmra.mxu1 %v3189_v33  ;;  %v3247_v33 = vld [vmem:[%s4268_s0 + $0x23c] ss:$20 sps:$4 sm:$0xff]  }
  0xb2   :  { %1592 = vmatprep.mubr.bf16.mxu1 %v3193_v35  ;;  %2916 = vmatprep.mubr.msk.bf16.mxu0 %vm3308_vm0, %v4270_v24 }
  0xb9   :  { %1593 = vmatmul.mubr.bf16.gmra.mxu1 %v3195_v36  ;;  %2917 = vmatmul.mubr.msk.bf16.vlgmr.msra.gmra.mxu0 %vm1199_vm1, %v3196_v37 }
  0xba   :  { %1600 = vmatprep.mubr.bf16.mxu1 %v3197_v38  ;;  %2920 = vmatprep.mubr.msk.bf16.mxu0 %vm3308_vm0, %v4270_v24 }
  0xc1   :  { %1601 = vmatmul.mubr.bf16.gmra.mxu1 %v3199_v39  ;;  %2921 = vmatmul.mubr.msk.bf16.gmra.mxu0 %vm1199_vm1, %v3200_v40 }
  0xc2   :  { %1608 = vmatprep.mubr.bf16.mxu1 %v3201_v41  ;;  %2924 = vmatprep.mubr.msk.bf16.mxu0 %vm3308_vm0, %v4270_v24 }
  0xc9   :  { %1609 = vmatmul.mubr.bf16.gmra.mxu1 %v3203_v42  ;;  %2925 = vmatmul.mubr.msk.bf16.gmra.mxu0 %vm1199_vm1, %v3204_v43  ;;  %v3245_v42 = vld [vmem:[%s4268_s0 + $0x238] ss:$20 sps:$4 sm:$0xff]  }
  0xca   :  { %1616 = vmatprep.mubr.bf16.mxu1 %v3205_v44  ;;  %2928 = vmatprep.mubr.msk.bf16.mxu0 %vm3308_vm0, %v4270_v24  ;;  %v3248_v43 = vld [vmem:[%s4268_s0 + $0x218] ss:$20 sps:$4 sm:$0xff]  }
  0xcb   :  { %v3251_v44 = vld [vmem:[%s4268_s0 + $0x264] ss:$20 sps:$4 sm:$0xff]  }
  0xd1   :  { %1617 = vmatmul.mubr.bf16.gmra.mxu1 %v3207_v45  ;;  %2929 = vmatmul.mubr.msk.bf16.gmra.mxu0 %vm1199_vm1, %v3208_v46 }
  0xd2   :  { %1624 = vmatprep.mubr.bf16.mxu1 %v3209_v47  ;;  %2932 = vmatprep.mubr.msk.bf16.mxu0 %vm3308_vm0, %v4270_v24 }
  0xd9   :  { %1625 = vmatmul.mubr.bf16.gmra.mxu1 %v3211_v48  ;;  %2933 = vmatmul.mubr.msk.bf16.gmra.mxu0 %vm1199_vm1, %v3212_v49 }
  0xda   :  { %1632 = vmatprep.mubr.bf16.mxu1 %v3213_v50  ;;  %2936 = vmatprep.mubr.msk.bf16.mxu0 %vm3308_vm0, %v4270_v24 }
  0xe1   :  { %1633 = vmatmul.mubr.bf16.gmra.mxu1 %v3215_v51  ;;  %2937 = vmatmul.mubr.msk.bf16.gmra.mxu0 %vm1199_vm1, %v3216_v52 }
  0xe2   :  { %1640 = vmatprep.mubr.bf16.mxu1 %v3217_v53  ;;  %2940 = vmatprep.mubr.msk.bf16.mxu0 %vm3308_vm0, %v4270_v24  ;;  %v3249_v53 = vld [vmem:[%s4268_s0 + $0x260] ss:$20 sps:$4 sm:$0xff]  }
  0xe9   :  { %1641 = vmatmul.mubr.bf16.gmra.mxu1 %v3219_v54  ;;  %2941 = vmatmul.mubr.msk.bf16.gmra.mxu0 %vm1199_vm1, %v3220_v55  ;;  %v3252_v54 = vld [vmem:[%s4268_s0 + $0x240] ss:$20 sps:$4 sm:$0xff]  }
  0xea   :  { %1648 = vmatprep.mubr.bf16.mxu1 %v3221_v56  ;;  %2944 = vmatprep.mubr.msk.bf16.mxu0 %vm3308_vm0, %v4270_v24  ;;  %v3255_v55 = vld [vmem:[%s4268_s0 + $0x28c] ss:$20 sps:$4 sm:$0xff]  }
  0xf1   :  { %1649 = vmatmul.mubr.bf16.gmra.mxu1 %v3223_v57  ;;  %2945 = vmatmul.mubr.msk.bf16.gmra.mxu0 %vm1199_vm1, %v3224_v58 }
  0xf2   :  { %1656 = vmatprep.mubr.bf16.mxu1 %v3225_v59  ;;  %2948 = vmatprep.mubr.msk.bf16.mxu0 %vm3308_vm0, %v4270_v24 }
  0xf9   :  { %1657 = vmatmul.mubr.bf16.gmra.mxu1 %v3227_v60  ;;  %2949 = vmatmul.mubr.msk.bf16.gmra.mxu0 %vm1199_vm1, %v3228_v61 }
  0xfa   :  { %1664 = vmatprep.mubr.bf16.mxu1 %v3229_v62  ;;  %2952 = vmatprep.mubr.msk.bf16.mxu0 %vm3308_vm0, %v4270_v24 }
 0x101   :  { %v3786_v3 = vpop.f32.mrf.mxu0  ;;  %v3788_v4 = vpop.f32.mrf.mxu1  ;;  %1665 = vmatmul.mubr.bf16.gmra.mxu1 %v3231_v63  ;;  %2953 = vmatmul.mubr.msk.bf16.gmra.mxu0 %vm1199_vm1, %v3232_v1  ;;  %v3253_v1 = vld [vmem:[%s4268_s0 + $0x288] ss:$20 sps:$4 sm:$0xff]  }
 0x102   :  { %1672 = vmatprep.mubr.bf16.mxu1 %v3233_v2  ;;  %2956 = vmatprep.mubr.msk.bf16.mxu0 %vm3308_vm0, %v4270_v24  ;;  %v3256_v2 = vld [vmem:[%s4268_s0 + $0x268] ss:$20 sps:$4 sm:$0xff]  }
 0x103   :  { %v1323_v5 = vpop.f32.mrf.mxu0  ;;  %v1443_v6 = vpop.f32.mrf.mxu1 }
 0x104   :  { %v3259_v5 = vld [vmem:[%s4268_s0 + $0x2b4] ss:$20 sps:$4 sm:$0xff]  }
 0x105   :  { %v3793_v7 = vpop.f32.mrf.mxu0  ;;  %v3795_v8 = vpop.f32.mrf.mxu1 }
 0x107   :  { %v1326_v12 = vpop.f32.mrf.mxu0  ;;  %v1446_v0 = vpop.f32.mrf.mxu1 }
 0x109   :  { %v3806_v13 = vpop.f32.mrf.mxu0  ;;  %v3808_v14 = vpop.f32.mrf.mxu1  ;;  %1673 = vmatmul.mubr.bf16.gmra.mxu1 %v3235_v9  ;;  %2957 = vmatmul.mubr.msk.bf16.gmra.mxu0 %vm1199_vm1, %v3236_v10 }
 0x10a   :  { %1680 = vmatprep.mubr.bf16.mxu1 %v3237_v11  ;;  %2960 = vmatprep.mubr.msk.bf16.mxu0 %vm3308_vm0, %v4270_v24 }
 0x10b   :  { %v1331_v15 = vpop.f32.mrf.mxu0  ;;  %v1451_v16 = vpop.f32.mrf.mxu1 }
 0x10d   :  { %v3813_v17 = vpop.f32.mrf.mxu0  ;;  %v3815_v18 = vpop.f32.mrf.mxu1 }
 0x10f   :  { %v1334_v22 = vpop.f32.mrf.mxu0  ;;  %v1454_v23 = vpop.f32.mrf.mxu1 }
 0x111   :  { %v3826_v25 = vpop.f32.mrf.mxu0  ;;  %v3828_v26 = vpop.f32.mrf.mxu1  ;;  %1681 = vmatmul.mubr.bf16.gmra.mxu1 %v3239_v19  ;;  %2961 = vmatmul.mubr.msk.bf16.gmra.mxu0 %vm1199_vm1, %v3240_v20  ;;  %v3257_v19 = vld [vmem:[%s4268_s0 + $0x2b0] ss:$20 sps:$4 sm:$0xff]  }
 0x112   :  { %1688 = vmatprep.mubr.bf16.mxu1 %v3241_v21  ;;  %2964 = vmatprep.mubr.msk.bf16.mxu0 %vm3308_vm0, %v4270_v24  ;;  %v3260_v20 = vld [vmem:[%s4268_s0 + $0x290] ss:$20 sps:$4 sm:$0xff]  }
 0x113   :  { %v1339_v27 = vpop.f32.mrf.mxu0  ;;  %v1459_v28 = vpop.f32.mrf.mxu1  ;;  %v3263_v21 = vld [vmem:[%s4268_s0 + $0x2dc] ss:$20 sps:$4 sm:$0xff]  }
 0x115   :  { %v3833_v29 = vpop.f32.mrf.mxu0  ;;  %v3835_v30 = vpop.f32.mrf.mxu1 }
 0x117   :  { %v1342_v34 = vpop.f32.mrf.mxu0  ;;  %v1462_v35 = vpop.f32.mrf.mxu1 }
 0x118   :  { %v3261_v35 = vld [vmem:[%s4268_s0 + $0x2d8] ss:$20 sps:$4 sm:$0xff]  }
 0x119   :  { %v3846_v36 = vpop.f32.mrf.mxu0  ;;  %v3848_v37 = vpop.f32.mrf.mxu1  ;;  %1689 = vmatmul.mubr.bf16.gmra.mxu1 %v3243_v31  ;;  %2965 = vmatmul.mubr.msk.bf16.gmra.mxu0 %vm1199_vm1, %v3244_v32 }
 0x11a   :  { %1696 = vmatprep.mubr.bf16.mxu1 %v3247_v33  ;;  %2968 = vmatprep.mubr.msk.bf16.mxu0 %vm3308_vm0, %v4270_v24 }
 0x11b   :  { %v1347_v38 = vpop.f32.mrf.mxu0  ;;  %v1467_v39 = vpop.f32.mrf.mxu1 }
 0x11c   :  { %v3264_v38 = vld [vmem:[%s4268_s0 + $0x2b8] ss:$20 sps:$4 sm:$0xff]  }
 0x11d   :  { %v3853_v40 = vpop.f32.mrf.mxu0  ;;  %v3855_v41 = vpop.f32.mrf.mxu1  ;;  %v3267_v39 = vld [vmem:[%s4268_s0 + $0x304] ss:$20 sps:$4 sm:$0xff]  }
 0x11f   :  { %v1350_v45 = vpop.f32.mrf.mxu0  ;;  %v1470_v46 = vpop.f32.mrf.mxu1 }
 0x121   :  { %v3866_v47 = vpop.f32.mrf.mxu0  ;;  %v3868_v48 = vpop.f32.mrf.mxu1  ;;  %1697 = vmatmul.mubr.bf16.gmra.mxu1 %v3245_v42  ;;  %2969 = vmatmul.mubr.msk.bf16.gmra.mxu0 %vm1199_vm1, %v3248_v43 }
 0x122   :  { %1704 = vmatprep.mubr.bf16.mxu1 %v3251_v44  ;;  %2972 = vmatprep.mubr.msk.bf16.mxu0 %vm3308_vm0, %v4270_v24 }
 0x123   :  { %v1355_v49 = vpop.f32.mrf.mxu0  ;;  %v1475_v50 = vpop.f32.mrf.mxu1 }
 0x125   :  { %v3873_v51 = vpop.f32.mrf.mxu0  ;;  %v3875_v52 = vpop.f32.mrf.mxu1 }
 0x127   :  { %v1358_v56 = vpop.f32.mrf.mxu0  ;;  %v1478_v57 = vpop.f32.mrf.mxu1 }
 0x128   :  { %v3271_v56 = vld [vmem:[%s4268_s0 + $0x32c] ss:$20 sps:$4 sm:$0xff]  }
 0x129   :  { %v3886_v58 = vpop.f32.mrf.mxu0  ;;  %v3888_v59 = vpop.f32.mrf.mxu1  ;;  %1705 = vmatmul.mubr.bf16.gmra.mxu1 %v3249_v53  ;;  %2973 = vmatmul.mubr.msk.bf16.gmra.mxu0 %vm1199_vm1, %v3252_v54  ;;  %v3265_v54 = vld [vmem:[%s4268_s0 + $0x300] ss:$20 sps:$4 sm:$0xff]  }
 0x12a   :  { %1712 = vmatprep.mubr.bf16.mxu1 %v3255_v55  ;;  %2976 = vmatprep.mubr.msk.bf16.mxu0 %vm3308_vm0, %v4270_v24  ;;  %v3268_v55 = vld [vmem:[%s4268_s0 + $0x2e0] ss:$20 sps:$4 sm:$0xff]  }
 0x12b   :  { %v1363_v60 = vpop.f32.mrf.mxu0  ;;  %v1483_v61 = vpop.f32.mrf.mxu1 }
 0x12d   :  { %v3893_v62 = vpop.f32.mrf.mxu0  ;;  %v3895_v63 = vpop.f32.mrf.mxu1 }
 0x12f   :  { %v1366_v6 = vpop.f32.mrf.mxu0  ;;  %v1486_v9 = vpop.f32.mrf.mxu1 }
 0x131   :  { %v3906_v10 = vpop.f32.mrf.mxu0  ;;  %v3908_v11 = vpop.f32.mrf.mxu1  ;;  %1713 = vmatmul.mubr.bf16.gmra.mxu1 %v3253_v1  ;;  %2977 = vmatmul.mubr.msk.bf16.gmra.mxu0 %vm1199_vm1, %v3256_v2 }
 0x132   :  { %1720 = vmatprep.mubr.bf16.mxu1 %v3259_v5  ;;  %2980 = vmatprep.mubr.msk.bf16.mxu0 %vm3308_vm0, %v4270_v24 }
 0x133   :  { %v1371_v12 = vpop.f32.mrf.mxu0  ;;  %v1491_v0 = vpop.f32.mrf.mxu1 }
 0x134   :  { %v3269_v12 = vld [vmem:[%s4268_s0 + $0x328] ss:$20 sps:$4 sm:$0xff]  }
 0x135   :  { %v3913_v15 = vpop.f32.mrf.mxu0  ;;  %v3915_v16 = vpop.f32.mrf.mxu1  ;;  %v3272_v0 = vld [vmem:[%s4268_s0 + $0x308] ss:$20 sps:$4 sm:$0xff]  }
 0x137   :  { %v1374_v22 = vpop.f32.mrf.mxu0  ;;  %v1494_v23 = vpop.f32.mrf.mxu1 }
 0x139   :  { %v3926_v27 = vpop.f32.mrf.mxu0  ;;  %v3928_v28 = vpop.f32.mrf.mxu1  ;;  %1721 = vmatmul.mubr.bf16.gmra.mxu1 %v3257_v19  ;;  %2981 = vmatmul.mubr.msk.bf16.gmra.mxu0 %vm1199_vm1, %v3260_v20  ;;  %v3275_v19 = vld [vmem:[%s4268_s0 + $0x354] ss:$20 sps:$4 sm:$0xff]  }
 0x13a   :  { %1728 = vmatprep.mubr.bf16.mxu1 %v3263_v21  ;;  %2984 = vmatprep.mubr.msk.bf16.mxu0 %vm3308_vm0, %v4270_v24 }
 0x13b   :  { %v1379_v31 = vpop.f32.mrf.mxu0  ;;  %v1499_v32 = vpop.f32.mrf.mxu1 }
 0x13d   :  { %v3933_v33 = vpop.f32.mrf.mxu0  ;;  %v3935_v34 = vpop.f32.mrf.mxu1 }
 0x13f   :  { %v1382_v42 = vpop.f32.mrf.mxu0  ;;  %v1502_v43 = vpop.f32.mrf.mxu1 }
 0x140   :  { %v3276_v42 = vld [vmem:[%s4268_s0 + $0x330] ss:$20 sps:$4 sm:$0xff]  }
 0x141   :  { %v3946_v44 = vpop.f32.mrf.mxu0  ;;  %v3948_v45 = vpop.f32.mrf.mxu1  ;;  %1729 = vmatmul.mubr.bf16.gmra.mxu1 %v3261_v35  ;;  %2985 = vmatmul.mubr.msk.bf16.gmra.mxu0 %vm1199_vm1, %v3264_v38  ;;  %v3279_v43 = vld [vmem:[%s4268_s0 + $0x37c] ss:$20 sps:$4 sm:$0xff]  }
 0x142   :  { %1736 = vmatprep.mubr.bf16.mxu1 %v3267_v39  ;;  %2988 = vmatprep.mubr.msk.bf16.mxu0 %vm3308_vm0, %v4270_v24  ;;  %v3273_v39 = vld [vmem:[%s4268_s0 + $0x350] ss:$20 sps:$4 sm:$0xff]  }
 0x143   :  { %v1387_v46 = vpop.f32.mrf.mxu0  ;;  %v1507_v49 = vpop.f32.mrf.mxu1 }
 0x145   :  { %v3953_v50 = vpop.f32.mrf.mxu0  ;;  %v3955_v53 = vpop.f32.mrf.mxu1 }
 0x147   :  { %v1390_v57 = vpop.f32.mrf.mxu0  ;;  %v1510_v60 = vpop.f32.mrf.mxu1 }
 0x149   :  { %v3966_v61 = vpop.f32.mrf.mxu0  ;;  %v3968_v1 = vpop.f32.mrf.mxu1  ;;  %1737 = vmatmul.mubr.bf16.gmra.mxu1 %v3265_v54  ;;  %2989 = vmatmul.mubr.msk.bf16.gmra.mxu0 %vm1199_vm1, %v3268_v55 }
 0x14a   :  { %4272 = vst [vmem:[#allocation2_spill] sm:$0xff] %v3968_v1  ;;  %1744 = vmatprep.mubr.bf16.mxu1 %v3271_v56  ;;  %2992 = vmatprep.mubr.msk.bf16.mxu0 %vm3308_vm0, %v4270_v24 }
 0x14b   :  { %v1395_v2 = vpop.f32.mrf.mxu0  ;;  %v1515_v5 = vpop.f32.mrf.mxu1 }
 0x14c   :  { %v3277_v5 = vld [vmem:[%s4268_s0 + $0x378] ss:$20 sps:$4 sm:$0xff]  }
 0x14d   :  { %v3973_v6 = vpop.f32.mrf.mxu0  ;;  %v3975_v9 = vpop.f32.mrf.mxu1 }
 0x14e   :  { %4273 = vst [vmem:[#allocation3_spill] sm:$0xff] %v3975_v9 }
 0x14f   :  { %v1398_v20 = vpop.f32.mrf.mxu0  ;;  %v1518_v21 = vpop.f32.mrf.mxu1 }
 0x151   :  { %v3986_v22 = vpop.f32.mrf.mxu0  ;;  %v3988_v23 = vpop.f32.mrf.mxu1  ;;  %1745 = vmatmul.mubr.bf16.gmra.mxu1 %v3269_v12  ;;  %2993 = vmatmul.mubr.msk.bf16.gmra.mxu0 %vm1199_vm1, %v3272_v0  ;;  %v3280_v12 = vld [vmem:[%s4268_s0 + $0x358] ss:$20 sps:$4 sm:$0xff]  }
 0x152   :  { %4274 = vst [vmem:[#allocation4_spill] sm:$0xff] %v3988_v23  ;;  %1752 = vmatprep.mubr.bf16.mxu1 %v3275_v19  ;;  %2996 = vmatprep.mubr.msk.bf16.mxu0 %vm3308_vm0, %v4270_v24  ;;  %v3283_v0 = vld [vmem:[%s4268_s0 + $0x3a4] ss:$20 sps:$4 sm:$0xff]  }
 0x153   :  { %v1403_v31 = vpop.f32.mrf.mxu0  ;;  %v1523_v32 = vpop.f32.mrf.mxu1 }
 0x155   :  { %v3993_v35 = vpop.f32.mrf.mxu0  ;;  %v3995_v38 = vpop.f32.mrf.mxu1 }
 0x156   :  { %4275 = vst [vmem:[#allocation5_spill] sm:$0xff] %v3995_v38 }
 0x157   :  { %v1406_v46 = vpop.f32.mrf.mxu0  ;;  %v1526_v49 = vpop.f32.mrf.mxu1 }
 0x158   :  { %v3281_v46 = vld [vmem:[%s4268_s0 + $0x3a0] ss:$20 sps:$4 sm:$0xff]  }
 0x159   :  { %v4006_v54 = vpop.f32.mrf.mxu0  ;;  %v4008_v55 = vpop.f32.mrf.mxu1  ;;  %1753 = vmatmul.mubr.bf16.gmra.mxu1 %v3273_v39  ;;  %2997 = vmatmul.mubr.msk.bf16.gmra.mxu0 %vm1199_vm1, %v3276_v42  ;;  %v3284_v49 = vld [vmem:[%s4268_s0 + $0x380] ss:$20 sps:$4 sm:$0xff]  }
 0x15a   :  { %4276 = vst [vmem:[#allocation6_spill] sm:$0xff] %v4008_v55  ;;  %1760 = vmatprep.mubr.bf16.mxu1 %v3279_v43  ;;  %3000 = vmatprep.mubr.msk.bf16.mxu0 %vm3308_vm0, %v4270_v24 }
 0x15b   :  { %v1411_v56 = vpop.f32.mrf.mxu0  ;;  %v1531_v57 = vpop.f32.mrf.mxu1 }
 0x15c   :  { %v3287_v56 = vld [vmem:[%s4268_s0 + $0x3cc] ss:$20 sps:$4 sm:$0xff]  }
 0x15d   :  { %v4013_v60 = vpop.f32.mrf.mxu0  ;;  %v4015_v2 = vpop.f32.mrf.mxu1 }
 0x15e   :  { %4277 = vst [vmem:[#allocation7_spill] sm:$0xff] %v4015_v2 }
 0x15f   :  { %v1414_v19 = vpop.f32.mrf.mxu0  ;;  %v1534_v20 = vpop.f32.mrf.mxu1 }
 0x161   :  { %v4026_v21 = vpop.f32.mrf.mxu0  ;;  %v4028_v31 = vpop.f32.mrf.mxu1  ;;  %1761 = vmatmul.mubr.bf16.gmra.mxu1 %v3277_v5  ;;  %3001 = vmatmul.mubr.msk.bf16.gmra.mxu0 %vm1199_vm1, %v3280_v12 }
 0x162   :  { %4278 = vst [vmem:[#allocation8_spill] sm:$0xff] %v4028_v31  ;;  %1768 = vmatprep.mubr.bf16.mxu1 %v3283_v0  ;;  %3004 = vmatprep.mubr.msk.bf16.mxu0 %vm3308_vm0, %v4270_v24 }
 0x163   :  { %v1419_v32 = vpop.f32.mrf.mxu0  ;;  %v1539_v39 = vpop.f32.mrf.mxu1 }
 0x165   :  { %v4033_v42 = vpop.f32.mrf.mxu0  ;;  %v4035_v43 = vpop.f32.mrf.mxu1 }
 0x166   :  { %4279 = vst [vmem:[#allocation9_spill] sm:$0xff] %v4035_v43 }
 0x167   :  { %v1422_v57 = vpop.f32.mrf.mxu0  ;;  %v1542_v5 = vpop.f32.mrf.mxu1 }
 0x168   :  { %v3285_v57 = vld [vmem:[%s4268_s0 + $0x3c8] ss:$20 sps:$4 sm:$0xff]  }
 0x169   :  { %v4046_v12 = vpop.f32.mrf.mxu0  ;;  %v4048_v0 = vpop.f32.mrf.mxu1  ;;  %1769 = vmatmul.mubr.bf16.gmra.mxu1 %v3281_v46  ;;  %3005 = vmatmul.mubr.msk.bf16.gmra.mxu0 %vm1199_vm1, %v3284_v49  ;;  %v3288_v46 = vld [vmem:[%s4268_s0 + $0x3a8] ss:$20 sps:$4 sm:$0xff]  }
 0x16a   :  { %4280 = vst [vmem:[#allocation10_spill] sm:$0xff] %v4048_v0  ;;  %1776 = vmatprep.mubr.bf16.mxu1 %v3287_v56  ;;  %3008 = vmatprep.mubr.msk.bf16.mxu0 %vm3308_vm0, %v4270_v24  ;;  %v3291_v49 = vld [vmem:[%s4268_s0 + $0x3f4] ss:$20 sps:$4 sm:$0xff]  }
 0x16b   :  { %v1427_v19 = vpop.f32.mrf.mxu0  ;;  %v1547_v20 = vpop.f32.mrf.mxu1 }
 0x16d   :  { %v4053_v32 = vpop.f32.mrf.mxu0  ;;  %v4055_v39 = vpop.f32.mrf.mxu1 }
 0x16e   :  { %4281 = vst [vmem:[#allocation11_spill] sm:$0xff] %v4055_v39 }
 0x16f   :  { %v1430_v56 = vpop.f32.mrf.mxu0  ;;  %v1550_v5 = vpop.f32.mrf.mxu1 }
 0x170   :  { %v3289_v56 = vld [vmem:[%s4268_s0 + $0x3f0] ss:$20 sps:$4 sm:$0xff]  }
 0x171   :  { %v4066_v19 = vpop.f32.mrf.mxu0  ;;  %v1586_v20 = vpop.f32.mrf.mxu1  ;;  %1777 = vmatmul.mubr.bf16.gmra.mxu1 %v3285_v57  ;;  %3009 = vmatmul.mubr.msk.bf16.gmra.mxu0 %vm1199_vm1, %v3288_v46  ;;  %v3292_v5 = vld [vmem:[%s4268_s0 + $0x3d0] ss:$20 sps:$4 sm:$0xff]  }
 0x172   :  { %1784 = vmatprep.mubr.bf16.mxu1 %v3291_v49  ;;  %3012 = vmatprep.mubr.msk.bf16.mxu0 %vm3308_vm0, %v4270_v24  ;;  %v3295_v57 = vld [vmem:[%s4268_s0 + $0x41c] ss:$20 sps:$4 sm:$0xff]   ;;  %v1587_v38 = vadd.f32 %v1586_v20, %v3786_v3 }
 0x173   :  { %v1435_v39 = vpop.f32.mrf.mxu0  ;;  %v1588_v0 = vpop.f32.mrf.mxu1 }
 0x174   :  { %v4282_v39 = vmov 0.0  }
 0x175   :  { %v4071_v43 = vpop.f32.mrf.mxu0  ;;  %v1589_v31 = vpop.f32.mrf.mxu1 }
 0x176   :  { %v1590_v23 = vadd.f32 %v1589_v31, %v3793_v7 }
 0x177   :  { %v1438_v46 = vpop.f32.mrf.mxu0  ;;  %v1591_v49 = vpop.f32.mrf.mxu1 }
 0x178   :  { %v3293_v46 = vld [vmem:[%s4268_s0 + $0x418] ss:$20 sps:$4 sm:$0xff]  }
 0x179   :  { %v1594_v24 = vpop.f32.mrf.mxu1  ;;  %1785 = vmatmul.mubr.bf16.gmra.mxu1 %v3289_v56  ;;  %v1851_v0 = vpop.f32.mrf.mxu0  ;;  %3013 = vmatmul.mubr.msk.bf16.gmra.mxu0 %vm1199_vm1, %v3292_v5  ;;  %v3296_v56 = vld [vmem:[%s4268_s0 + $0x3f8] ss:$20 sps:$4 sm:$0xff]  }
 0x17a   :  { %1792 = vmatprep.mubr.bf16.mxu1 %v3295_v57  ;;  %3016 = vmatprep.mubr.msk.bf16.mxu0 %vm3308_vm0, %v4282_v39  ;;  %v1852_v5 = vadd.f32 %v1851_v0, %v1587_v38  ;;  %v1595_v38 = vadd.f32 %v1594_v24, %v3806_v13 }
 0x17b   :  { %v1596_v2 = vpop.f32.mrf.mxu1  ;;  %v2918_v55 = vpop.f32.mrf.mxu0 }
 0x17c   :  { %v3299_v55 = vld [vmem:[%s4268_s0 + $0x444] ss:$20 sps:$4 sm:$0xff]  }
 0x17d   :  { %v1597_v9 = vpop.f32.mrf.mxu1  ;;  %v1854_v1 = vpop.f32.mrf.mxu0 }
 0x17e   :  { %v1855_v57 = vadd.f32 %v1854_v1, %v1590_v23  ;;  %v1598_v49 = vadd.f32 %v1597_v9, %v3813_v17 }
 0x17f   :  { %v1599_v2 = vpop.f32.mrf.mxu1  ;;  %v2919_v3 = vpop.f32.mrf.mxu0 }
 0x180   :  { %v2705_v20 = vpack.c.bf16 %v1855_v57, %v1852_v5  ;;  %v3303_v2 = vld [vmem:[%s4268_s0 + $0x46c] ss:$20 sps:$4 sm:$0xff]  }
 0x181   :  { %v1602_v7 = vpop.f32.mrf.mxu1  ;;  %1793 = vmatmul.mubr.bf16.gmra.mxu1 %v3293_v46  ;;  %v1859_v31 = vpop.f32.mrf.mxu0  ;;  %3017 = vmatmul.mubr.msk.bf16.gmra.mxu0 %vm1199_vm1, %v3296_v56  ;;  %v3297_v46 = vld [vmem:[%s4268_s0 + $0x440] ss:$20 sps:$4 sm:$0xff]  }
 0x182   :  { %2706 = vst [vmem:[%s4269_s2] sm:$0xff] %v2705_v20   ;;  %1800 = vmatprep.mubr.bf16.mxu1 %v3299_v55  ;;  %3020 = vmatprep.mubr.msk.bf16.mxu0 %vm3308_vm0, %v4282_v39  ;;  %v3300_v56 = vld [vmem:[%s4268_s0 + $0x420] ss:$20 sps:$4 sm:$0xff]   ;;  %v1860_v57 = vadd.f32 %v1859_v31, %v1595_v38 }
 0x183   :  { %v1604_v1 = vpop.f32.mrf.mxu1  ;;  %v2922_v23 = vpop.f32.mrf.mxu0 }
 0x184   :  { %v1603_v1 = vadd.f32 %v1602_v7, %v3826_v25 }
 0x185   :  { %v1605_v0 = vpop.f32.mrf.mxu1  ;;  %v1862_v5 = vpop.f32.mrf.mxu0 }
 0x186   :  { %v1863_v55 = vadd.f32 %v1862_v5, %v1598_v49  ;;  %v1606_v23 = vadd.f32 %v1605_v0, %v3833_v29  ;;  %v3301_v5 = vld [vmem:[%s4268_s0 + $0x468] ss:$20 sps:$4 sm:$0xff]  }
 0x187   :  { %v1607_v3 = vpop.f32.mrf.mxu1  ;;  %v2923_v24 = vpop.f32.mrf.mxu0 }
 0x188   :  { %v2710_v13 = vpack.c.bf16 %v1863_v55, %v1860_v57 }
 0x189   :  { %v1610_v17 = vpop.f32.mrf.mxu1  ;;  %1801 = vmatmul.mubr.bf16.gmra.mxu1 %v3297_v46  ;;  %v1867_v9 = vpop.f32.mrf.mxu0  ;;  %3021 = vmatmul.mubr.msk.bf16.gmra.mxu0 %vm1199_vm1, %v3300_v56  ;;  %v3304_v46 = vld [vmem:[%s4268_s0 + $0x448] ss:$20 sps:$4 sm:$0xff]  }
 0x18a   :  { %2847 = vst [vmem:[%s4269_s2 + $0x8] sm:$0xff] %v2710_v13   ;;  %1808 = vmatprep.mubr.bf16.mxu1 %v3303_v2  ;;  %3024 = vmatprep.mubr.msk.bf16.mxu0 %vm3308_vm0, %v4282_v39  ;;  %v1868_v56 = vadd.f32 %v1867_v9, %v1603_v1  ;;  %v1611_v0 = vadd.f32 %v1610_v17, %v3846_v36 }
 0x18b   :  { %v1612_v20 = vpop.f32.mrf.mxu1  ;;  %v2926_v31 = vpop.f32.mrf.mxu0 }
 0x18c   :  { %v3305_v31 = vld [vmem:[%s4268_s0 + $0x470] ss:$20 sps:$4 sm:$0xff]  }
 0x18d   :  { %v1613_v38 = vpop.f32.mrf.mxu1  ;;  %v1870_v49 = vpop.f32.mrf.mxu0 }
 0x18e   :  { %v1871_v57 = vadd.f32 %v1870_v49, %v1606_v23  ;;  %v1614_v13 = vadd.f32 %v1613_v38, %v3853_v40 }
 0x18f   :  { %v1615_v55 = vpop.f32.mrf.mxu1  ;;  %v2927_v2 = vpop.f32.mrf.mxu0 }
 0x190   :  { %v2715_v3 = vpack.c.bf16 %v1871_v57, %v1868_v56 }
 0x191   :  { %v1618_v24 = vpop.f32.mrf.mxu1  ;;  %1809 = vmatmul.mubr.bf16.gmra.mxu1 %v3301_v5  ;;  %v1875_v25 = vpop.f32.mrf.mxu0  ;;  %3025 = vmatmul.mubr.msk.bf16.gmra.mxu0 %vm1199_vm1, %v3304_v46 }
 0x192   :  { %2848 = vst [vmem:[%s4269_s2 + $0x10] sm:$0xff] %v2715_v3   ;;  %3028 = vmatprep.mubr.msk.bf16.mxu0 %vm3308_vm0, %v4282_v39  ;;  %v1876_v1 = vadd.f32 %v1875_v25, %v1611_v0  ;;  %v1619_v39 = vadd.f32 %v1618_v24, %v3866_v47 }
 0x193   :  { %v1620_v29 = vpop.f32.mrf.mxu1  ;;  %v2930_v7 = vpop.f32.mrf.mxu0 }
 0x195   :  { %v1621_v9 = vpop.f32.mrf.mxu1  ;;  %v1878_v20 = vpop.f32.mrf.mxu0 }
 0x196   :  { %v1879_v23 = vadd.f32 %v1878_v20, %v1614_v13  ;;  %v1622_v17 = vadd.f32 %v1621_v9, %v3873_v51 }
 0x197   :  { %v1623_v49 = vpop.f32.mrf.mxu1  ;;  %v2931_v5 = vpop.f32.mrf.mxu0 }
 0x198   :  { %v2720_v46 = vpack.c.bf16 %v1879_v23, %v1876_v1 }
 0x199   :  { %v1626_v56 = vpop.f32.mrf.mxu1  ;;  %v1883_v57 = vpop.f32.mrf.mxu0  ;;  %3029 = vmatmul.mubr.msk.bf16.gmra.mxu0 %vm1199_vm1, %v3305_v31 }
 0x19a   :  { %2849 = vst [vmem:[%s4269_s2 + $0x18] sm:$0xff] %v2720_v46   ;;  %v1884_v2 = vadd.f32 %v1883_v57, %v1619_v39  ;;  %v1627_v1 = vadd.f32 %v1626_v56, %v3886_v58 }
 0x19b   :  { %v1628_v36 = vpop.f32.mrf.mxu1  ;;  %v2934_v40 = vpop.f32.mrf.mxu0 }
 0x19d   :  { %v1629_v38 = vpop.f32.mrf.mxu1  ;;  %v1886_v55 = vpop.f32.mrf.mxu0 }
 0x19e   :  { %v1887_v3 = vadd.f32 %v1886_v55, %v1622_v17  ;;  %v1630_v47 = vadd.f32 %v1629_v38, %v3893_v62 }
 0x19f   :  { %v1631_v25 = vpop.f32.mrf.mxu1  ;;  %v2935_v29 = vpop.f32.mrf.mxu0 }
 0x1a0   :  { %v2725_v7 = vpack.c.bf16 %v1887_v3, %v1884_v2 }
 0x1a1   :  { %v1634_v0 = vpop.f32.mrf.mxu1  ;;  %v1891_v13 = vpop.f32.mrf.mxu0 }
 0x1a2   :  { %2850 = vst [vmem:[%s4269_s2 + $0x20] sm:$0xff] %v2725_v7   ;;  %v1892_v9 = vadd.f32 %v1891_v13, %v1627_v1  ;;  %v1635_v17 = vadd.f32 %v1634_v0, %v3906_v10 }
 0x1a3   :  { %v1636_v20 = vpop.f32.mrf.mxu1  ;;  %v2938_v31 = vpop.f32.mrf.mxu0 }
 0x1a5   :  { %v1637_v51 = vpop.f32.mrf.mxu1  ;;  %v1894_v24 = vpop.f32.mrf.mxu0 }
 0x1a6   :  { %v1895_v23 = vadd.f32 %v1894_v24, %v1630_v47  ;;  %v1638_v58 = vadd.f32 %v1637_v51, %v3913_v15 }
 0x1a7   :  { %v1639_v49 = vpop.f32.mrf.mxu1  ;;  %v2939_v5 = vpop.f32.mrf.mxu0 }
 0x1a8   :  { %v2730_v46 = vpack.c.bf16 %v1895_v23, %v1892_v9 }
 0x1a9   :  { %v1642_v57 = vpop.f32.mrf.mxu1  ;;  %v1899_v36 = vpop.f32.mrf.mxu0 }
 0x1aa   :  { %2851 = vst [vmem:[%s4269_s2 + $0x28] sm:$0xff] %v2730_v46   ;;  %v1900_v38 = vadd.f32 %v1899_v36, %v1635_v17  ;;  %v1643_v31 = vadd.f32 %v1642_v57, %v3926_v27 }
 0x1ab   :  { %v1644_v40 = vpop.f32.mrf.mxu1  ;;  %v2942_v39 = vpop.f32.mrf.mxu0 }
 0x1ad   :  { %v1645_v62 = vpop.f32.mrf.mxu1  ;;  %v1902_v56 = vpop.f32.mrf.mxu0 }
 0x1ae   :  { %v1903_v55 = vadd.f32 %v1902_v56, %v1638_v58  ;;  %v1646_v10 = vadd.f32 %v1645_v62, %v3933_v33 }
 0x1af   :  { %v1647_v2 = vpop.f32.mrf.mxu1  ;;  %v2943_v3 = vpop.f32.mrf.mxu0 }
 0x1b0   :  { %v2735_v25 = vpack.c.bf16 %v1903_v55, %v1900_v38 }
 0x1b1   :  { %v1650_v29 = vpop.f32.mrf.mxu1  ;;  %v1907_v7 = vpop.f32.mrf.mxu0 }
 0x1b2   :  { %2852 = vst [vmem:[%s4269_s2 + $0x30] sm:$0xff] %v2735_v25   ;;  %v1908_v1 = vadd.f32 %v1907_v7, %v1643_v31  ;;  %v1651_v36 = vadd.f32 %v1650_v29, %v3946_v44 }
 0x1b3   :  { %v1652_v13 = vpop.f32.mrf.mxu1  ;;  %v2946_v20 = vpop.f32.mrf.mxu0 }
 0x1b5   :  { %v1653_v15 = vpop.f32.mrf.mxu1  ;;  %v1910_v0 = vpop.f32.mrf.mxu0 }
 0x1b6   :  { %v1911_v47 = vadd.f32 %v1910_v0, %v1646_v10  ;;  %v1654_v27 = vadd.f32 %v1653_v15, %v3953_v50 }
 0x1b7   :  { %v1655_v51 = vpop.f32.mrf.mxu1  ;;  %v2947_v24 = vpop.f32.mrf.mxu0 }
 0x1b8   :  { %v2740_v9 = vpack.c.bf16 %v1911_v47, %v1908_v1 }
 0x1b9   :  { %v1658_v23 = vpop.f32.mrf.mxu1  ;;  %v1915_v49 = vpop.f32.mrf.mxu0 }
 0x1ba   :  { %2853 = vst [vmem:[%s4269_s2 + $0x38] sm:$0xff] %v2740_v9   ;;  %v1916_v40 = vadd.f32 %v1915_v49, %v1651_v36  ;;  %v1659_v3 = vadd.f32 %v1658_v23, %v3966_v61 }
 0x1bb   :  { %v1660_v5 = vpop.f32.mrf.mxu1  ;;  %v2950_v46 = vpop.f32.mrf.mxu0 }
 0x1bd   :  { %v1661_v33 = vpop.f32.mrf.mxu1  ;;  %v1918_v57 = vpop.f32.mrf.mxu0 }
 0x1be   :  { %v1919_v39 = vadd.f32 %v1918_v57, %v1654_v27  ;;  %v1662_v44 = vadd.f32 %v1661_v33, %v3973_v6 }
 0x1bf   :  { %v1663_v17 = vpop.f32.mrf.mxu1  ;;  %v2951_v58 = vpop.f32.mrf.mxu0 }
 0x1c0   :  { %v2745_v62 = vpack.c.bf16 %v1919_v39, %v1916_v40 }
 0x1c1   :  { %v1666_v56 = vpop.f32.mrf.mxu1  ;;  %v1923_v38 = vpop.f32.mrf.mxu0 }
 0x1c2   :  { %2854 = vst [vmem:[%s4269_s2 + $0x40] sm:$0xff] %v2745_v62   ;;  %v1924_v29 = vadd.f32 %v1923_v38, %v1659_v3  ;;  %v1667_v47 = vadd.f32 %v1666_v56, %v3986_v22 }
 0x1c3   :  { %v1668_v55 = vpop.f32.mrf.mxu1  ;;  %v2954_v2 = vpop.f32.mrf.mxu0 }
 0x1c5   :  { %v1669_v50 = vpop.f32.mrf.mxu1  ;;  %v1926_v25 = vpop.f32.mrf.mxu0 }
 0x1c6   :  { %v1927_v7 = vadd.f32 %v1926_v25, %v1662_v44  ;;  %v1670_v61 = vadd.f32 %v1669_v50, %v3993_v35 }
 0x1c7   :  { %v1671_v13 = vpop.f32.mrf.mxu1  ;;  %v2955_v20 = vpop.f32.mrf.mxu0 }
 0x1c8   :  { %v2750_v31 = vpack.c.bf16 %v1927_v7, %v1924_v29 }
 0x1c9   :  { %v1674_v10 = vpop.f32.mrf.mxu1  ;;  %v1931_v15 = vpop.f32.mrf.mxu0 }
 0x1ca   :  { %2855 = vst [vmem:[%s4269_s2 + $0x48] sm:$0xff] %v2750_v31   ;;  %v1932_v24 = vadd.f32 %v1931_v15, %v1667_v47  ;;  %v1675_v57 = vadd.f32 %v1674_v10, %v4006_v54 }
 0x1cb   :  { %v1676_v0 = vpop.f32.mrf.mxu1  ;;  %v2958_v1 = vpop.f32.mrf.mxu0 }
 0x1cd   :  { %v1677_v6 = vpop.f32.mrf.mxu1  ;;  %v1934_v51 = vpop.f32.mrf.mxu0 }
 0x1ce   :  { %v1935_v9 = vadd.f32 %v1934_v51, %v1670_v61  ;;  %v1678_v22 = vadd.f32 %v1677_v6, %v4013_v60 }
 0x1cf   :  { %v1679_v23 = vpop.f32.mrf.mxu1  ;;  %v2959_v49 = vpop.f32.mrf.mxu0 }
 0x1d0   :  { %v2755_v5 = vpack.c.bf16 %v1935_v9, %v1932_v24 }
 0x1d1   :  { %v1682_v46 = vpop.f32.mrf.mxu1  ;;  %v1939_v36 = vpop.f32.mrf.mxu0 }
 0x1d2   :  { %2856 = vst [vmem:[%s4269_s2 + $0x50] sm:$0xff] %v2755_v5   ;;  %v1940_v39 = vadd.f32 %v1939_v36, %v1675_v57  ;;  %v1683_v44 = vadd.f32 %v1682_v46, %v4026_v21 }
 0x1d3   :  { %v1684_v27 = vpop.f32.mrf.mxu1  ;;  %v2962_v33 = vpop.f32.mrf.mxu0 }
 0x1d5   :  { %v1685_v35 = vpop.f32.mrf.mxu1  ;;  %v1942_v40 = vpop.f32.mrf.mxu0 }
 0x1d6   :  { %v1943_v17 = vadd.f32 %v1942_v40, %v1678_v22  ;;  %v1686_v54 = vadd.f32 %v1685_v35, %v4033_v42 }
 0x1d7   :  { %v1687_v58 = vpop.f32.mrf.mxu1  ;;  %v2963_v62 = vpop.f32.mrf.mxu0 }
 0x1d8   :  { %v2760_v56 = vpack.c.bf16 %v1943_v17, %v1940_v39 }
 0x1d9   :  { %v1690_v38 = vpop.f32.mrf.mxu1  ;;  %v1947_v55 = vpop.f32.mrf.mxu0 }
 0x1da   :  { %2857 = vst [vmem:[%s4269_s2 + $0x58] sm:$0xff] %v2760_v56   ;;  %v1948_v25 = vadd.f32 %v1947_v55, %v1683_v44  ;;  %v1691_v1 = vadd.f32 %v1690_v38, %v4046_v12 }
 0x1db   :  { %v1692_v2 = vpop.f32.mrf.mxu1  ;;  %v2966_v3 = vpop.f32.mrf.mxu0 }
 0x1dd   :  { %v1693_v60 = vpop.f32.mrf.mxu1  ;;  %v1950_v50 = vpop.f32.mrf.mxu0 }
 0x1de   :  { %v1951_v29 = vadd.f32 %v1950_v50, %v1686_v54  ;;  %v1694_v21 = vadd.f32 %v1693_v60, %v4053_v32 }
 0x1df   :  { %v1695_v7 = vpop.f32.mrf.mxu1  ;;  %v2967_v13 = vpop.f32.mrf.mxu0 }
 0x1e0   :  { %v2765_v20 = vpack.c.bf16 %v1951_v29, %v1948_v25 }
 0x1e1   :  { %v1698_v31 = vpop.f32.mrf.mxu1  ;;  %v1955_v10 = vpop.f32.mrf.mxu0 }
 0x1e2   :  { %2858 = vst [vmem:[%s4269_s2 + $0x60] sm:$0xff] %v2765_v20   ;;  %v1956_v61 = vadd.f32 %v1955_v10, %v1691_v1  ;;  %v1699_v36 = vadd.f32 %v1698_v31, %v4066_v19 }
 0x1e3   :  { %v1700_v15 = vpop.f32.mrf.mxu1  ;;  %v2970_v0 = vpop.f32.mrf.mxu0 }
 0x1e5   :  { %v1701_v42 = vpop.f32.mrf.mxu1  ;;  %v1958_v47 = vpop.f32.mrf.mxu0 }
 0x1e6   :  { %v1959_v6 = vadd.f32 %v1958_v47, %v1694_v21  ;;  %v1702_v12 = vadd.f32 %v1701_v42, %v4071_v43 }
 0x1e7   :  { %v1703_v51 = vpop.f32.mrf.mxu1  ;;  %v2971_v24 = vpop.f32.mrf.mxu0 }
 0x1e8   :  { %v2770_v9 = vpack.c.bf16 %v1959_v6, %v1956_v61 }
 0x1e9   :  { %v1706_v23 = vpop.f32.mrf.mxu1  ;;  %v1963_v49 = vpop.f32.mrf.mxu0 }
 0x1ea   :  { %2859 = vst [vmem:[%s4269_s2 + $0x68] sm:$0xff] %v2770_v9   ;;  %v1964_v33 = vadd.f32 %v1963_v49, %v1699_v36  ;;  %v1707_v56 = vadd.f32 %v1706_v23, %v3788_v4 }
 0x1eb   :  { %v1708_v5 = vpop.f32.mrf.mxu1  ;;  %v2974_v46 = vpop.f32.mrf.mxu0 }
 0x1ed   :  { %v1709_v32 = vpop.f32.mrf.mxu1  ;;  %v1966_v27 = vpop.f32.mrf.mxu0 }
 0x1ee   :  { %v1967_v57 = vadd.f32 %v1966_v27, %v1702_v12  ;;  %v1710_v19 = vadd.f32 %v1709_v32, %v3795_v8 }
 0x1ef   :  { %v1711_v22 = vpop.f32.mrf.mxu1  ;;  %v2975_v35 = vpop.f32.mrf.mxu0 }
 0x1f0   :  { %v2775_v40 = vpack.c.bf16 %v1967_v57, %v1964_v33 }
 0x1f1   :  { %v1714_v39 = vpop.f32.mrf.mxu1  ;;  %v1971_v17 = vpop.f32.mrf.mxu0 }
 0x1f2   :  { %2860 = vst [vmem:[%s4269_s2 + $0x70] sm:$0xff] %v2775_v40   ;;  %v1972_v55 = vadd.f32 %v1971_v17, %v1707_v56  ;;  %v1715_v7 = vadd.f32 %v1714_v39, %v3808_v14 }
 0x1f3   :  { %v1716_v58 = vpop.f32.mrf.mxu1  ;;  %v2978_v62 = vpop.f32.mrf.mxu0 }
 0x1f5   :  { %v1717_v43 = vpop.f32.mrf.mxu1  ;;  %v1974_v38 = vpop.f32.mrf.mxu0 }
 0x1f6   :  { %v1975_v2 = vadd.f32 %v1974_v38, %v1710_v19  ;;  %v1718_v4 = vadd.f32 %v1717_v43, %v3815_v18 }
 0x1f7   :  { %v1719_v3 = vpop.f32.mrf.mxu1  ;;  %v2979_v44 = vpop.f32.mrf.mxu0 }
 0x1f8   :  { %v2780_v54 = vpack.c.bf16 %v1975_v2, %v1972_v55 }
 0x1f9   :  { %v1722_v60 = vpop.f32.mrf.mxu1  ;;  %v1979_v50 = vpop.f32.mrf.mxu0 }
 0x1fa   :  { %2861 = vst [vmem:[%s4269_s2 + $0x78] sm:$0xff] %v2780_v54   ;;  %v1980_v20 = vadd.f32 %v1979_v50, %v1715_v7  ;;  %v1723_v61 = vadd.f32 %v1722_v60, %v3828_v26 }
 0x1fb   :  { %v1724_v25 = vpop.f32.mrf.mxu1  ;;  %v2982_v29 = vpop.f32.mrf.mxu0 }
 0x1fd   :  { %v1725_v8 = vpop.f32.mrf.mxu1  ;;  %v1982_v13 = vpop.f32.mrf.mxu0 }
 0x1fe   :  { %v1983_v31 = vadd.f32 %v1982_v13, %v1718_v4  ;;  %v1726_v14 = vadd.f32 %v1725_v8, %v3835_v30 }
 0x1ff   :  { %v1727_v10 = vpop.f32.mrf.mxu1  ;;  %v2983_v15 = vpop.f32.mrf.mxu0 }
 0x200   :  { %v2785_v0 = vpack.c.bf16 %v1983_v31, %v1980_v20 }
 0x201   :  { %v1730_v1 = vpop.f32.mrf.mxu1  ;;  %v1987_v21 = vpop.f32.mrf.mxu0 }
 0x202   :  { %2862 = vst [vmem:[%s4269_s2 + $0x80] sm:$0xff] %v2785_v0   ;;  %v1988_v51 = vadd.f32 %v1987_v21, %v1723_v61  ;;  %v1731_v32 = vadd.f32 %v1730_v1, %v3848_v37 }
 0x203   :  { %v1732_v42 = vpop.f32.mrf.mxu1  ;;  %v2986_v47 = vpop.f32.mrf.mxu0 }
 0x205   :  { %v1733_v18 = vpop.f32.mrf.mxu1  ;;  %v1990_v6 = vpop.f32.mrf.mxu0 }
 0x206   :  { %v1991_v24 = vadd.f32 %v1990_v6, %v1726_v14  ;;  %v1734_v26 = vadd.f32 %v1733_v18, %v3855_v41 }
 0x207   :  { %v1735_v9 = vpop.f32.mrf.mxu1  ;;  %v2987_v23 = vpop.f32.mrf.mxu0 }
 0x208   :  { %v2790_v49 = vpack.c.bf16 %v1991_v24, %v1988_v51 }
 0x209   :  { %v1738_v5 = vpop.f32.mrf.mxu1  ;;  %v1995_v46 = vpop.f32.mrf.mxu0 }
 0x20a   :  { %2863 = vst [vmem:[%s4269_s2 + $0x88] sm:$0xff] %v2790_v49   ;;  %v1996_v33 = vadd.f32 %v1995_v46, %v1731_v32  ;;  %v1739_v56 = vadd.f32 %v1738_v5, %v3868_v48 }
 0x20b   :  { %v1740_v36 = vpop.f32.mrf.mxu1  ;;  %v2990_v12 = vpop.f32.mrf.mxu0 }
 0x20d   :  { %v1741_v30 = vpop.f32.mrf.mxu1  ;;  %v1998_v27 = vpop.f32.mrf.mxu0 }
 0x20e   :  { %v1999_v57 = vadd.f32 %v1998_v27, %v1734_v26  ;;  %v1742_v37 = vadd.f32 %v1741_v30, %v3875_v52 }
 0x20f   :  { %v1743_v22 = vpop.f32.mrf.mxu1  ;;  %v2991_v35 = vpop.f32.mrf.mxu0 }
 0x210   :  { %v2795_v40 = vpack.c.bf16 %v1999_v57, %v1996_v33 }
 0x211   :  { %v1746_v39 = vpop.f32.mrf.mxu1  ;;  %v2003_v17 = vpop.f32.mrf.mxu0 }
 0x212   :  { %2864 = vst [vmem:[%s4269_s2 + $0x90] sm:$0xff] %v2795_v40   ;;  %v2004_v43 = vadd.f32 %v2003_v17, %v1739_v56  ;;  %v1747_v25 = vadd.f32 %v1746_v39, %v3888_v59 }
 0x213   :  { %v1748_v58 = vpop.f32.mrf.mxu1  ;;  %v2994_v62 = vpop.f32.mrf.mxu0 }
 0x215   :  { %v1749_v41 = vpop.f32.mrf.mxu1  ;;  %v2006_v19 = vpop.f32.mrf.mxu0 }
 0x216   :  { %v2007_v38 = vadd.f32 %v2006_v19, %v1742_v37  ;;  %v1750_v48 = vadd.f32 %v1749_v41, %v3895_v63  ;;  %v4283_v19 = vld [vmem:[#allocation2_spill] sm:$0xff] }
 0x217   :  { %v1751_v55 = vpop.f32.mrf.mxu1  ;;  %v2995_v2 = vpop.f32.mrf.mxu0 }
 0x218   :  { %v2800_v3 = vpack.c.bf16 %v2007_v38, %v2004_v43 }
 0x219   :  { %v1754_v44 = vpop.f32.mrf.mxu1  ;;  %v2011_v54 = vpop.f32.mrf.mxu0 }
 0x21a   :  { %2865 = vst [vmem:[%s4269_s2 + $0x98] sm:$0xff] %v2800_v3   ;;  %v2012_v7 = vadd.f32 %v2011_v54, %v1747_v25  ;;  %v1755_v1 = vadd.f32 %v1754_v44, %v3908_v11 }
 0x21b   :  { %v1756_v60 = vpop.f32.mrf.mxu1  ;;  %v2998_v50 = vpop.f32.mrf.mxu0 }
 0x21d   :  { %v1757_v52 = vpop.f32.mrf.mxu1  ;;  %v2014_v29 = vpop.f32.mrf.mxu0 }
 0x21e   :  { %v2015_v4 = vadd.f32 %v2014_v29, %v1750_v48  ;;  %v1758_v59 = vadd.f32 %v1757_v52, %v3915_v16  ;;  %v4285_v29 = vld [vmem:[#allocation4_spill] sm:$0xff] }
 0x21f   :  { %v1759_v8 = vpop.f32.mrf.mxu1  ;;  %v2999_v13 = vpop.f32.mrf.mxu0 }
 0x220   :  { %v2805_v20 = vpack.c.bf16 %v2015_v4, %v2012_v7  ;;  %v4286_v4 = vld [vmem:[#allocation5_spill] sm:$0xff] }
 0x221   :  { %v1762_v31 = vpop.f32.mrf.mxu1  ;;  %v2019_v10 = vpop.f32.mrf.mxu0 }
 0x222   :  { %2866 = vst [vmem:[%s4269_s2 + $0xa0] sm:$0xff] %v2805_v20   ;;  %v2020_v42 = vadd.f32 %v2019_v10, %v1755_v1  ;;  %v1763_v23 = vadd.f32 %v1762_v31, %v3928_v28 }
 0x223   :  { %v1764_v15 = vpop.f32.mrf.mxu1  ;;  %v3002_v0 = vpop.f32.mrf.mxu0 }
 0x225   :  { %v1765_v63 = vpop.f32.mrf.mxu1  ;;  %v2022_v21 = vpop.f32.mrf.mxu0 }
 0x226   :  { %v2023_v47 = vadd.f32 %v2022_v21, %v1758_v59  ;;  %v1766_v11 = vadd.f32 %v1765_v63, %v3935_v34 }
 0x227   :  { %v1767_v61 = vpop.f32.mrf.mxu1  ;;  %v3003_v14 = vpop.f32.mrf.mxu0 }
 0x228   :  { %v2810_v18 = vpack.c.bf16 %v2023_v47, %v2020_v42  ;;  %v4287_v47 = vld [vmem:[#allocation6_spill] sm:$0xff]  ;;  %v4288_v14 = vld [vmem:[#allocation7_spill] sm:$0xff] }
 0x229   :  { %v1770_v6 = vpop.f32.mrf.mxu1  ;;  %v2027_v51 = vpop.f32.mrf.mxu0 }
 0x22a   :  { %2867 = vst [vmem:[%s4269_s2 + $0xa8] sm:$0xff] %v2810_v18   ;;  %v2028_v5 = vadd.f32 %v2027_v51, %v1763_v23  ;;  %v1771_v57 = vadd.f32 %v1770_v6, %v3948_v45  ;;  %v4284_v45 = vld [vmem:[#allocation3_spill] sm:$0xff] }
 0x22b   :  { %v1772_v24 = vpop.f32.mrf.mxu1  ;;  %v3006_v9 = vpop.f32.mrf.mxu0 }
 0x22d   :  { %v1773_v16 = vpop.f32.mrf.mxu1  ;;  %v2030_v49 = vpop.f32.mrf.mxu0 }
 0x22e   :  { %v2031_v46 = vadd.f32 %v2030_v49, %v1766_v11  ;;  %v1774_v28 = vadd.f32 %v1773_v16, %v3955_v53 }
 0x22f   :  { %v1775_v36 = vpop.f32.mrf.mxu1  ;;  %v3007_v12 = vpop.f32.mrf.mxu0 }
 0x230   :  { %v2815_v32 = vpack.c.bf16 %v2031_v46, %v2028_v5  ;;  %v4289_v12 = vld [vmem:[#allocation8_spill] sm:$0xff] }
 0x231   :  { %v1778_v26 = vpop.f32.mrf.mxu1  ;;  %v2035_v30 = vpop.f32.mrf.mxu0 }
 0x232   :  { %2868 = vst [vmem:[%s4269_s2 + $0xb0] sm:$0xff] %v2815_v32   ;;  %v2036_v35 = vadd.f32 %v2035_v30, %v1771_v57  ;;  %v1779_v43 = vadd.f32 %v1778_v26, %v4283_v19  ;;  %v4290_v26 = vld [vmem:[#allocation9_spill] sm:$0xff] }
 0x233   :  { %v1780_v27 = vpop.f32.mrf.mxu1  ;;  %v3010_v33 = vpop.f32.mrf.mxu0 }
 0x235   :  { %v1781_v34 = vpop.f32.mrf.mxu1  ;;  %v2038_v22 = vpop.f32.mrf.mxu0 }
 0x236   :  { %v2039_v40 = vadd.f32 %v2038_v22, %v1774_v28  ;;  %v1782_v38 = vadd.f32 %v1781_v34, %v4284_v45 }
 0x237   :  { %v1783_v39 = vpop.f32.mrf.mxu1  ;;  %v3011_v17 = vpop.f32.mrf.mxu0 }
 0x238   :  { %v2820_v58 = vpack.c.bf16 %v2039_v40, %v2036_v35  ;;  %v4291_v17 = vld [vmem:[#allocation10_spill] sm:$0xff] }
 0x239   :  { %v1786_v62 = vpop.f32.mrf.mxu1  ;;  %v2043_v56 = vpop.f32.mrf.mxu0 }
 0x23a   :  { %2869 = vst [vmem:[%s4269_s2 + $0xb8] sm:$0xff] %v2820_v58   ;;  %v2044_v2 = vadd.f32 %v2043_v56, %v1779_v43  ;;  %v1787_v7 = vadd.f32 %v1786_v62, %v4285_v29  ;;  %v4292_v62 = vld [vmem:[#allocation11_spill] sm:$0xff] }
 0x23b   :  { %v1788_v37 = vpop.f32.mrf.mxu1  ;;  %v3014_v41 = vpop.f32.mrf.mxu0 }
 0x23d   :  { %v1789_v53 = vpop.f32.mrf.mxu1  ;;  %v2046_v55 = vpop.f32.mrf.mxu0 }
 0x23e   :  { %v2047_v3 = vadd.f32 %v2046_v55, %v1782_v38  ;;  %v1790_v8 = vadd.f32 %v1789_v53, %v4286_v4 }
 0x23f   :  { %v1791_v44 = vpop.f32.mrf.mxu1  ;;  %v3015_v54 = vpop.f32.mrf.mxu0 }
 0x240   :  { %v2825_v60 = vpack.c.bf16 %v2047_v3, %v2044_v2 }
 0x241   :  { %v1794_v50 = vpop.f32.mrf.mxu1  ;;  %v2051_v25 = vpop.f32.mrf.mxu0 }
 0x242   :  { %2870 = vst [vmem:[%s4269_s2 + $0xc0] sm:$0xff] %v2825_v60   ;;  %v2052_v31 = vadd.f32 %v2051_v25, %v1787_v7  ;;  %v1795_v61 = vadd.f32 %v1794_v50, %v4287_v47 }
 0x243   :  { %v1796_v48 = vpop.f32.mrf.mxu1  ;;  %v3018_v52 = vpop.f32.mrf.mxu0 }
 0x245   :  { %v1797_v13 = vpop.f32.mrf.mxu1  ;;  %v2054_v20 = vpop.f32.mrf.mxu0 }
 0x246   :  { %v2055_v10 = vadd.f32 %v2054_v20, %v1790_v8  ;;  %v1798_v18 = vadd.f32 %v1797_v13, %v4288_v14 }
 0x247   :  { %v1799_v15 = vpop.f32.mrf.mxu1  ;;  %v3019_v0 = vpop.f32.mrf.mxu0 }
 0x248   :  { %v2830_v1 = vpack.c.bf16 %v2055_v10, %v2052_v31 }
 0x249   :  { %v1802_v59 = vpop.f32.mrf.mxu1  ;;  %v2059_v63 = vpop.f32.mrf.mxu0 }
 0x24a   :  { %2871 = vst [vmem:[%s4269_s2 + $0xc8] sm:$0xff] %v2830_v1   ;;  %v2060_v24 = vadd.f32 %v2059_v63, %v1795_v61  ;;  %v1803_v32 = vadd.f32 %v1802_v59, %v4289_v12 }
 0x24b   :  { %v1804_v21 = vpop.f32.mrf.mxu1  ;;  %v3022_v42 = vpop.f32.mrf.mxu0 }
 0x24d   :  { %v1805_v6 = vpop.f32.mrf.mxu1  ;;  %v2062_v51 = vpop.f32.mrf.mxu0 }
 0x24e   :  { %v2063_v9 = vadd.f32 %v2062_v51, %v1798_v18  ;;  %v1806_v30 = vadd.f32 %v1805_v6, %v4290_v26 }
 0x24f   :  { %v1807_v23 = vpop.f32.mrf.mxu1  ;;  %v3023_v11 = vpop.f32.mrf.mxu0 }
 0x250   :  { %v2835_v16 = vpack.c.bf16 %v2063_v9, %v2060_v24 }
 0x251   :  { %v1810_v49 = vpop.f32.mrf.mxu1  ;;  %v2067_v5 = vpop.f32.mrf.mxu0 }
 0x252   :  { %2872 = vst [vmem:[%s4269_s2 + $0xd0] sm:$0xff] %v2835_v16   ;;  %v2068_v57 = vadd.f32 %v2067_v5, %v1803_v32  ;;  %v1811_v58 = vadd.f32 %v1810_v49, %v4291_v17 }
 0x253   :  { %v1812_v46 = vpop.f32.mrf.mxu1  ;;  %v3026_v36 = vpop.f32.mrf.mxu0 }
 0x255   :  { %v1813_v27 = vpop.f32.mrf.mxu1  ;;  %v2070_v33 = vpop.f32.mrf.mxu0 }
 0x256   :  { %v2071_v28 = vadd.f32 %v2070_v33, %v1806_v30  ;;  %v1814_v56 = vadd.f32 %v1813_v27, %v4292_v62 }
 0x257   :  { %v3027_v34 = vpop.f32.mrf.mxu0  ;;  %v1815_v22 = vpop.f32.mrf.mxu1 }
 0x258   :  { %v2840_v35 = vpack.c.bf16 %v2071_v28, %v2068_v57 }
 0x259   :  { %v2075_v40 = vpop.f32.mrf.mxu0 }
 0x25a   :  { %2873 = vst [vmem:[%s4269_s2 + $0xd8] sm:$0xff] %v2840_v35   ;;  %v2076_v41 = vadd.f32 %v2075_v40, %v1811_v58 }
 0x25b   :  { %v3030_v39 = vpop.f32.mrf.mxu0 }
 0x25d   :  { %v2078_v37 = vpop.f32.mrf.mxu0 }
 0x25e   :  { %v2079_v19 = vadd.f32 %v2078_v37, %v1814_v56 }
 0x25f   :  { %v3031_v43 = vpop.f32.mrf.mxu0 }
 0x260   :  { %v2845_v45 = vpack.c.bf16 %v2079_v19, %v2076_v41 }
 0x262   :  { %2874 = vst [vmem:[%s4269_s2 + $0xe0] sm:$0xff] %v2845_v45  }

// kernel: seafar_forward.14
= control target key start
LH: loop header
LB: loop body
LE: loop exit
PB: predicated region body
PF: predicated region fallthrough
CT: control target
= control target key end

     0   :  { %v2339_v0 = vmov 0   ;;  %v2340_v2 = vmov 0.0   ;;  %vm2341_vm0 = vmmov 0   ;;  %vm715_vm1 = vcmask 261120   ;;  %s3100_s1 = inlined_call_operand.vmem [shape: bf16[288,128], index: 1, kind: input, shape index: {}]   ;;  %s3101_s0 = inlined_call_operand.vmem [shape: bf16[464,288], index: 0, kind: input, shape index: {}]   ;;  %s3102_s2 = inlined_call_operand.vmem [shape: f32[8,128], index: 2, kind: input, shape index: {}]   ;;  %s3103_s3 = inlined_call_operand.vmem [shape: bf16[464,128], index: 3, kind: output, shape index: {}]  }
   0x1   :  { %803 = vmatprep.subr.bf16.mxu0 %v2339_v0  ;;  %v2205_v1 = vld [vmem:[%s3100_s1 + $0x38] sm:$0xff]   ;;  %2082 = vmatprep.subr.bf16.mxu1 %v2340_v2  ;;  %v2206_v3 = vld [vmem:[%s3100_s1 + $0x30] sm:$0xff]   ;;  %v2207_v4 = vld [vmem:[%s3100_s1 + $0x28] sm:$0xff]  }
   0x2   :  { %2086 = vmatprep.mubr.msk.bf16.mxu1 %vm2341_vm0, %v2340_v2  ;;  %804 = vmatpush1.bf16.msra.mxu0 %v2205_v1  ;;  %v2208_v5 = vld [vmem:[%s3100_s1 + $0x20] sm:$0xff]   ;;  %v2209_v6 = vld [vmem:[%s3100_s1 + $0x18] sm:$0xff]   ;;  %v2219_v7 = vld [vmem:[%s3100_s1 + $0x88] sm:$0xff]  }
   0x3   :  { %805 = vmatprep.subr.bf16.mxu0 %v2339_v0  ;;  %2083 = vmatpush3.bf16.msra.mxu1 %v2219_v7  ;;  %v2221_v8 = vld [vmem:[%s3100_s1 + $0x80] sm:$0xff]   ;;  %v2210_v9 = vld [vmem:[%s3100_s1 + $0x10] sm:$0xff]   ;;  %v2211_v12 = vld [vmem:[%s3100_s1 + $0x8] sm:$0xff]  }
   0x4   :  { %2084 = vmatprep.subr.bf16.mxu1 %v2340_v2  ;;  %v2222_v10 = vld [vmem:[%s3101_s0 + $0x8] ss:$12 sps:$4 sm:$0xff]   ;;  %v2226_v11 = vld [vmem:[%s3101_s0 + $0x4] ss:$12 sps:$4 sm:$0xff]   ;;  %v2227_v14 = vld [vmem:[%s3101_s0 + $0x20] ss:$12 sps:$4 sm:$0xff]  }
   0x5   :  { %835 = vmatprep.mubr.bf16.mxu0 %v2226_v11  ;;  %v2212_v13 = vld [vmem:[%s3100_s1] sm:$0xff]   ;;  %v2213_v15 = vld [vmem:[%s3100_s1 + $0x78] sm:$0xff]   ;;  %v2214_v16 = vld [vmem:[%s3100_s1 + $0x70] sm:$0xff]  }
   0x6   :  { %806 = vmatpush1.bf16.msra.mxu0 %v2206_v3  ;;  %v2231_v17 = vld [vmem:[%s3101_s0 + $0x38] ss:$12 sps:$4 sm:$0xff]   ;;  %v2215_v18 = vld [vmem:[%s3100_s1 + $0x68] sm:$0xff]   ;;  %v2235_v20 = vld [vmem:[%s3101_s0 + $0x50] ss:$12 sps:$4 sm:$0xff]  }
   0x7   :  { %807 = vmatprep.subr.bf16.mxu0 %v2339_v0  ;;  %2085 = vmatpush3.bf16.msra.mxu1 %v2221_v8  ;;  %v2216_v19 = vld [vmem:[%s3100_s1 + $0x60] sm:$0xff]   ;;  %v2217_v21 = vld [vmem:[%s3100_s1 + $0x58] sm:$0xff]   ;;  %v2218_v22 = vld [vmem:[%s3100_s1 + $0x50] sm:$0xff]  }
   0x8   :  { %v2239_v23 = vld [vmem:[%s3101_s0 + $0x68] ss:$12 sps:$4 sm:$0xff]   ;;  %v2223_v25 = vld [vmem:[%s3100_s1 + $0x40] sm:$0xff]   ;;  %v2251_v32 = vld [vmem:[%s3101_s0 + $0xb0] ss:$12 sps:$4 sm:$0xff]  }
   0x9   :  { %v2220_v24 = vld [vmem:[%s3100_s1 + $0x48] sm:$0xff]   ;;  %v2247_v29 = vld [vmem:[%s3101_s0 + $0x98] ss:$12 sps:$4 sm:$0xff]   ;;  %v2232_v31 = vld [vmem:[%s3101_s0 + $0x34] ss:$12 sps:$4 sm:$0xff]  }
   0xa   :  { %808 = vmatpush1.bf16.msra.mxu0 %v2207_v4  ;;  %2087 = vmatmul.mubr.msk.bf16.vlgmr.msra.gmra.mxu1 %vm715_vm1, %v2222_v10  ;;  %v2243_v26 = vld [vmem:[%s3101_s0 + $0x80] ss:$12 sps:$4 sm:$0xff]   ;;  %v2228_v28 = vld [vmem:[%s3101_s0 + $0x1c] ss:$12 sps:$4 sm:$0xff]   ;;  %v2230_v30 = vld [vmem:[%s3101_s0 + $0x18] ss:$12 sps:$4 sm:$0xff]  }
   0xb   :  { %809 = vmatprep.subr.bf16.mxu0 %v2339_v0  ;;  %2090 = vmatprep.mubr.msk.bf16.mxu1 %vm2341_vm0, %v2340_v2  ;;  %v2224_v27 = vld [vmem:[%s3101_s0] ss:$12 sps:$4 sm:$0xff]   ;;  %v2234_v33 = vld [vmem:[%s3101_s0 + $0x30] ss:$12 sps:$4 sm:$0xff]   ;;  %v2255_v35 = vld [vmem:[%s3101_s0 + $0xc8] ss:$12 sps:$4 sm:$0xff]  }
   0xc   :  { %v2236_v34 = vld [vmem:[%s3101_s0 + $0x4c] ss:$12 sps:$4 sm:$0xff]   ;;  %v2238_v36 = vld [vmem:[%s3101_s0 + $0x48] ss:$12 sps:$4 sm:$0xff]   ;;  %v2240_v37 = vld [vmem:[%s3101_s0 + $0x64] ss:$12 sps:$4 sm:$0xff]  }
   0xd   :  { %v2259_v38 = vld [vmem:[%s3101_s0 + $0xe0] ss:$12 sps:$4 sm:$0xff]   ;;  %v2244_v40 = vld [vmem:[%s3101_s0 + $0x7c] ss:$12 sps:$4 sm:$0xff]   ;;  %v2263_v41 = vld [vmem:[%s3101_s0 + $0xf8] ss:$12 sps:$4 sm:$0xff]  }
   0xe   :  { %810 = vmatpush1.bf16.msra.mxu0 %v2208_v5  ;;  %v2242_v39 = vld [vmem:[%s3101_s0 + $0x60] ss:$12 sps:$4 sm:$0xff]   ;;  %v2246_v42 = vld [vmem:[%s3101_s0 + $0x78] ss:$12 sps:$4 sm:$0xff]   ;;  %v2267_v44 = vld [vmem:[%s3101_s0 + $0x110] ss:$12 sps:$4 sm:$0xff]  }
   0xf   :  { %811 = vmatprep.subr.bf16.mxu0 %v2339_v0  ;;  %v2248_v43 = vld [vmem:[%s3101_s0 + $0x94] ss:$12 sps:$4 sm:$0xff]   ;;  %v2250_v45 = vld [vmem:[%s3101_s0 + $0x90] ss:$12 sps:$4 sm:$0xff]   ;;  %v2252_v46 = vld [vmem:[%s3101_s0 + $0xac] ss:$12 sps:$4 sm:$0xff]  }
  0x10   :  { %v2271_v47 = vld [vmem:[%s3101_s0 + $0x128] ss:$12 sps:$4 sm:$0xff]   ;;  %v2256_v49 = vld [vmem:[%s3101_s0 + $0xc4] ss:$12 sps:$4 sm:$0xff]   ;;  %v2275_v50 = vld [vmem:[%s3101_s0 + $0x140] ss:$12 sps:$4 sm:$0xff]  }
  0x11   :  { %v2254_v48 = vld [vmem:[%s3101_s0 + $0xa8] ss:$12 sps:$4 sm:$0xff]   ;;  %v2258_v51 = vld [vmem:[%s3101_s0 + $0xc0] ss:$12 sps:$4 sm:$0xff]   ;;  %v2279_v53 = vld [vmem:[%s3101_s0 + $0x158] ss:$12 sps:$4 sm:$0xff]  }
  0x12   :  { %812 = vmatpush1.bf16.msra.mxu0 %v2209_v6  ;;  %2091 = vmatmul.mubr.msk.bf16.gmra.mxu1 %vm715_vm1, %v2227_v14  ;;  %v2260_v52 = vld [vmem:[%s3101_s0 + $0xdc] ss:$12 sps:$4 sm:$0xff]   ;;  %v2262_v54 = vld [vmem:[%s3101_s0 + $0xd8] ss:$12 sps:$4 sm:$0xff]   ;;  %v2264_v55 = vld [vmem:[%s3101_s0 + $0xf4] ss:$12 sps:$4 sm:$0xff]  }
  0x13   :  { %813 = vmatprep.subr.bf16.mxu0 %v2339_v0  ;;  %2094 = vmatprep.mubr.msk.bf16.mxu1 %vm2341_vm0, %v2340_v2  ;;  %v2283_v56 = vld [vmem:[%s3101_s0 + $0x170] ss:$12 sps:$4 sm:$0xff]   ;;  %v2268_v58 = vld [vmem:[%s3101_s0 + $0x10c] ss:$12 sps:$4 sm:$0xff]   ;;  %v2287_v59 = vld [vmem:[%s3101_s0 + $0x188] ss:$12 sps:$4 sm:$0xff]  }
  0x14   :  { %v2266_v57 = vld [vmem:[%s3101_s0 + $0xf0] ss:$12 sps:$4 sm:$0xff]   ;;  %v2270_v60 = vld [vmem:[%s3101_s0 + $0x108] ss:$12 sps:$4 sm:$0xff]   ;;  %v2291_v62 = vld [vmem:[%s3101_s0 + $0x1a0] ss:$12 sps:$4 sm:$0xff]  }
  0x15   :  { %v2272_v61 = vld [vmem:[%s3101_s0 + $0x124] ss:$12 sps:$4 sm:$0xff]   ;;  %v2274_v63 = vld [vmem:[%s3101_s0 + $0x120] ss:$12 sps:$4 sm:$0xff]   ;;  %v2303_v8 = vld [vmem:[%s3101_s0 + $0x1e8] ss:$12 sps:$4 sm:$0xff]  }
  0x16   :  { %814 = vmatpush1.bf16.msra.mxu0 %v2210_v9  ;;  %v2295_v1 = vld [vmem:[%s3101_s0 + $0x1b8] ss:$12 sps:$4 sm:$0xff]   ;;  %v2280_v4 = vld [vmem:[%s3101_s0 + $0x154] ss:$12 sps:$4 sm:$0xff]   ;;  %v2299_v5 = vld [vmem:[%s3101_s0 + $0x1d0] ss:$12 sps:$4 sm:$0xff]  }
  0x17   :  { %815 = vmatprep.subr.bf16.mxu0 %v2339_v0  ;;  %v2278_v3 = vld [vmem:[%s3101_s0 + $0x138] ss:$12 sps:$4 sm:$0xff]   ;;  %v2282_v6 = vld [vmem:[%s3101_s0 + $0x150] ss:$12 sps:$4 sm:$0xff]   ;;  %v2286_v9 = vld [vmem:[%s3101_s0 + $0x168] ss:$12 sps:$4 sm:$0xff]  }
  0x18   :  { %v2284_v7 = vld [vmem:[%s3101_s0 + $0x16c] ss:$12 sps:$4 sm:$0xff]   ;;  %v2288_v10 = vld [vmem:[%s3101_s0 + $0x184] ss:$12 sps:$4 sm:$0xff]  }
  0x19   :  { %v2307_v11 = vld [vmem:[%s3101_s0 + $0x200] ss:$12 sps:$4 sm:$0xff]   ;;  %v2311_v14 = vld [vmem:[%s3101_s0 + $0x218] ss:$12 sps:$4 sm:$0xff]  }
  0x1a   :  { %816 = vmatpush1.bf16.msra.mxu0 %v2211_v12  ;;  %2095 = vmatmul.mubr.msk.bf16.gmra.mxu1 %vm715_vm1, %v2231_v17  ;;  %v2290_v12 = vld [vmem:[%s3101_s0 + $0x180] ss:$12 sps:$4 sm:$0xff]   ;;  %v2315_v17 = vld [vmem:[%s3101_s0 + $0x230] ss:$12 sps:$4 sm:$0xff]  }
  0x1b   :  { %817 = vmatprep.subr.bf16.mxu0 %v2339_v0  ;;  %2098 = vmatprep.mubr.msk.bf16.mxu1 %vm2341_vm0, %v2340_v2 }
  0x1e   :  { %818 = vmatpush1.bf16.msra.mxu0 %v2212_v13  ;;  %v2292_v13 = vld [vmem:[%s3101_s0 + $0x19c] ss:$12 sps:$4 sm:$0xff]  }
  0x1f   :  { %819 = vmatprep.subr.bf16.mxu0 %v2339_v0 }
  0x22   :  { %820 = vmatpush2.bf16.msra.mxu0 %v2213_v15  ;;  %2099 = vmatmul.mubr.msk.bf16.gmra.mxu1 %vm715_vm1, %v2235_v20  ;;  %v2294_v15 = vld [vmem:[%s3101_s0 + $0x198] ss:$12 sps:$4 sm:$0xff]   ;;  %v2319_v20 = vld [vmem:[%s3101_s0 + $0x248] ss:$12 sps:$4 sm:$0xff]  }
  0x23   :  { %821 = vmatprep.subr.bf16.mxu0 %v2339_v0  ;;  %2102 = vmatprep.mubr.msk.bf16.mxu1 %vm2341_vm0, %v2340_v2 }
  0x26   :  { %822 = vmatpush2.bf16.msra.mxu0 %v2214_v16  ;;  %v2296_v16 = vld [vmem:[%s3101_s0 + $0x1b4] ss:$12 sps:$4 sm:$0xff]  }
  0x27   :  { %823 = vmatprep.subr.bf16.mxu0 %v2339_v0 }
  0x2a   :  { %824 = vmatpush2.bf16.msra.mxu0 %v2215_v18  ;;  %2103 = vmatmul.mubr.msk.bf16.gmra.mxu1 %vm715_vm1, %v2239_v23  ;;  %v2298_v18 = vld [vmem:[%s3101_s0 + $0x1b0] ss:$12 sps:$4 sm:$0xff]  }
  0x2b   :  { %825 = vmatprep.subr.bf16.mxu0 %v2339_v0  ;;  %2106 = vmatprep.mubr.msk.bf16.mxu1 %vm2341_vm0, %v2340_v2 }
  0x2e   :  { %826 = vmatpush2.bf16.msra.mxu0 %v2216_v19  ;;  %v2300_v19 = vld [vmem:[%s3101_s0 + $0x1cc] ss:$12 sps:$4 sm:$0xff]  }
  0x2f   :  { %827 = vmatprep.subr.bf16.mxu0 %v2339_v0 }
  0x32   :  { %828 = vmatpush2.bf16.msra.mxu0 %v2217_v21  ;;  %2107 = vmatmul.mubr.msk.bf16.gmra.mxu1 %vm715_vm1, %v2243_v26  ;;  %v2302_v21 = vld [vmem:[%s3101_s0 + $0x1c8] ss:$12 sps:$4 sm:$0xff]   ;;  %v2323_v26 = vld [vmem:[%s3101_s0 + $0x260] ss:$12 sps:$4 sm:$0xff]  }
  0x33   :  { %829 = vmatprep.subr.bf16.mxu0 %v2339_v0  ;;  %2110 = vmatprep.mubr.msk.bf16.mxu1 %vm2341_vm0, %v2340_v2 }
  0x36   :  { %830 = vmatpush2.bf16.msra.mxu0 %v2218_v22  ;;  %v2304_v22 = vld [vmem:[%s3101_s0 + $0x1e4] ss:$12 sps:$4 sm:$0xff]  }
  0x37   :  { %831 = vmatprep.subr.bf16.mxu0 %v2339_v0 }
  0x3a   :  { %832 = vmatpush2.bf16.msra.mxu0 %v2220_v24  ;;  %2111 = vmatmul.mubr.msk.bf16.gmra.mxu1 %vm715_vm1, %v2247_v29  ;;  %v2308_v29 = vld [vmem:[%s3101_s0 + $0x1fc] ss:$12 sps:$4 sm:$0xff]  }
  0x3b   :  { %833 = vmatprep.subr.bf16.mxu0 %v2339_v0  ;;  %2114 = vmatprep.mubr.msk.bf16.mxu1 %vm2341_vm0, %v2340_v2  ;;  %v2276_v0 = vld [vmem:[%s3101_s0 + $0x13c] ss:$12 sps:$4 sm:$0xff]  }
  0x3e   :  { %834 = vmatpush2.bf16.msra.mxu0 %v2223_v25 }
  0x41   :  { %836 = vmatmul.mubr.bf16.vlgmr.msra.gmra.mxu0 %v2224_v27  ;;  %v2306_v27 = vld [vmem:[%s3101_s0 + $0x1e0] ss:$12 sps:$4 sm:$0xff]  }
  0x42   :  { %843 = vmatprep.mubr.bf16.mxu0 %v2228_v28  ;;  %2115 = vmatmul.mubr.msk.bf16.gmra.mxu1 %vm715_vm1, %v2251_v32 }
  0x43   :  { %2118 = vmatprep.mubr.msk.bf16.mxu1 %vm2341_vm0, %v2340_v2 }
  0x49   :  { %844 = vmatmul.mubr.bf16.gmra.mxu0 %v2230_v30 }
  0x4a   :  { %851 = vmatprep.mubr.bf16.mxu0 %v2232_v31  ;;  %2119 = vmatmul.mubr.msk.bf16.gmra.mxu1 %vm715_vm1, %v2255_v35 }
  0x4b   :  { %2122 = vmatprep.mubr.msk.bf16.mxu1 %vm2341_vm0, %v2340_v2 }
  0x51   :  { %852 = vmatmul.mubr.bf16.gmra.mxu0 %v2234_v33  ;;  %v2327_v33 = vld [vmem:[%s3101_s0 + $0x278] ss:$12 sps:$4 sm:$0xff]  }
  0x52   :  { %859 = vmatprep.mubr.bf16.mxu0 %v2236_v34  ;;  %2123 = vmatmul.mubr.msk.bf16.gmra.mxu1 %vm715_vm1, %v2259_v38  ;;  %v2310_v34 = vld [vmem:[%s3101_s0 + $0x1f8] ss:$12 sps:$4 sm:$0xff]  }
  0x53   :  { %2126 = vmatprep.mubr.msk.bf16.mxu1 %vm2341_vm0, %v2340_v2 }
  0x59   :  { %860 = vmatmul.mubr.bf16.gmra.mxu0 %v2238_v36  ;;  %v2312_v36 = vld [vmem:[%s3101_s0 + $0x214] ss:$12 sps:$4 sm:$0xff]  }
  0x5a   :  { %867 = vmatprep.mubr.bf16.mxu0 %v2240_v37  ;;  %2127 = vmatmul.mubr.msk.bf16.gmra.mxu1 %vm715_vm1, %v2263_v41  ;;  %v2314_v41 = vld [vmem:[%s3101_s0 + $0x210] ss:$12 sps:$4 sm:$0xff]  }
  0x5b   :  { %2130 = vmatprep.mubr.msk.bf16.mxu1 %vm2341_vm0, %v2340_v2 }
  0x61   :  { %868 = vmatmul.mubr.bf16.gmra.mxu0 %v2242_v39 }
  0x62   :  { %875 = vmatprep.mubr.bf16.mxu0 %v2244_v40  ;;  %2131 = vmatmul.mubr.msk.bf16.gmra.mxu1 %vm715_vm1, %v2267_v44  ;;  %v2331_v40 = vld [vmem:[%s3101_s0 + $0x290] ss:$12 sps:$4 sm:$0xff]  }
  0x63   :  { %2134 = vmatprep.mubr.msk.bf16.mxu1 %vm2341_vm0, %v2340_v2 }
  0x69   :  { %876 = vmatmul.mubr.bf16.gmra.mxu0 %v2246_v42 }
  0x6a   :  { %883 = vmatprep.mubr.bf16.mxu0 %v2248_v43  ;;  %2135 = vmatmul.mubr.msk.bf16.gmra.mxu1 %vm715_vm1, %v2271_v47  ;;  %v2316_v43 = vld [vmem:[%s3101_s0 + $0x22c] ss:$12 sps:$4 sm:$0xff]   ;;  %v2335_v47 = vld [vmem:[%s3101_s0 + $0x2a8] ss:$12 sps:$4 sm:$0xff]  }
  0x6b   :  { %2138 = vmatprep.mubr.msk.bf16.mxu1 %vm2341_vm0, %v2340_v2 }
  0x71   :  { %884 = vmatmul.mubr.bf16.gmra.mxu0 %v2250_v45 }
  0x72   :  { %891 = vmatprep.mubr.bf16.mxu0 %v2252_v46  ;;  %2139 = vmatmul.mubr.msk.bf16.gmra.mxu1 %vm715_vm1, %v2275_v50  ;;  %v2320_v50 = vld [vmem:[%s3101_s0 + $0x244] ss:$12 sps:$4 sm:$0xff]  }
  0x73   :  { %2142 = vmatprep.mubr.msk.bf16.mxu1 %vm2341_vm0, %v2340_v2 }
  0x79   :  { %892 = vmatmul.mubr.bf16.gmra.mxu0 %v2254_v48  ;;  %v2318_v48 = vld [vmem:[%s3101_s0 + $0x228] ss:$12 sps:$4 sm:$0xff]  }
  0x7a   :  { %899 = vmatprep.mubr.bf16.mxu0 %v2256_v49  ;;  %2143 = vmatmul.mubr.msk.bf16.gmra.mxu1 %vm715_vm1, %v2279_v53  ;;  %v2322_v53 = vld [vmem:[%s3101_s0 + $0x240] ss:$12 sps:$4 sm:$0xff]  }
  0x7b   :  { %2146 = vmatprep.mubr.msk.bf16.mxu1 %vm2341_vm0, %v2340_v2 }
  0x81   :  { %900 = vmatmul.mubr.bf16.gmra.mxu0 %v2258_v51 }
  0x82   :  { %907 = vmatprep.mubr.bf16.mxu0 %v2260_v52  ;;  %2147 = vmatmul.mubr.msk.bf16.gmra.mxu1 %vm715_vm1, %v2283_v56 }
  0x83   :  { %2150 = vmatprep.mubr.msk.bf16.mxu1 %vm2341_vm0, %v2340_v2 }
  0x89   :  { %908 = vmatmul.mubr.bf16.gmra.mxu0 %v2262_v54 }
  0x8a   :  { %915 = vmatprep.mubr.bf16.mxu0 %v2264_v55  ;;  %2151 = vmatmul.mubr.msk.bf16.gmra.mxu1 %vm715_vm1, %v2287_v59  ;;  %v2324_v55 = vld [vmem:[%s3101_s0 + $0x25c] ss:$12 sps:$4 sm:$0xff]  }
  0x8b   :  { %2154 = vmatprep.mubr.msk.bf16.mxu1 %vm2341_vm0, %v2340_v2 }
  0x91   :  { %916 = vmatmul.mubr.bf16.gmra.mxu0 %v2266_v57  ;;  %v2786_v57 = vld [vmem:[%s3102_s2] ss:$0 sm:$0xff] }
  0x92   :  { %923 = vmatprep.mubr.bf16.mxu0 %v2268_v58  ;;  %2155 = vmatmul.mubr.msk.bf16.gmra.mxu1 %vm715_vm1, %v2291_v62 }
  0x93   :  { %2158 = vmatprep.mubr.msk.bf16.mxu1 %vm2341_vm0, %v2340_v2 }
  0x99   :  { %924 = vmatmul.mubr.bf16.gmra.mxu0 %v2270_v60 }
  0x9a   :  { %931 = vmatprep.mubr.bf16.mxu0 %v2272_v61  ;;  %2159 = vmatmul.mubr.msk.bf16.gmra.mxu1 %vm715_vm1, %v2295_v1 }
  0x9b   :  { %2162 = vmatprep.mubr.msk.bf16.mxu1 %vm2341_vm0, %v2340_v2 }
  0xa1   :  { %932 = vmatmul.mubr.bf16.gmra.mxu0 %v2274_v63 }
  0xa2   :  { %939 = vmatprep.mubr.bf16.mxu0 %v2276_v0  ;;  %2163 = vmatmul.mubr.msk.bf16.gmra.mxu1 %vm715_vm1, %v2299_v5  ;;  %v2326_v0 = vld [vmem:[%s3101_s0 + $0x258] ss:$12 sps:$4 sm:$0xff]  }
  0xa3   :  { %2166 = vmatprep.mubr.msk.bf16.mxu1 %vm2341_vm0, %v2340_v2 }
  0xa9   :  { %940 = vmatmul.mubr.bf16.gmra.mxu0 %v2278_v3 }
  0xaa   :  { %947 = vmatprep.mubr.bf16.mxu0 %v2280_v4  ;;  %2167 = vmatmul.mubr.msk.bf16.gmra.mxu1 %vm715_vm1, %v2303_v8  ;;  %v2328_v4 = vld [vmem:[%s3101_s0 + $0x274] ss:$12 sps:$4 sm:$0xff]  }
  0xab   :  { %2170 = vmatprep.mubr.msk.bf16.mxu1 %vm2341_vm0, %v2340_v2 }
  0xb1   :  { %948 = vmatmul.mubr.bf16.gmra.mxu0 %v2282_v6 }
  0xb2   :  { %955 = vmatprep.mubr.bf16.mxu0 %v2284_v7  ;;  %2171 = vmatmul.mubr.msk.bf16.gmra.mxu1 %vm715_vm1, %v2307_v11 }
  0xb3   :  { %2174 = vmatprep.mubr.msk.bf16.mxu1 %vm2341_vm0, %v2340_v2 }
  0xb9   :  { %956 = vmatmul.mubr.bf16.gmra.mxu0 %v2286_v9 }
  0xba   :  { %963 = vmatprep.mubr.bf16.mxu0 %v2288_v10  ;;  %2175 = vmatmul.mubr.msk.bf16.gmra.mxu1 %vm715_vm1, %v2311_v14 }
  0xbb   :  { %2178 = vmatprep.mubr.msk.bf16.mxu1 %vm2341_vm0, %v2340_v2 }
  0xc1   :  { %964 = vmatmul.mubr.bf16.gmra.mxu0 %v2290_v12 }
  0xc2   :  { %971 = vmatprep.mubr.bf16.mxu0 %v2292_v13  ;;  %2179 = vmatmul.mubr.msk.bf16.gmra.mxu1 %vm715_vm1, %v2315_v17 }
  0xc3   :  { %2182 = vmatprep.mubr.msk.bf16.mxu1 %vm2341_vm0, %v2340_v2 }
  0xc9   :  { %972 = vmatmul.mubr.bf16.gmra.mxu0 %v2294_v15 }
  0xca   :  { %979 = vmatprep.mubr.bf16.mxu0 %v2296_v16  ;;  %v2706_v23 = vpop.f32.mrf.mxu1  ;;  %2183 = vmatmul.mubr.msk.bf16.gmra.mxu1 %vm715_vm1, %v2319_v20  ;;  %v2330_v16 = vld [vmem:[%s3101_s0 + $0x270] ss:$12 sps:$4 sm:$0xff]  }
  0xcb   :  { %2186 = vmatprep.mubr.msk.bf16.mxu1 %vm2341_vm0, %v2340_v2 }
  0xcc   :  { %v2088_v24 = vpop.f32.mrf.mxu1 }
  0xce   :  { %v2711_v25 = vpop.f32.mrf.mxu1 }
  0xd0   :  { %v2089_v28 = vpop.f32.mrf.mxu1 }
  0xd1   :  { %980 = vmatmul.mubr.bf16.gmra.mxu0 %v2298_v18 }
  0xd2   :  { %987 = vmatprep.mubr.bf16.mxu0 %v2300_v19  ;;  %v2722_v30 = vpop.f32.mrf.mxu1  ;;  %2187 = vmatmul.mubr.msk.bf16.gmra.mxu1 %vm715_vm1, %v2323_v26  ;;  %v2332_v19 = vld [vmem:[%s3101_s0 + $0x28c] ss:$12 sps:$4 sm:$0xff]  }
  0xd3   :  { %2190 = vmatprep.mubr.msk.bf16.mxu1 %vm2341_vm0, %v2340_v2 }
  0xd4   :  { %v2092_v31 = vpop.f32.mrf.mxu1 }
  0xd6   :  { %v2727_v32 = vpop.f32.mrf.mxu1 }
  0xd8   :  { %v2093_v35 = vpop.f32.mrf.mxu1 }
  0xd9   :  { %988 = vmatmul.mubr.bf16.gmra.mxu0 %v2302_v21 }
  0xda   :  { %995 = vmatprep.mubr.bf16.mxu0 %v2304_v22  ;;  %v2738_v37 = vpop.f32.mrf.mxu1  ;;  %2191 = vmatmul.mubr.msk.bf16.gmra.mxu1 %vm715_vm1, %v2327_v33 }
  0xdb   :  { %2194 = vmatprep.mubr.msk.bf16.mxu1 %vm2341_vm0, %v2340_v2 }
  0xdc   :  { %v2096_v38 = vpop.f32.mrf.mxu1 }
  0xde   :  { %v2743_v39 = vpop.f32.mrf.mxu1 }
  0xe0   :  { %v2097_v42 = vpop.f32.mrf.mxu1 }
  0xe1   :  { %996 = vmatmul.mubr.bf16.gmra.mxu0 %v2306_v27 }
  0xe2   :  { %1003 = vmatprep.mubr.bf16.mxu0 %v2308_v29  ;;  %v2754_v44 = vpop.f32.mrf.mxu1  ;;  %2195 = vmatmul.mubr.msk.bf16.gmra.mxu1 %vm715_vm1, %v2331_v40 }
  0xe3   :  { %2198 = vmatprep.mubr.msk.bf16.mxu1 %vm2341_vm0, %v2340_v2 }
  0xe4   :  { %v2100_v45 = vpop.f32.mrf.mxu1 }
  0xe6   :  { %v2759_v46 = vpop.f32.mrf.mxu1 }
  0xe8   :  { %v2101_v49 = vpop.f32.mrf.mxu1 }
  0xe9   :  { %1004 = vmatmul.mubr.bf16.gmra.mxu0 %v2310_v34  ;;  %v2338_v34 = vld [vmem:[%s3101_s0 + $0x2a4] ss:$12 sps:$4 sm:$0xff]  }
  0xea   :  { %1011 = vmatprep.mubr.bf16.mxu0 %v2312_v36  ;;  %v2770_v51 = vpop.f32.mrf.mxu1  ;;  %2199 = vmatmul.mubr.msk.bf16.gmra.mxu1 %vm715_vm1, %v2335_v47 }
  0xec   :  { %v2104_v2 = vpop.f32.mrf.mxu1 }
  0xee   :  { %v2773_v52 = vpop.f32.mrf.mxu1 }
  0xf0   :  { %v2105_v54 = vpop.f32.mrf.mxu1 }
  0xf1   :  { %1012 = vmatmul.mubr.bf16.gmra.mxu0 %v2314_v41 }
  0xf2   :  { %1019 = vmatprep.mubr.bf16.mxu0 %v2316_v43  ;;  %v2781_v56 = vpop.f32.mrf.mxu1 }
  0xf4   :  { %v2108_v59 = vpop.f32.mrf.mxu1 }
  0xf6   :  { %v2788_v61 = vpop.f32.mrf.mxu1 }
  0xf8   :  { %v2109_v1 = vpop.f32.mrf.mxu1 }
  0xf9   :  { %1020 = vmatmul.mubr.bf16.gmra.mxu0 %v2318_v48 }
  0xfa   :  { %1027 = vmatprep.mubr.bf16.mxu0 %v2320_v50  ;;  %v2798_v6 = vpop.f32.mrf.mxu1 }
  0xfc   :  { %v2112_v10 = vpop.f32.mrf.mxu1 }
  0xfe   :  { %v2802_v13 = vpop.f32.mrf.mxu1 }
 0x100   :  { %v2113_v17 = vpop.f32.mrf.mxu1 }
 0x101   :  { %v837_v58 = vpop.f32.mrf.mxu0  ;;  %1028 = vmatmul.mubr.bf16.gmra.mxu0 %v2322_v53 }
 0x102   :  { %1035 = vmatprep.mubr.bf16.mxu0 %v2324_v55  ;;  %v838_v62 = vadd.f32 %v2786_v57, %v837_v58  ;;  %v2815_v21 = vpop.f32.mrf.mxu1 }
 0x103   :  { %v839_v60 = vpop.f32.mrf.mxu0 }
 0x104   :  { %v1103_v7 = vadd.f32 %v2706_v23, %v838_v62 }
 0x105   :  { %v840_v63 = vpop.f32.mrf.mxu0 }
 0x106   :  { %v841_v3 = vadd.f32 %v2786_v57, %v840_v63 }
 0x107   :  { %v842_v5 = vpop.f32.mrf.mxu0 }
 0x108   :  { %v1106_v8 = vadd.f32 %v2711_v25, %v841_v3  ;;  %v2116_v25 = vpop.f32.mrf.mxu1 }
 0x109   :  { %v845_v9 = vpop.f32.mrf.mxu0  ;;  %1036 = vmatmul.mubr.bf16.gmra.mxu0 %v2326_v0 }
 0x10a   :  { %v1881_v11 = vpack.c.bf16 %v1106_v8, %v1103_v7  ;;  %1043 = vmatprep.mubr.bf16.mxu0 %v2328_v4  ;;  %v846_v14 = vadd.f32 %v2786_v57, %v845_v9  ;;  %v2819_v28 = vpop.f32.mrf.mxu1 }
 0x10b   :  { %v847_v12 = vpop.f32.mrf.mxu0 }
 0x10c   :  { %1882 = vst [vmem:[%s3103_s3] sm:$0xff] %v1881_v11   ;;  %v1111_v22 = vadd.f32 %v2722_v30, %v846_v14  ;;  %v2334_v30 = vld [vmem:[%s3101_s0 + $0x288] ss:$12 sps:$4 sm:$0xff]  }
 0x10d   :  { %v848_v15 = vpop.f32.mrf.mxu0 }
 0x10e   :  { %v849_v18 = vadd.f32 %v2786_v57, %v848_v15 }
 0x10f   :  { %v850_v20 = vpop.f32.mrf.mxu0 }
 0x110   :  { %v1114_v23 = vadd.f32 %v2727_v32, %v849_v18  ;;  %v2117_v32 = vpop.f32.mrf.mxu1 }
 0x111   :  { %v853_v24 = vpop.f32.mrf.mxu0  ;;  %1044 = vmatmul.mubr.bf16.gmra.mxu0 %v2330_v16 }
 0x112   :  { %v1886_v26 = vpack.c.bf16 %v1114_v23, %v1111_v22  ;;  %1051 = vmatprep.mubr.bf16.mxu0 %v2332_v19  ;;  %v854_v29 = vadd.f32 %v2786_v57, %v853_v24  ;;  %v2832_v36 = vpop.f32.mrf.mxu1 }
 0x113   :  { %v855_v27 = vpop.f32.mrf.mxu0 }
 0x114   :  { %2023 = vst [vmem:[%s3103_s3 + $0x8] sm:$0xff] %v1886_v26   ;;  %v1119_v38 = vadd.f32 %v2738_v37, %v854_v29  ;;  %v2120_v42 = vpop.f32.mrf.mxu1  ;;  %v2336_v37 = vld [vmem:[%s3101_s0 + $0x2a0] ss:$12 sps:$4 sm:$0xff]  }
 0x115   :  { %v856_v31 = vpop.f32.mrf.mxu0 }
 0x116   :  { %v857_v33 = vadd.f32 %v2786_v57, %v856_v31  ;;  %v2836_v47 = vpop.f32.mrf.mxu1 }
 0x117   :  { %v858_v35 = vpop.f32.mrf.mxu0 }
 0x118   :  { %v1122_v40 = vadd.f32 %v2743_v39, %v857_v33  ;;  %v2121_v39 = vpop.f32.mrf.mxu1 }
 0x119   :  { %v861_v41 = vpop.f32.mrf.mxu0  ;;  %1052 = vmatmul.mubr.bf16.gmra.mxu0 %v2334_v30 }
 0x11a   :  { %v1891_v43 = vpack.c.bf16 %v1122_v40, %v1119_v38  ;;  %1059 = vmatprep.mubr.bf16.mxu0 %v2338_v34  ;;  %v862_v48 = vadd.f32 %v2786_v57, %v861_v41  ;;  %v2846_v53 = vpop.f32.mrf.mxu1 }
 0x11b   :  { %v863_v45 = vpop.f32.mrf.mxu0 }
 0x11c   :  { %2024 = vst [vmem:[%s3103_s3 + $0x10] sm:$0xff] %v1891_v43   ;;  %v1127_v54 = vadd.f32 %v2754_v44, %v862_v48  ;;  %v2124_v59 = vpop.f32.mrf.mxu1 }
 0x11d   :  { %v864_v49 = vpop.f32.mrf.mxu0 }
 0x11e   :  { %v865_v50 = vadd.f32 %v2786_v57, %v864_v49  ;;  %v2850_v63 = vpop.f32.mrf.mxu1 }
 0x11f   :  { %v866_v2 = vpop.f32.mrf.mxu0 }
 0x120   :  { %v1130_v55 = vadd.f32 %v2759_v46, %v865_v50  ;;  %v2125_v3 = vpop.f32.mrf.mxu1 }
 0x121   :  { %v869_v58 = vpop.f32.mrf.mxu0  ;;  %1060 = vmatmul.mubr.bf16.gmra.mxu0 %v2336_v37 }
 0x122   :  { %v1896_v60 = vpack.c.bf16 %v1130_v55, %v1127_v54  ;;  %v870_v0 = vadd.f32 %v2786_v57, %v869_v58  ;;  %v2857_v5 = vpop.f32.mrf.mxu1 }
 0x123   :  { %v871_v62 = vpop.f32.mrf.mxu0 }
 0x124   :  { %2025 = vst [vmem:[%s3103_s3 + $0x18] sm:$0xff] %v1896_v60   ;;  %v1135_v46 = vadd.f32 %v2770_v51, %v870_v0  ;;  %v2128_v9 = vpop.f32.mrf.mxu1 }
 0x125   :  { %v872_v1 = vpop.f32.mrf.mxu0 }
 0x126   :  { %v873_v4 = vadd.f32 %v2786_v57, %v872_v1  ;;  %v2861_v12 = vpop.f32.mrf.mxu1 }
 0x127   :  { %v874_v44 = vpop.f32.mrf.mxu0 }
 0x128   :  { %v1138_v7 = vadd.f32 %v2773_v52, %v873_v4  ;;  %v2129_v16 = vpop.f32.mrf.mxu1 }
 0x129   :  { %v877_v8 = vpop.f32.mrf.mxu0 }
 0x12a   :  { %v1901_v10 = vpack.c.bf16 %v1138_v7, %v1135_v46  ;;  %v878_v14 = vadd.f32 %v2786_v57, %v877_v8  ;;  %v2868_v51 = vpop.f32.mrf.mxu1 }
 0x12b   :  { %v879_v11 = vpop.f32.mrf.mxu0 }
 0x12c   :  { %2026 = vst [vmem:[%s3103_s3 + $0x20] sm:$0xff] %v1901_v10   ;;  %v1143_v52 = vadd.f32 %v2781_v56, %v878_v14  ;;  %v2132_v22 = vpop.f32.mrf.mxu1 }
 0x12d   :  { %v880_v15 = vpop.f32.mrf.mxu0 }
 0x12e   :  { %v881_v17 = vadd.f32 %v2786_v57, %v880_v15  ;;  %v2872_v25 = vpop.f32.mrf.mxu1 }
 0x12f   :  { %v882_v18 = vpop.f32.mrf.mxu0 }
 0x130   :  { %v1146_v19 = vadd.f32 %v2788_v61, %v881_v17  ;;  %v2133_v29 = vpop.f32.mrf.mxu1 }
 0x131   :  { %v885_v20 = vpop.f32.mrf.mxu0 }
 0x132   :  { %v1906_v23 = vpack.c.bf16 %v1146_v19, %v1143_v52  ;;  %v886_v26 = vadd.f32 %v2786_v57, %v885_v20  ;;  %v2879_v56 = vpop.f32.mrf.mxu1 }
 0x133   :  { %v887_v24 = vpop.f32.mrf.mxu0 }
 0x134   :  { %2027 = vst [vmem:[%s3103_s3 + $0x28] sm:$0xff] %v1906_v23   ;;  %v1151_v61 = vadd.f32 %v2798_v6, %v886_v26  ;;  %v2136_v34 = vpop.f32.mrf.mxu1 }
 0x135   :  { %v888_v27 = vpop.f32.mrf.mxu0 }
 0x136   :  { %v889_v31 = vadd.f32 %v2786_v57, %v888_v27  ;;  %v2883_v40 = vpop.f32.mrf.mxu1 }
 0x137   :  { %v890_v30 = vpop.f32.mrf.mxu0 }
 0x138   :  { %v1154_v32 = vadd.f32 %v2802_v13, %v889_v31  ;;  %v2137_v43 = vpop.f32.mrf.mxu1 }
 0x139   :  { %v893_v33 = vpop.f32.mrf.mxu0 }
 0x13a   :  { %v1911_v35 = vpack.c.bf16 %v1154_v32, %v1151_v61  ;;  %v894_v41 = vadd.f32 %v2786_v57, %v893_v33  ;;  %v2890_v6 = vpop.f32.mrf.mxu1 }
 0x13b   :  { %v895_v38 = vpop.f32.mrf.mxu0 }
 0x13c   :  { %2028 = vst [vmem:[%s3103_s3 + $0x30] sm:$0xff] %v1911_v35   ;;  %v1159_v13 = vadd.f32 %v2815_v21, %v894_v41  ;;  %v2140_v39 = vpop.f32.mrf.mxu1 }
 0x13d   :  { %v896_v42 = vpop.f32.mrf.mxu0 }
 0x13e   :  { %v897_v45 = vadd.f32 %v2786_v57, %v896_v42  ;;  %v2894_v54 = vpop.f32.mrf.mxu1 }
 0x13f   :  { %v898_v48 = vpop.f32.mrf.mxu0 }
 0x140   :  { %v1162_v49 = vadd.f32 %v2819_v28, %v897_v45  ;;  %v2141_v59 = vpop.f32.mrf.mxu1 }
 0x141   :  { %v901_v37 = vpop.f32.mrf.mxu0 }
 0x142   :  { %v1916_v50 = vpack.c.bf16 %v1162_v49, %v1159_v13  ;;  %v902_v55 = vadd.f32 %v2786_v57, %v901_v37  ;;  %v2901_v21 = vpop.f32.mrf.mxu1 }
 0x143   :  { %v903_v2 = vpop.f32.mrf.mxu0 }
 0x144   :  { %2029 = vst [vmem:[%s3103_s3 + $0x38] sm:$0xff] %v1916_v50   ;;  %v1167_v28 = vadd.f32 %v2832_v36, %v902_v55  ;;  %v2144_v3 = vpop.f32.mrf.mxu1 }
 0x145   :  { %v904_v58 = vpop.f32.mrf.mxu0 }
 0x146   :  { %v905_v60 = vadd.f32 %v2786_v57, %v904_v58  ;;  %v2905_v46 = vpop.f32.mrf.mxu1 }
 0x147   :  { %v906_v62 = vpop.f32.mrf.mxu0 }
 0x148   :  { %v1170_v0 = vadd.f32 %v2836_v47, %v905_v60  ;;  %v2145_v9 = vpop.f32.mrf.mxu1 }
 0x149   :  { %v909_v1 = vpop.f32.mrf.mxu0 }
 0x14a   :  { %v1921_v4 = vpack.c.bf16 %v1170_v0, %v1167_v28  ;;  %v910_v7 = vadd.f32 %v2786_v57, %v909_v1  ;;  %v2912_v36 = vpop.f32.mrf.mxu1 }
 0x14b   :  { %v911_v44 = vpop.f32.mrf.mxu0 }
 0x14c   :  { %2030 = vst [vmem:[%s3103_s3 + $0x40] sm:$0xff] %v1921_v4   ;;  %v1175_v47 = vadd.f32 %v2846_v53, %v910_v7  ;;  %v2148_v16 = vpop.f32.mrf.mxu1 }
 0x14d   :  { %v912_v8 = vpop.f32.mrf.mxu0 }
 0x14e   :  { %v913_v10 = vadd.f32 %v2786_v57, %v912_v8  ;;  %v2916_v52 = vpop.f32.mrf.mxu1 }
 0x14f   :  { %v914_v11 = vpop.f32.mrf.mxu0 }
 0x150   :  { %v1178_v14 = vadd.f32 %v2850_v63, %v913_v10  ;;  %v2149_v22 = vpop.f32.mrf.mxu1 }
 0x151   :  { %v917_v15 = vpop.f32.mrf.mxu0 }
 0x152   :  { %v1926_v17 = vpack.c.bf16 %v1178_v14, %v1175_v47  ;;  %v918_v19 = vadd.f32 %v2786_v57, %v917_v15  ;;  %v2923_v53 = vpop.f32.mrf.mxu1 }
 0x153   :  { %v919_v18 = vpop.f32.mrf.mxu0 }
 0x154   :  { %2031 = vst [vmem:[%s3103_s3 + $0x48] sm:$0xff] %v1926_v17   ;;  %v1183_v63 = vadd.f32 %v2857_v5, %v918_v19  ;;  %v2152_v29 = vpop.f32.mrf.mxu1 }
 0x155   :  { %v920_v20 = vpop.f32.mrf.mxu0 }
 0x156   :  { %v921_v23 = vadd.f32 %v2786_v57, %v920_v20  ;;  %v2927_v61 = vpop.f32.mrf.mxu1 }
 0x157   :  { %v922_v24 = vpop.f32.mrf.mxu0 }
 0x158   :  { %v1186_v26 = vadd.f32 %v2861_v12, %v921_v23  ;;  %v2153_v34 = vpop.f32.mrf.mxu1 }
 0x159   :  { %v925_v27 = vpop.f32.mrf.mxu0 }
 0x15a   :  { %v1931_v31 = vpack.c.bf16 %v1186_v26, %v1183_v63  ;;  %v926_v32 = vadd.f32 %v2786_v57, %v925_v27  ;;  %v2934_v5 = vpop.f32.mrf.mxu1 }
 0x15b   :  { %v927_v30 = vpop.f32.mrf.mxu0 }
 0x15c   :  { %2032 = vst [vmem:[%s3103_s3 + $0x50] sm:$0xff] %v1931_v31   ;;  %v1191_v12 = vadd.f32 %v2868_v51, %v926_v32  ;;  %v2156_v43 = vpop.f32.mrf.mxu1 }
 0x15d   :  { %v928_v33 = vpop.f32.mrf.mxu0 }
 0x15e   :  { %v929_v35 = vadd.f32 %v2786_v57, %v928_v33  ;;  %v2938_v13 = vpop.f32.mrf.mxu1 }
 0x15f   :  { %v930_v38 = vpop.f32.mrf.mxu0 }
 0x160   :  { %v1194_v41 = vadd.f32 %v2872_v25, %v929_v35  ;;  %v2157_v39 = vpop.f32.mrf.mxu1 }
 0x161   :  { %v933_v42 = vpop.f32.mrf.mxu0 }
 0x162   :  { %v1936_v45 = vpack.c.bf16 %v1194_v41, %v1191_v12  ;;  %v934_v49 = vadd.f32 %v2786_v57, %v933_v42  ;;  %v2945_v51 = vpop.f32.mrf.mxu1 }
 0x163   :  { %v935_v48 = vpop.f32.mrf.mxu0 }
 0x164   :  { %2033 = vst [vmem:[%s3103_s3 + $0x58] sm:$0xff] %v1936_v45   ;;  %v1199_v25 = vadd.f32 %v2879_v56, %v934_v49  ;;  %v2160_v59 = vpop.f32.mrf.mxu1 }
 0x165   :  { %v936_v37 = vpop.f32.mrf.mxu0 }
 0x166   :  { %v937_v50 = vadd.f32 %v2786_v57, %v936_v37  ;;  %v2949_v28 = vpop.f32.mrf.mxu1 }
 0x167   :  { %v938_v2 = vpop.f32.mrf.mxu0 }
 0x168   :  { %v1202_v55 = vadd.f32 %v2883_v40, %v937_v50  ;;  %v2161_v3 = vpop.f32.mrf.mxu1 }
 0x169   :  { %v941_v58 = vpop.f32.mrf.mxu0 }
 0x16a   :  { %v1941_v60 = vpack.c.bf16 %v1202_v55, %v1199_v25  ;;  %v942_v0 = vadd.f32 %v2786_v57, %v941_v58  ;;  %v2956_v56 = vpop.f32.mrf.mxu1 }
 0x16b   :  { %v943_v62 = vpop.f32.mrf.mxu0 }
 0x16c   :  { %2034 = vst [vmem:[%s3103_s3 + $0x60] sm:$0xff] %v1941_v60   ;;  %v1207_v40 = vadd.f32 %v2890_v6, %v942_v0  ;;  %v2164_v9 = vpop.f32.mrf.mxu1 }
 0x16d   :  { %v944_v1 = vpop.f32.mrf.mxu0 }
 0x16e   :  { %v945_v4 = vadd.f32 %v2786_v57, %v944_v1  ;;  %v2960_v47 = vpop.f32.mrf.mxu1 }
 0x16f   :  { %v946_v44 = vpop.f32.mrf.mxu0 }
 0x170   :  { %v1210_v7 = vadd.f32 %v2894_v54, %v945_v4  ;;  %v2165_v16 = vpop.f32.mrf.mxu1 }
 0x171   :  { %v949_v8 = vpop.f32.mrf.mxu0 }
 0x172   :  { %v1946_v10 = vpack.c.bf16 %v1210_v7, %v1207_v40  ;;  %v950_v14 = vadd.f32 %v2786_v57, %v949_v8  ;;  %v2967_v6 = vpop.f32.mrf.mxu1 }
 0x173   :  { %v951_v11 = vpop.f32.mrf.mxu0 }
 0x174   :  { %2035 = vst [vmem:[%s3103_s3 + $0x68] sm:$0xff] %v1946_v10   ;;  %v1215_v54 = vadd.f32 %v2901_v21, %v950_v14  ;;  %v2168_v22 = vpop.f32.mrf.mxu1 }
 0x175   :  { %v952_v15 = vpop.f32.mrf.mxu0 }
 0x176   :  { %v953_v17 = vadd.f32 %v2786_v57, %v952_v15  ;;  %v2971_v63 = vpop.f32.mrf.mxu1 }
 0x177   :  { %v954_v18 = vpop.f32.mrf.mxu0 }
 0x178   :  { %v1218_v19 = vadd.f32 %v2905_v46, %v953_v17  ;;  %v2169_v29 = vpop.f32.mrf.mxu1 }
 0x179   :  { %v957_v20 = vpop.f32.mrf.mxu0 }
 0x17a   :  { %v1951_v23 = vpack.c.bf16 %v1218_v19, %v1215_v54  ;;  %v958_v26 = vadd.f32 %v2786_v57, %v957_v20  ;;  %v2978_v21 = vpop.f32.mrf.mxu1 }
 0x17b   :  { %v959_v24 = vpop.f32.mrf.mxu0 }
 0x17c   :  { %2036 = vst [vmem:[%s3103_s3 + $0x70] sm:$0xff] %v1951_v23   ;;  %v1223_v46 = vadd.f32 %v2912_v36, %v958_v26  ;;  %v2172_v34 = vpop.f32.mrf.mxu1 }
 0x17d   :  { %v960_v27 = vpop.f32.mrf.mxu0 }
 0x17e   :  { %v961_v31 = vadd.f32 %v2786_v57, %v960_v27  ;;  %v2982_v12 = vpop.f32.mrf.mxu1 }
 0x17f   :  { %v962_v30 = vpop.f32.mrf.mxu0 }
 0x180   :  { %v1226_v32 = vadd.f32 %v2916_v52, %v961_v31  ;;  %v2173_v43 = vpop.f32.mrf.mxu1 }
 0x181   :  { %v965_v33 = vpop.f32.mrf.mxu0 }
 0x182   :  { %v1956_v35 = vpack.c.bf16 %v1226_v32, %v1223_v46  ;;  %v966_v41 = vadd.f32 %v2786_v57, %v965_v33  ;;  %v2989_v36 = vpop.f32.mrf.mxu1 }
 0x183   :  { %v967_v38 = vpop.f32.mrf.mxu0 }
 0x184   :  { %2037 = vst [vmem:[%s3103_s3 + $0x78] sm:$0xff] %v1956_v35   ;;  %v1231_v52 = vadd.f32 %v2923_v53, %v966_v41  ;;  %v2176_v39 = vpop.f32.mrf.mxu1 }
 0x185   :  { %v968_v42 = vpop.f32.mrf.mxu0 }
 0x186   :  { %v969_v45 = vadd.f32 %v2786_v57, %v968_v42  ;;  %v2993_v25 = vpop.f32.mrf.mxu1 }
 0x187   :  { %v970_v48 = vpop.f32.mrf.mxu0 }
 0x188   :  { %v1234_v49 = vadd.f32 %v2927_v61, %v969_v45  ;;  %v2177_v59 = vpop.f32.mrf.mxu1 }
 0x189   :  { %v973_v37 = vpop.f32.mrf.mxu0 }
 0x18a   :  { %v1961_v50 = vpack.c.bf16 %v1234_v49, %v1231_v52  ;;  %v974_v55 = vadd.f32 %v2786_v57, %v973_v37  ;;  %v3000_v53 = vpop.f32.mrf.mxu1 }
 0x18b   :  { %v975_v2 = vpop.f32.mrf.mxu0 }
 0x18c   :  { %2038 = vst [vmem:[%s3103_s3 + $0x80] sm:$0xff] %v1961_v50   ;;  %v1239_v61 = vadd.f32 %v2934_v5, %v974_v55  ;;  %v2180_v3 = vpop.f32.mrf.mxu1 }
 0x18d   :  { %v976_v58 = vpop.f32.mrf.mxu0 }
 0x18e   :  { %v977_v60 = vadd.f32 %v2786_v57, %v976_v58  ;;  %v3004_v40 = vpop.f32.mrf.mxu1 }
 0x18f   :  { %v978_v62 = vpop.f32.mrf.mxu0 }
 0x190   :  { %v1242_v0 = vadd.f32 %v2938_v13, %v977_v60  ;;  %v2181_v9 = vpop.f32.mrf.mxu1 }
 0x191   :  { %v981_v1 = vpop.f32.mrf.mxu0 }
 0x192   :  { %v1966_v4 = vpack.c.bf16 %v1242_v0, %v1239_v61  ;;  %v982_v7 = vadd.f32 %v2786_v57, %v981_v1  ;;  %v3011_v5 = vpop.f32.mrf.mxu1 }
 0x193   :  { %v983_v44 = vpop.f32.mrf.mxu0 }
 0x194   :  { %2039 = vst [vmem:[%s3103_s3 + $0x88] sm:$0xff] %v1966_v4   ;;  %v1247_v13 = vadd.f32 %v2945_v51, %v982_v7  ;;  %v2184_v16 = vpop.f32.mrf.mxu1 }
 0x195   :  { %v984_v8 = vpop.f32.mrf.mxu0 }
 0x196   :  { %v985_v10 = vadd.f32 %v2786_v57, %v984_v8  ;;  %v3015_v54 = vpop.f32.mrf.mxu1 }
 0x197   :  { %v986_v11 = vpop.f32.mrf.mxu0 }
 0x198   :  { %v1250_v14 = vadd.f32 %v2949_v28, %v985_v10  ;;  %v2185_v22 = vpop.f32.mrf.mxu1 }
 0x199   :  { %v989_v15 = vpop.f32.mrf.mxu0 }
 0x19a   :  { %v1971_v17 = vpack.c.bf16 %v1250_v14, %v1247_v13  ;;  %v990_v19 = vadd.f32 %v2786_v57, %v989_v15  ;;  %v3022_v51 = vpop.f32.mrf.mxu1 }
 0x19b   :  { %v991_v18 = vpop.f32.mrf.mxu0 }
 0x19c   :  { %2040 = vst [vmem:[%s3103_s3 + $0x90] sm:$0xff] %v1971_v17   ;;  %v1255_v28 = vadd.f32 %v2956_v56, %v990_v19  ;;  %v2188_v29 = vpop.f32.mrf.mxu1 }
 0x19d   :  { %v992_v20 = vpop.f32.mrf.mxu0 }
 0x19e   :  { %v993_v23 = vadd.f32 %v2786_v57, %v992_v20  ;;  %v3026_v46 = vpop.f32.mrf.mxu1 }
 0x19f   :  { %v994_v24 = vpop.f32.mrf.mxu0 }
 0x1a0   :  { %v1258_v26 = vadd.f32 %v2960_v47, %v993_v23  ;;  %v2189_v34 = vpop.f32.mrf.mxu1 }
 0x1a1   :  { %v997_v27 = vpop.f32.mrf.mxu0 }
 0x1a2   :  { %v1976_v31 = vpack.c.bf16 %v1258_v26, %v1255_v28  ;;  %v998_v32 = vadd.f32 %v2786_v57, %v997_v27  ;;  %v3033_v56 = vpop.f32.mrf.mxu1 }
 0x1a3   :  { %v999_v30 = vpop.f32.mrf.mxu0 }
 0x1a4   :  { %2041 = vst [vmem:[%s3103_s3 + $0x98] sm:$0xff] %v1976_v31   ;;  %v1263_v47 = vadd.f32 %v2967_v6, %v998_v32  ;;  %v2192_v43 = vpop.f32.mrf.mxu1 }
 0x1a5   :  { %v1000_v33 = vpop.f32.mrf.mxu0 }
 0x1a6   :  { %v1001_v35 = vadd.f32 %v2786_v57, %v1000_v33  ;;  %v3037_v52 = vpop.f32.mrf.mxu1 }
 0x1a7   :  { %v1002_v38 = vpop.f32.mrf.mxu0 }
 0x1a8   :  { %v1266_v41 = vadd.f32 %v2971_v63, %v1001_v35  ;;  %v2193_v39 = vpop.f32.mrf.mxu1 }
 0x1a9   :  { %v1005_v42 = vpop.f32.mrf.mxu0 }
 0x1aa   :  { %v1981_v45 = vpack.c.bf16 %v1266_v41, %v1263_v47  ;;  %v1006_v49 = vadd.f32 %v2786_v57, %v1005_v42  ;;  %v3044_v6 = vpop.f32.mrf.mxu1 }
 0x1ab   :  { %v1007_v48 = vpop.f32.mrf.mxu0 }
 0x1ac   :  { %2042 = vst [vmem:[%s3103_s3 + $0xa0] sm:$0xff] %v1981_v45   ;;  %v1271_v63 = vadd.f32 %v2978_v21, %v1006_v49  ;;  %v2196_v59 = vpop.f32.mrf.mxu1 }
 0x1ad   :  { %v1008_v37 = vpop.f32.mrf.mxu0 }
 0x1ae   :  { %v1009_v50 = vadd.f32 %v2786_v57, %v1008_v37  ;;  %v1321_v61 = vpop.f32.mrf.mxu1 }
 0x1af   :  { %v1010_v2 = vpop.f32.mrf.mxu0 }
 0x1b0   :  { %v1274_v55 = vadd.f32 %v2982_v12, %v1009_v50  ;;  %v2197_v3 = vpop.f32.mrf.mxu1 }
 0x1b1   :  { %v1013_v58 = vpop.f32.mrf.mxu0 }
 0x1b2   :  { %v1986_v60 = vpack.c.bf16 %v1274_v55, %v1271_v63  ;;  %v1014_v0 = vadd.f32 %v2786_v57, %v1013_v58  ;;  %v3053_v7 = vpop.f32.mrf.mxu1 }
 0x1b3   :  { %v1015_v62 = vpop.f32.mrf.mxu0 }
 0x1b4   :  { %2043 = vst [vmem:[%s3103_s3 + $0xa8] sm:$0xff] %v1986_v60   ;;  %v1279_v21 = vadd.f32 %v2989_v36, %v1014_v0  ;;  %v2200_v9 = vpop.f32.mrf.mxu1 }
 0x1b5   :  { %v1016_v1 = vpop.f32.mrf.mxu0 }
 0x1b6   :  { %v1017_v4 = vadd.f32 %v2786_v57, %v1016_v1  ;;  %v1329_v13 = vpop.f32.mrf.mxu1 }
 0x1b7   :  { %v1018_v44 = vpop.f32.mrf.mxu0 }
 0x1b8   :  { %v1282_v12 = vadd.f32 %v2993_v25, %v1017_v4  ;;  %v2201_v16 = vpop.f32.mrf.mxu1 }
 0x1b9   :  { %v1021_v8 = vpop.f32.mrf.mxu0 }
 0x1ba   :  { %v1991_v10 = vpack.c.bf16 %v1282_v12, %v1279_v21  ;;  %v1022_v14 = vadd.f32 %v2786_v57, %v1021_v8 }
 0x1bb   :  { %v1023_v11 = vpop.f32.mrf.mxu0 }
 0x1bc   :  { %2044 = vst [vmem:[%s3103_s3 + $0xb0] sm:$0xff] %v1991_v10   ;;  %v1287_v36 = vadd.f32 %v3000_v53, %v1022_v14 }
 0x1bd   :  { %v1024_v15 = vpop.f32.mrf.mxu0 }
 0x1be   :  { %v1025_v17 = vadd.f32 %v2786_v57, %v1024_v15 }
 0x1bf   :  { %v1026_v18 = vpop.f32.mrf.mxu0 }
 0x1c0   :  { %v1290_v25 = vadd.f32 %v3004_v40, %v1025_v17 }
 0x1c1   :  { %v1029_v19 = vpop.f32.mrf.mxu0 }
 0x1c2   :  { %v1996_v20 = vpack.c.bf16 %v1290_v25, %v1287_v36  ;;  %v1030_v23 = vadd.f32 %v2786_v57, %v1029_v19 }
 0x1c3   :  { %v1031_v22 = vpop.f32.mrf.mxu0 }
 0x1c4   :  { %2045 = vst [vmem:[%s3103_s3 + $0xb8] sm:$0xff] %v1996_v20   ;;  %v1295_v27 = vadd.f32 %v3011_v5, %v1030_v23 }
 0x1c5   :  { %v1032_v24 = vpop.f32.mrf.mxu0 }
 0x1c6   :  { %v1033_v28 = vadd.f32 %v2786_v57, %v1032_v24 }
 0x1c7   :  { %v1034_v26 = vpop.f32.mrf.mxu0 }
 0x1c8   :  { %v1298_v29 = vadd.f32 %v3015_v54, %v1033_v28 }
 0x1c9   :  { %v1037_v53 = vpop.f32.mrf.mxu0 }
 0x1ca   :  { %v2001_v31 = vpack.c.bf16 %v1298_v29, %v1295_v27  ;;  %v1038_v30 = vadd.f32 %v2786_v57, %v1037_v53 }
 0x1cb   :  { %v1039_v40 = vpop.f32.mrf.mxu0 }
 0x1cc   :  { %2046 = vst [vmem:[%s3103_s3 + $0xc0] sm:$0xff] %v2001_v31   ;;  %v1303_v35 = vadd.f32 %v3022_v51, %v1038_v30 }
 0x1cd   :  { %v1040_v32 = vpop.f32.mrf.mxu0 }
 0x1ce   :  { %v1041_v33 = vadd.f32 %v2786_v57, %v1040_v32 }
 0x1cf   :  { %v1042_v34 = vpop.f32.mrf.mxu0 }
 0x1d0   :  { %v1306_v38 = vadd.f32 %v3026_v46, %v1041_v33 }
 0x1d1   :  { %v1045_v5 = vpop.f32.mrf.mxu0 }
 0x1d2   :  { %v2006_v47 = vpack.c.bf16 %v1306_v38, %v1303_v35  ;;  %v1046_v41 = vadd.f32 %v2786_v57, %v1045_v5 }
 0x1d3   :  { %v1047_v54 = vpop.f32.mrf.mxu0 }
 0x1d4   :  { %2047 = vst [vmem:[%s3103_s3 + $0xc8] sm:$0xff] %v2006_v47   ;;  %v1311_v48 = vadd.f32 %v3033_v56, %v1046_v41 }
 0x1d5   :  { %v1048_v42 = vpop.f32.mrf.mxu0 }
 0x1d6   :  { %v1049_v43 = vadd.f32 %v2786_v57, %v1048_v42 }
 0x1d7   :  { %v1050_v45 = vpop.f32.mrf.mxu0 }
 0x1d8   :  { %v1314_v49 = vadd.f32 %v3037_v52, %v1049_v43 }
 0x1d9   :  { %v1053_v51 = vpop.f32.mrf.mxu0 }
 0x1da   :  { %v2011_v37 = vpack.c.bf16 %v1314_v49, %v1311_v48  ;;  %v1054_v39 = vadd.f32 %v2786_v57, %v1053_v51 }
 0x1db   :  { %v1055_v46 = vpop.f32.mrf.mxu0 }
 0x1dc   :  { %2048 = vst [vmem:[%s3103_s3 + $0xd0] sm:$0xff] %v2011_v37   ;;  %v1319_v55 = vadd.f32 %v3044_v6, %v1054_v39 }
 0x1dd   :  { %v1056_v50 = vpop.f32.mrf.mxu0 }
 0x1de   :  { %v1057_v2 = vadd.f32 %v2786_v57, %v1056_v50 }
 0x1df   :  { %v1058_v63 = vpop.f32.mrf.mxu0 }
 0x1e0   :  { %v1322_v58 = vadd.f32 %v1321_v61, %v1057_v2 }
 0x1e1   :  { %v1061_v59 = vpop.f32.mrf.mxu0 }
 0x1e2   :  { %v2016_v56 = vpack.c.bf16 %v1322_v58, %v1319_v55  ;;  %v1062_v52 = vadd.f32 %v2786_v57, %v1061_v59 }
 0x1e3   :  { %v1063_v60 = vpop.f32.mrf.mxu0 }
 0x1e4   :  { %2049 = vst [vmem:[%s3103_s3 + $0xd8] sm:$0xff] %v2016_v56   ;;  %v1327_v3 = vadd.f32 %v3053_v7, %v1062_v52 }
 0x1e5   :  { %v1064_v62 = vpop.f32.mrf.mxu0 }
 0x1e6   :  { %v1065_v0 = vadd.f32 %v2786_v57, %v1064_v62 }
 0x1e7   :  { %v1066_v1 = vpop.f32.mrf.mxu0 }
 0x1e8   :  { %v1330_v4 = vadd.f32 %v1329_v13, %v1065_v0 }
 0x1ea   :  { %v2021_v44 = vpack.c.bf16 %v1330_v4, %v1327_v3 }
 0x1ec   :  { %2050 = vst [vmem:[%s3103_s3 + $0xe0] sm:$0xff] %v2021_v44  }

// kernel: seafar_forward.15
= control target key start
LH: loop header
LB: loop body
LE: loop exit
PB: predicated region body
PF: predicated region fallthrough
CT: control target
= control target key end

     0   :  { %v2112_v0 = vmov 0   ;;  %vm742_vm0 = vcmask 392192   ;;  %s2740_s1 = inlined_call_operand.vmem [shape: bf16[432,128], index: 1, kind: input, shape index: {}]   ;;  %s2741_s0 = inlined_call_operand.vmem [shape: bf16[352,432], index: 0, kind: input, shape index: {}]   ;;  %s2742_s2 = inlined_call_operand.vmem [shape: f32[8,128], index: 2, kind: input, shape index: {}]   ;;  %s2743_s3 = inlined_call_operand.vmem [shape: bf16[352,128], index: 3, kind: output, shape index: {}]  }
   0x1   :  { %809 = vmatprep.subr.bf16.mxu0 %v2112_v0  ;;  %v1953_v1 = vld [vmem:[%s2740_s1 + $0x38] sm:$0xff]   ;;  %1018 = vmatprep.subr.bf16.mxu1 %v2112_v0  ;;  %v1954_v2 = vld [vmem:[%s2740_s1 + $0x30] sm:$0xff]   ;;  %v1955_v4 = vld [vmem:[%s2740_s1 + $0x28] sm:$0xff]  }
   0x2   :  { %810 = vmatpush1.bf16.msra.mxu0 %v1953_v1  ;;  %v1958_v3 = vld [vmem:[%s2740_s1 + $0xb8] sm:$0xff]   ;;  %v1960_v5 = vld [vmem:[%s2740_s1 + $0xb0] sm:$0xff]   ;;  %v1956_v6 = vld [vmem:[%s2740_s1 + $0x20] sm:$0xff]  }
   0x3   :  { %811 = vmatprep.subr.bf16.mxu0 %v2112_v0  ;;  %1019 = vmatpush1.bf16.msra.mxu1 %v1958_v3  ;;  %v1962_v7 = vld [vmem:[%s2740_s1 + $0xa8] sm:$0xff]   ;;  %v1957_v8 = vld [vmem:[%s2740_s1 + $0x18] sm:$0xff]   ;;  %v1964_v9 = vld [vmem:[%s2740_s1 + $0xa0] sm:$0xff]  }
   0x4   :  { %1020 = vmatprep.subr.bf16.mxu1 %v2112_v0  ;;  %v1959_v10 = vld [vmem:[%s2740_s1 + $0x10] sm:$0xff]   ;;  %v1966_v11 = vld [vmem:[%s2740_s1 + $0x98] sm:$0xff]   ;;  %v1961_v12 = vld [vmem:[%s2740_s1 + $0x8] sm:$0xff]  }
   0x5   :  { %v1968_v13 = vld [vmem:[%s2740_s1 + $0x90] sm:$0xff]   ;;  %v1963_v14 = vld [vmem:[%s2740_s1] sm:$0xff]   ;;  %v1970_v15 = vld [vmem:[%s2740_s1 + $0x88] sm:$0xff]  }
   0x6   :  { %812 = vmatpush1.bf16.msra.mxu0 %v1954_v2  ;;  %v1981_v16 = vld [vmem:[%s2741_s0 + $0xc] ss:$16 sps:$4 sm:$0xff]   ;;  %v1985_v17 = vld [vmem:[%s2741_s0 + $0x4] ss:$16 sps:$4 sm:$0xff]   ;;  %v1979_v27 = vld [vmem:[%s2741_s0 + $0x8] ss:$16 sps:$4 sm:$0xff]  }
   0x7   :  { %813 = vmatprep.subr.bf16.mxu0 %v2112_v0  ;;  %1021 = vmatpush1.bf16.msra.mxu1 %v1960_v5  ;;  %v1965_v18 = vld [vmem:[%s2740_s1 + $0x78] sm:$0xff]   ;;  %v1972_v19 = vld [vmem:[%s2740_s1 + $0x80] sm:$0xff]   ;;  %v1967_v20 = vld [vmem:[%s2740_s1 + $0x70] sm:$0xff]  }
   0x8   :  { %1022 = vmatprep.subr.bf16.mxu1 %v2112_v0  ;;  %1709 = vmatprep.mubr.msk.bf16.mxu1 %vm742_vm0, %v1981_v16  ;;  %v1974_v21 = vld [vmem:[%s2740_s1 + $0xd0] sm:$0xff]   ;;  %v1969_v22 = vld [vmem:[%s2740_s1 + $0x68] sm:$0xff]   ;;  %v1971_v24 = vld [vmem:[%s2740_s1 + $0x60] sm:$0xff]  }
   0x9   :  { %841 = vmatprep.mubr.bf16.mxu0 %v1985_v17  ;;  %v1976_v23 = vld [vmem:[%s2740_s1 + $0xc8] sm:$0xff]   ;;  %v1978_v25 = vld [vmem:[%s2740_s1 + $0xc0] sm:$0xff]   ;;  %v1973_v26 = vld [vmem:[%s2740_s1 + $0x58] sm:$0xff]  }
   0xa   :  { %814 = vmatpush1.bf16.msra.mxu0 %v1955_v4  ;;  %v1986_v28 = vld [vmem:[%s2741_s0 + $0x2c] ss:$16 sps:$4 sm:$0xff]   ;;  %v1975_v29 = vld [vmem:[%s2740_s1 + $0x50] sm:$0xff]   ;;  %v1988_v31 = vld [vmem:[%s2741_s0 + $0x28] ss:$16 sps:$4 sm:$0xff]  }
   0xb   :  { %815 = vmatprep.subr.bf16.mxu0 %v2112_v0  ;;  %1023 = vmatpush1.bf16.msra.mxu1 %v1962_v7  ;;  %v1977_v30 = vld [vmem:[%s2740_s1 + $0x48] sm:$0xff]   ;;  %v1982_v33 = vld [vmem:[%s2740_s1 + $0x40] sm:$0xff]  }
   0xc   :  { %1024 = vmatprep.subr.bf16.mxu1 %v2112_v0  ;;  %v1992_v32 = vld [vmem:[%s2741_s0 + $0x4c] ss:$16 sps:$4 sm:$0xff]   ;;  %v1983_v34 = vld [vmem:[%s2741_s0] ss:$16 sps:$4 sm:$0xff]   ;;  %v1989_v35 = vld [vmem:[%s2741_s0 + $0x24] ss:$16 sps:$4 sm:$0xff]  }
   0xd   :  { %v1994_v36 = vld [vmem:[%s2741_s0 + $0x48] ss:$16 sps:$4 sm:$0xff]   ;;  %v1998_v37 = vld [vmem:[%s2741_s0 + $0x6c] ss:$16 sps:$4 sm:$0xff]   ;;  %v1991_v38 = vld [vmem:[%s2741_s0 + $0x20] ss:$16 sps:$4 sm:$0xff]  }
   0xe   :  { %816 = vmatpush1.bf16.msra.mxu0 %v1956_v6  ;;  %v1995_v39 = vld [vmem:[%s2741_s0 + $0x44] ss:$16 sps:$4 sm:$0xff]   ;;  %v2000_v40 = vld [vmem:[%s2741_s0 + $0x68] ss:$16 sps:$4 sm:$0xff]   ;;  %v2004_v41 = vld [vmem:[%s2741_s0 + $0x8c] ss:$16 sps:$4 sm:$0xff]  }
   0xf   :  { %817 = vmatprep.subr.bf16.mxu0 %v2112_v0  ;;  %1025 = vmatpush1.bf16.msra.mxu1 %v1964_v9  ;;  %v1997_v42 = vld [vmem:[%s2741_s0 + $0x40] ss:$16 sps:$4 sm:$0xff]   ;;  %v2001_v43 = vld [vmem:[%s2741_s0 + $0x64] ss:$16 sps:$4 sm:$0xff]   ;;  %v2006_v44 = vld [vmem:[%s2741_s0 + $0x88] ss:$16 sps:$4 sm:$0xff]  }
  0x10   :  { %1026 = vmatprep.subr.bf16.mxu1 %v2112_v0  ;;  %v2010_v45 = vld [vmem:[%s2741_s0 + $0xac] ss:$16 sps:$4 sm:$0xff]   ;;  %v2003_v46 = vld [vmem:[%s2741_s0 + $0x60] ss:$16 sps:$4 sm:$0xff]   ;;  %v2007_v47 = vld [vmem:[%s2741_s0 + $0x84] ss:$16 sps:$4 sm:$0xff]  }
  0x11   :  { %v2012_v48 = vld [vmem:[%s2741_s0 + $0xa8] ss:$16 sps:$4 sm:$0xff]   ;;  %v2016_v49 = vld [vmem:[%s2741_s0 + $0xcc] ss:$16 sps:$4 sm:$0xff]   ;;  %v2009_v50 = vld [vmem:[%s2741_s0 + $0x80] ss:$16 sps:$4 sm:$0xff]  }
  0x12   :  { %818 = vmatpush1.bf16.msra.mxu0 %v1957_v8  ;;  %v2013_v51 = vld [vmem:[%s2741_s0 + $0xa4] ss:$16 sps:$4 sm:$0xff]   ;;  %v2018_v52 = vld [vmem:[%s2741_s0 + $0xc8] ss:$16 sps:$4 sm:$0xff]   ;;  %v2022_v53 = vld [vmem:[%s2741_s0 + $0xec] ss:$16 sps:$4 sm:$0xff]  }
  0x13   :  { %819 = vmatprep.subr.bf16.mxu0 %v2112_v0  ;;  %1027 = vmatpush1.bf16.msra.mxu1 %v1966_v11  ;;  %v2015_v54 = vld [vmem:[%s2741_s0 + $0xa0] ss:$16 sps:$4 sm:$0xff]   ;;  %v2019_v55 = vld [vmem:[%s2741_s0 + $0xc4] ss:$16 sps:$4 sm:$0xff]   ;;  %v2024_v56 = vld [vmem:[%s2741_s0 + $0xe8] ss:$16 sps:$4 sm:$0xff]  }
  0x14   :  { %1028 = vmatprep.subr.bf16.mxu1 %v2112_v0  ;;  %v2028_v57 = vld [vmem:[%s2741_s0 + $0x10c] ss:$16 sps:$4 sm:$0xff]   ;;  %v2021_v58 = vld [vmem:[%s2741_s0 + $0xc0] ss:$16 sps:$4 sm:$0xff]   ;;  %v2025_v59 = vld [vmem:[%s2741_s0 + $0xe4] ss:$16 sps:$4 sm:$0xff]  }
  0x15   :  { %v2030_v60 = vld [vmem:[%s2741_s0 + $0x108] ss:$16 sps:$4 sm:$0xff]   ;;  %v2034_v61 = vld [vmem:[%s2741_s0 + $0x12c] ss:$16 sps:$4 sm:$0xff]   ;;  %v2027_v62 = vld [vmem:[%s2741_s0 + $0xe0] ss:$16 sps:$4 sm:$0xff]  }
  0x16   :  { %820 = vmatpush1.bf16.msra.mxu0 %v1959_v10  ;;  %v2031_v63 = vld [vmem:[%s2741_s0 + $0x104] ss:$16 sps:$4 sm:$0xff]   ;;  %v2040_v1 = vld [vmem:[%s2741_s0 + $0x14c] ss:$16 sps:$4 sm:$0xff]   ;;  %v2033_v2 = vld [vmem:[%s2741_s0 + $0x100] ss:$16 sps:$4 sm:$0xff]  }
  0x17   :  { %821 = vmatprep.subr.bf16.mxu0 %v2112_v0  ;;  %1029 = vmatpush1.bf16.msra.mxu1 %v1968_v13  ;;  %v2037_v3 = vld [vmem:[%s2741_s0 + $0x124] ss:$16 sps:$4 sm:$0xff]   ;;  %v2042_v4 = vld [vmem:[%s2741_s0 + $0x148] ss:$16 sps:$4 sm:$0xff]   ;;  %v2046_v5 = vld [vmem:[%s2741_s0 + $0x16c] ss:$16 sps:$4 sm:$0xff]  }
  0x18   :  { %1030 = vmatprep.subr.bf16.mxu1 %v2112_v0  ;;  %v2039_v6 = vld [vmem:[%s2741_s0 + $0x120] ss:$16 sps:$4 sm:$0xff]   ;;  %v2043_v7 = vld [vmem:[%s2741_s0 + $0x144] ss:$16 sps:$4 sm:$0xff]   ;;  %v2048_v8 = vld [vmem:[%s2741_s0 + $0x168] ss:$16 sps:$4 sm:$0xff]  }
  0x19   :  { %v2052_v9 = vld [vmem:[%s2741_s0 + $0x18c] ss:$16 sps:$4 sm:$0xff]   ;;  %v2045_v10 = vld [vmem:[%s2741_s0 + $0x140] ss:$16 sps:$4 sm:$0xff]   ;;  %v2049_v11 = vld [vmem:[%s2741_s0 + $0x164] ss:$16 sps:$4 sm:$0xff]  }
  0x1a   :  { %822 = vmatpush1.bf16.msra.mxu0 %v1961_v12  ;;  %v2054_v12 = vld [vmem:[%s2741_s0 + $0x188] ss:$16 sps:$4 sm:$0xff]   ;;  %v2058_v13 = vld [vmem:[%s2741_s0 + $0x1ac] ss:$16 sps:$4 sm:$0xff]  }
  0x1b   :  { %823 = vmatprep.subr.bf16.mxu0 %v2112_v0  ;;  %1031 = vmatpush1.bf16.msra.mxu1 %v1970_v15  ;;  %v2055_v15 = vld [vmem:[%s2741_s0 + $0x184] ss:$16 sps:$4 sm:$0xff]   ;;  %v2060_v16 = vld [vmem:[%s2741_s0 + $0x1a8] ss:$16 sps:$4 sm:$0xff]   ;;  %v2064_v17 = vld [vmem:[%s2741_s0 + $0x1cc] ss:$16 sps:$4 sm:$0xff]  }
  0x1c   :  { %1032 = vmatprep.subr.bf16.mxu1 %v2112_v0 }
  0x1e   :  { %824 = vmatpush1.bf16.msra.mxu0 %v1963_v14  ;;  %v2051_v14 = vld [vmem:[%s2741_s0 + $0x160] ss:$16 sps:$4 sm:$0xff]  }
  0x1f   :  { %825 = vmatprep.subr.bf16.mxu0 %v2112_v0  ;;  %1033 = vmatpush1.bf16.msra.mxu1 %v1972_v19  ;;  %v2061_v19 = vld [vmem:[%s2741_s0 + $0x1a4] ss:$16 sps:$4 sm:$0xff]  }
  0x20   :  { %1044 = vmatprep.subr.bf16.mxu1 %v2112_v0 }
  0x22   :  { %826 = vmatpush2.bf16.msra.mxu0 %v1965_v18  ;;  %v2057_v18 = vld [vmem:[%s2741_s0 + $0x180] ss:$16 sps:$4 sm:$0xff]  }
  0x23   :  { %827 = vmatprep.subr.bf16.mxu0 %v2112_v0  ;;  %1045 = vmatpush2.bf16.msra.mxu1 %v1974_v21  ;;  %v2070_v21 = vld [vmem:[%s2741_s0 + $0x1ec] ss:$16 sps:$4 sm:$0xff]  }
  0x24   :  { %1046 = vmatprep.subr.bf16.mxu1 %v2112_v0 }
  0x26   :  { %828 = vmatpush2.bf16.msra.mxu0 %v1967_v20  ;;  %v2066_v20 = vld [vmem:[%s2741_s0 + $0x1c8] ss:$16 sps:$4 sm:$0xff]  }
  0x27   :  { %829 = vmatprep.subr.bf16.mxu0 %v2112_v0  ;;  %1047 = vmatpush2.bf16.msra.mxu1 %v1976_v23  ;;  %v2067_v23 = vld [vmem:[%s2741_s0 + $0x1c4] ss:$16 sps:$4 sm:$0xff]  }
  0x28   :  { %1048 = vmatprep.subr.bf16.mxu1 %v2112_v0 }
  0x2a   :  { %830 = vmatpush2.bf16.msra.mxu0 %v1969_v22  ;;  %v2063_v22 = vld [vmem:[%s2741_s0 + $0x1a0] ss:$16 sps:$4 sm:$0xff]  }
  0x2b   :  { %831 = vmatprep.subr.bf16.mxu0 %v2112_v0  ;;  %1049 = vmatpush2.bf16.msra.mxu1 %v1978_v25  ;;  %v2076_v25 = vld [vmem:[%s2741_s0 + $0x20c] ss:$16 sps:$4 sm:$0xff]  }
  0x2e   :  { %832 = vmatpush2.bf16.msra.mxu0 %v1971_v24  ;;  %1051 = vmatmul.mubr.bf16.vlgmr.msra.gmra.mxu1 %v1979_v27  ;;  %v2072_v24 = vld [vmem:[%s2741_s0 + $0x1e8] ss:$16 sps:$4 sm:$0xff]   ;;  %v2073_v27 = vld [vmem:[%s2741_s0 + $0x1e4] ss:$16 sps:$4 sm:$0xff]  }
  0x2f   :  { %833 = vmatprep.subr.bf16.mxu0 %v2112_v0  ;;  %1710 = vmatprep.mubr.msk.bf16.mxu1 %vm742_vm0, %v1986_v28  ;;  %v2078_v28 = vld [vmem:[%s2741_s0 + $0x208] ss:$16 sps:$4 sm:$0xff]  }
  0x32   :  { %834 = vmatpush2.bf16.msra.mxu0 %v1973_v26  ;;  %v2069_v26 = vld [vmem:[%s2741_s0 + $0x1c0] ss:$16 sps:$4 sm:$0xff]  }
  0x33   :  { %835 = vmatprep.subr.bf16.mxu0 %v2112_v0 }
  0x36   :  { %836 = vmatpush2.bf16.msra.mxu0 %v1975_v29  ;;  %1059 = vmatmul.mubr.bf16.gmra.mxu1 %v1988_v31  ;;  %v2082_v29 = vld [vmem:[%s2741_s0 + $0x22c] ss:$16 sps:$4 sm:$0xff]   ;;  %v2079_v31 = vld [vmem:[%s2741_s0 + $0x204] ss:$16 sps:$4 sm:$0xff]  }
  0x37   :  { %837 = vmatprep.subr.bf16.mxu0 %v2112_v0  ;;  %1711 = vmatprep.mubr.msk.bf16.mxu1 %vm742_vm0, %v1992_v32  ;;  %v2084_v32 = vld [vmem:[%s2741_s0 + $0x228] ss:$16 sps:$4 sm:$0xff]  }
  0x3a   :  { %838 = vmatpush2.bf16.msra.mxu0 %v1977_v30  ;;  %v2075_v30 = vld [vmem:[%s2741_s0 + $0x1e0] ss:$16 sps:$4 sm:$0xff]  }
  0x3b   :  { %839 = vmatprep.subr.bf16.mxu0 %v2112_v0  ;;  %v2036_v0 = vld [vmem:[%s2741_s0 + $0x128] ss:$16 sps:$4 sm:$0xff]  }
  0x3e   :  { %840 = vmatpush2.bf16.msra.mxu0 %v1982_v33  ;;  %1067 = vmatmul.mubr.bf16.gmra.mxu1 %v1994_v36  ;;  %v2088_v33 = vld [vmem:[%s2741_s0 + $0x24c] ss:$16 sps:$4 sm:$0xff]   ;;  %v2090_v36 = vld [vmem:[%s2741_s0 + $0x248] ss:$16 sps:$4 sm:$0xff]  }
  0x3f   :  { %1712 = vmatprep.mubr.msk.bf16.mxu1 %vm742_vm0, %v1998_v37  ;;  %v2094_v37 = vld [vmem:[%s2741_s0 + $0x26c] ss:$16 sps:$4 sm:$0xff]  }
  0x41   :  { %842 = vmatmul.mubr.bf16.vlgmr.msra.gmra.mxu0 %v1983_v34  ;;  %v2081_v34 = vld [vmem:[%s2741_s0 + $0x200] ss:$16 sps:$4 sm:$0xff]  }
  0x42   :  { %849 = vmatprep.mubr.bf16.mxu0 %v1989_v35  ;;  %v2085_v35 = vld [vmem:[%s2741_s0 + $0x224] ss:$16 sps:$4 sm:$0xff]  }
  0x46   :  { %1075 = vmatmul.mubr.bf16.gmra.mxu1 %v2000_v40  ;;  %v2096_v40 = vld [vmem:[%s2741_s0 + $0x268] ss:$16 sps:$4 sm:$0xff]  }
  0x47   :  { %1713 = vmatprep.mubr.msk.bf16.mxu1 %vm742_vm0, %v2004_v41  ;;  %v2100_v41 = vld [vmem:[%s2741_s0 + $0x28c] ss:$16 sps:$4 sm:$0xff]  }
  0x49   :  { %850 = vmatmul.mubr.bf16.gmra.mxu0 %v1991_v38  ;;  %v2087_v38 = vld [vmem:[%s2741_s0 + $0x220] ss:$16 sps:$4 sm:$0xff]  }
  0x4a   :  { %857 = vmatprep.mubr.bf16.mxu0 %v1995_v39  ;;  %v2091_v39 = vld [vmem:[%s2741_s0 + $0x244] ss:$16 sps:$4 sm:$0xff]  }
  0x4e   :  { %1083 = vmatmul.mubr.bf16.gmra.mxu1 %v2006_v44  ;;  %v2102_v44 = vld [vmem:[%s2741_s0 + $0x288] ss:$16 sps:$4 sm:$0xff]  }
  0x4f   :  { %1714 = vmatprep.mubr.msk.bf16.mxu1 %vm742_vm0, %v2010_v45  ;;  %v2106_v45 = vld [vmem:[%s2741_s0 + $0x2ac] ss:$16 sps:$4 sm:$0xff]  }
  0x51   :  { %858 = vmatmul.mubr.bf16.gmra.mxu0 %v1997_v42  ;;  %v2093_v42 = vld [vmem:[%s2741_s0 + $0x240] ss:$16 sps:$4 sm:$0xff]  }
  0x52   :  { %865 = vmatprep.mubr.bf16.mxu0 %v2001_v43  ;;  %v2097_v43 = vld [vmem:[%s2741_s0 + $0x264] ss:$16 sps:$4 sm:$0xff]  }
  0x56   :  { %1091 = vmatmul.mubr.bf16.gmra.mxu1 %v2012_v48  ;;  %v2108_v48 = vld [vmem:[%s2741_s0 + $0x2a8] ss:$16 sps:$4 sm:$0xff]  }
  0x57   :  { %1715 = vmatprep.mubr.msk.bf16.mxu1 %vm742_vm0, %v2016_v49  ;;  %v2105_v49 = vld [vmem:[%s2741_s0 + $0x280] ss:$16 sps:$4 sm:$0xff]  }
  0x59   :  { %866 = vmatmul.mubr.bf16.gmra.mxu0 %v2003_v46  ;;  %v2099_v46 = vld [vmem:[%s2741_s0 + $0x260] ss:$16 sps:$4 sm:$0xff]  }
  0x5a   :  { %873 = vmatprep.mubr.bf16.mxu0 %v2007_v47  ;;  %v2103_v47 = vld [vmem:[%s2741_s0 + $0x284] ss:$16 sps:$4 sm:$0xff]  }
  0x5e   :  { %1099 = vmatmul.mubr.bf16.gmra.mxu1 %v2018_v52 }
  0x5f   :  { %1716 = vmatprep.mubr.msk.bf16.mxu1 %vm742_vm0, %v2022_v53 }
  0x61   :  { %874 = vmatmul.mubr.bf16.gmra.mxu0 %v2009_v50  ;;  %v2109_v50 = vld [vmem:[%s2741_s0 + $0x2a4] ss:$16 sps:$4 sm:$0xff]  }
  0x62   :  { %881 = vmatprep.mubr.bf16.mxu0 %v2013_v51  ;;  %v2111_v51 = vld [vmem:[%s2741_s0 + $0x2a0] ss:$16 sps:$4 sm:$0xff]  }
  0x66   :  { %1107 = vmatmul.mubr.bf16.gmra.mxu1 %v2024_v56 }
  0x67   :  { %1717 = vmatprep.mubr.msk.bf16.mxu1 %vm742_vm0, %v2028_v57 }
  0x69   :  { %882 = vmatmul.mubr.bf16.gmra.mxu0 %v2015_v54 }
  0x6a   :  { %889 = vmatprep.mubr.bf16.mxu0 %v2019_v55 }
  0x6e   :  { %1115 = vmatmul.mubr.bf16.gmra.mxu1 %v2030_v60 }
  0x6f   :  { %1718 = vmatprep.mubr.msk.bf16.mxu1 %vm742_vm0, %v2034_v61 }
  0x71   :  { %890 = vmatmul.mubr.bf16.gmra.mxu0 %v2021_v58 }
  0x72   :  { %897 = vmatprep.mubr.bf16.mxu0 %v2025_v59  ;;  %v2530_v59 = vld [vmem:[%s2742_s2] ss:$0 sm:$0xff] }
  0x76   :  { %1123 = vmatmul.mubr.bf16.gmra.mxu1 %v2036_v0 }
  0x77   :  { %1719 = vmatprep.mubr.msk.bf16.mxu1 %vm742_vm0, %v2040_v1 }
  0x79   :  { %898 = vmatmul.mubr.bf16.gmra.mxu0 %v2027_v62 }
  0x7a   :  { %905 = vmatprep.mubr.bf16.mxu0 %v2031_v63 }
  0x7e   :  { %1131 = vmatmul.mubr.bf16.gmra.mxu1 %v2042_v4 }
  0x7f   :  { %1720 = vmatprep.mubr.msk.bf16.mxu1 %vm742_vm0, %v2046_v5 }
  0x81   :  { %906 = vmatmul.mubr.bf16.gmra.mxu0 %v2033_v2 }
  0x82   :  { %913 = vmatprep.mubr.bf16.mxu0 %v2037_v3 }
  0x86   :  { %1139 = vmatmul.mubr.bf16.gmra.mxu1 %v2048_v8 }
  0x87   :  { %1721 = vmatprep.mubr.msk.bf16.mxu1 %vm742_vm0, %v2052_v9 }
  0x89   :  { %914 = vmatmul.mubr.bf16.gmra.mxu0 %v2039_v6 }
  0x8a   :  { %921 = vmatprep.mubr.bf16.mxu0 %v2043_v7  ;;  %v2537_v7 = vld [vmem:[%s2742_s2 + $0x1] ss:$0 sm:$0xff] }
  0x8e   :  { %1147 = vmatmul.mubr.bf16.gmra.mxu1 %v2054_v12 }
  0x8f   :  { %1722 = vmatprep.mubr.msk.bf16.mxu1 %vm742_vm0, %v2058_v13 }
  0x91   :  { %922 = vmatmul.mubr.bf16.gmra.mxu0 %v2045_v10 }
  0x92   :  { %929 = vmatprep.mubr.bf16.mxu0 %v2049_v11 }
  0x96   :  { %1155 = vmatmul.mubr.bf16.gmra.mxu1 %v2060_v16  ;;  %v2544_v16 = vld [vmem:[%s2742_s2 + $0x2] ss:$0 sm:$0xff] }
  0x97   :  { %1723 = vmatprep.mubr.msk.bf16.mxu1 %vm742_vm0, %v2064_v17 }
  0x99   :  { %930 = vmatmul.mubr.bf16.gmra.mxu0 %v2051_v14 }
  0x9a   :  { %937 = vmatprep.mubr.bf16.mxu0 %v2055_v15 }
  0x9e   :  { %1163 = vmatmul.mubr.bf16.gmra.mxu1 %v2066_v20 }
  0x9f   :  { %1724 = vmatprep.mubr.msk.bf16.mxu1 %vm742_vm0, %v2070_v21 }
  0xa1   :  { %938 = vmatmul.mubr.bf16.gmra.mxu0 %v2057_v18 }
  0xa2   :  { %945 = vmatprep.mubr.bf16.mxu0 %v2061_v19 }
  0xa6   :  { %1171 = vmatmul.mubr.bf16.gmra.mxu1 %v2072_v24 }
  0xa7   :  { %1725 = vmatprep.mubr.msk.bf16.mxu1 %vm742_vm0, %v2076_v25 }
  0xa9   :  { %946 = vmatmul.mubr.bf16.gmra.mxu0 %v2063_v22 }
  0xaa   :  { %953 = vmatprep.mubr.bf16.mxu0 %v2067_v23 }
  0xae   :  { %1179 = vmatmul.mubr.bf16.gmra.mxu1 %v2078_v28 }
  0xaf   :  { %1726 = vmatprep.mubr.msk.bf16.mxu1 %vm742_vm0, %v2082_v29 }
  0xb1   :  { %954 = vmatmul.mubr.bf16.gmra.mxu0 %v2069_v26 }
  0xb2   :  { %961 = vmatprep.mubr.bf16.mxu0 %v2073_v27 }
  0xb6   :  { %1187 = vmatmul.mubr.bf16.gmra.mxu1 %v2084_v32 }
  0xb7   :  { %1727 = vmatprep.mubr.msk.bf16.mxu1 %vm742_vm0, %v2088_v33 }
  0xb9   :  { %962 = vmatmul.mubr.bf16.gmra.mxu0 %v2075_v30 }
  0xba   :  { %969 = vmatprep.mubr.bf16.mxu0 %v2079_v31 }
  0xbe   :  { %1195 = vmatmul.mubr.bf16.gmra.mxu1 %v2090_v36 }
  0xbf   :  { %1728 = vmatprep.mubr.msk.bf16.mxu1 %vm742_vm0, %v2094_v37 }
  0xc1   :  { %970 = vmatmul.mubr.bf16.gmra.mxu0 %v2081_v34 }
  0xc2   :  { %977 = vmatprep.mubr.bf16.mxu0 %v2085_v35 }
  0xc6   :  { %1203 = vmatmul.mubr.bf16.gmra.mxu1 %v2096_v40 }
  0xc7   :  { %1729 = vmatprep.mubr.msk.bf16.mxu1 %vm742_vm0, %v2100_v41 }
  0xc9   :  { %978 = vmatmul.mubr.bf16.gmra.mxu0 %v2087_v38 }
  0xca   :  { %985 = vmatprep.mubr.bf16.mxu0 %v2091_v39 }
  0xce   :  { %1211 = vmatmul.mubr.bf16.gmra.mxu1 %v2102_v44 }
  0xcf   :  { %1730 = vmatprep.mubr.msk.bf16.mxu1 %vm742_vm0, %v2106_v45 }
  0xd1   :  { %986 = vmatmul.mubr.bf16.gmra.mxu0 %v2093_v42 }
  0xd2   :  { %993 = vmatprep.mubr.bf16.mxu0 %v2097_v43 }
  0xd6   :  { %1219 = vmatmul.mubr.bf16.gmra.mxu1 %v2108_v48 }
  0xd9   :  { %994 = vmatmul.mubr.bf16.gmra.mxu0 %v2099_v46 }
  0xda   :  { %1001 = vmatprep.mubr.bf16.mxu0 %v2103_v47 }
  0xe1   :  { %1002 = vmatmul.mubr.bf16.gmra.mxu0 %v2105_v49 }
  0xe2   :  { %1009 = vmatprep.mubr.bf16.mxu0 %v2109_v50 }
  0xe9   :  { %1010 = vmatmul.mubr.bf16.gmra.mxu0 %v2111_v51 }
  0xee   :  { %v1052_v52 = vpop.f32.mrf.mxu1 }
  0xf0   :  { %v1054_v53 = vpop.f32.mrf.mxu1 }
  0xf2   :  { %v1055_v54 = vpop.f32.mrf.mxu1 }
  0xf4   :  { %v1057_v55 = vpop.f32.mrf.mxu1 }
  0xf6   :  { %v1060_v56 = vpop.f32.mrf.mxu1 }
  0xf8   :  { %v1062_v57 = vpop.f32.mrf.mxu1 }
  0xfa   :  { %v1063_v58 = vpop.f32.mrf.mxu1 }
  0xfc   :  { %v1065_v60 = vpop.f32.mrf.mxu1 }
  0xfe   :  { %v1068_v63 = vpop.f32.mrf.mxu1 }
 0x100   :  { %v1070_v2 = vpop.f32.mrf.mxu1 }
 0x101   :  { %v843_v61 = vpop.f32.mrf.mxu0 }
 0x102   :  { %v844_v62 = vadd.f32 %v2530_v59, %v843_v61  ;;  %v1071_v6 = vpop.f32.mrf.mxu1 }
 0x103   :  { %v845_v0 = vpop.f32.mrf.mxu0 }
 0x104   :  { %v1053_v1 = vadd.f32 %v1052_v52, %v844_v62  ;;  %v1073_v10 = vpop.f32.mrf.mxu1 }
 0x105   :  { %v846_v3 = vpop.f32.mrf.mxu0 }
 0x106   :  { %v1227_v4 = vmax.f32 %v1053_v1, 0.0  ;;  %v847_v5 = vadd.f32 %v2530_v59, %v846_v3  ;;  %v1076_v15 = vpop.f32.mrf.mxu1 }
 0x107   :  { %v848_v8 = vpop.f32.mrf.mxu0 }
 0x108   :  { %v1056_v9 = vadd.f32 %v1055_v54, %v847_v5  ;;  %v1276_v12 = vmul.f32 %v2537_v7, %v1227_v4  ;;  %v1078_v20 = vpop.f32.mrf.mxu1 }
 0x109   :  { %v851_v11 = vpop.f32.mrf.mxu0 }
 0x10a   :  { %v1228_v13 = vmax.f32 %v1056_v9, 0.0  ;;  %v852_v14 = vadd.f32 %v2530_v59, %v851_v11  ;;  %v1325_v22 = vadd.f32 %v2544_v16, %v1276_v12  ;;  %v1079_v26 = vpop.f32.mrf.mxu1 }
 0x10b   :  { %v853_v17 = vpop.f32.mrf.mxu0 }
 0x10c   :  { %v1277_v18 = vmul.f32 %v2537_v7, %v1228_v13  ;;  %v1061_v19 = vadd.f32 %v1060_v56, %v852_v14  ;;  %v1081_v30 = vpop.f32.mrf.mxu1 }
 0x10d   :  { %v854_v21 = vpop.f32.mrf.mxu0 }
 0x10e   :  { %v1326_v23 = vadd.f32 %v2544_v16, %v1277_v18  ;;  %v1229_v24 = vmax.f32 %v1061_v19, 0.0  ;;  %v855_v25 = vadd.f32 %v2530_v59, %v854_v21  ;;  %v1084_v35 = vpop.f32.mrf.mxu1 }
 0x10f   :  { %v856_v27 = vpop.f32.mrf.mxu0 }
 0x110   :  { %v1824_v28 = vpack.c.bf16 %v1326_v23, %v1325_v22  ;;  %v1064_v29 = vadd.f32 %v1063_v58, %v855_v25  ;;  %v1278_v32 = vmul.f32 %v2537_v7, %v1229_v24  ;;  %v1086_v39 = vpop.f32.mrf.mxu1 }
 0x111   :  { %v859_v31 = vpop.f32.mrf.mxu0 }
 0x112   :  { %1825 = vst [vmem:[%s2743_s3] sm:$0xff] %v1824_v28   ;;  %v1230_v33 = vmax.f32 %v1064_v29, 0.0  ;;  %v860_v34 = vadd.f32 %v2530_v59, %v859_v31  ;;  %v1327_v41 = vadd.f32 %v2544_v16, %v1278_v32  ;;  %v1087_v45 = vpop.f32.mrf.mxu1 }
 0x113   :  { %v861_v36 = vpop.f32.mrf.mxu0 }
 0x114   :  { %v1279_v37 = vmul.f32 %v2537_v7, %v1230_v33  ;;  %v1069_v38 = vadd.f32 %v1068_v63, %v860_v34  ;;  %v1089_v49 = vpop.f32.mrf.mxu1 }
 0x115   :  { %v862_v40 = vpop.f32.mrf.mxu0 }
 0x116   :  { %v1328_v42 = vadd.f32 %v2544_v16, %v1279_v37  ;;  %v1231_v43 = vmax.f32 %v1069_v38, 0.0  ;;  %v863_v44 = vadd.f32 %v2530_v59, %v862_v40  ;;  %v1092_v54 = vpop.f32.mrf.mxu1 }
 0x117   :  { %v864_v46 = vpop.f32.mrf.mxu0 }
 0x118   :  { %v1829_v47 = vpack.c.bf16 %v1328_v42, %v1327_v41  ;;  %v1072_v48 = vadd.f32 %v1071_v6, %v863_v44  ;;  %v1280_v51 = vmul.f32 %v2537_v7, %v1231_v43  ;;  %v1094_v58 = vpop.f32.mrf.mxu1 }
 0x119   :  { %v867_v50 = vpop.f32.mrf.mxu0 }
 0x11a   :  { %1931 = vst [vmem:[%s2743_s3 + $0x8] sm:$0xff] %v1829_v47   ;;  %v1232_v52 = vmax.f32 %v1072_v48, 0.0  ;;  %v868_v53 = vadd.f32 %v2530_v59, %v867_v50  ;;  %v1329_v61 = vadd.f32 %v2544_v16, %v1280_v51  ;;  %v1095_v1 = vpop.f32.mrf.mxu1 }
 0x11b   :  { %v869_v55 = vpop.f32.mrf.mxu0 }
 0x11c   :  { %v1281_v56 = vmul.f32 %v2537_v7, %v1232_v52  ;;  %v1077_v57 = vadd.f32 %v1076_v15, %v868_v53  ;;  %v1097_v5 = vpop.f32.mrf.mxu1 }
 0x11d   :  { %v870_v60 = vpop.f32.mrf.mxu0 }
 0x11e   :  { %v1330_v62 = vadd.f32 %v2544_v16, %v1281_v56  ;;  %v1233_v63 = vmax.f32 %v1077_v57, 0.0  ;;  %v871_v0 = vadd.f32 %v2530_v59, %v870_v60  ;;  %v1100_v11 = vpop.f32.mrf.mxu1 }
 0x11f   :  { %v872_v2 = vpop.f32.mrf.mxu0 }
 0x120   :  { %v1834_v3 = vpack.c.bf16 %v1330_v62, %v1329_v61  ;;  %v1080_v4 = vadd.f32 %v1079_v26, %v871_v0  ;;  %v1282_v8 = vmul.f32 %v2537_v7, %v1233_v63  ;;  %v1102_v15 = vpop.f32.mrf.mxu1 }
 0x121   :  { %v875_v6 = vpop.f32.mrf.mxu0 }
 0x122   :  { %1932 = vst [vmem:[%s2743_s3 + $0x10] sm:$0xff] %v1834_v3   ;;  %v1234_v9 = vmax.f32 %v1080_v4, 0.0  ;;  %v876_v10 = vadd.f32 %v2530_v59, %v875_v6  ;;  %v1331_v18 = vadd.f32 %v2544_v16, %v1282_v8  ;;  %v1103_v22 = vpop.f32.mrf.mxu1 }
 0x123   :  { %v877_v12 = vpop.f32.mrf.mxu0 }
 0x124   :  { %v1283_v13 = vmul.f32 %v2537_v7, %v1234_v9  ;;  %v1085_v14 = vadd.f32 %v1084_v35, %v876_v10  ;;  %v1105_v26 = vpop.f32.mrf.mxu1 }
 0x125   :  { %v878_v17 = vpop.f32.mrf.mxu0 }
 0x126   :  { %v1332_v19 = vadd.f32 %v2544_v16, %v1283_v13  ;;  %v1235_v20 = vmax.f32 %v1085_v14, 0.0  ;;  %v879_v21 = vadd.f32 %v2530_v59, %v878_v17  ;;  %v1108_v31 = vpop.f32.mrf.mxu1 }
 0x127   :  { %v880_v23 = vpop.f32.mrf.mxu0 }
 0x128   :  { %v1839_v24 = vpack.c.bf16 %v1332_v19, %v1331_v18  ;;  %v1088_v25 = vadd.f32 %v1087_v45, %v879_v21  ;;  %v1284_v28 = vmul.f32 %v2537_v7, %v1235_v20  ;;  %v1110_v35 = vpop.f32.mrf.mxu1 }
 0x129   :  { %v883_v27 = vpop.f32.mrf.mxu0 }
 0x12a   :  { %1933 = vst [vmem:[%s2743_s3 + $0x18] sm:$0xff] %v1839_v24   ;;  %v1236_v29 = vmax.f32 %v1088_v25, 0.0  ;;  %v884_v30 = vadd.f32 %v2530_v59, %v883_v27  ;;  %v1333_v37 = vadd.f32 %v2544_v16, %v1284_v28  ;;  %v1111_v41 = vpop.f32.mrf.mxu1 }
 0x12b   :  { %v885_v32 = vpop.f32.mrf.mxu0 }
 0x12c   :  { %v1285_v33 = vmul.f32 %v2537_v7, %v1236_v29  ;;  %v1093_v34 = vadd.f32 %v1092_v54, %v884_v30  ;;  %v1113_v45 = vpop.f32.mrf.mxu1 }
 0x12d   :  { %v886_v36 = vpop.f32.mrf.mxu0 }
 0x12e   :  { %v1334_v38 = vadd.f32 %v2544_v16, %v1285_v33  ;;  %v1237_v39 = vmax.f32 %v1093_v34, 0.0  ;;  %v887_v40 = vadd.f32 %v2530_v59, %v886_v36  ;;  %v1116_v50 = vpop.f32.mrf.mxu1 }
 0x12f   :  { %v888_v42 = vpop.f32.mrf.mxu0 }
 0x130   :  { %v1844_v43 = vpack.c.bf16 %v1334_v38, %v1333_v37  ;;  %v1096_v44 = vadd.f32 %v1095_v1, %v887_v40  ;;  %v1286_v47 = vmul.f32 %v2537_v7, %v1237_v39  ;;  %v1118_v54 = vpop.f32.mrf.mxu1 }
 0x131   :  { %v891_v46 = vpop.f32.mrf.mxu0 }
 0x132   :  { %1934 = vst [vmem:[%s2743_s3 + $0x20] sm:$0xff] %v1844_v43   ;;  %v1238_v48 = vmax.f32 %v1096_v44, 0.0  ;;  %v892_v49 = vadd.f32 %v2530_v59, %v891_v46  ;;  %v1335_v56 = vadd.f32 %v2544_v16, %v1286_v47  ;;  %v1119_v61 = vpop.f32.mrf.mxu1 }
 0x133   :  { %v893_v51 = vpop.f32.mrf.mxu0 }
 0x134   :  { %v1287_v52 = vmul.f32 %v2537_v7, %v1238_v48  ;;  %v1101_v53 = vadd.f32 %v1100_v11, %v892_v49  ;;  %v1121_v1 = vpop.f32.mrf.mxu1 }
 0x135   :  { %v894_v55 = vpop.f32.mrf.mxu0 }
 0x136   :  { %v1336_v57 = vadd.f32 %v2544_v16, %v1287_v52  ;;  %v1239_v58 = vmax.f32 %v1101_v53, 0.0  ;;  %v895_v60 = vadd.f32 %v2530_v59, %v894_v55  ;;  %v1124_v6 = vpop.f32.mrf.mxu1 }
 0x137   :  { %v896_v62 = vpop.f32.mrf.mxu0 }
 0x138   :  { %v1849_v63 = vpack.c.bf16 %v1336_v57, %v1335_v56  ;;  %v1104_v0 = vadd.f32 %v1103_v22, %v895_v60  ;;  %v1288_v3 = vmul.f32 %v2537_v7, %v1239_v58  ;;  %v1126_v11 = vpop.f32.mrf.mxu1 }
 0x139   :  { %v899_v2 = vpop.f32.mrf.mxu0 }
 0x13a   :  { %1935 = vst [vmem:[%s2743_s3 + $0x28] sm:$0xff] %v1849_v63   ;;  %v1240_v4 = vmax.f32 %v1104_v0, 0.0  ;;  %v900_v5 = vadd.f32 %v2530_v59, %v899_v2  ;;  %v1337_v13 = vadd.f32 %v2544_v16, %v1288_v3  ;;  %v1127_v18 = vpop.f32.mrf.mxu1 }
 0x13b   :  { %v901_v8 = vpop.f32.mrf.mxu0 }
 0x13c   :  { %v1289_v9 = vmul.f32 %v2537_v7, %v1240_v4  ;;  %v1109_v10 = vadd.f32 %v1108_v31, %v900_v5  ;;  %v1129_v22 = vpop.f32.mrf.mxu1 }
 0x13d   :  { %v902_v12 = vpop.f32.mrf.mxu0 }
 0x13e   :  { %v1338_v14 = vadd.f32 %v2544_v16, %v1289_v9  ;;  %v1241_v15 = vmax.f32 %v1109_v10, 0.0  ;;  %v903_v17 = vadd.f32 %v2530_v59, %v902_v12  ;;  %v1132_v27 = vpop.f32.mrf.mxu1 }
 0x13f   :  { %v904_v19 = vpop.f32.mrf.mxu0 }
 0x140   :  { %v1854_v20 = vpack.c.bf16 %v1338_v14, %v1337_v13  ;;  %v1112_v21 = vadd.f32 %v1111_v41, %v903_v17  ;;  %v1290_v24 = vmul.f32 %v2537_v7, %v1241_v15  ;;  %v1134_v31 = vpop.f32.mrf.mxu1 }
 0x141   :  { %v907_v23 = vpop.f32.mrf.mxu0 }
 0x142   :  { %1936 = vst [vmem:[%s2743_s3 + $0x30] sm:$0xff] %v1854_v20   ;;  %v1242_v25 = vmax.f32 %v1112_v21, 0.0  ;;  %v908_v26 = vadd.f32 %v2530_v59, %v907_v23  ;;  %v1339_v33 = vadd.f32 %v2544_v16, %v1290_v24  ;;  %v1135_v37 = vpop.f32.mrf.mxu1 }
 0x143   :  { %v909_v28 = vpop.f32.mrf.mxu0 }
 0x144   :  { %v1291_v29 = vmul.f32 %v2537_v7, %v1242_v25  ;;  %v1117_v30 = vadd.f32 %v1116_v50, %v908_v26  ;;  %v1137_v41 = vpop.f32.mrf.mxu1 }
 0x145   :  { %v910_v32 = vpop.f32.mrf.mxu0 }
 0x146   :  { %v1340_v34 = vadd.f32 %v2544_v16, %v1291_v29  ;;  %v1243_v35 = vmax.f32 %v1117_v30, 0.0  ;;  %v911_v36 = vadd.f32 %v2530_v59, %v910_v32  ;;  %v1140_v46 = vpop.f32.mrf.mxu1 }
 0x147   :  { %v912_v38 = vpop.f32.mrf.mxu0 }
 0x148   :  { %v1859_v39 = vpack.c.bf16 %v1340_v34, %v1339_v33  ;;  %v1120_v40 = vadd.f32 %v1119_v61, %v911_v36  ;;  %v1292_v43 = vmul.f32 %v2537_v7, %v1243_v35  ;;  %v1142_v50 = vpop.f32.mrf.mxu1 }
 0x149   :  { %v915_v42 = vpop.f32.mrf.mxu0 }
 0x14a   :  { %1937 = vst [vmem:[%s2743_s3 + $0x38] sm:$0xff] %v1859_v39   ;;  %v1244_v44 = vmax.f32 %v1120_v40, 0.0  ;;  %v916_v45 = vadd.f32 %v2530_v59, %v915_v42  ;;  %v1341_v52 = vadd.f32 %v2544_v16, %v1292_v43  ;;  %v1143_v56 = vpop.f32.mrf.mxu1 }
 0x14b   :  { %v917_v47 = vpop.f32.mrf.mxu0 }
 0x14c   :  { %v1293_v48 = vmul.f32 %v2537_v7, %v1244_v44  ;;  %v1125_v49 = vadd.f32 %v1124_v6, %v916_v45  ;;  %v1145_v61 = vpop.f32.mrf.mxu1 }
 0x14d   :  { %v918_v51 = vpop.f32.mrf.mxu0 }
 0x14e   :  { %v1342_v53 = vadd.f32 %v2544_v16, %v1293_v48  ;;  %v1245_v54 = vmax.f32 %v1125_v49, 0.0  ;;  %v919_v55 = vadd.f32 %v2530_v59, %v918_v51  ;;  %v1148_v2 = vpop.f32.mrf.mxu1 }
 0x14f   :  { %v920_v57 = vpop.f32.mrf.mxu0 }
 0x150   :  { %v1864_v58 = vpack.c.bf16 %v1342_v53, %v1341_v52  ;;  %v1128_v60 = vadd.f32 %v1127_v18, %v919_v55  ;;  %v1294_v63 = vmul.f32 %v2537_v7, %v1245_v54  ;;  %v1150_v6 = vpop.f32.mrf.mxu1 }
 0x151   :  { %v923_v62 = vpop.f32.mrf.mxu0 }
 0x152   :  { %1938 = vst [vmem:[%s2743_s3 + $0x40] sm:$0xff] %v1864_v58   ;;  %v1246_v0 = vmax.f32 %v1128_v60, 0.0  ;;  %v924_v1 = vadd.f32 %v2530_v59, %v923_v62  ;;  %v1343_v9 = vadd.f32 %v2544_v16, %v1294_v63  ;;  %v1151_v13 = vpop.f32.mrf.mxu1 }
 0x153   :  { %v925_v3 = vpop.f32.mrf.mxu0 }
 0x154   :  { %v1295_v4 = vmul.f32 %v2537_v7, %v1246_v0  ;;  %v1133_v5 = vadd.f32 %v1132_v27, %v924_v1  ;;  %v1153_v18 = vpop.f32.mrf.mxu1 }
 0x155   :  { %v926_v8 = vpop.f32.mrf.mxu0 }
 0x156   :  { %v1344_v10 = vadd.f32 %v2544_v16, %v1295_v4  ;;  %v1247_v11 = vmax.f32 %v1133_v5, 0.0  ;;  %v927_v12 = vadd.f32 %v2530_v59, %v926_v8  ;;  %v1156_v23 = vpop.f32.mrf.mxu1 }
 0x157   :  { %v928_v14 = vpop.f32.mrf.mxu0 }
 0x158   :  { %v1869_v15 = vpack.c.bf16 %v1344_v10, %v1343_v9  ;;  %v1136_v17 = vadd.f32 %v1135_v37, %v927_v12  ;;  %v1296_v20 = vmul.f32 %v2537_v7, %v1247_v11  ;;  %v1158_v27 = vpop.f32.mrf.mxu1 }
 0x159   :  { %v931_v19 = vpop.f32.mrf.mxu0 }
 0x15a   :  { %1939 = vst [vmem:[%s2743_s3 + $0x48] sm:$0xff] %v1869_v15   ;;  %v1248_v21 = vmax.f32 %v1136_v17, 0.0  ;;  %v932_v22 = vadd.f32 %v2530_v59, %v931_v19  ;;  %v1345_v29 = vadd.f32 %v2544_v16, %v1296_v20  ;;  %v1159_v33 = vpop.f32.mrf.mxu1 }
 0x15b   :  { %v933_v24 = vpop.f32.mrf.mxu0 }
 0x15c   :  { %v1297_v25 = vmul.f32 %v2537_v7, %v1248_v21  ;;  %v1141_v26 = vadd.f32 %v1140_v46, %v932_v22  ;;  %v1161_v37 = vpop.f32.mrf.mxu1 }
 0x15d   :  { %v934_v28 = vpop.f32.mrf.mxu0 }
 0x15e   :  { %v1346_v30 = vadd.f32 %v2544_v16, %v1297_v25  ;;  %v1249_v31 = vmax.f32 %v1141_v26, 0.0  ;;  %v935_v32 = vadd.f32 %v2530_v59, %v934_v28  ;;  %v1164_v42 = vpop.f32.mrf.mxu1 }
 0x15f   :  { %v936_v34 = vpop.f32.mrf.mxu0 }
 0x160   :  { %v1874_v35 = vpack.c.bf16 %v1346_v30, %v1345_v29  ;;  %v1144_v36 = vadd.f32 %v1143_v56, %v935_v32  ;;  %v1298_v39 = vmul.f32 %v2537_v7, %v1249_v31  ;;  %v1166_v46 = vpop.f32.mrf.mxu1 }
 0x161   :  { %v939_v38 = vpop.f32.mrf.mxu0 }
 0x162   :  { %1940 = vst [vmem:[%s2743_s3 + $0x50] sm:$0xff] %v1874_v35   ;;  %v1250_v40 = vmax.f32 %v1144_v36, 0.0  ;;  %v940_v41 = vadd.f32 %v2530_v59, %v939_v38  ;;  %v1347_v48 = vadd.f32 %v2544_v16, %v1298_v39  ;;  %v1167_v52 = vpop.f32.mrf.mxu1 }
 0x163   :  { %v941_v43 = vpop.f32.mrf.mxu0 }
 0x164   :  { %v1299_v44 = vmul.f32 %v2537_v7, %v1250_v40  ;;  %v1149_v45 = vadd.f32 %v1148_v2, %v940_v41  ;;  %v1169_v56 = vpop.f32.mrf.mxu1 }
 0x165   :  { %v942_v47 = vpop.f32.mrf.mxu0 }
 0x166   :  { %v1348_v49 = vadd.f32 %v2544_v16, %v1299_v44  ;;  %v1251_v50 = vmax.f32 %v1149_v45, 0.0  ;;  %v943_v51 = vadd.f32 %v2530_v59, %v942_v47  ;;  %v1172_v62 = vpop.f32.mrf.mxu1 }
 0x167   :  { %v944_v53 = vpop.f32.mrf.mxu0 }
 0x168   :  { %v1879_v54 = vpack.c.bf16 %v1348_v49, %v1347_v48  ;;  %v1152_v55 = vadd.f32 %v1151_v13, %v943_v51  ;;  %v1300_v58 = vmul.f32 %v2537_v7, %v1251_v50  ;;  %v1174_v2 = vpop.f32.mrf.mxu1 }
 0x169   :  { %v947_v57 = vpop.f32.mrf.mxu0 }
 0x16a   :  { %1941 = vst [vmem:[%s2743_s3 + $0x58] sm:$0xff] %v1879_v54   ;;  %v1252_v60 = vmax.f32 %v1152_v55, 0.0  ;;  %v948_v61 = vadd.f32 %v2530_v59, %v947_v57  ;;  %v1349_v4 = vadd.f32 %v2544_v16, %v1300_v58  ;;  %v1175_v9 = vpop.f32.mrf.mxu1 }
 0x16b   :  { %v949_v63 = vpop.f32.mrf.mxu0 }
 0x16c   :  { %v1301_v0 = vmul.f32 %v2537_v7, %v1252_v60  ;;  %v1157_v1 = vadd.f32 %v1156_v23, %v948_v61  ;;  %v1177_v13 = vpop.f32.mrf.mxu1 }
 0x16d   :  { %v950_v3 = vpop.f32.mrf.mxu0 }
 0x16e   :  { %v1350_v5 = vadd.f32 %v2544_v16, %v1301_v0  ;;  %v1253_v6 = vmax.f32 %v1157_v1, 0.0  ;;  %v951_v8 = vadd.f32 %v2530_v59, %v950_v3  ;;  %v1180_v19 = vpop.f32.mrf.mxu1 }
 0x16f   :  { %v952_v10 = vpop.f32.mrf.mxu0 }
 0x170   :  { %v1884_v11 = vpack.c.bf16 %v1350_v5, %v1349_v4  ;;  %v1160_v12 = vadd.f32 %v1159_v33, %v951_v8  ;;  %v1302_v15 = vmul.f32 %v2537_v7, %v1253_v6  ;;  %v1182_v23 = vpop.f32.mrf.mxu1 }
 0x171   :  { %v955_v14 = vpop.f32.mrf.mxu0 }
 0x172   :  { %1942 = vst [vmem:[%s2743_s3 + $0x60] sm:$0xff] %v1884_v11   ;;  %v1254_v17 = vmax.f32 %v1160_v12, 0.0  ;;  %v956_v18 = vadd.f32 %v2530_v59, %v955_v14  ;;  %v1351_v25 = vadd.f32 %v2544_v16, %v1302_v15  ;;  %v1183_v29 = vpop.f32.mrf.mxu1 }
 0x173   :  { %v957_v20 = vpop.f32.mrf.mxu0 }
 0x174   :  { %v1303_v21 = vmul.f32 %v2537_v7, %v1254_v17  ;;  %v1165_v22 = vadd.f32 %v1164_v42, %v956_v18  ;;  %v1185_v33 = vpop.f32.mrf.mxu1 }
 0x175   :  { %v958_v24 = vpop.f32.mrf.mxu0 }
 0x176   :  { %v1352_v26 = vadd.f32 %v2544_v16, %v1303_v21  ;;  %v1255_v27 = vmax.f32 %v1165_v22, 0.0  ;;  %v959_v28 = vadd.f32 %v2530_v59, %v958_v24  ;;  %v1188_v38 = vpop.f32.mrf.mxu1 }
 0x177   :  { %v960_v30 = vpop.f32.mrf.mxu0 }
 0x178   :  { %v1889_v31 = vpack.c.bf16 %v1352_v26, %v1351_v25  ;;  %v1168_v32 = vadd.f32 %v1167_v52, %v959_v28  ;;  %v1304_v35 = vmul.f32 %v2537_v7, %v1255_v27  ;;  %v1190_v42 = vpop.f32.mrf.mxu1 }
 0x179   :  { %v963_v34 = vpop.f32.mrf.mxu0 }
 0x17a   :  { %1943 = vst [vmem:[%s2743_s3 + $0x68] sm:$0xff] %v1889_v31   ;;  %v1256_v36 = vmax.f32 %v1168_v32, 0.0  ;;  %v964_v37 = vadd.f32 %v2530_v59, %v963_v34  ;;  %v1353_v44 = vadd.f32 %v2544_v16, %v1304_v35  ;;  %v1191_v48 = vpop.f32.mrf.mxu1 }
 0x17b   :  { %v965_v39 = vpop.f32.mrf.mxu0 }
 0x17c   :  { %v1305_v40 = vmul.f32 %v2537_v7, %v1256_v36  ;;  %v1173_v41 = vadd.f32 %v1172_v62, %v964_v37  ;;  %v1193_v52 = vpop.f32.mrf.mxu1 }
 0x17d   :  { %v966_v43 = vpop.f32.mrf.mxu0 }
 0x17e   :  { %v1354_v45 = vadd.f32 %v2544_v16, %v1305_v40  ;;  %v1257_v46 = vmax.f32 %v1173_v41, 0.0  ;;  %v967_v47 = vadd.f32 %v2530_v59, %v966_v43  ;;  %v1196_v57 = vpop.f32.mrf.mxu1 }
 0x17f   :  { %v968_v49 = vpop.f32.mrf.mxu0 }
 0x180   :  { %v1894_v50 = vpack.c.bf16 %v1354_v45, %v1353_v44  ;;  %v1176_v51 = vadd.f32 %v1175_v9, %v967_v47  ;;  %v1306_v54 = vmul.f32 %v2537_v7, %v1257_v46  ;;  %v1198_v62 = vpop.f32.mrf.mxu1 }
 0x181   :  { %v971_v53 = vpop.f32.mrf.mxu0 }
 0x182   :  { %1944 = vst [vmem:[%s2743_s3 + $0x70] sm:$0xff] %v1894_v50   ;;  %v1258_v55 = vmax.f32 %v1176_v51, 0.0  ;;  %v972_v56 = vadd.f32 %v2530_v59, %v971_v53  ;;  %v1355_v0 = vadd.f32 %v2544_v16, %v1306_v54  ;;  %v1199_v4 = vpop.f32.mrf.mxu1 }
 0x183   :  { %v973_v58 = vpop.f32.mrf.mxu0 }
 0x184   :  { %v1307_v60 = vmul.f32 %v2537_v7, %v1258_v55  ;;  %v1181_v61 = vadd.f32 %v1180_v19, %v972_v56  ;;  %v1201_v9 = vpop.f32.mrf.mxu1 }
 0x185   :  { %v974_v63 = vpop.f32.mrf.mxu0 }
 0x186   :  { %v1356_v1 = vadd.f32 %v2544_v16, %v1307_v60  ;;  %v1259_v2 = vmax.f32 %v1181_v61, 0.0  ;;  %v975_v3 = vadd.f32 %v2530_v59, %v974_v63  ;;  %v1204_v14 = vpop.f32.mrf.mxu1 }
 0x187   :  { %v976_v5 = vpop.f32.mrf.mxu0 }
 0x188   :  { %v1899_v6 = vpack.c.bf16 %v1356_v1, %v1355_v0  ;;  %v1184_v8 = vadd.f32 %v1183_v29, %v975_v3  ;;  %v1308_v11 = vmul.f32 %v2537_v7, %v1259_v2  ;;  %v1206_v19 = vpop.f32.mrf.mxu1 }
 0x189   :  { %v979_v10 = vpop.f32.mrf.mxu0 }
 0x18a   :  { %1945 = vst [vmem:[%s2743_s3 + $0x78] sm:$0xff] %v1899_v6   ;;  %v1260_v12 = vmax.f32 %v1184_v8, 0.0  ;;  %v980_v13 = vadd.f32 %v2530_v59, %v979_v10  ;;  %v1357_v21 = vadd.f32 %v2544_v16, %v1308_v11  ;;  %v1207_v25 = vpop.f32.mrf.mxu1 }
 0x18b   :  { %v981_v15 = vpop.f32.mrf.mxu0 }
 0x18c   :  { %v1309_v17 = vmul.f32 %v2537_v7, %v1260_v12  ;;  %v1189_v18 = vadd.f32 %v1188_v38, %v980_v13  ;;  %v1209_v29 = vpop.f32.mrf.mxu1 }
 0x18d   :  { %v982_v20 = vpop.f32.mrf.mxu0 }
 0x18e   :  { %v1358_v22 = vadd.f32 %v2544_v16, %v1309_v17  ;;  %v1261_v23 = vmax.f32 %v1189_v18, 0.0  ;;  %v983_v24 = vadd.f32 %v2530_v59, %v982_v20  ;;  %v1212_v34 = vpop.f32.mrf.mxu1 }
 0x18f   :  { %v984_v26 = vpop.f32.mrf.mxu0 }
 0x190   :  { %v1904_v27 = vpack.c.bf16 %v1358_v22, %v1357_v21  ;;  %v1192_v28 = vadd.f32 %v1191_v48, %v983_v24  ;;  %v1310_v31 = vmul.f32 %v2537_v7, %v1261_v23  ;;  %v1214_v38 = vpop.f32.mrf.mxu1 }
 0x191   :  { %v987_v30 = vpop.f32.mrf.mxu0 }
 0x192   :  { %1946 = vst [vmem:[%s2743_s3 + $0x80] sm:$0xff] %v1904_v27   ;;  %v1262_v32 = vmax.f32 %v1192_v28, 0.0  ;;  %v988_v33 = vadd.f32 %v2530_v59, %v987_v30  ;;  %v1359_v40 = vadd.f32 %v2544_v16, %v1310_v31  ;;  %v1215_v44 = vpop.f32.mrf.mxu1 }
 0x193   :  { %v989_v35 = vpop.f32.mrf.mxu0 }
 0x194   :  { %v1311_v36 = vmul.f32 %v2537_v7, %v1262_v32  ;;  %v1197_v37 = vadd.f32 %v1196_v57, %v988_v33  ;;  %v1217_v48 = vpop.f32.mrf.mxu1 }
 0x195   :  { %v990_v39 = vpop.f32.mrf.mxu0 }
 0x196   :  { %v1360_v41 = vadd.f32 %v2544_v16, %v1311_v36  ;;  %v1263_v42 = vmax.f32 %v1197_v37, 0.0  ;;  %v991_v43 = vadd.f32 %v2530_v59, %v990_v39  ;;  %v1220_v53 = vpop.f32.mrf.mxu1 }
 0x197   :  { %v992_v45 = vpop.f32.mrf.mxu0 }
 0x198   :  { %v1909_v46 = vpack.c.bf16 %v1360_v41, %v1359_v40  ;;  %v1200_v47 = vadd.f32 %v1199_v4, %v991_v43  ;;  %v1312_v50 = vmul.f32 %v2537_v7, %v1263_v42  ;;  %v1222_v57 = vpop.f32.mrf.mxu1 }
 0x199   :  { %v995_v49 = vpop.f32.mrf.mxu0 }
 0x19a   :  { %1947 = vst [vmem:[%s2743_s3 + $0x88] sm:$0xff] %v1909_v46   ;;  %v1264_v51 = vmax.f32 %v1200_v47, 0.0  ;;  %v996_v52 = vadd.f32 %v2530_v59, %v995_v49  ;;  %v1361_v60 = vadd.f32 %v2544_v16, %v1312_v50  ;;  %v1223_v0 = vpop.f32.mrf.mxu1 }
 0x19b   :  { %v997_v54 = vpop.f32.mrf.mxu0 }
 0x19c   :  { %v1313_v55 = vmul.f32 %v2537_v7, %v1264_v51  ;;  %v1205_v56 = vadd.f32 %v1204_v14, %v996_v52  ;;  %v1225_v4 = vpop.f32.mrf.mxu1 }
 0x19d   :  { %v998_v58 = vpop.f32.mrf.mxu0 }
 0x19e   :  { %v1362_v61 = vadd.f32 %v2544_v16, %v1313_v55  ;;  %v1265_v62 = vmax.f32 %v1205_v56, 0.0  ;;  %v999_v63 = vadd.f32 %v2530_v59, %v998_v58 }
 0x19f   :  { %v1000_v1 = vpop.f32.mrf.mxu0 }
 0x1a0   :  { %v1914_v2 = vpack.c.bf16 %v1362_v61, %v1361_v60  ;;  %v1208_v3 = vadd.f32 %v1207_v25, %v999_v63  ;;  %v1314_v6 = vmul.f32 %v2537_v7, %v1265_v62 }
 0x1a1   :  { %v1003_v5 = vpop.f32.mrf.mxu0 }
 0x1a2   :  { %1948 = vst [vmem:[%s2743_s3 + $0x90] sm:$0xff] %v1914_v2   ;;  %v1266_v8 = vmax.f32 %v1208_v3, 0.0  ;;  %v1004_v9 = vadd.f32 %v2530_v59, %v1003_v5  ;;  %v1363_v14 = vadd.f32 %v2544_v16, %v1314_v6 }
 0x1a3   :  { %v1005_v10 = vpop.f32.mrf.mxu0 }
 0x1a4   :  { %v1315_v11 = vmul.f32 %v2537_v7, %v1266_v8  ;;  %v1213_v12 = vadd.f32 %v1212_v34, %v1004_v9 }
 0x1a5   :  { %v1006_v13 = vpop.f32.mrf.mxu0 }
 0x1a6   :  { %v1364_v15 = vadd.f32 %v2544_v16, %v1315_v11  ;;  %v1267_v17 = vmax.f32 %v1213_v12, 0.0  ;;  %v1007_v18 = vadd.f32 %v2530_v59, %v1006_v13 }
 0x1a7   :  { %v1008_v19 = vpop.f32.mrf.mxu0 }
 0x1a8   :  { %v1919_v20 = vpack.c.bf16 %v1364_v15, %v1363_v14  ;;  %v1216_v21 = vadd.f32 %v1215_v44, %v1007_v18  ;;  %v1316_v23 = vmul.f32 %v2537_v7, %v1267_v17 }
 0x1a9   :  { %v1011_v22 = vpop.f32.mrf.mxu0 }
 0x1aa   :  { %1949 = vst [vmem:[%s2743_s3 + $0x98] sm:$0xff] %v1919_v20   ;;  %v1268_v24 = vmax.f32 %v1216_v21, 0.0  ;;  %v1012_v25 = vadd.f32 %v2530_v59, %v1011_v22  ;;  %v1365_v30 = vadd.f32 %v2544_v16, %v1316_v23 }
 0x1ab   :  { %v1013_v26 = vpop.f32.mrf.mxu0 }
 0x1ac   :  { %v1317_v27 = vmul.f32 %v2537_v7, %v1268_v24  ;;  %v1221_v28 = vadd.f32 %v1220_v53, %v1012_v25 }
 0x1ad   :  { %v1014_v29 = vpop.f32.mrf.mxu0 }
 0x1ae   :  { %v1366_v31 = vadd.f32 %v2544_v16, %v1317_v27  ;;  %v1269_v32 = vmax.f32 %v1221_v28, 0.0  ;;  %v1015_v33 = vadd.f32 %v2530_v59, %v1014_v29 }
 0x1af   :  { %v1016_v34 = vpop.f32.mrf.mxu0 }
 0x1b0   :  { %v1924_v35 = vpack.c.bf16 %v1366_v31, %v1365_v30  ;;  %v1224_v36 = vadd.f32 %v1223_v0, %v1015_v33  ;;  %v1318_v37 = vmul.f32 %v2537_v7, %v1269_v32 }
 0x1b2   :  { %1950 = vst [vmem:[%s2743_s3 + $0xa0] sm:$0xff] %v1924_v35   ;;  %v1270_v38 = vmax.f32 %v1224_v36, 0.0  ;;  %v1367_v40 = vadd.f32 %v2544_v16, %v1318_v37 }
 0x1b4   :  { %v1319_v39 = vmul.f32 %v2537_v7, %v1270_v38 }
 0x1b6   :  { %v1368_v41 = vadd.f32 %v2544_v16, %v1319_v39 }
 0x1b8   :  { %v1929_v42 = vpack.c.bf16 %v1368_v41, %v1367_v40 }
 0x1ba   :  { %1951 = vst [vmem:[%s2743_s3 + $0xa8] sm:$0xff] %v1929_v42  }

// kernel: seafar_forward.16
= control target key start
LH: loop header
LB: loop body
LE: loop exit
PB: predicated region body
PF: predicated region fallthrough
CT: control target
= control target key end

     0   :  { %v1285_v34 = vmov 0.0   ;;  %vm1286_vm0 = vmmov 0   ;;  %vm517_vm1 = vcmask 523264   ;;  %s1652_s1 = inlined_call_operand.vmem [shape: bf16[576,128], index: 1, kind: input, shape index: {}]   ;;  %s1653_s0 = inlined_call_operand.vmem [shape: bf16[112,576], index: 0, kind: input, shape index: {}]   ;;  %s1654_s2 = inlined_call_operand.vmem [shape: bf16[112,128], index: 2, kind: output, shape index: {}]  }
   0x1   :  { %v1200_v0 = vld [vmem:[%s1652_s1 + $0x78] sm:$0xff]   ;;  %v1204_v4 = vld [vmem:[%s1652_s1 + $0x70] sm:$0xff]   ;;  %v1208_v8 = vld [vmem:[%s1652_s1 + $0x68] sm:$0xff]  }
   0x2   :  { %v1201_v1 = vld [vmem:[%s1652_s1 + $0xf8] sm:$0xff]   ;;  %1027 = vmatprep.subr.bf16.mxu0 %v1200_v0  ;;  %v1205_v5 = vld [vmem:[%s1652_s1 + $0xf0] sm:$0xff]   ;;  %v1209_v9 = vld [vmem:[%s1652_s1 + $0xe8] sm:$0xff]  }
   0x3   :  { %v1202_v2 = vld [vmem:[%s1652_s1 + $0x38] sm:$0xff]   ;;  %1085 = vmatprep.subr.bf16.mxu1 %v1201_v1  ;;  %v1206_v6 = vld [vmem:[%s1652_s1 + $0x30] sm:$0xff]   ;;  %v1210_v10 = vld [vmem:[%s1652_s1 + $0x28] sm:$0xff]  }
   0x4   :  { %v1203_v3 = vld [vmem:[%s1652_s1 + $0xb8] sm:$0xff]   ;;  %1028 = vmatpush3.bf16.msra.mxu0 %v1202_v2  ;;  %v1207_v7 = vld [vmem:[%s1652_s1 + $0xb0] sm:$0xff]   ;;  %v1211_v11 = vld [vmem:[%s1652_s1 + $0xa8] sm:$0xff]  }
   0x5   :  { %1086 = vmatpush3.bf16.msra.mxu1 %v1203_v3  ;;  %1029 = vmatprep.subr.bf16.mxu0 %v1204_v4  ;;  %v1212_v12 = vld [vmem:[%s1652_s1 + $0x60] sm:$0xff]   ;;  %v1216_v16 = vld [vmem:[%s1652_s1 + $0x58] sm:$0xff]   ;;  %v1220_v20 = vld [vmem:[%s1652_s1 + $0x50] sm:$0xff]  }
   0x6   :  { %1087 = vmatprep.subr.bf16.mxu1 %v1205_v5  ;;  %v1213_v13 = vld [vmem:[%s1652_s1 + $0xe0] sm:$0xff]   ;;  %v1217_v17 = vld [vmem:[%s1652_s1 + $0xd8] sm:$0xff]   ;;  %v1221_v21 = vld [vmem:[%s1652_s1 + $0xd0] sm:$0xff]  }
   0x7   :  { %v1214_v14 = vld [vmem:[%s1652_s1 + $0x20] sm:$0xff]   ;;  %v1218_v18 = vld [vmem:[%s1652_s1 + $0x18] sm:$0xff]   ;;  %v1222_v22 = vld [vmem:[%s1652_s1 + $0x10] sm:$0xff]  }
   0x8   :  { %1030 = vmatpush3.bf16.msra.mxu0 %v1206_v6  ;;  %v1215_v15 = vld [vmem:[%s1652_s1 + $0xa0] sm:$0xff]   ;;  %v1219_v19 = vld [vmem:[%s1652_s1 + $0x98] sm:$0xff]   ;;  %v1223_v23 = vld [vmem:[%s1652_s1 + $0x90] sm:$0xff]  }
   0x9   :  { %1088 = vmatpush3.bf16.msra.mxu1 %v1207_v7  ;;  %1031 = vmatprep.subr.bf16.mxu0 %v1208_v8  ;;  %v1224_v24 = vld [vmem:[%s1652_s1 + $0x48] sm:$0xff]   ;;  %v1228_v28 = vld [vmem:[%s1652_s1 + $0x40] sm:$0xff]   ;;  %v1238_v37 = vld [vmem:[%s1652_s1 + $0x118] sm:$0xff]  }
   0xa   :  { %1089 = vmatprep.subr.bf16.mxu1 %v1209_v9  ;;  %v1225_v25 = vld [vmem:[%s1652_s1 + $0xc8] sm:$0xff]   ;;  %v1229_v29 = vld [vmem:[%s1652_s1 + $0xc0] sm:$0xff]   ;;  %v1249_v43 = vld [vmem:[%s1652_s1 + $0x110] sm:$0xff]  }
   0xb   :  { %v1226_v26 = vld [vmem:[%s1652_s1 + $0x8] sm:$0xff]   ;;  %v1230_v30 = vld [vmem:[%s1652_s1] sm:$0xff]   ;;  %v1247_v44 = vld [vmem:[%s1653_s0 + $0x5c] ss:$20 sps:$4 sm:$0xff]  }
   0xc   :  { %1032 = vmatpush3.bf16.msra.mxu0 %v1210_v10  ;;  %v1227_v27 = vld [vmem:[%s1652_s1 + $0x88] sm:$0xff]   ;;  %v1231_v31 = vld [vmem:[%s1652_s1 + $0x80] sm:$0xff]   ;;  %v1252_v48 = vld [vmem:[%s1653_s0 + $0x7c] ss:$20 sps:$4 sm:$0xff]  }
   0xd   :  { %1090 = vmatpush3.bf16.msra.mxu1 %v1211_v11  ;;  %1033 = vmatprep.subr.bf16.mxu0 %v1212_v12  ;;  %v1232_v32 = vld [vmem:[%s1653_s0] ss:$20 sps:$4 sm:$0xff]   ;;  %v1234_v33 = vld [vmem:[%s1653_s0 + $0x4] ss:$20 sps:$4 sm:$0xff]   ;;  %v1235_v35 = vld [vmem:[%s1653_s0 + $0x8] ss:$20 sps:$4 sm:$0xff]  }
   0xe   :  { %1091 = vmatprep.subr.bf16.mxu1 %v1213_v13  ;;  %v1237_v36 = vld [vmem:[%s1653_s0 + $0xc] ss:$20 sps:$4 sm:$0xff]   ;;  %571 = vmatprep.mubr.bf16.mxu0 %v1234_v33  ;;  %v1241_v39 = vld [vmem:[%s1653_s0 + $0x34] ss:$20 sps:$4 sm:$0xff]   ;;  %v1244_v41 = vld [vmem:[%s1653_s0 + $0x30] ss:$20 sps:$4 sm:$0xff]  }
   0xf   :  { %660 = vmatprep.mubr.bf16.mxu1 %v1237_v36  ;;  %v1239_v38 = vld [vmem:[%s1653_s0 + $0x2c] ss:$20 sps:$4 sm:$0xff]   ;;  %v1243_v40 = vld [vmem:[%s1653_s0 + $0x28] ss:$20 sps:$4 sm:$0xff]   ;;  %v1250_v46 = vld [vmem:[%s1653_s0 + $0x50] ss:$20 sps:$4 sm:$0xff]  }
  0x10   :  { %1034 = vmatpush3.bf16.msra.mxu0 %v1214_v14  ;;  %v1245_v42 = vld [vmem:[%s1653_s0 + $0x54] ss:$20 sps:$4 sm:$0xff]   ;;  %v1251_v47 = vld [vmem:[%s1653_s0 + $0x58] ss:$20 sps:$4 sm:$0xff]   ;;  %v1271_v50 = vld [vmem:[%s1652_s1 + $0x100] sm:$0xff]  }
  0x11   :  { %1092 = vmatpush3.bf16.msra.mxu1 %v1215_v15  ;;  %1035 = vmatprep.subr.bf16.mxu0 %v1216_v16  ;;  %v1258_v45 = vld [vmem:[%s1652_s1 + $0x108] sm:$0xff]   ;;  %v1254_v49 = vld [vmem:[%s1653_s0 + $0x84] ss:$20 sps:$4 sm:$0xff]   ;;  %v1257_v52 = vld [vmem:[%s1653_s0 + $0x80] ss:$20 sps:$4 sm:$0xff]  }
  0x12   :  { %1093 = vmatprep.subr.bf16.mxu1 %v1217_v17  ;;  %v1256_v51 = vld [vmem:[%s1653_s0 + $0x78] ss:$20 sps:$4 sm:$0xff]   ;;  %v1263_v55 = vld [vmem:[%s1653_s0 + $0xa0] ss:$20 sps:$4 sm:$0xff]   ;;  %v1264_v56 = vld [vmem:[%s1653_s0 + $0xa8] ss:$20 sps:$4 sm:$0xff]  }
  0x13   :  { %v1259_v53 = vld [vmem:[%s1653_s0 + $0xa4] ss:$20 sps:$4 sm:$0xff]   ;;  %v1261_v54 = vld [vmem:[%s1653_s0 + $0xac] ss:$20 sps:$4 sm:$0xff]   ;;  %v1267_v58 = vld [vmem:[%s1653_s0 + $0xd4] ss:$20 sps:$4 sm:$0xff]  }
  0x14   :  { %1036 = vmatpush3.bf16.msra.mxu0 %v1218_v18  ;;  %v1265_v57 = vld [vmem:[%s1653_s0 + $0xcc] ss:$20 sps:$4 sm:$0xff]   ;;  %v1269_v59 = vld [vmem:[%s1653_s0 + $0xc8] ss:$20 sps:$4 sm:$0xff]   ;;  %v1270_v60 = vld [vmem:[%s1653_s0 + $0xd0] ss:$20 sps:$4 sm:$0xff]  }
  0x15   :  { %1094 = vmatpush3.bf16.msra.mxu1 %v1219_v19  ;;  %1037 = vmatprep.subr.bf16.mxu0 %v1220_v20  ;;  %v1272_v61 = vld [vmem:[%s1653_s0 + $0xf4] ss:$20 sps:$4 sm:$0xff]   ;;  %v1274_v62 = vld [vmem:[%s1653_s0 + $0xfc] ss:$20 sps:$4 sm:$0xff]   ;;  %v1277_v0 = vld [vmem:[%s1653_s0 + $0xf8] ss:$20 sps:$4 sm:$0xff]  }
  0x16   :  { %1095 = vmatprep.subr.bf16.mxu1 %v1221_v21  ;;  %v1276_v63 = vld [vmem:[%s1653_s0 + $0xf0] ss:$20 sps:$4 sm:$0xff]   ;;  %v1280_v3 = vld [vmem:[%s1653_s0 + $0x38] ss:$20 sps:$4 sm:$0xff]   ;;  %v1282_v5 = vld [vmem:[%s1653_s0 + $0x60] ss:$20 sps:$4 sm:$0xff]  }
  0x17   :  { %v1278_v1 = vld [vmem:[%s1653_s0 + $0x10] ss:$20 sps:$4 sm:$0xff]   ;;  %v1281_v4 = vld [vmem:[%s1653_s0 + $0xd8] ss:$20 sps:$4 sm:$0xff]   ;;  %v1283_v6 = vld [vmem:[%s1653_s0 + $0x100] ss:$20 sps:$4 sm:$0xff]  }
  0x18   :  { %1038 = vmatpush3.bf16.msra.mxu0 %v1222_v22  ;;  %v1279_v2 = vld [vmem:[%s1653_s0 + $0xb0] ss:$20 sps:$4 sm:$0xff]   ;;  %v1284_v7 = vld [vmem:[%s1653_s0 + $0x88] ss:$20 sps:$4 sm:$0xff]  }
  0x19   :  { %1096 = vmatpush3.bf16.msra.mxu1 %v1223_v23  ;;  %1039 = vmatprep.subr.bf16.mxu0 %v1224_v24 }
  0x1a   :  { %1097 = vmatprep.subr.bf16.mxu1 %v1225_v25 }
  0x1c   :  { %1040 = vmatpush3.bf16.msra.mxu0 %v1226_v26 }
  0x1d   :  { %1098 = vmatpush3.bf16.msra.mxu1 %v1227_v27  ;;  %1041 = vmatprep.subr.bf16.mxu0 %v1228_v28 }
  0x1e   :  { %1099 = vmatprep.subr.bf16.mxu1 %v1229_v29 }
  0x20   :  { %1042 = vmatpush3.bf16.msra.mxu0 %v1230_v30 }
  0x21   :  { %1100 = vmatpush3.bf16.msra.mxu1 %v1231_v31  ;;  %1154 = vmatprep.subr.bf16.mxu0 %v1285_v34 }
  0x22   :  { %1190 = vmatprep.subr.bf16.mxu1 %v1285_v34 }
  0x23   :  { %572 = vmatmul.mubr.bf16.vlgmr.msra.gmra.mxu0 %v1232_v32 }
  0x24   :  { %661 = vmatmul.mubr.bf16.vlgmr.msra.gmra.mxu1 %v1235_v35  ;;  %1155 = vmatpush3.bf16.msra.mxu0 %v1238_v37 }
  0x25   :  { %579 = vmatprep.mubr.bf16.mxu0 %v1239_v38  ;;  %1194 = vmatpush3.bf16.msra.mxu1 %v1238_v37 }
  0x26   :  { %668 = vmatprep.mubr.bf16.mxu1 %v1241_v39  ;;  %1156 = vmatprep.subr.bf16.mxu0 %v1285_v34 }
  0x27   :  { %1191 = vmatprep.subr.bf16.mxu1 %v1285_v34 }
  0x28   :  { %1157 = vmatpush3.bf16.msra.mxu0 %v1249_v43 }
  0x29   :  { %1195 = vmatpush3.bf16.msra.mxu1 %v1249_v43  ;;  %1158 = vmatprep.subr.bf16.mxu0 %v1285_v34 }
  0x2a   :  { %1192 = vmatprep.subr.bf16.mxu1 %v1285_v34 }
  0x2b   :  { %580 = vmatmul.mubr.bf16.gmra.mxu0 %v1243_v40 }
  0x2c   :  { %669 = vmatmul.mubr.bf16.gmra.mxu1 %v1244_v41  ;;  %587 = vmatprep.mubr.bf16.mxu0 %v1245_v42 }
  0x2d   :  { %676 = vmatprep.mubr.bf16.mxu1 %v1247_v44  ;;  %1159 = vmatpush3.bf16.msra.mxu0 %v1258_v45 }
  0x2e   :  { %1196 = vmatpush3.bf16.msra.mxu1 %v1258_v45  ;;  %1160 = vmatprep.subr.bf16.mxu0 %v1285_v34 }
  0x2f   :  { %1193 = vmatprep.subr.bf16.mxu1 %v1285_v34 }
  0x31   :  { %1161 = vmatpush3.bf16.msra.mxu0 %v1271_v50 }
  0x32   :  { %1197 = vmatpush3.bf16.msra.mxu1 %v1271_v50 }
  0x33   :  { %588 = vmatmul.mubr.bf16.gmra.mxu0 %v1250_v46 }
  0x34   :  { %677 = vmatmul.mubr.bf16.gmra.mxu1 %v1251_v47  ;;  %595 = vmatprep.mubr.bf16.mxu0 %v1252_v48 }
  0x35   :  { %684 = vmatprep.mubr.bf16.mxu1 %v1254_v49 }
  0x3b   :  { %596 = vmatmul.mubr.bf16.gmra.mxu0 %v1256_v51 }
  0x3c   :  { %685 = vmatmul.mubr.bf16.gmra.mxu1 %v1257_v52  ;;  %603 = vmatprep.mubr.bf16.mxu0 %v1259_v53 }
  0x3d   :  { %692 = vmatprep.mubr.bf16.mxu1 %v1261_v54 }
  0x43   :  { %604 = vmatmul.mubr.bf16.gmra.mxu0 %v1263_v55 }
  0x44   :  { %693 = vmatmul.mubr.bf16.gmra.mxu1 %v1264_v56  ;;  %611 = vmatprep.mubr.bf16.mxu0 %v1265_v57 }
  0x45   :  { %700 = vmatprep.mubr.bf16.mxu1 %v1267_v58 }
  0x4b   :  { %612 = vmatmul.mubr.bf16.gmra.mxu0 %v1269_v59 }
  0x4c   :  { %701 = vmatmul.mubr.bf16.gmra.mxu1 %v1270_v60  ;;  %619 = vmatprep.mubr.bf16.mxu0 %v1272_v61 }
  0x4d   :  { %708 = vmatprep.mubr.bf16.mxu1 %v1274_v62 }
  0x53   :  { %620 = vmatmul.mubr.bf16.gmra.mxu0 %v1276_v63 }
  0x54   :  { %709 = vmatmul.mubr.bf16.gmra.mxu1 %v1277_v0  ;;  %1162 = vmatprep.mubr.msk.bf16.mxu0 %vm1286_vm0, %v1285_v34 }
  0x55   :  { %1178 = vmatprep.mubr.msk.bf16.mxu1 %vm1286_vm0, %v1285_v34 }
  0x5b   :  { %1163 = vmatmul.mubr.msk.bf16.vlgmr.msra.gmra.mxu0 %vm517_vm1, %v1278_v1 }
  0x5c   :  { %1179 = vmatmul.mubr.msk.bf16.vlgmr.msra.gmra.mxu1 %vm517_vm1, %v1279_v2  ;;  %1166 = vmatprep.mubr.msk.bf16.mxu0 %vm1286_vm0, %v1285_v34 }
  0x5d   :  { %1182 = vmatprep.mubr.msk.bf16.mxu1 %vm1286_vm0, %v1285_v34 }
  0x63   :  { %1167 = vmatmul.mubr.msk.bf16.gmra.mxu0 %vm517_vm1, %v1280_v3 }
  0x64   :  { %1183 = vmatmul.mubr.msk.bf16.gmra.mxu1 %vm517_vm1, %v1281_v4  ;;  %1170 = vmatprep.mubr.msk.bf16.mxu0 %vm1286_vm0, %v1285_v34 }
  0x65   :  { %1186 = vmatprep.mubr.msk.bf16.mxu1 %vm1286_vm0, %v1285_v34 }
  0x6b   :  { %1171 = vmatmul.mubr.msk.bf16.gmra.mxu0 %vm517_vm1, %v1282_v5 }
  0x6c   :  { %1187 = vmatmul.mubr.msk.bf16.gmra.mxu1 %vm517_vm1, %v1283_v6  ;;  %1174 = vmatprep.mubr.msk.bf16.mxu0 %vm1286_vm0, %v1285_v34 }
  0x73   :  { %1175 = vmatmul.mubr.msk.bf16.gmra.mxu0 %vm517_vm1, %v1284_v7 }
  0xe3   :  { %v1043_v8 = vpop.f32.mrf.mxu0 }
  0xe4   :  { %v1101_v9 = vpop.f32.mrf.mxu1 }
  0xe5   :  { %v1044_v10 = vpop.f32.mrf.mxu0 }
  0xe6   :  { %v1102_v11 = vpop.f32.mrf.mxu1  ;;  %v1045_v63 = vadd.f32 %v1044_v10, %v1043_v8 }
  0xe7   :  { %v1046_v12 = vpop.f32.mrf.mxu0  ;;  %v1103_v0 = vadd.f32 %v1102_v11, %v1101_v9 }
  0xe8   :  { %v1104_v13 = vpop.f32.mrf.mxu1 }
  0xe9   :  { %v1047_v14 = vpop.f32.mrf.mxu0 }
  0xea   :  { %v1105_v15 = vpop.f32.mrf.mxu1  ;;  %v1048_v1 = vadd.f32 %v1047_v14, %v1046_v12 }
  0xeb   :  { %v1544_v16 = vpop.f32.mrf.mxu0  ;;  %v1106_v2 = vadd.f32 %v1105_v15, %v1104_v13 }
  0xec   :  { %v1546_v17 = vpop.f32.mrf.mxu1 }
  0xed   :  { %v1548_v18 = vpop.f32.mrf.mxu0 }
  0xee   :  { %v1550_v19 = vpop.f32.mrf.mxu1  ;;  %v1051_v9 = vadd.f32 %v1548_v18, %v1544_v16 }
  0xef   :  { %v1552_v20 = vpop.f32.mrf.mxu0  ;;  %v1109_v10 = vadd.f32 %v1550_v19, %v1546_v17 }
  0xf0   :  { %v1554_v21 = vpop.f32.mrf.mxu1 }
  0xf1   :  { %v1556_v22 = vpop.f32.mrf.mxu0  ;;  %v671_v19 = vadd.f32 %v1109_v10, %v1051_v9 }
  0xf2   :  { %v1558_v23 = vpop.f32.mrf.mxu1  ;;  %v1054_v14 = vadd.f32 %v1556_v22, %v1552_v20 }
  0xf3   :  { %v1560_v24 = vpop.f32.mrf.mxu0  ;;  %v1112_v15 = vadd.f32 %v1558_v23, %v1554_v21 }
  0xf4   :  { %v1562_v25 = vpop.f32.mrf.mxu1 }
  0xf5   :  { %v1564_v26 = vpop.f32.mrf.mxu0  ;;  %v674_v21 = vadd.f32 %v1112_v15, %v1054_v14 }
  0xf6   :  { %v1566_v27 = vpop.f32.mrf.mxu1 }
  0xf7   :  { %v1568_v28 = vpop.f32.mrf.mxu0 }
  0xf8   :  { %v1570_v29 = vpop.f32.mrf.mxu1 }
  0xf9   :  { %v1572_v30 = vpop.f32.mrf.mxu0 }
  0xfa   :  { %v1574_v31 = vpop.f32.mrf.mxu1 }
  0xfb   :  { %v1576_v32 = vpop.f32.mrf.mxu0 }
  0xfc   :  { %1655 = vst [vmem:[#allocation2_spill] sm:$0xff] %v1576_v32  ;;  %v1578_v33 = vpop.f32.mrf.mxu1 }
  0xfd   :  { %1656 = vst [vmem:[#allocation3_spill] sm:$0xff] %v1578_v33  ;;  %v1580_v34 = vpop.f32.mrf.mxu0  ;;  %v666_v33 = vadd.f32 %v1106_v2, %v1048_v1 }
  0xfe   :  { %1657 = vst [vmem:[#allocation4_spill] sm:$0xff] %v1580_v34  ;;  %v1582_v35 = vpop.f32.mrf.mxu1 }
  0xff   :  { %1658 = vst [vmem:[#allocation5_spill] sm:$0xff] %v1582_v35  ;;  %v1584_v36 = vpop.f32.mrf.mxu0 }
 0x100   :  { %1659 = vst [vmem:[#allocation6_spill] sm:$0xff] %v1584_v36  ;;  %v1586_v37 = vpop.f32.mrf.mxu1  ;;  %v663_v36 = vadd.f32 %v1103_v0, %v1045_v63 }
 0x101   :  { %1660 = vst [vmem:[#allocation7_spill] sm:$0xff] %v1586_v37  ;;  %v1588_v38 = vpop.f32.mrf.mxu0 }
 0x102   :  { %1661 = vst [vmem:[#allocation8_spill] sm:$0xff] %v1588_v38  ;;  %v1590_v39 = vpop.f32.mrf.mxu1 }
 0x103   :  { %1662 = vst [vmem:[#allocation9_spill] sm:$0xff] %v1590_v39  ;;  %v1067_v40 = vpop.f32.mrf.mxu0  ;;  %v1669_v0 = vld [vmem:[#allocation2_spill] sm:$0xff] }
 0x104   :  { %v1125_v41 = vpop.f32.mrf.mxu1 }
 0x105   :  { %v1068_v42 = vpop.f32.mrf.mxu0  ;;  %v1670_v1 = vld [vmem:[#allocation4_spill] sm:$0xff] }
 0x106   :  { %v1126_v43 = vpop.f32.mrf.mxu1  ;;  %v1069_v4 = vadd.f32 %v1068_v42, %v1067_v40  ;;  %v1063_v2 = vadd.f32 %v1670_v1, %v1669_v0 }
 0x107   :  { %v1070_v44 = vpop.f32.mrf.mxu0  ;;  %v1127_v5 = vadd.f32 %v1126_v43, %v1125_v41  ;;  %v1057_v43 = vadd.f32 %v1564_v26, %v1560_v24  ;;  %v1673_v9 = vld [vmem:[#allocation6_spill] sm:$0xff] }
 0x108   :  { %v1128_v45 = vpop.f32.mrf.mxu1 }
 0x109   :  { %v1071_v46 = vpop.f32.mrf.mxu0  ;;  %v695_v34 = vadd.f32 %v1127_v5, %v1069_v4  ;;  %v1674_v10 = vld [vmem:[#allocation8_spill] sm:$0xff] }
 0x10a   :  { %v1129_v47 = vpop.f32.mrf.mxu1  ;;  %v1072_v6 = vadd.f32 %v1071_v46, %v1070_v44  ;;  %v1115_v44 = vadd.f32 %v1566_v27, %v1562_v25 }
 0x10b   :  { %v1073_v48 = vpop.f32.mrf.mxu0  ;;  %v1130_v7 = vadd.f32 %v1129_v47, %v1128_v45 }
 0x10c   :  { %v1131_v49 = vpop.f32.mrf.mxu1 }
 0x10d   :  { %v1074_v50 = vpop.f32.mrf.mxu0 }
 0x10e   :  { %v1132_v51 = vpop.f32.mrf.mxu1 }
 0x10f   :  { %v1076_v52 = vpop.f32.mrf.mxu0 }
 0x110   :  { %v1134_v53 = vpop.f32.mrf.mxu1 }
 0x111   :  { %v1077_v54 = vpop.f32.mrf.mxu0 }
 0x112   :  { %v1135_v55 = vpop.f32.mrf.mxu1 }
 0x113   :  { %v1592_v56 = vpop.f32.mrf.mxu0 }
 0x114   :  { %v1594_v57 = vpop.f32.mrf.mxu1 }
 0x115   :  { %v1080_v58 = vpop.f32.mrf.mxu0 }
 0x116   :  { %v1596_v59 = vpop.f32.mrf.mxu1 }
 0x117   :  { %1663 = vst [vmem:[#allocation10_spill] sm:$0xff] %v1596_v59  ;;  %v1598_v60 = vpop.f32.mrf.mxu0 }
 0x118   :  { %1664 = vst [vmem:[#allocation11_spill] sm:$0xff] %v1598_v60  ;;  %v1600_v61 = vpop.f32.mrf.mxu1  ;;  %v698_v60 = vadd.f32 %v1130_v7, %v1072_v6  ;;  %v1671_v6 = vld [vmem:[#allocation3_spill] sm:$0xff]  ;;  %v1672_v7 = vld [vmem:[#allocation5_spill] sm:$0xff] }
 0x119   :  { %1665 = vst [vmem:[#allocation12_spill] sm:$0xff] %v1600_v61  ;;  %v1083_v62 = vpop.f32.mrf.mxu0 }
 0x11a   :  { %v1141_v3 = vpop.f32.mrf.mxu1 }
 0x11b   :  { %v751_v39 = vpop.f32.mrf.mxu0 }
 0x11c   :  { %v783_v37 = vpop.f32.mrf.mxu1  ;;  %v752_v61 = vadd.f32 %v751_v39, %v663_v36  ;;  %v1136_v39 = vadd.f32 %v1135_v55, %v1134_v53 }
 0x11d   :  { %v1164_v38 = vpop.f32.mrf.mxu0  ;;  %v784_v11 = vadd.f32 %v783_v37, %v695_v34 }
 0x11e   :  { %v1180_v35 = vpop.f32.mrf.mxu1  ;;  %v1666_v53 = vld [vmem:[#allocation10_spill] sm:$0xff] }
 0x11f   :  { %v754_v32 = vpop.f32.mrf.mxu0  ;;  %v1075_v35 = vadd.f32 %v1074_v50, %v1073_v48  ;;  %v1060_v48 = vadd.f32 %v1572_v30, %v1568_v28  ;;  %v1081_v50 = vadd.f32 %v1080_v58, %v1592_v56  ;;  %v1667_v24 = vld [vmem:[#allocation11_spill] sm:$0xff]  ;;  %v679_v30 = vadd.f32 %v1115_v44, %v1057_v43 }
 0x120   :  { %v755_v59 = vadd.f32 %v754_v32, %v666_v33  ;;  %v786_v8 = vpop.f32.mrf.mxu1  ;;  %v1133_v32 = vadd.f32 %v1132_v51, %v1131_v49  ;;  %v1078_v33 = vadd.f32 %v1077_v54, %v1076_v52  ;;  %v1118_v49 = vadd.f32 %v1574_v31, %v1570_v29  ;;  %v1668_v55 = vld [vmem:[#allocation12_spill] sm:$0xff] }
 0x121   :  { %v787_v12 = vadd.f32 %v786_v8, %v698_v60  ;;  %v1165_v13 = vpop.f32.mrf.mxu0  ;;  %v1139_v54 = vadd.f32 %v1666_v53, %v1594_v57  ;;  %v1084_v26 = vadd.f32 %v1083_v62, %v1667_v24  ;;  %v1142_v25 = vadd.f32 %v1141_v3, %v1668_v55 }
 0x122   :  { %v989_v38 = vpack.c.bf16 %v755_v59, %v752_v61  ;;  %v1181_v36 = vpop.f32.mrf.mxu1  ;;  %v703_v22 = vadd.f32 %v1133_v32, %v1075_v35  ;;  %v706_v34 = vadd.f32 %v1136_v39, %v1078_v33  ;;  %v682_v56 = vadd.f32 %v1118_v49, %v1060_v48  ;;  %v1676_v13 = vld [vmem:[#allocation9_spill] sm:$0xff] }
 0x123   :  { %v1009_v40 = vpack.c.bf16 %v787_v12, %v784_v11  ;;  %v759_v16 = vpop.f32.mrf.mxu0  ;;  %v711_v57 = vadd.f32 %v1139_v54, %v1081_v50  ;;  %v714_v60 = vadd.f32 %v1142_v25, %v1084_v26  ;;  %v1121_v8 = vadd.f32 %v1672_v7, %v1671_v6  ;;  %v1675_v12 = vld [vmem:[#allocation7_spill] sm:$0xff] }
 0x124   :  { %990 = vst [vmem:[%s1654_s2] sm:$0xff] %v989_v38   ;;  %v791_v17 = vpop.f32.mrf.mxu1  ;;  %v760_v37 = vadd.f32 %v759_v16, %v671_v19  ;;  %v1066_v11 = vadd.f32 %v1674_v10, %v1673_v9  ;;  %v1124_v14 = vadd.f32 %v1676_v13, %v1675_v12 }
 0x125   :  { %1024 = vst [vmem:[%s1654_s2 + $0x20] sm:$0xff] %v1009_v40   ;;  %v1168_v18 = vpop.f32.mrf.mxu0  ;;  %v792_v45 = vadd.f32 %v791_v17, %v703_v22  ;;  %v687_v33 = vadd.f32 %v1121_v8, %v1063_v2 }
 0x126   :  { %v1184_v20 = vpop.f32.mrf.mxu1  ;;  %v690_v39 = vadd.f32 %v1124_v14, %v1066_v11 }
 0x127   :  { %v762_v23 = vpop.f32.mrf.mxu0 }
 0x128   :  { %v763_v41 = vadd.f32 %v762_v23, %v674_v21  ;;  %v794_v42 = vpop.f32.mrf.mxu1 }
 0x129   :  { %v795_v46 = vadd.f32 %v794_v42, %v706_v34  ;;  %v1169_v47 = vpop.f32.mrf.mxu0 }
 0x12a   :  { %v994_v51 = vpack.c.bf16 %v763_v41, %v760_v37  ;;  %v1185_v52 = vpop.f32.mrf.mxu1 }
 0x12b   :  { %v1014_v27 = vpack.c.bf16 %v795_v46, %v792_v45  ;;  %v767_v59 = vpop.f32.mrf.mxu0 }
 0x12c   :  { %1021 = vst [vmem:[%s1654_s2 + $0x8] sm:$0xff] %v994_v51   ;;  %v799_v28 = vpop.f32.mrf.mxu1  ;;  %v768_v61 = vadd.f32 %v767_v59, %v679_v30 }
 0x12d   :  { %1025 = vst [vmem:[%s1654_s2 + $0x28] sm:$0xff] %v1014_v27   ;;  %v1172_v29 = vpop.f32.mrf.mxu0  ;;  %v800_v3 = vadd.f32 %v799_v28, %v711_v57 }
 0x12e   :  { %v1188_v31 = vpop.f32.mrf.mxu1 }
 0x12f   :  { %v770_v58 = vpop.f32.mrf.mxu0 }
 0x130   :  { %v771_v62 = vadd.f32 %v770_v58, %v682_v56  ;;  %v802_v63 = vpop.f32.mrf.mxu1 }
 0x131   :  { %v803_v4 = vadd.f32 %v802_v63, %v714_v60  ;;  %v1173_v5 = vpop.f32.mrf.mxu0 }
 0x132   :  { %v999_v15 = vpack.c.bf16 %v771_v62, %v768_v61  ;;  %v1189_v35 = vpop.f32.mrf.mxu1 }
 0x133   :  { %v1019_v38 = vpack.c.bf16 %v803_v4, %v800_v3  ;;  %v775_v36 = vpop.f32.mrf.mxu0 }
 0x134   :  { %1022 = vst [vmem:[%s1654_s2 + $0x10] sm:$0xff] %v999_v15   ;;  %v776_v16 = vadd.f32 %v775_v36, %v687_v33 }
 0x135   :  { %1026 = vst [vmem:[%s1654_s2 + $0x30] sm:$0xff] %v1019_v38   ;;  %v1176_v32 = vpop.f32.mrf.mxu0 }
 0x137   :  { %v778_v40 = vpop.f32.mrf.mxu0 }
 0x138   :  { %v779_v17 = vadd.f32 %v778_v40, %v690_v39 }
 0x139   :  { %v1177_v18 = vpop.f32.mrf.mxu0 }
 0x13a   :  { %v1004_v19 = vpack.c.bf16 %v779_v17, %v776_v16 }
 0x13c   :  { %1023 = vst [vmem:[%s1654_s2 + $0x18] sm:$0xff] %v1004_v19  }

// kernel: seafar_forward.17
= control target key start
LH: loop header
LB: loop body
LE: loop exit
PB: predicated region body
PF: predicated region fallthrough
CT: control target
= control target key end

     0   :  { %v882_v1 = vmov 0.0   ;;  %vm883_vm0 = vmmov 0   ;;  %vm292_vm1 = vcmask 261120   ;;  %s1103_s1 = inlined_call_operand.vmem [shape: bf16[288,128], index: 1, kind: input, shape index: {}]   ;;  %s1104_s0 = inlined_call_operand.vmem [shape: bf16[112,288], index: 0, kind: input, shape index: {}]   ;;  %s1105_s2 = inlined_call_operand.vmem [shape: f32[8,128], index: 2, kind: input, shape index: {}]   ;;  %s1106_s3 = inlined_call_operand.vmem [shape: bf16[112,128], index: 3, kind: output, shape index: {}]  }
   0x1   :  { %v836_v0 = vld [vmem:[%s1103_s1 + $0x78] sm:$0xff]   ;;  %802 = vmatprep.subr.bf16.mxu1 %v882_v1  ;;  %806 = vmatprep.mubr.msk.bf16.mxu1 %vm883_vm0, %v882_v1  ;;  %v838_v3 = vld [vmem:[%s1103_s1 + $0x70] sm:$0xff]   ;;  %v840_v5 = vld [vmem:[%s1103_s1 + $0x68] sm:$0xff]  }
   0x2   :  { %v837_v2 = vld [vmem:[%s1103_s1 + $0x38] sm:$0xff]   ;;  %735 = vmatprep.subr.bf16.mxu0 %v836_v0  ;;  %v839_v4 = vld [vmem:[%s1103_s1 + $0x30] sm:$0xff]   ;;  %v841_v6 = vld [vmem:[%s1103_s1 + $0x28] sm:$0xff]  }
   0x3   :  { %736 = vmatpush3.bf16.msra.mxu0 %v837_v2  ;;  %v842_v7 = vld [vmem:[%s1103_s1 + $0x60] sm:$0xff]   ;;  %v844_v9 = vld [vmem:[%s1103_s1 + $0x58] sm:$0xff]   ;;  %v848_v10 = vld [vmem:[%s1103_s1 + $0x88] sm:$0xff]  }
   0x4   :  { %737 = vmatprep.subr.bf16.mxu0 %v838_v3  ;;  %v843_v8 = vld [vmem:[%s1103_s1 + $0x20] sm:$0xff]   ;;  %v845_v11 = vld [vmem:[%s1103_s1 + $0x18] sm:$0xff]   ;;  %803 = vmatpush3.bf16.msra.mxu1 %v848_v10  ;;  %v846_v13 = vld [vmem:[%s1103_s1 + $0x50] sm:$0xff]  }
   0x5   :  { %804 = vmatprep.subr.bf16.mxu1 %v882_v1  ;;  %v851_v12 = vld [vmem:[%s1103_s1 + $0x80] sm:$0xff]   ;;  %v847_v14 = vld [vmem:[%s1103_s1 + $0x10] sm:$0xff]   ;;  %v849_v16 = vld [vmem:[%s1103_s1 + $0x48] sm:$0xff]  }
   0x6   :  { %v854_v15 = vld [vmem:[%s1104_s0 + $0x8] ss:$12 sps:$4 sm:$0xff]   ;;  %v857_v17 = vld [vmem:[%s1104_s0 + $0x4] ss:$12 sps:$4 sm:$0xff]   ;;  %v858_v20 = vld [vmem:[%s1104_s0 + $0x20] ss:$12 sps:$4 sm:$0xff]  }
   0x7   :  { %738 = vmatpush3.bf16.msra.mxu0 %v839_v4  ;;  %346 = vmatprep.mubr.bf16.mxu0 %v857_v17  ;;  %v850_v18 = vld [vmem:[%s1103_s1 + $0x8] sm:$0xff]   ;;  %v852_v19 = vld [vmem:[%s1103_s1 + $0x40] sm:$0xff]   ;;  %v866_v27 = vld [vmem:[%s1104_s0 + $0x50] ss:$12 sps:$4 sm:$0xff]  }
   0x8   :  { %739 = vmatprep.subr.bf16.mxu0 %v840_v5  ;;  %805 = vmatpush3.bf16.msra.mxu1 %v851_v12  ;;  %v853_v21 = vld [vmem:[%s1103_s1] sm:$0xff]   ;;  %v859_v23 = vld [vmem:[%s1104_s0 + $0x1c] ss:$12 sps:$4 sm:$0xff]   ;;  %v867_v29 = vld [vmem:[%s1104_s0 + $0x4c] ss:$12 sps:$4 sm:$0xff]  }
   0x9   :  { %v855_v22 = vld [vmem:[%s1104_s0] ss:$12 sps:$4 sm:$0xff]   ;;  %v862_v24 = vld [vmem:[%s1104_s0 + $0x38] ss:$12 sps:$4 sm:$0xff]   ;;  %v865_v28 = vld [vmem:[%s1104_s0 + $0x30] ss:$12 sps:$4 sm:$0xff]  }
   0xa   :  { %v861_v25 = vld [vmem:[%s1104_s0 + $0x18] ss:$12 sps:$4 sm:$0xff]   ;;  %v863_v26 = vld [vmem:[%s1104_s0 + $0x34] ss:$12 sps:$4 sm:$0xff]   ;;  %v875_v35 = vld [vmem:[%s1104_s0 + $0x7c] ss:$12 sps:$4 sm:$0xff]  }
   0xb   :  { %740 = vmatpush3.bf16.msra.mxu0 %v841_v6  ;;  %807 = vmatmul.mubr.msk.bf16.vlgmr.msra.gmra.mxu1 %vm292_vm1, %v854_v15  ;;  %v870_v30 = vld [vmem:[%s1104_s0 + $0x68] ss:$12 sps:$4 sm:$0xff]   ;;  %v871_v32 = vld [vmem:[%s1104_s0 + $0x64] ss:$12 sps:$4 sm:$0xff]   ;;  %v874_v33 = vld [vmem:[%s1104_s0 + $0x80] ss:$12 sps:$4 sm:$0xff]  }
   0xc   :  { %741 = vmatprep.subr.bf16.mxu0 %v842_v7  ;;  %810 = vmatprep.mubr.msk.bf16.mxu1 %vm883_vm0, %v882_v1  ;;  %v869_v31 = vld [vmem:[%s1104_s0 + $0x48] ss:$12 sps:$4 sm:$0xff]   ;;  %v873_v34 = vld [vmem:[%s1104_s0 + $0x60] ss:$12 sps:$4 sm:$0xff]   ;;  %v878_v36 = vld [vmem:[%s1104_s0 + $0x98] ss:$12 sps:$4 sm:$0xff]  }
   0xd   :  { %v877_v37 = vld [vmem:[%s1104_s0 + $0x78] ss:$12 sps:$4 sm:$0xff]   ;;  %v879_v38 = vld [vmem:[%s1104_s0 + $0x94] ss:$12 sps:$4 sm:$0xff]   ;;  %v881_v39 = vld [vmem:[%s1104_s0 + $0x90] ss:$12 sps:$4 sm:$0xff]  }
   0xe   :  { %v1047_v59 = vld [vmem:[%s1105_s2 + $0x1] ss:$0 sm:$0xff]  ;;  %v1053_v4 = vld [vmem:[%s1105_s2 + $0x2] ss:$0 sm:$0xff] }
   0xf   :  { %742 = vmatpush3.bf16.msra.mxu0 %v843_v8 }
  0x10   :  { %743 = vmatprep.subr.bf16.mxu0 %v844_v9 }
  0x13   :  { %744 = vmatpush3.bf16.msra.mxu0 %v845_v11  ;;  %811 = vmatmul.mubr.msk.bf16.gmra.mxu1 %vm292_vm1, %v858_v20 }
  0x14   :  { %745 = vmatprep.subr.bf16.mxu0 %v846_v13  ;;  %814 = vmatprep.mubr.msk.bf16.mxu1 %vm883_vm0, %v882_v1 }
  0x17   :  { %746 = vmatpush3.bf16.msra.mxu0 %v847_v14 }
  0x18   :  { %747 = vmatprep.subr.bf16.mxu0 %v849_v16 }
  0x1b   :  { %748 = vmatpush3.bf16.msra.mxu0 %v850_v18  ;;  %815 = vmatmul.mubr.msk.bf16.gmra.mxu1 %vm292_vm1, %v862_v24 }
  0x1c   :  { %749 = vmatprep.subr.bf16.mxu0 %v852_v19  ;;  %818 = vmatprep.mubr.msk.bf16.mxu1 %vm883_vm0, %v882_v1 }
  0x1f   :  { %750 = vmatpush3.bf16.msra.mxu0 %v853_v21 }
  0x22   :  { %347 = vmatmul.mubr.bf16.vlgmr.msra.gmra.mxu0 %v855_v22 }
  0x23   :  { %354 = vmatprep.mubr.bf16.mxu0 %v859_v23  ;;  %819 = vmatmul.mubr.msk.bf16.gmra.mxu1 %vm292_vm1, %v866_v27 }
  0x24   :  { %822 = vmatprep.mubr.msk.bf16.mxu1 %vm883_vm0, %v882_v1 }
  0x2a   :  { %355 = vmatmul.mubr.bf16.gmra.mxu0 %v861_v25 }
  0x2b   :  { %362 = vmatprep.mubr.bf16.mxu0 %v863_v26  ;;  %823 = vmatmul.mubr.msk.bf16.gmra.mxu1 %vm292_vm1, %v870_v30 }
  0x2c   :  { %826 = vmatprep.mubr.msk.bf16.mxu1 %vm883_vm0, %v882_v1 }
  0x32   :  { %363 = vmatmul.mubr.bf16.gmra.mxu0 %v865_v28 }
  0x33   :  { %370 = vmatprep.mubr.bf16.mxu0 %v867_v29  ;;  %827 = vmatmul.mubr.msk.bf16.gmra.mxu1 %vm292_vm1, %v874_v33 }
  0x34   :  { %830 = vmatprep.mubr.msk.bf16.mxu1 %vm883_vm0, %v882_v1 }
  0x3a   :  { %371 = vmatmul.mubr.bf16.gmra.mxu0 %v869_v31 }
  0x3b   :  { %378 = vmatprep.mubr.bf16.mxu0 %v871_v32  ;;  %831 = vmatmul.mubr.msk.bf16.gmra.mxu1 %vm292_vm1, %v878_v36 }
  0x42   :  { %379 = vmatmul.mubr.bf16.gmra.mxu0 %v873_v34 }
  0x43   :  { %386 = vmatprep.mubr.bf16.mxu0 %v875_v35 }
  0x4a   :  { %387 = vmatmul.mubr.bf16.gmra.mxu0 %v877_v37 }
  0x4b   :  { %394 = vmatprep.mubr.bf16.mxu0 %v879_v38 }
  0x52   :  { %395 = vmatmul.mubr.bf16.gmra.mxu0 %v881_v39 }
  0xcb   :  { %v437_v40 = vpop.f32.mrf.mxu1 }
  0xcd   :  { %v808_v41 = vpop.f32.mrf.mxu1 }
  0xcf   :  { %v440_v42 = vpop.f32.mrf.mxu1 }
  0xd1   :  { %v809_v43 = vpop.f32.mrf.mxu1 }
  0xd3   :  { %v445_v44 = vpop.f32.mrf.mxu1 }
  0xd5   :  { %v812_v45 = vpop.f32.mrf.mxu1 }
  0xd7   :  { %v448_v46 = vpop.f32.mrf.mxu1 }
  0xd9   :  { %v813_v48 = vpop.f32.mrf.mxu1 }
  0xdb   :  { %v453_v51 = vpop.f32.mrf.mxu1 }
  0xdd   :  { %v816_v54 = vpop.f32.mrf.mxu1 }
  0xdf   :  { %v456_v58 = vpop.f32.mrf.mxu1 }
  0xe1   :  { %v817_v62 = vpop.f32.mrf.mxu1 }
  0xe2   :  { %v751_v47 = vpop.f32.mrf.mxu0 }
  0xe3   :  { %v461_v3 = vpop.f32.mrf.mxu1 }
  0xe4   :  { %v752_v49 = vpop.f32.mrf.mxu0 }
  0xe5   :  { %v753_v50 = vadd.f32 %v752_v49, %v751_v47  ;;  %v820_v8 = vpop.f32.mrf.mxu1 }
  0xe6   :  { %v754_v52 = vpop.f32.mrf.mxu0 }
  0xe7   :  { %v438_v53 = vadd.f32 %v753_v50, %v437_v40  ;;  %v464_v14 = vpop.f32.mrf.mxu1 }
  0xe8   :  { %v755_v55 = vpop.f32.mrf.mxu0 }
  0xe9   :  { %v492_v56 = vmax.f32 %v438_v53, 0.0  ;;  %v756_v57 = vadd.f32 %v755_v55, %v754_v52  ;;  %v821_v18 = vpop.f32.mrf.mxu1 }
  0xea   :  { %v757_v60 = vpop.f32.mrf.mxu0 }
  0xeb   :  { %v441_v61 = vadd.f32 %v756_v57, %v440_v42  ;;  %v511_v0 = vmul.f32 %v1047_v59, %v492_v56  ;;  %v469_v23 = vpop.f32.mrf.mxu1 }
  0xec   :  { %v758_v63 = vpop.f32.mrf.mxu0 }
  0xed   :  { %v493_v1 = vmax.f32 %v441_v61, 0.0  ;;  %v759_v2 = vadd.f32 %v758_v63, %v757_v60  ;;  %v530_v10 = vadd.f32 %v1053_v4, %v511_v0  ;;  %v824_v27 = vpop.f32.mrf.mxu1 }
  0xee   :  { %v760_v5 = vpop.f32.mrf.mxu0 }
  0xef   :  { %v512_v6 = vmul.f32 %v1047_v59, %v493_v1  ;;  %v446_v7 = vadd.f32 %v759_v2, %v445_v44  ;;  %v472_v33 = vpop.f32.mrf.mxu1 }
  0xf0   :  { %v761_v9 = vpop.f32.mrf.mxu0 }
  0xf1   :  { %v531_v11 = vadd.f32 %v1053_v4, %v512_v6  ;;  %v494_v12 = vmax.f32 %v446_v7, 0.0  ;;  %v762_v13 = vadd.f32 %v761_v9, %v760_v5  ;;  %v825_v37 = vpop.f32.mrf.mxu1 }
  0xf2   :  { %v763_v15 = vpop.f32.mrf.mxu0 }
  0xf3   :  { %v697_v16 = vpack.c.bf16 %v531_v11, %v530_v10  ;;  %v449_v17 = vadd.f32 %v762_v13, %v448_v46  ;;  %v513_v20 = vmul.f32 %v1047_v59, %v494_v12  ;;  %v477_v42 = vpop.f32.mrf.mxu1 }
  0xf4   :  { %v764_v19 = vpop.f32.mrf.mxu0 }
  0xf5   :  { %698 = vst [vmem:[%s1106_s3] sm:$0xff] %v697_v16   ;;  %v495_v21 = vmax.f32 %v449_v17, 0.0  ;;  %v765_v22 = vadd.f32 %v764_v19, %v763_v15  ;;  %v532_v29 = vadd.f32 %v1053_v4, %v513_v20  ;;  %v828_v46 = vpop.f32.mrf.mxu1 }
  0xf6   :  { %v766_v24 = vpop.f32.mrf.mxu0 }
  0xf7   :  { %v514_v25 = vmul.f32 %v1047_v59, %v495_v21  ;;  %v454_v26 = vadd.f32 %v765_v22, %v453_v51  ;;  %v480_v52 = vpop.f32.mrf.mxu1 }
  0xf8   :  { %v767_v28 = vpop.f32.mrf.mxu0 }
  0xf9   :  { %v533_v30 = vadd.f32 %v1053_v4, %v514_v25  ;;  %v496_v31 = vmax.f32 %v454_v26, 0.0  ;;  %v768_v32 = vadd.f32 %v767_v28, %v766_v24  ;;  %v829_v56 = vpop.f32.mrf.mxu1 }
  0xfa   :  { %v769_v34 = vpop.f32.mrf.mxu0 }
  0xfb   :  { %v702_v35 = vpack.c.bf16 %v533_v30, %v532_v29  ;;  %v457_v36 = vadd.f32 %v768_v32, %v456_v58  ;;  %v515_v39 = vmul.f32 %v1047_v59, %v496_v31  ;;  %v485_v62 = vpop.f32.mrf.mxu1 }
  0xfc   :  { %v770_v38 = vpop.f32.mrf.mxu0 }
  0xfd   :  { %729 = vst [vmem:[%s1106_s3 + $0x8] sm:$0xff] %v702_v35   ;;  %v497_v40 = vmax.f32 %v457_v36, 0.0  ;;  %v771_v41 = vadd.f32 %v770_v38, %v769_v34  ;;  %v534_v48 = vadd.f32 %v1053_v4, %v515_v39  ;;  %v832_v2 = vpop.f32.mrf.mxu1 }
  0xfe   :  { %v772_v43 = vpop.f32.mrf.mxu0 }
  0xff   :  { %v516_v44 = vmul.f32 %v1047_v59, %v497_v40  ;;  %v462_v45 = vadd.f32 %v771_v41, %v461_v3  ;;  %v488_v9 = vpop.f32.mrf.mxu1 }
 0x100   :  { %v773_v47 = vpop.f32.mrf.mxu0 }
 0x101   :  { %v535_v49 = vadd.f32 %v1053_v4, %v516_v44  ;;  %v498_v50 = vmax.f32 %v462_v45, 0.0  ;;  %v774_v51 = vadd.f32 %v773_v47, %v772_v43  ;;  %v833_v13 = vpop.f32.mrf.mxu1 }
 0x102   :  { %v775_v53 = vpop.f32.mrf.mxu0 }
 0x103   :  { %v707_v54 = vpack.c.bf16 %v535_v49, %v534_v48  ;;  %v465_v55 = vadd.f32 %v774_v51, %v464_v14  ;;  %v517_v58 = vmul.f32 %v1047_v59, %v498_v50 }
 0x104   :  { %v776_v57 = vpop.f32.mrf.mxu0 }
 0x105   :  { %730 = vst [vmem:[%s1106_s3 + $0x10] sm:$0xff] %v707_v54   ;;  %v499_v60 = vmax.f32 %v465_v55, 0.0  ;;  %v777_v61 = vadd.f32 %v776_v57, %v775_v53  ;;  %v536_v5 = vadd.f32 %v1053_v4, %v517_v58 }
 0x106   :  { %v778_v63 = vpop.f32.mrf.mxu0 }
 0x107   :  { %v518_v0 = vmul.f32 %v1047_v59, %v499_v60  ;;  %v470_v1 = vadd.f32 %v777_v61, %v469_v23 }
 0x108   :  { %v779_v3 = vpop.f32.mrf.mxu0 }
 0x109   :  { %v537_v6 = vadd.f32 %v1053_v4, %v518_v0  ;;  %v500_v7 = vmax.f32 %v470_v1, 0.0  ;;  %v780_v8 = vadd.f32 %v779_v3, %v778_v63 }
 0x10a   :  { %v781_v10 = vpop.f32.mrf.mxu0 }
 0x10b   :  { %v712_v11 = vpack.c.bf16 %v537_v6, %v536_v5  ;;  %v473_v12 = vadd.f32 %v780_v8, %v472_v33  ;;  %v519_v15 = vmul.f32 %v1047_v59, %v500_v7 }
 0x10c   :  { %v782_v14 = vpop.f32.mrf.mxu0 }
 0x10d   :  { %731 = vst [vmem:[%s1106_s3 + $0x18] sm:$0xff] %v712_v11   ;;  %v501_v16 = vmax.f32 %v473_v12, 0.0  ;;  %v783_v17 = vadd.f32 %v782_v14, %v781_v10  ;;  %v538_v22 = vadd.f32 %v1053_v4, %v519_v15 }
 0x10e   :  { %v784_v18 = vpop.f32.mrf.mxu0 }
 0x10f   :  { %v520_v19 = vmul.f32 %v1047_v59, %v501_v16  ;;  %v478_v20 = vadd.f32 %v783_v17, %v477_v42 }
 0x110   :  { %v785_v21 = vpop.f32.mrf.mxu0 }
 0x111   :  { %v539_v23 = vadd.f32 %v1053_v4, %v520_v19  ;;  %v502_v24 = vmax.f32 %v478_v20, 0.0  ;;  %v786_v25 = vadd.f32 %v785_v21, %v784_v18 }
 0x112   :  { %v787_v26 = vpop.f32.mrf.mxu0 }
 0x113   :  { %v717_v27 = vpack.c.bf16 %v539_v23, %v538_v22  ;;  %v481_v28 = vadd.f32 %v786_v25, %v480_v52  ;;  %v521_v30 = vmul.f32 %v1047_v59, %v502_v24 }
 0x114   :  { %v788_v29 = vpop.f32.mrf.mxu0 }
 0x115   :  { %732 = vst [vmem:[%s1106_s3 + $0x20] sm:$0xff] %v717_v27   ;;  %v503_v31 = vmax.f32 %v481_v28, 0.0  ;;  %v789_v32 = vadd.f32 %v788_v29, %v787_v26  ;;  %v540_v37 = vadd.f32 %v1053_v4, %v521_v30 }
 0x116   :  { %v790_v33 = vpop.f32.mrf.mxu0 }
 0x117   :  { %v522_v34 = vmul.f32 %v1047_v59, %v503_v31  ;;  %v486_v35 = vadd.f32 %v789_v32, %v485_v62 }
 0x118   :  { %v791_v36 = vpop.f32.mrf.mxu0 }
 0x119   :  { %v541_v38 = vadd.f32 %v1053_v4, %v522_v34  ;;  %v504_v39 = vmax.f32 %v486_v35, 0.0  ;;  %v792_v40 = vadd.f32 %v791_v36, %v790_v33 }
 0x11b   :  { %v722_v41 = vpack.c.bf16 %v541_v38, %v540_v37  ;;  %v489_v42 = vadd.f32 %v792_v40, %v488_v9  ;;  %v523_v43 = vmul.f32 %v1047_v59, %v504_v39 }
 0x11d   :  { %733 = vst [vmem:[%s1106_s3 + $0x28] sm:$0xff] %v722_v41   ;;  %v505_v44 = vmax.f32 %v489_v42, 0.0  ;;  %v542_v46 = vadd.f32 %v1053_v4, %v523_v43 }
 0x11f   :  { %v524_v45 = vmul.f32 %v1047_v59, %v505_v44 }
 0x121   :  { %v543_v47 = vadd.f32 %v1053_v4, %v524_v45 }
 0x123   :  { %v727_v48 = vpack.c.bf16 %v543_v47, %v542_v46 }
 0x125   :  { %734 = vst [vmem:[%s1106_s3 + $0x30] sm:$0xff] %v727_v48  }

// kernel: seafar_forward.20
= control target key start
LH: loop header
LB: loop body
LE: loop exit
PB: predicated region body
PF: predicated region fallthrough
CT: control target
= control target key end

     0   :  { %vm48_vm0 = vcmask 1043456   ;;  %vm41_vm1 = vcmask 195584   ;;  %s235_s1 = inlined_call_operand.vmem [shape: bf16[24,128], index: 1, kind: input, shape index: {}]   ;;  %s236_s0 = inlined_call_operand.vmem [shape: bf16[32,24], index: 0, kind: input, shape index: {}]   ;;  %s237_s2 = inlined_call_operand.vmem [shape: f32[8,128], index: 2, kind: input, shape index: {}]   ;;  %s238_s3 = inlined_call_operand.vmem [shape: bf16[32,128], index: 3, kind: output, shape index: {}]  }
   0x1   :  { %v187_v0 = vld [vmem:[%s235_s1 + $0x8] ss:$0 sps:$4 sm:$0xff]   ;;  %v188_v1 = vld [vmem:[%s235_s1] sm:$0xff]  }
   0x2   :  { %186 = vmatprep.subr.msk.bf16.mxu0 %vm48_vm0, %v187_v0  ;;  %v50_v2 = vsel %vm48_vm0, %v187_v0, 0  ;;  %v189_v3 = vld [vmem:[%s236_s0] sm:$0xff]   ;;  %v190_v4 = vld [vmem:[%s236_s0 + $0x8] sm:$0xff]  }
   0x3   :  { %179 = vmatpush3.bf16.msra.mxu0 %v50_v2  ;;  %182 = vmatprep.mubr.msk.bf16.mxu0 %vm41_vm1, %v189_v3  ;;  %v153_v7 = vld [vmem:[%s237_s2 + $0x1] ss:$0 sm:$0xff]  ;;  %v154_v13 = vld [vmem:[%s237_s2 + $0x2] ss:$0 sm:$0xff] }
   0x4   :  { %180 = vmatprep.subr.bf16.mxu0 %v188_v1 }
   0x7   :  { %181 = vmatpush3.bf16.msra.mxu0 %v188_v1 }
   0xa   :  { %183 = vmatmul.mubr.msk.bf16.vlgmr.msra.gmra.mxu0 %vm41_vm1, %v190_v4 }
  0xca   :  { %v184_v5 = vpop.f32.mrf.mxu0 }
  0xcb   :  { %v103_v6 = vmax.f32 %v184_v5, 0.0 }
  0xcc   :  { %v86_v8 = vpop.f32.mrf.mxu0 }
  0xcd   :  { %v101_v9 = vmax.f32 %v86_v8, 0.0  ;;  %v112_v11 = vmul.f32 %v153_v7, %v103_v6 }
  0xce   :  { %v185_v10 = vpop.f32.mrf.mxu0 }
  0xcf   :  { %v104_v12 = vmax.f32 %v185_v10, 0.0  ;;  %v110_v15 = vmul.f32 %v153_v7, %v101_v9  ;;  %v121_v18 = vadd.f32 %v154_v13, %v112_v11 }
  0xd0   :  { %v89_v14 = vpop.f32.mrf.mxu0 }
  0xd1   :  { %v113_v16 = vmul.f32 %v153_v7, %v104_v12  ;;  %v102_v17 = vmax.f32 %v89_v14, 0.0  ;;  %v119_v21 = vadd.f32 %v154_v13, %v110_v15 }
  0xd3   :  { %v122_v19 = vadd.f32 %v154_v13, %v113_v16  ;;  %v111_v20 = vmul.f32 %v153_v7, %v102_v17 }
  0xd5   :  { %v171_v22 = vpack.c.bf16 %v122_v19, %v121_v18  ;;  %v120_v23 = vadd.f32 %v154_v13, %v111_v20 }
  0xd7   :  { %173 = vst [vmem:[%s238_s3 + $0x8] sm:$0xff] %v171_v22   ;;  %v166_v24 = vpack.c.bf16 %v120_v23, %v119_v21 }
  0xd9   :  { %167 = vst [vmem:[%s238_s3] sm:$0xff] %v166_v24  }

// kernel: seafar_forward.19
= control target key start
LH: loop header
LB: loop body
LE: loop exit
PB: predicated region body
PF: predicated region fallthrough
CT: control target
= control target key end

     0   :  { %v527_v0 = vmov 0   ;;  %vm274_vm0 = vcmask 392192   ;;  %s667_s1 = inlined_call_operand.vmem [shape: bf16[432,128], index: 1, kind: input, shape index: {}]   ;;  %s668_s0 = inlined_call_operand.vmem [shape: bf16[32,432], index: 0, kind: input, shape index: {}]   ;;  %s669_s2 = inlined_call_operand.vmem [shape: bf16[32,128], index: 2, kind: output, shape index: {}]  }
   0x1   :  { %330 = vmatprep.subr.bf16.mxu1 %v527_v0  ;;  %v488_v1 = vld [vmem:[%s667_s1 + $0xb8] sm:$0xff]   ;;  %v491_v4 = vld [vmem:[%s667_s1 + $0xb0] sm:$0xff]   ;;  %v494_v7 = vld [vmem:[%s667_s1 + $0xa8] sm:$0xff]  }
   0x2   :  { %v489_v2 = vld [vmem:[%s667_s1 + $0x78] sm:$0xff]   ;;  %331 = vmatpush1.bf16.msra.mxu1 %v488_v1  ;;  %v492_v5 = vld [vmem:[%s667_s1 + $0x70] sm:$0xff]   ;;  %v495_v8 = vld [vmem:[%s667_s1 + $0x68] sm:$0xff]  }
   0x3   :  { %v490_v3 = vld [vmem:[%s667_s1 + $0x38] sm:$0xff]   ;;  %459 = vmatprep.subr.bf16.mxu0 %v489_v2  ;;  %332 = vmatprep.subr.bf16.mxu1 %v527_v0  ;;  %v493_v6 = vld [vmem:[%s667_s1 + $0x30] sm:$0xff]   ;;  %v496_v9 = vld [vmem:[%s667_s1 + $0x28] sm:$0xff]  }
   0x4   :  { %460 = vmatpush3.bf16.msra.mxu0 %v490_v3  ;;  %v497_v10 = vld [vmem:[%s667_s1 + $0xa0] sm:$0xff]   ;;  %v501_v13 = vld [vmem:[%s667_s1 + $0x58] sm:$0xff]   ;;  %v504_v16 = vld [vmem:[%s667_s1 + $0x50] sm:$0xff]  }
   0x5   :  { %461 = vmatprep.subr.bf16.mxu0 %v492_v5  ;;  %v498_v11 = vld [vmem:[%s667_s1 + $0x60] sm:$0xff]   ;;  %v500_v14 = vld [vmem:[%s667_s1 + $0x98] sm:$0xff]   ;;  %v503_v17 = vld [vmem:[%s667_s1 + $0x90] sm:$0xff]  }
   0x6   :  { %333 = vmatpush1.bf16.msra.mxu1 %v491_v4  ;;  %v499_v12 = vld [vmem:[%s667_s1 + $0x20] sm:$0xff]   ;;  %v502_v15 = vld [vmem:[%s667_s1 + $0x18] sm:$0xff]   ;;  %v505_v18 = vld [vmem:[%s667_s1 + $0x10] sm:$0xff]  }
   0x7   :  { %334 = vmatprep.subr.bf16.mxu1 %v527_v0  ;;  %v507_v19 = vld [vmem:[%s667_s1 + $0x48] sm:$0xff]   ;;  %v510_v22 = vld [vmem:[%s667_s1 + $0x40] sm:$0xff]   ;;  %v515_v26 = vld [vmem:[%s667_s1 + $0xd0] sm:$0xff]  }
   0x8   :  { %462 = vmatpush3.bf16.msra.mxu0 %v493_v6  ;;  %v506_v20 = vld [vmem:[%s667_s1 + $0x88] sm:$0xff]   ;;  %v514_v23 = vld [vmem:[%s668_s0 + $0x4] ss:$16 sps:$4 sm:$0xff]   ;;  %v512_v28 = vld [vmem:[%s668_s0] ss:$16 sps:$4 sm:$0xff]  }
   0x9   :  { %463 = vmatprep.subr.bf16.mxu0 %v495_v8  ;;  %v508_v21 = vld [vmem:[%s667_s1 + $0x8] sm:$0xff]   ;;  %v509_v24 = vld [vmem:[%s667_s1 + $0x80] sm:$0xff]   ;;  %313 = vmatprep.mubr.bf16.mxu0 %v514_v23 }
   0xa   :  { %335 = vmatpush1.bf16.msra.mxu1 %v494_v7  ;;  %v511_v25 = vld [vmem:[%s667_s1] sm:$0xff]   ;;  %v523_v27 = vld [vmem:[%s668_s0 + $0xc] ss:$16 sps:$4 sm:$0xff]   ;;  %v521_v33 = vld [vmem:[%s668_s0 + $0x8] ss:$16 sps:$4 sm:$0xff]  }
   0xb   :  { %336 = vmatprep.subr.bf16.mxu1 %v527_v0  ;;  %v517_v29 = vld [vmem:[%s668_s0 + $0x24] ss:$16 sps:$4 sm:$0xff]   ;;  %438 = vmatprep.mubr.msk.bf16.mxu1 %vm274_vm0, %v523_v27  ;;  %v516_v30 = vld [vmem:[%s667_s1 + $0xc8] sm:$0xff]   ;;  %v520_v32 = vld [vmem:[%s668_s0 + $0x20] ss:$16 sps:$4 sm:$0xff]  }
   0xc   :  { %464 = vmatpush3.bf16.msra.mxu0 %v496_v9  ;;  %v519_v31 = vld [vmem:[%s667_s1 + $0xc0] sm:$0xff]   ;;  %v524_v34 = vld [vmem:[%s668_s0 + $0x2c] ss:$16 sps:$4 sm:$0xff]   ;;  %v526_v35 = vld [vmem:[%s668_s0 + $0x28] ss:$16 sps:$4 sm:$0xff]  }
   0xd   :  { %465 = vmatprep.subr.bf16.mxu0 %v498_v11 }
   0xe   :  { %337 = vmatpush1.bf16.msra.mxu1 %v497_v10 }
   0xf   :  { %338 = vmatprep.subr.bf16.mxu1 %v527_v0 }
  0x10   :  { %466 = vmatpush3.bf16.msra.mxu0 %v499_v12 }
  0x11   :  { %467 = vmatprep.subr.bf16.mxu0 %v501_v13 }
  0x12   :  { %339 = vmatpush1.bf16.msra.mxu1 %v500_v14 }
  0x13   :  { %340 = vmatprep.subr.bf16.mxu1 %v527_v0 }
  0x14   :  { %468 = vmatpush3.bf16.msra.mxu0 %v502_v15 }
  0x15   :  { %469 = vmatprep.subr.bf16.mxu0 %v504_v16 }
  0x16   :  { %341 = vmatpush1.bf16.msra.mxu1 %v503_v17 }
  0x17   :  { %342 = vmatprep.subr.bf16.mxu1 %v527_v0 }
  0x18   :  { %470 = vmatpush3.bf16.msra.mxu0 %v505_v18 }
  0x19   :  { %471 = vmatprep.subr.bf16.mxu0 %v507_v19 }
  0x1a   :  { %343 = vmatpush1.bf16.msra.mxu1 %v506_v20 }
  0x1b   :  { %344 = vmatprep.subr.bf16.mxu1 %v527_v0 }
  0x1c   :  { %472 = vmatpush3.bf16.msra.mxu0 %v508_v21 }
  0x1d   :  { %473 = vmatprep.subr.bf16.mxu0 %v510_v22 }
  0x1e   :  { %345 = vmatpush1.bf16.msra.mxu1 %v509_v24 }
  0x1f   :  { %356 = vmatprep.subr.bf16.mxu1 %v527_v0 }
  0x20   :  { %474 = vmatpush3.bf16.msra.mxu0 %v511_v25 }
  0x22   :  { %357 = vmatpush2.bf16.msra.mxu1 %v515_v26 }
  0x23   :  { %314 = vmatmul.mubr.bf16.vlgmr.msra.gmra.mxu0 %v512_v28  ;;  %358 = vmatprep.subr.bf16.mxu1 %v527_v0 }
  0x24   :  { %321 = vmatprep.mubr.bf16.mxu0 %v517_v29 }
  0x26   :  { %359 = vmatpush2.bf16.msra.mxu1 %v516_v30 }
  0x27   :  { %360 = vmatprep.subr.bf16.mxu1 %v527_v0 }
  0x2a   :  { %361 = vmatpush2.bf16.msra.mxu1 %v519_v31 }
  0x2b   :  { %322 = vmatmul.mubr.bf16.gmra.mxu0 %v520_v32 }
  0x2d   :  { %363 = vmatmul.mubr.bf16.vlgmr.msra.gmra.mxu1 %v521_v33 }
  0x2e   :  { %439 = vmatprep.mubr.msk.bf16.mxu1 %vm274_vm0, %v524_v34 }
  0x35   :  { %371 = vmatmul.mubr.bf16.gmra.mxu1 %v526_v35 }
  0xe3   :  { %v475_v36 = vpop.f32.mrf.mxu0 }
  0xe5   :  { %v476_v37 = vpop.f32.mrf.mxu0 }
  0xe6   :  { %v477_v44 = vadd.f32 %v476_v37, %v475_v36 }
  0xe7   :  { %v478_v38 = vpop.f32.mrf.mxu0 }
  0xe9   :  { %v479_v39 = vpop.f32.mrf.mxu0 }
  0xea   :  { %v480_v45 = vadd.f32 %v479_v39, %v478_v38 }
  0xeb   :  { %v481_v40 = vpop.f32.mrf.mxu0 }
  0xed   :  { %v482_v41 = vpop.f32.mrf.mxu0  ;;  %v364_v42 = vpop.f32.mrf.mxu1 }
  0xee   :  { %v365_v48 = vadd.f32 %v477_v44, %v364_v42  ;;  %v483_v55 = vadd.f32 %v482_v41, %v481_v40 }
  0xef   :  { %v366_v43 = vpop.f32.mrf.mxu1  ;;  %v484_v46 = vpop.f32.mrf.mxu0 }
  0xf1   :  { %v367_v47 = vpop.f32.mrf.mxu1  ;;  %v485_v52 = vpop.f32.mrf.mxu0 }
  0xf2   :  { %v368_v49 = vadd.f32 %v480_v45, %v367_v47  ;;  %v486_v56 = vadd.f32 %v485_v52, %v484_v46 }
  0xf3   :  { %v369_v50 = vpop.f32.mrf.mxu1 }
  0xf4   :  { %v451_v51 = vpack.c.bf16 %v368_v49, %v365_v48 }
  0xf5   :  { %v372_v53 = vpop.f32.mrf.mxu1 }
  0xf6   :  { %452 = vst [vmem:[%s669_s2] sm:$0xff] %v451_v51   ;;  %v373_v58 = vadd.f32 %v483_v55, %v372_v53 }
  0xf7   :  { %v374_v54 = vpop.f32.mrf.mxu1 }
  0xf9   :  { %v375_v57 = vpop.f32.mrf.mxu1 }
  0xfa   :  { %v376_v59 = vadd.f32 %v486_v56, %v375_v57 }
  0xfb   :  { %v377_v60 = vpop.f32.mrf.mxu1 }
  0xfc   :  { %v456_v61 = vpack.c.bf16 %v376_v59, %v373_v58 }
  0xfe   :  { %458 = vst [vmem:[%s669_s2 + $0x8] sm:$0xff] %v456_v61  }

// kernel: seafar_forward.21
= control target key start
LH: loop header
LB: loop body
LE: loop exit
PB: predicated region body
PF: predicated region fallthrough
CT: control target
= control target key end

     0   :  { %v355_v1 = vmov 0.0   ;;  %vm356_vm0 = vmmov 0   ;;  %vm183_vm1 = vcmask 261120   ;;  %s449_s1 = inlined_call_operand.vmem [shape: bf16[288,128], index: 1, kind: input, shape index: {}]   ;;  %s450_s0 = inlined_call_operand.vmem [shape: bf16[16,288], index: 0, kind: input, shape index: {}]   ;;  %s451_s2 = inlined_call_operand.vmem [shape: f32[8,128], index: 2, kind: input, shape index: {}]   ;;  %s452_s3 = inlined_call_operand.vmem [shape: f32[16,128], index: 3, kind: output, shape index: {}]  }
   0x1   :  { %v333_v0 = vld [vmem:[%s449_s1 + $0x78] sm:$0xff]   ;;  %323 = vmatprep.subr.bf16.mxu1 %v355_v1  ;;  %327 = vmatprep.mubr.msk.bf16.mxu1 %vm356_vm0, %v355_v1  ;;  %v335_v3 = vld [vmem:[%s449_s1 + $0x70] sm:$0xff]   ;;  %v337_v5 = vld [vmem:[%s449_s1 + $0x68] sm:$0xff]  }
   0x2   :  { %v334_v2 = vld [vmem:[%s449_s1 + $0x38] sm:$0xff]   ;;  %298 = vmatprep.subr.bf16.mxu0 %v333_v0  ;;  %v336_v4 = vld [vmem:[%s449_s1 + $0x30] sm:$0xff]   ;;  %v338_v6 = vld [vmem:[%s449_s1 + $0x28] sm:$0xff]  }
   0x3   :  { %299 = vmatpush3.bf16.msra.mxu0 %v334_v2  ;;  %v339_v7 = vld [vmem:[%s449_s1 + $0x60] sm:$0xff]   ;;  %v341_v9 = vld [vmem:[%s449_s1 + $0x58] sm:$0xff]   ;;  %v347_v10 = vld [vmem:[%s449_s1 + $0x88] sm:$0xff]  }
   0x4   :  { %300 = vmatprep.subr.bf16.mxu0 %v335_v3  ;;  %v340_v8 = vld [vmem:[%s449_s1 + $0x20] sm:$0xff]   ;;  %v342_v11 = vld [vmem:[%s449_s1 + $0x18] sm:$0xff]   ;;  %v343_v12 = vld [vmem:[%s449_s1 + $0x50] sm:$0xff]   ;;  %324 = vmatpush3.bf16.msra.mxu1 %v347_v10 }
   0x5   :  { %325 = vmatprep.subr.bf16.mxu1 %v355_v1  ;;  %v350_v13 = vld [vmem:[%s449_s1 + $0x80] sm:$0xff]   ;;  %v344_v14 = vld [vmem:[%s449_s1 + $0x10] sm:$0xff]   ;;  %v345_v16 = vld [vmem:[%s449_s1 + $0x48] sm:$0xff]  }
   0x6   :  { %v353_v15 = vld [vmem:[%s450_s0 + $0x4] ss:$12 sps:$4 sm:$0xff]   ;;  %v354_v17 = vld [vmem:[%s450_s0 + $0x8] ss:$12 sps:$4 sm:$0xff]   ;;  %v351_v21 = vld [vmem:[%s450_s0] ss:$12 sps:$4 sm:$0xff]  }
   0x7   :  { %301 = vmatpush3.bf16.msra.mxu0 %v336_v4  ;;  %219 = vmatprep.mubr.bf16.mxu0 %v353_v15  ;;  %v346_v18 = vld [vmem:[%s449_s1 + $0x8] sm:$0xff]   ;;  %v348_v19 = vld [vmem:[%s449_s1 + $0x40] sm:$0xff]  }
   0x8   :  { %302 = vmatprep.subr.bf16.mxu0 %v337_v5  ;;  %326 = vmatpush3.bf16.msra.mxu1 %v350_v13  ;;  %v349_v20 = vld [vmem:[%s449_s1] sm:$0xff]  }
   0x9   :  { %v275_v27 = vld [vmem:[%s451_s2] ss:$0 sm:$0xff] }
   0xb   :  { %303 = vmatpush3.bf16.msra.mxu0 %v338_v6  ;;  %328 = vmatmul.mubr.msk.bf16.vlgmr.msra.gmra.mxu1 %vm183_vm1, %v354_v17 }
   0xc   :  { %304 = vmatprep.subr.bf16.mxu0 %v339_v7 }
   0xf   :  { %305 = vmatpush3.bf16.msra.mxu0 %v340_v8 }
  0x10   :  { %306 = vmatprep.subr.bf16.mxu0 %v341_v9 }
  0x13   :  { %307 = vmatpush3.bf16.msra.mxu0 %v342_v11 }
  0x14   :  { %308 = vmatprep.subr.bf16.mxu0 %v343_v12 }
  0x17   :  { %309 = vmatpush3.bf16.msra.mxu0 %v344_v14 }
  0x18   :  { %310 = vmatprep.subr.bf16.mxu0 %v345_v16 }
  0x1b   :  { %311 = vmatpush3.bf16.msra.mxu0 %v346_v18 }
  0x1c   :  { %312 = vmatprep.subr.bf16.mxu0 %v348_v19 }
  0x1f   :  { %313 = vmatpush3.bf16.msra.mxu0 %v349_v20 }
  0x22   :  { %220 = vmatmul.mubr.bf16.vlgmr.msra.gmra.mxu0 %v351_v21 }
  0xcb   :  { %v262_v22 = vpop.f32.mrf.mxu1 }
  0xcd   :  { %v329_v23 = vpop.f32.mrf.mxu1 }
  0xcf   :  { %v265_v24 = vpop.f32.mrf.mxu1 }
  0xd1   :  { %v330_v25 = vpop.f32.mrf.mxu1 }
  0xe2   :  { %v314_v26 = vpop.f32.mrf.mxu0 }
  0xe4   :  { %v315_v28 = vpop.f32.mrf.mxu0 }
  0xe5   :  { %v316_v29 = vadd.f32 %v315_v28, %v314_v26 }
  0xe6   :  { %v317_v30 = vpop.f32.mrf.mxu0 }
  0xe7   :  { %v222_v31 = vadd.f32 %v316_v29, %v275_v27 }
  0xe8   :  { %v318_v32 = vpop.f32.mrf.mxu0 }
  0xe9   :  { %v263_v33 = vadd.f32 %v262_v22, %v222_v31  ;;  %v319_v34 = vadd.f32 %v318_v32, %v317_v30 }
  0xeb   :  { %269 = vst [vmem:[%s452_s3] sm:$0xff] %v263_v33  ;;  %v225_v35 = vadd.f32 %v319_v34, %v275_v27 }
  0xed   :  { %v266_v36 = vadd.f32 %v265_v24, %v225_v35 }
  0xef   :  { %270 = vst [vmem:[%s452_s3 + $0x8] sm:$0xff] %v266_v36 }

</bundles_post_ra>
